<compile_context>
chip_gen: v5e
topology: v5e:2x2
jax: 0.10.0
libtpu: 0.0.40
codegen_flags: <defaults>
</compile_context>

<pallas_src>
import functools

import jax
import jax.numpy as jnp
import numpy as np
from jax.experimental import pallas as pl
from jax.experimental.pallas import tpu as pltpu

jax.config.update("jax_default_matmul_precision", "highest")

BN_EPS = 1e-5
# tap order kh-major, kw-minor; offsets relative to the output pixel.
_TAPS = [(kh - 1, kw - 1) for kh in range(3) for kw in range(3)]


# ----------------------------------------------------------------------------
# Fused residual-block kernel
# ----------------------------------------------------------------------------
def _make_resblock_kernel(Ho: int, Wo: int, conv1_in_kernel: bool,
                          has_downsample: bool):
    """conv1(+BN1)+ReLU -> conv2(+BN2) -> +shortcut -> ReLU, all in one kernel."""

    def tapped_conv3x3(src, w_ref, mask_ref):
        # 3x3 'same' conv of row-major (M, C) `src`.  Rows are (n, i, j) row-major,
        # so an in-image (dh, dw) spatial offset is a row shift of dh*Wo + dw;
        # zero-padding / image boundaries handled by the static masks.
        M = src.shape[0]
        acc = None
        for t, (dh, dw) in enumerate(_TAPS):
            if dh == 0 and dw == 0:
                tap = src
            else:
                s = dh * Wo + dw
                tap = pltpu.roll(src, shift=(-s) % M, axis=0) * mask_ref[t]
            contrib = jnp.dot(tap, w_ref[t],
                              preferred_element_type=jnp.float32,
                              precision=jax.lax.Precision.HIGHEST)
            acc = contrib if acc is None else acc + contrib
        return acc

    def kernel(*refs):
        x_ref, w1_ref, t1_ref, w2_ref, t2_ref, mask_ref = refs[:6]
        rest = refs[6:]
        if conv1_in_kernel:                      # stride == 1
            if has_downsample:
                wd_ref, td_ref, o_ref = rest
            else:
                (o_ref,) = rest
        else:                                    # stride != 1 (always downsampled)
            if has_downsample:
                xs_ref, wd_ref, td_ref, o_ref = rest
            else:
                xs_ref, o_ref = rest

        # ---- conv1 (BN1 scale folded into w1) + shift + ReLU; `h` stays on chip.
        if conv1_in_kernel:
            x = x_ref[...]                       # (M, Cin): read once, reused below
            h = tapped_conv3x3(x, w1_ref, mask_ref)
            sc = x
        else:
            h = jnp.dot(x_ref[...], w1_ref[...],
                        preferred_element_type=jnp.float32,
                        precision=jax.lax.Precision.HIGHEST)
            sc = xs_ref[...]
        h = jnp.maximum(h + t1_ref[...], 0.0)    # (M, Cout)

        # ---- conv2 (BN2 scale folded into w2) as 9 shifted taps.
        acc = tapped_conv3x3(h, w2_ref, mask_ref) + t2_ref[...]

        # ---- shortcut: fused 1x1 conv + BN (folded), or identity.
        if has_downsample:
            sc = jnp.dot(sc, wd_ref[...],
                         preferred_element_type=jnp.float32,
                         precision=jax.lax.Precision.HIGHEST) + td_ref[...]

        o_ref[...] = jnp.maximum(acc + sc, 0.0).astype(o_ref.dtype)

    return kernel


# ----------------------------------------------------------------------------
# Host-side helpers (fold BN, strided conv1 patches, static tap masks)
# ----------------------------------------------------------------------------
def _bn_fold(conv_b, gamma, beta, mean, var):
    inv = gamma / jnp.sqrt(var + BN_EPS)
    shift = (conv_b - mean) * inv + beta
    return inv, shift


def _conv1_patches_nhwc(x_nhwc, stride):
    """Strided 3x3 im2col of the block INPUT (only used when stride != 1)."""
    N, H, W, C = x_nhwc.shape
    Ho = (H - 1) // stride + 1
    Wo = (W - 1) // stride + 1
    xp = jnp.pad(x_nhwc, ((0, 0), (1, 1), (1, 1), (0, 0)))
    taps = [xp[:, kh:kh + (Ho - 1) * stride + 1:stride,
                  kw:kw + (Wo - 1) * stride + 1:stride, :]
            for kh in range(3) for kw in range(3)]
    pat = jnp.concatenate(taps, axis=-1)                 # (N, Ho, Wo, 9*C), tap-major
    return pat.reshape(N * Ho * Wo, 9 * C), Ho, Wo


def _tap_masks(N, Ho, Wo):
    """Static (trace-time numpy) zero-padding masks for the in-kernel shifted taps."""
    i = np.arange(Ho)[:, None]
    j = np.arange(Wo)[None, :]
    masks = np.empty((9, N * Ho * Wo, 1), np.float32)
    for t, (dh, dw) in enumerate(_TAPS):
        valid = ((i + dh >= 0) & (i + dh < Ho) &
                 (j + dw >= 0) & (j + dw < Wo)).astype(np.float32)
        masks[t] = np.tile(valid.reshape(Ho * Wo, 1), (N, 1))
    return jnp.asarray(masks)


# ----------------------------------------------------------------------------
# Forward pass (NCHW in, NCHW out — matches the PyTorch module)
# ----------------------------------------------------------------------------
@functools.partial(jax.jit, static_argnames=("stride",))
def residual_block_forward(x, params, *, stride):
    N, Cin, H, W = x.shape
    Cout = params['w1'].shape[0]
    has_ds = 'wd' in params
    conv1_in_kernel = (stride == 1)

    x_nhwc = jnp.transpose(x, (0, 2, 3, 1))

    # Fold conv bias + eval-mode BatchNorm into (scaled weights, shift).
    inv1, t1 = _bn_fold(params['b1'], params['g1'], params['be1'],
                        params['m1'], params['v1'])
    inv2, t2 = _bn_fold(params['b2'], params['g2'], params['be2'],
                        params['m2'], params['v2'])
    w2f = params['w2'].transpose(2, 3, 1, 0).reshape(9, Cout, Cout) * inv2[None, None, :]

    if conv1_in_kernel:
        Ho, Wo = H, W
        M = N * Ho * Wo
        first = x_nhwc.reshape(M, Cin)                   # x read once; no im2col
        w1f = params['w1'].transpose(2, 3, 1, 0).reshape(9, Cin, Cout) * inv1[None, None, :]
    else:
        first, Ho, Wo = _conv1_patches_nhwc(x_nhwc, stride)
        M = N * Ho * Wo
        w1f = params['w1'].transpose(2, 3, 1, 0).reshape(9 * Cin, Cout) * inv1[None, :]

    masks = _tap_masks(N, Ho, Wo)
    args = [first, w1f, t1.reshape(1, Cout), w2f, t2.reshape(1, Cout), masks]

    if not conv1_in_kernel:
        # strided shortcut input (stride != 1 always has the 1x1 downsample).
        xs = x_nhwc[:, ::stride, ::stride, :].reshape(M, Cin)
        args.append(xs)
    if has_ds:
        invd, td = _bn_fold(params['bd'], params['gd'], params['bed'],
                            params['md'], params['vd'])
        wdf = params['wd'].reshape(Cout, Cin).T * invd[None, :]
        args += [wdf, td.reshape(1, Cout)]

    out2d = pl.pallas_call(
        _make_resblock_kernel(Ho, Wo, conv1_in_kernel, has_ds),
        out_shape=jax.ShapeDtypeStruct((M, Cout), jnp.float32),
        compiler_params=pltpu.CompilerParams(vmem_limit_bytes=64 * 1024 * 1024),
    )(*args)

    return out2d.reshape(N, Ho, Wo, Cout).transpose(0, 3, 1, 2)


# ----------------------------------------------------------------------------
# Deterministic parameter init (shapes per nn.Module __init__)
# ----------------------------------------------------------------------------
def init_block_params(key, cin, cout, stride):
    ks = jax.random.split(key, 18)
    nrm = lambda k, shape, s: s * jax.random.normal(k, shape, jnp.float32)
    p = dict(
        w1=nrm(ks[0], (cout, cin, 3, 3), (2.0 / (cin * 9)) ** 0.5),
        b1=nrm(ks[1], (cout,), 0.05),
        g1=1.0 + nrm(ks[2], (cout,), 0.1),
        be1=nrm(ks[3], (cout,), 0.1),
        m1=nrm(ks[4], (cout,), 0.1),
        v1=0.5 + jnp.abs(nrm(ks[5], (cout,), 0.2)),
        w2=nrm(ks[6], (cout, cout, 3, 3), (2.0 / (cout * 9)) ** 0.5),
        b2=nrm(ks[7], (cout,), 0.05),
        g2=1.0 + nrm(ks[8], (cout,), 0.1),
        be2=nrm(ks[9], (cout,), 0.1),
        m2=nrm(ks[10], (cout,), 0.1),
        v2=0.5 + jnp.abs(nrm(ks[11], (cout,), 0.2)),
    )
    if stride != 1 or cin != cout:
        p.update(
            wd=nrm(ks[12], (cout, cin, 1, 1), (2.0 / cin) ** 0.5),
            bd=nrm(ks[13], (cout,), 0.05),
            gd=1.0 + nrm(ks[14], (cout,), 0.1),
            bed=nrm(ks[15], (cout,), 0.1),
            md=nrm(ks[16], (cout,), 0.1),
            vd=0.5 + jnp.abs(nrm(ks[17], (cout,), 0.2)),
        )
    return p


# ----------------------------------------------------------------------------
# Pure-JAX reference (correctness check)
# ----------------------------------------------------------------------------
def _ref_conv_bn(x, w, b, gamma, beta, mean, var, stride, padding):
    out = jax.lax.conv_general_dilated(
        x, w, (stride, stride), [(padding, padding), (padding, padding)],
        dimension_numbers=('NCHW', 'OIHW', 'NCHW'))
    out = out + b.reshape(1, -1, 1, 1)
    inv = (gamma / jnp.sqrt(var + BN_EPS)).reshape(1, -1, 1, 1)
    return (out - mean.reshape(1, -1, 1, 1)) * inv + beta.reshape(1, -1, 1, 1)


def _ref_block(x, p, stride):
    out = jax.nn.relu(_ref_conv_bn(x, p['w1'], p['b1'], p['g1'], p['be1'],
                                   p['m1'], p['v1'], stride, 1))
    out = _ref_conv_bn(out, p['w2'], p['b2'], p['g2'], p['be2'], p['m2'], p['v2'], 1, 1)
    if 'wd' in p:
        shortcut = _ref_conv_bn(x, p['wd'], p['bd'], p['gd'], p['bed'],
                                p['md'], p['vd'], stride, 0)
    else:
        shortcut = x
    return jax.nn.relu(out + shortcut)


# ----------------------------------------------------------------------------
if __name__ == "__main__":
    key = jax.random.PRNGKey(0)
    k_x1, k_p1, k_x2, k_p2, k_x3, k_p3 = jax.random.split(key, 6)

    # Case 1: strided downsample path (stride=2, cin != cout). Cout=128 -> lane-dense output.
    x1 = jax.random.normal(k_x1, (2, 4, 16, 16), jnp.float32)
    p1 = init_block_params(k_p1, 4, 128, 2)
    out1 = jax.block_until_ready(residual_block_forward(x1, p1, stride=2))
    ref1 = jax.block_until_ready(_ref_block(x1, p1, 2))
    assert out1.shape == (2, 128, 8, 8)
    np.testing.assert_allclose(np.asarray(out1), np.asarray(ref1), atol=5e-3, rtol=5e-3)

    # Case 2: identity-shortcut path (stride=1, cin == cout): fully in-kernel conv1+conv2.
    x2 = jax.random.normal(k_x2, (2, 128, 8, 8), jnp.float32)
    p2 = init_block_params(k_p2, 128, 128, 1)
    out2 = jax.block_until_ready(residual_block_forward(x2, p2, stride=1))
    ref2 = jax.block_until_ready(_ref_block(x2, p2, 1))
    assert out2.shape == (2, 128, 8, 8)
    np.testing.assert_allclose(np.asarray(out2), np.asarray(ref2), atol=5e-3, rtol=5e-3)

    # Case 3: stride=1 but cin != cout (1x1-conv shortcut, conv1 still in-kernel).
    x3 = jax.random.normal(k_x3, (2, 64, 8, 8), jnp.float32)
    p3 = init_block_params(k_p3, 64, 128, 1)
    out3 = jax.block_until_ready(residual_block_forward(x3, p3, stride=1))
    ref3 = jax.block_until_ready(_ref_block(x3, p3, 1))
    assert out3.shape == (2, 128, 8, 8)
    np.testing.assert_allclose(np.asarray(out3), np.asarray(ref3), atol=5e-3, rtol=5e-3)

    # TODO(synk): BatchNorm is evaluated with running stats (eval mode); training-mode
    # batch statistics / stat updates are not modeled.
    print("KERNEL_OK")
</pallas_src>

<mosaic_0001>
module attributes {stable_mosaic.version = 11 : i64} {
  func.func @kernel(%arg0: memref<128x36xf32, #tpu.memory_space<vmem>>, %arg1: memref<36x128xf32, #tpu.memory_space<vmem>>, %arg2: memref<1x128xf32, #tpu.memory_space<vmem>>, %arg3: memref<9x128x128xf32, #tpu.memory_space<vmem>>, %arg4: memref<1x128xf32, #tpu.memory_space<vmem>>, %arg5: memref<9x128x1xf32, #tpu.memory_space<vmem>>, %arg6: memref<128x4xf32, #tpu.memory_space<vmem>>, %arg7: memref<4x128xf32, #tpu.memory_space<vmem>>, %arg8: memref<1x128xf32, #tpu.memory_space<vmem>>, %arg9: memref<128x128xf32, #tpu.memory_space<vmem>>) attributes {dimension_semantics = [], scalar_prefetch = 0 : i64, scratch_operands = 0 : i64, tpu.core_type = #tpu.core_type<tc>} {
    %c0 = arith.constant 0 : index
    %c0_0 = arith.constant 0 : index
    %0 = vector.load %arg0[%c0, %c0_0] : memref<128x36xf32, #tpu.memory_space<vmem>>, vector<128x36xf32>
    %c0_1 = arith.constant 0 : index
    %c0_2 = arith.constant 0 : index
    %1 = vector.load %arg1[%c0_1, %c0_2] : memref<36x128xf32, #tpu.memory_space<vmem>>, vector<36x128xf32>
    %cst = arith.constant dense<0.000000e+00> : vector<128x128xf32>
    %2 = tpu.matmul %0, %1, %cst {dimension_numbers = #tpu.dot_dimension_numbers<[1], [0], [0], [1], [0, 0, 1, 1], [], []>, precision = #tpu.contract_precision<fp32>} : vector<128x36xf32>, vector<36x128xf32>, vector<128x128xf32> -> vector<128x128xf32>
    %c0_3 = arith.constant 0 : index
    %c0_4 = arith.constant 0 : index
    %3 = vector.load %arg6[%c0_3, %c0_4] : memref<128x4xf32, #tpu.memory_space<vmem>>, vector<128x4xf32>
    %c0_5 = arith.constant 0 : index
    %c0_6 = arith.constant 0 : index
    %4 = vector.load %arg2[%c0_5, %c0_6] : memref<1x128xf32, #tpu.memory_space<vmem>>, vector<1x128xf32>
    %5 = vector.broadcast %4 : vector<1x128xf32> to vector<128x128xf32>
    %6 = arith.addf %2, %5 : vector<128x128xf32>
    %cst_7 = arith.constant 0.000000e+00 : f32
    %7 = vector.broadcast %cst_7 : f32 to vector<128x128xf32>
    %8 = arith.maximumf %6, %7 : vector<128x128xf32>
    %c9_i32 = arith.constant 9 : i32
    %9 = tpu.dynamic_rotate %8 by %c9_i32 dim 0 : vector<128x128xf32>, i32 -> vector<128x128xf32>
    %c0_8 = arith.constant 0 : index
    %c0_9 = arith.constant 0 : index
    %c0_10 = arith.constant 0 : index
    %10 = vector.load %arg5[%c0_8, %c0_9, %c0_10] : memref<9x128x1xf32, #tpu.memory_space<vmem>>, vector<1x128x1xf32>
    %11 = vector.shape_cast %10 : vector<1x128x1xf32> to vector<128x1xf32>
    %12 = vector.broadcast %11 : vector<128x1xf32> to vector<128x128xf32>
    %13 = arith.mulf %9, %12 : vector<128x128xf32>
    %c0_11 = arith.constant 0 : index
    %c0_12 = arith.constant 0 : index
    %c0_13 = arith.constant 0 : index
    %14 = vector.load %arg3[%c0_11, %c0_12, %c0_13] : memref<9x128x128xf32, #tpu.memory_space<vmem>>, vector<1x128x128xf32>
    %15 = vector.shape_cast %14 : vector<1x128x128xf32> to vector<128x128xf32>
    %cst_14 = arith.constant dense<0.000000e+00> : vector<128x128xf32>
    %16 = tpu.matmul %13, %15, %cst_14 {dimension_numbers = #tpu.dot_dimension_numbers<[1], [0], [0], [1], [0, 0, 1, 1], [], []>, precision = #tpu.contract_precision<fp32>} : vector<128x128xf32>, vector<128x128xf32>, vector<128x128xf32> -> vector<128x128xf32>
    %c8_i32 = arith.constant 8 : i32
    %17 = tpu.dynamic_rotate %8 by %c8_i32 dim 0 : vector<128x128xf32>, i32 -> vector<128x128xf32>
    %c1 = arith.constant 1 : index
    %c0_15 = arith.constant 0 : index
    %c0_16 = arith.constant 0 : index
    %18 = vector.load %arg5[%c1, %c0_15, %c0_16] : memref<9x128x1xf32, #tpu.memory_space<vmem>>, vector<1x128x1xf32>
    %19 = vector.shape_cast %18 : vector<1x128x1xf32> to vector<128x1xf32>
    %20 = vector.broadcast %19 : vector<128x1xf32> to vector<128x128xf32>
    %21 = arith.mulf %17, %20 : vector<128x128xf32>
    %c1_17 = arith.constant 1 : index
    %c0_18 = arith.constant 0 : index
    %c0_19 = arith.constant 0 : index
    %22 = vector.load %arg3[%c1_17, %c0_18, %c0_19] : memref<9x128x128xf32, #tpu.memory_space<vmem>>, vector<1x128x128xf32>
    %23 = vector.shape_cast %22 : vector<1x128x128xf32> to vector<128x128xf32>
    %cst_20 = arith.constant dense<0.000000e+00> : vector<128x128xf32>
    %24 = tpu.matmul %21, %23, %cst_20 {dimension_numbers = #tpu.dot_dimension_numbers<[1], [0], [0], [1], [0, 0, 1, 1], [], []>, precision = #tpu.contract_precision<fp32>} : vector<128x128xf32>, vector<128x128xf32>, vector<128x128xf32> -> vector<128x128xf32>
    %25 = arith.addf %16, %24 : vector<128x128xf32>
    %c7_i32 = arith.constant 7 : i32
    %26 = tpu.dynamic_rotate %8 by %c7_i32 dim 0 : vector<128x128xf32>, i32 -> vector<128x128xf32>
    %c2 = arith.constant 2 : index
    %c0_21 = arith.constant 0 : index
    %c0_22 = arith.constant 0 : index
    %27 = vector.load %arg5[%c2, %c0_21, %c0_22] : memref<9x128x1xf32, #tpu.memory_space<vmem>>, vector<1x128x1xf32>
    %28 = vector.shape_cast %27 : vector<1x128x1xf32> to vector<128x1xf32>
    %29 = vector.broadcast %28 : vector<128x1xf32> to vector<128x128xf32>
    %30 = arith.mulf %26, %29 : vector<128x128xf32>
    %c2_23 = arith.constant 2 : index
    %c0_24 = arith.constant 0 : index
    %c0_25 = arith.constant 0 : index
    %31 = vector.load %arg3[%c2_23, %c0_24, %c0_25] : memref<9x128x128xf32, #tpu.memory_space<vmem>>, vector<1x128x128xf32>
    %32 = vector.shape_cast %31 : vector<1x128x128xf32> to vector<128x128xf32>
    %cst_26 = arith.constant dense<0.000000e+00> : vector<128x128xf32>
    %33 = tpu.matmul %30, %32, %cst_26 {dimension_numbers = #tpu.dot_dimension_numbers<[1], [0], [0], [1], [0, 0, 1, 1], [], []>, precision = #tpu.contract_precision<fp32>} : vector<128x128xf32>, vector<128x128xf32>, vector<128x128xf32> -> vector<128x128xf32>
    %34 = arith.addf %25, %33 : vector<128x128xf32>
    %c1_i32 = arith.constant 1 : i32
    %35 = tpu.dynamic_rotate %8 by %c1_i32 dim 0 : vector<128x128xf32>, i32 -> vector<128x128xf32>
    %c3 = arith.constant 3 : index
    %c0_27 = arith.constant 0 : index
    %c0_28 = arith.constant 0 : index
    %36 = vector.load %arg5[%c3, %c0_27, %c0_28] : memref<9x128x1xf32, #tpu.memory_space<vmem>>, vector<1x128x1xf32>
    %37 = vector.shape_cast %36 : vector<1x128x1xf32> to vector<128x1xf32>
    %38 = vector.broadcast %37 : vector<128x1xf32> to vector<128x128xf32>
    %39 = arith.mulf %35, %38 : vector<128x128xf32>
    %c3_29 = arith.constant 3 : index
    %c0_30 = arith.constant 0 : index
    %c0_31 = arith.constant 0 : index
    %40 = vector.load %arg3[%c3_29, %c0_30, %c0_31] : memref<9x128x128xf32, #tpu.memory_space<vmem>>, vector<1x128x128xf32>
    %41 = vector.shape_cast %40 : vector<1x128x128xf32> to vector<128x128xf32>
    %cst_32 = arith.constant dense<0.000000e+00> : vector<128x128xf32>
    %42 = tpu.matmul %39, %41, %cst_32 {dimension_numbers = #tpu.dot_dimension_numbers<[1], [0], [0], [1], [0, 0, 1, 1], [], []>, precision = #tpu.contract_precision<fp32>} : vector<128x128xf32>, vector<128x128xf32>, vector<128x128xf32> -> vector<128x128xf32>
    %43 = arith.addf %34, %42 : vector<128x128xf32>
    %c4 = arith.constant 4 : index
    %c0_33 = arith.constant 0 : index
    %c0_34 = arith.constant 0 : index
    %44 = vector.load %arg3[%c4, %c0_33, %c0_34] : memref<9x128x128xf32, #tpu.memory_space<vmem>>, vector<1x128x128xf32>
    %45 = vector.shape_cast %44 : vector<1x128x128xf32> to vector<128x128xf32>
    %cst_35 = arith.constant dense<0.000000e+00> : vector<128x128xf32>
    %46 = tpu.matmul %8, %45, %cst_35 {dimension_numbers = #tpu.dot_dimension_numbers<[1], [0], [0], [1], [0, 0, 1, 1], [], []>, precision = #tpu.contract_precision<fp32>} : vector<128x128xf32>, vector<128x128xf32>, vector<128x128xf32> -> vector<128x128xf32>
    %47 = arith.addf %43, %46 : vector<128x128xf32>
    %c127_i32 = arith.constant 127 : i32
    %48 = tpu.dynamic_rotate %8 by %c127_i32 dim 0 : vector<128x128xf32>, i32 -> vector<128x128xf32>
    %c5 = arith.constant 5 : index
    %c0_36 = arith.constant 0 : index
    %c0_37 = arith.constant 0 : index
    %49 = vector.load %arg5[%c5, %c0_36, %c0_37] : memref<9x128x1xf32, #tpu.memory_space<vmem>>, vector<1x128x1xf32>
    %50 = vector.shape_cast %49 : vector<1x128x1xf32> to vector<128x1xf32>
    %51 = vector.broadcast %50 : vector<128x1xf32> to vector<128x128xf32>
    %52 = arith.mulf %48, %51 : vector<128x128xf32>
    %c5_38 = arith.constant 5 : index
    %c0_39 = arith.constant 0 : index
    %c0_40 = arith.constant 0 : index
    %53 = vector.load %arg3[%c5_38, %c0_39, %c0_40] : memref<9x128x128xf32, #tpu.memory_space<vmem>>, vector<1x128x128xf32>
    %54 = vector.shape_cast %53 : vector<1x128x128xf32> to vector<128x128xf32>
    %cst_41 = arith.constant dense<0.000000e+00> : vector<128x128xf32>
    %55 = tpu.matmul %52, %54, %cst_41 {dimension_numbers = #tpu.dot_dimension_numbers<[1], [0], [0], [1], [0, 0, 1, 1], [], []>, precision = #tpu.contract_precision<fp32>} : vector<128x128xf32>, vector<128x128xf32>, vector<128x128xf32> -> vector<128x128xf32>
    %56 = arith.addf %47, %55 : vector<128x128xf32>
    %c121_i32 = arith.constant 121 : i32
    %57 = tpu.dynamic_rotate %8 by %c121_i32 dim 0 : vector<128x128xf32>, i32 -> vector<128x128xf32>
    %c6 = arith.constant 6 : index
    %c0_42 = arith.constant 0 : index
    %c0_43 = arith.constant 0 : index
    %58 = vector.load %arg5[%c6, %c0_42, %c0_43] : memref<9x128x1xf32, #tpu.memory_space<vmem>>, vector<1x128x1xf32>
    %59 = vector.shape_cast %58 : vector<1x128x1xf32> to vector<128x1xf32>
    %60 = vector.broadcast %59 : vector<128x1xf32> to vector<128x128xf32>
    %61 = arith.mulf %57, %60 : vector<128x128xf32>
    %c6_44 = arith.constant 6 : index
    %c0_45 = arith.constant 0 : index
    %c0_46 = arith.constant 0 : index
    %62 = vector.load %arg3[%c6_44, %c0_45, %c0_46] : memref<9x128x128xf32, #tpu.memory_space<vmem>>, vector<1x128x128xf32>
    %63 = vector.shape_cast %62 : vector<1x128x128xf32> to vector<128x128xf32>
    %cst_47 = arith.constant dense<0.000000e+00> : vector<128x128xf32>
    %64 = tpu.matmul %61, %63, %cst_47 {dimension_numbers = #tpu.dot_dimension_numbers<[1], [0], [0], [1], [0, 0, 1, 1], [], []>, precision = #tpu.contract_precision<fp32>} : vector<128x128xf32>, vector<128x128xf32>, vector<128x128xf32> -> vector<128x128xf32>
    %65 = arith.addf %56, %64 : vector<128x128xf32>
    %c120_i32 = arith.constant 120 : i32
    %66 = tpu.dynamic_rotate %8 by %c120_i32 dim 0 : vector<128x128xf32>, i32 -> vector<128x128xf32>
    %c7 = arith.constant 7 : index
    %c0_48 = arith.constant 0 : index
    %c0_49 = arith.constant 0 : index
    %67 = vector.load %arg5[%c7, %c0_48, %c0_49] : memref<9x128x1xf32, #tpu.memory_space<vmem>>, vector<1x128x1xf32>
    %68 = vector.shape_cast %67 : vector<1x128x1xf32> to vector<128x1xf32>
    %69 = vector.broadcast %68 : vector<128x1xf32> to vector<128x128xf32>
    %70 = arith.mulf %66, %69 : vector<128x128xf32>
    %c7_50 = arith.constant 7 : index
    %c0_51 = arith.constant 0 : index
    %c0_52 = arith.constant 0 : index
    %71 = vector.load %arg3[%c7_50, %c0_51, %c0_52] : memref<9x128x128xf32, #tpu.memory_space<vmem>>, vector<1x128x128xf32>
    %72 = vector.shape_cast %71 : vector<1x128x128xf32> to vector<128x128xf32>
    %cst_53 = arith.constant dense<0.000000e+00> : vector<128x128xf32>
    %73 = tpu.matmul %70, %72, %cst_53 {dimension_numbers = #tpu.dot_dimension_numbers<[1], [0], [0], [1], [0, 0, 1, 1], [], []>, precision = #tpu.contract_precision<fp32>} : vector<128x128xf32>, vector<128x128xf32>, vector<128x128xf32> -> vector<128x128xf32>
    %74 = arith.addf %65, %73 : vector<128x128xf32>
    %c119_i32 = arith.constant 119 : i32
    %75 = tpu.dynamic_rotate %8 by %c119_i32 dim 0 : vector<128x128xf32>, i32 -> vector<128x128xf32>
    %c8 = arith.constant 8 : index
    %c0_54 = arith.constant 0 : index
    %c0_55 = arith.constant 0 : index
    %76 = vector.load %arg5[%c8, %c0_54, %c0_55] : memref<9x128x1xf32, #tpu.memory_space<vmem>>, vector<1x128x1xf32>
    %77 = vector.shape_cast %76 : vector<1x128x1xf32> to vector<128x1xf32>
    %78 = vector.broadcast %77 : vector<128x1xf32> to vector<128x128xf32>
    %79 = arith.mulf %75, %78 : vector<128x128xf32>
    %c8_56 = arith.constant 8 : index
    %c0_57 = arith.constant 0 : index
    %c0_58 = arith.constant 0 : index
    %80 = vector.load %arg3[%c8_56, %c0_57, %c0_58] : memref<9x128x128xf32, #tpu.memory_space<vmem>>, vector<1x128x128xf32>
    %81 = vector.shape_cast %80 : vector<1x128x128xf32> to vector<128x128xf32>
    %cst_59 = arith.constant dense<0.000000e+00> : vector<128x128xf32>
    %82 = tpu.matmul %79, %81, %cst_59 {dimension_numbers = #tpu.dot_dimension_numbers<[1], [0], [0], [1], [0, 0, 1, 1], [], []>, precision = #tpu.contract_precision<fp32>} : vector<128x128xf32>, vector<128x128xf32>, vector<128x128xf32> -> vector<128x128xf32>
    %83 = arith.addf %74, %82 : vector<128x128xf32>
    %c0_60 = arith.constant 0 : index
    %c0_61 = arith.constant 0 : index
    %84 = vector.load %arg4[%c0_60, %c0_61] : memref<1x128xf32, #tpu.memory_space<vmem>>, vector<1x128xf32>
    %85 = vector.broadcast %84 : vector<1x128xf32> to vector<128x128xf32>
    %86 = arith.addf %83, %85 : vector<128x128xf32>
    %c0_62 = arith.constant 0 : index
    %c0_63 = arith.constant 0 : index
    %87 = vector.load %arg7[%c0_62, %c0_63] : memref<4x128xf32, #tpu.memory_space<vmem>>, vector<4x128xf32>
    %cst_64 = arith.constant dense<0.000000e+00> : vector<128x128xf32>
    %88 = tpu.matmul %3, %87, %cst_64 {dimension_numbers = #tpu.dot_dimension_numbers<[1], [0], [0], [1], [0, 0, 1, 1], [], []>, precision = #tpu.contract_precision<fp32>} : vector<128x4xf32>, vector<4x128xf32>, vector<128x128xf32> -> vector<128x128xf32>
    %c0_65 = arith.constant 0 : index
    %c0_66 = arith.constant 0 : index
    %89 = vector.load %arg8[%c0_65, %c0_66] : memref<1x128xf32, #tpu.memory_space<vmem>>, vector<1x128xf32>
    %90 = vector.broadcast %89 : vector<1x128xf32> to vector<128x128xf32>
    %91 = arith.addf %88, %90 : vector<128x128xf32>
    %92 = arith.addf %86, %91 : vector<128x128xf32>
    %cst_67 = arith.constant 0.000000e+00 : f32
    %93 = vector.broadcast %cst_67 : f32 to vector<128x128xf32>
    %94 = arith.maximumf %92, %93 : vector<128x128xf32>
    %c0_68 = arith.constant 0 : index
    %c0_69 = arith.constant 0 : index
    %95 = vector.load %arg9[%c0_68, %c0_69] : memref<128x128xf32, #tpu.memory_space<vmem>>, vector<128x128xf32>
    tpu.vector_store %arg9[%c0_68, %c0_69], %94 {strides = array<i32>} : memref<128x128xf32, #tpu.memory_space<vmem>>, vector<128x128xf32>,
    return
  }
}

</mosaic_0001>

<bundles_post_ra>
// kernel: residual_block_forward.1
= control target key start
LH: loop header
LB: loop body
LE: loop exit
PB: predicated region body
PF: predicated region fallthrough
CT: control target
= control target key end

     0   :  { %vm123_vm0 = vcmask 1043456   ;;  %v10335_v3 = vmov 0   ;;  %vm74_vm1 = vcmask 293888   ;;  %s17930_s0 = inlined_call_operand.vmem [shape: f32[128,36], index: 0, kind: input, shape index: {}]   ;;  %s17931_s1 = inlined_call_operand.vmem [shape: f32[36,128], index: 1, kind: input, shape index: {}]   ;;  %s17932_s2 = inlined_call_operand.vmem [shape: f32[1,128], index: 2, kind: input, shape index: {}]   ;;  %s17933_s3 = inlined_call_operand.vmem [shape: f32[9,128,128], index: 3, kind: input, shape index: {}]   ;;  %s17934_s4 = inlined_call_operand.vmem [shape: f32[1,128], index: 4, kind: input, shape index: {}]   ;;  %s17935_s5 = inlined_call_operand.vmem [shape: f32[9,128,1], index: 5, kind: input, shape index: {}]   ;;  %s17936_s6 = inlined_call_operand.vmem [shape: f32[128,4], index: 6, kind: input, shape index: {}]   ;;  %s17937_s7 = inlined_call_operand.vmem [shape: f32[4,128], index: 7, kind: input, shape index: {}]   ;;  %s17938_s8 = inlined_call_operand.vmem [shape: f32[1,128], index: 8, kind: input, shape index: {}]   ;;  %s17939_s9 = inlined_call_operand.hbm [shape: f32[128,128], index: 9, kind: output, shape index: {}]  }
   0x1   :  { %v10053_v0 = vld [vmem:[%s17935_s5 + $0xa0] sm:$0xff]  ;;  %v10051_v1 = vld [vmem:[%s17935_s5 + $0x90] sm:$0xff]  ;;  %10305 = vset.pattern.permute.xlu2 %v10335_v3  ;;  %10304 = vset.pattern.permute.xlu1 %v10335_v3  ;;  %v52_v5 = vld [vmem:[%s17931_s1 + $0x18] sm:$0xff] }
   0x2   :  { %v10049_v2 = vld [vmem:[%s17935_s5 + $0x80] sm:$0xff]  ;;  %v51_v6 = vld [vmem:[%s17931_s1 + $0x10] sm:$0xff]  ;;  %10303 = vset.pattern.permute.xlu0 %v10335_v3  ;;  %1008 = vperm.xlu2 %10305, %v10053_v0   ;;  %v10408_v8 = vand.u32 4294901760, %v52_v5  ;;  %v50_v11 = vld [vmem:[%s17931_s1 + $0x8] sm:$0xff] }
   0x3   :  { %v53_v4 = vld [vmem:[%s17931_s1 + $0x20] sm:$0xf]  ;;  %v10410_v9 = vand.u32 4294901760, %v51_v6  ;;  %998 = vperm.xlu1 %10304, %v10051_v1   ;;  %988 = vperm.xlu0 %10303, %v10049_v2   ;;  %v10423_v14 = vand.u32 4294901760, %v50_v11  ;;  %v42_v21 = vld [vmem:[%s17930_s0 + $0x48] sm:$0xff]  ;;  %v10052_v32 = vld [vmem:[%s17935_s5 + $0x98] sm:$0xff] }
   0x4   :  { %v125_v7 = vsel %vm123_vm0, %v53_v4, 0  ;;  %v49_v12 = vld [vmem:[%s17931_s1] sm:$0xff]  ;;  %v10429_v17 = vsub.f32 %v52_v5, %v10408_v8  ;;  %v103_v25 = vsel %vm74_vm1, %v42_v21, 0  ;;  %v10054_v27 = vld [vmem:[%s17935_s5 + $0xa8] sm:$0xff]  ;;  %v43_v42 = vld [vmem:[%s17930_s0 + $0x50] sm:$0xff] }
   0x5   :  { %v10412_v10 = vand.u32 4294901760, %v125_v7  ;;  %v41_v13 = vld [vmem:[%s17930_s0 + $0x40] sm:$0xff]  ;;  %v10425_v15 = vand.u32 4294901760, %v49_v12  ;;  %v10438_v20 = vsub.f32 %v51_v6, %v10410_v9  ;;  %v10446_v23 = vsub.f32 %v50_v11, %v10423_v14  ;;  %v10050_v33 = vld [vmem:[%s17935_s5 + $0x88] sm:$0xff]  ;;  %v35_v49 = vld [vmem:[%s17930_s0 + $0x10] sm:$0xff] }
   0x6   :  { %v100_v16 = vsel %vm74_vm1, %v41_v13, 0  ;;  %v296_v22 = vand.u32 4294901760, %v10429_v17  ;;  %v33_v26 = vld [vmem:[%s17930_s0] sm:$0xff]  ;;  %v10464_v31 = vand.u32 4294901760, %v103_v25  ;;  %v34_v44 = vld [vmem:[%s17930_s0 + $0x8] sm:$0xff]  ;;  %v106_v52 = vsel %vm74_vm1, %v43_v42, 0 }
   0x7   :  { %10289 = vmatpush.msra.mxu2 %v10412_v10  ;;  %v10433_v18 = vsub.f32 %v125_v7, %v10412_v10  ;;  %v10435_v19 = vand.u32 4294901760, %v100_v16  ;;  %139 = vmatpush.msra.mxu0 %v10412_v10  ;;  %v10449_v24 = vsub.f32 %v49_v12, %v10425_v15  ;;  %v302_v30 = vand.u32 4294901760, %v10438_v20 }
   0x8   :  { %v297_v34 = vsub.f32 %v10429_v17, %v296_v22  ;;  %v308_v35 = vand.u32 4294901760, %v10446_v23  ;;  %v76_v37 = vsel %vm74_vm1, %v33_v26, 0  ;;  %v10486_v41 = vsub.f32 %v103_v25, %v10464_v31 }
   0x9   :  { %10290 = vmatpush.msra.mxu2 %v10408_v8  ;;  %v290_v28 = vand.u32 4294901760, %v10433_v18  ;;  %v10461_v29 = vsub.f32 %v100_v16, %v10435_v19  ;;  %141 = vmatpush.msra.mxu0 %v10408_v8  ;;  %v314_v36 = vand.u32 4294901760, %v10449_v24  ;;  %v303_v40 = vsub.f32 %v10438_v20, %v302_v30 }
   0xa   :  { %1013 = vperm.xlu2 %10305, %v10054_v27   ;;  %v10492_v43 = vand.u32 4294901760, %v76_v37  ;;  %v298_v47 = vand.u32 4294901760, %v297_v34  ;;  %v222_v48 = vand.u32 4294901760, %v10486_v41  ;;  %v309_v50 = vsub.f32 %v10446_v23, %v308_v35 }
   0xb   :  { %10291 = vmatpush.msra.mxu2 %v10410_v9  ;;  %v291_v38 = vsub.f32 %v10433_v18, %v290_v28  ;;  %v214_v39 = vand.u32 4294901760, %v10461_v29  ;;  %143 = vmatpush.msra.mxu0 %v10410_v9 }
   0xc   :  { %1003 = vperm.xlu1 %10304, %v10052_v32   ;;  %993 = vperm.xlu0 %10303, %v10050_v33   ;;  %v10510_v51 = vsub.f32 %v76_v37, %v10492_v43 }
   0xd   :  { %v292_v45 = vand.u32 4294901760, %v291_v38  ;;  %v215_v46 = vsub.f32 %v10461_v29, %v214_v39  ;;  %10292 = vmatpush.msra.mxu2 %v10423_v14  ;;  %145 = vmatpush.msra.mxu0 %v10423_v14 }
   0xe   :  { %14 = vsyncpa [#allocation3], 0  ;;  %v304_v54 = vand.u32 4294901760, %v303_v40  ;;  %v10513_v55 = vand.u32 4294901760, %v106_v52  ;;  %v79_v56 = vsel %vm74_vm1, %v34_v44, 0  ;;  %v44_v57 = vld [vmem:[%s17930_s0 + $0x58] sm:$0xff]  ;;  %v315_v58 = vsub.f32 %v10449_v24, %v314_v36 }
   0xf   :  { %10294 = vmatpush.msra.mxu3 %v292_v45  ;;  %v216_v53 = vand.u32 4294901760, %v215_v46  ;;  %293 = vmatpush.msra.mxu1 %v292_v45  ;;  %v150_v59 = vand.u32 4294901760, %v10510_v51  ;;  %v10525_v60 = vand.u32 4294901760, %v79_v56  ;;  %v82_v61 = vsel %vm74_vm1, %v35_v49, 0  ;;  %v10057_v62 = vld [vmem:[%s17935_s5 + $0xc0] sm:$0xff]  ;;  %v10056_v1 = vld [vmem:[%s17935_s5 + $0xb8] sm:$0xff] }
  0x10   :  { %10293 = vmatpush.msra.mxu2 %v10425_v15  ;;  %147 = vmatpush.msra.mxu0 %v10425_v15  ;;  %v223_v63 = vsub.f32 %v10486_v41, %v222_v48  ;;  %v10535_v0 = vsub.f32 %v106_v52, %v10513_v55  ;;  %v10055_v2 = vld [vmem:[%s17935_s5 + $0xb0] sm:$0xff]  ;;  %v310_v3 = vand.u32 4294901760, %v309_v50  ;;  %v109_v6 = vsel %vm74_vm1, %v44_v57, 0  ;;  %v36_v25 = vld [vmem:[%s17930_s0 + $0x18] sm:$0xff]  ;;  %v10058_v40 = vld [vmem:[%s17935_s5 + $0xc8] sm:$0xff]  ;;  %s10037_s12 = sshll.u32 %s17939_s9, 4  ;;  %s10038_s12 = int_to_ptr.hbm [resolvable:$true] %s10037_s12 }
  0x11   :  { %217 = vmatmul.f32.vlgmr.msra.gmra.mxu2 %v216_v53  ;;  %10295 = vmatpush.msra.mxu3 %v298_v47  ;;  %v151_v4 = vsub.f32 %v10510_v51, %v150_v59  ;;  %v10548_v5 = vsub.f32 %v79_v56, %v10525_v60  ;;  %v10551_v7 = vand.u32 4294901760, %v82_v61  ;;  %v316_v11 = vand.u32 4294901760, %v315_v58  ;;  %v10060_v33 = vld [vmem:[%s17935_s5 + $0xd8] sm:$0xff]  ;;  %v10059_v38 = vld [vmem:[%s17935_s5 + $0xd0] sm:$0xff]  ;;  %v46_v52 = vld [vmem:[%s17930_s0 + $0x68] sm:$0xff]  ;;  %s10337_s13 = smov 128  }
  0x12   :  { %396 = vmatpush.msrb.mxu2 %v10433_v18  ;;  %299 = vmatpush.msra.mxu1 %v298_v47  ;;  %v224_v16 = vand.u32 4294901760, %v223_v63  ;;  %v230_v18 = vand.u32 4294901760, %v10535_v0  ;;  %v10555_v21 = vand.u32 4294901760, %v109_v6  ;;  %v85_v32 = vsel %vm74_vm1, %v36_v25, 0  ;;  %v10063_v53 = vld [vmem:[%s17935_s5 + $0xf0] sm:$0xff]  ;;  %s10338_s14 = smov 8  }
  0x13   :  { %10296 = vmatpush.msra.mxu3 %v304_v54  ;;  %622 = vmatpush.msrb.mxu0 %v290_v28  ;;  %v152_v12 = vand.u32 4294901760, %v151_v4  ;;  %v158_v13 = vand.u32 4294901760, %v10548_v5  ;;  %v10565_v27 = vsub.f32 %v82_v61, %v10551_v7  ;;  %v45_v28 = vld [vmem:[%s17930_s0 + $0x60] sm:$0xff]  ;;  %v10594_v46 = vand.u32 4294901760, %v85_v32  ;;  %v842_v4 = vld [vmem:[%s17935_s5 + $0x8] sm:$0xff] }
  0x14   :  { %1028 = vperm.xlu2 %10305, %v10057_v62   ;;  %305 = vmatpush.msra.mxu1 %v304_v54  ;;  %v231_v34 = vsub.f32 %v10535_v0, %v230_v18  ;;  %v10579_v37 = vsub.f32 %v109_v6, %v10555_v21  ;;  %v112_v42 = vsel %vm74_vm1, %v45_v28, 0  ;;  %vm9320_vm4 = vcmask 31744  }
  0x15   :  { %1023 = vperm.xlu1 %10304, %v10056_v1   ;;  %1018 = vperm.xlu0 %10303, %v10055_v2   ;;  %v159_v26 = vsub.f32 %v10548_v5, %v158_v13  ;;  %v166_v45 = vand.u32 4294901760, %v10565_v27  ;;  %v10598_v50 = vand.u32 4294901760, %v112_v42  ;;  %v38_v2 = vld [vmem:[%s17930_s0 + $0x28] sm:$0xff] }
  0x16   :  { %10297 = vmatpush.msra.mxu3 %v310_v3  ;;  %311 = vmatpush.msra.mxu1 %v310_v3  ;;  %v232_v47 = vand.u32 4294901760, %v231_v34  ;;  %v238_v49 = vand.u32 4294901760, %v10579_v37  ;;  %v91_v3 = vsel %vm74_vm1, %v38_v2, 0 }
  0x17   :  { %153 = vmatmul.f32.vlgmr.msra.gmra.mxu0 %v152_v12  ;;  %399 = vmatpush.msrb.mxu2 %v10429_v17  ;;  %v160_v44 = vand.u32 4294901760, %v159_v26  ;;  %v167_v17 = vsub.f32 %v10565_v27, %v166_v45  ;;  %v10627_v56 = vsub.f32 %v112_v42, %v10598_v50  ;;  %v10685_v25 = vand.u32 4294901760, %v91_v3 }
  0x18   :  { %10298 = vmatpush.msra.mxu3 %v316_v11  ;;  %317 = vmatpush.msra.mxu1 %v316_v11  ;;  %v239_v54 = vsub.f32 %v10579_v37, %v238_v49 }
  0x19   :  { %225 = vmatmul.f32.gmra.mxu2 %v224_v16  ;;  %351 = vmatmul.f32.vlgmr.msra.gmra.mxu3 %v10435_v19  ;;  %v168_v57 = vand.u32 4294901760, %v167_v17  ;;  %v246_v63 = vand.u32 4294901760, %v10627_v56  ;;  %v843_v17 = vld [vmem:[%s17935_s5 + $0x10] sm:$0xff] }
  0x1a   :  { %502 = vmatpush.msrb.mxu3 %v10412_v10  ;;  %319 = vmatmul.f32.vlgmr.msra.gmra.mxu1 %v10492_v43  ;;  %v240_v62 = vand.u32 4294901760, %v239_v54 }
  0x1b   :  { %716 = vmatpush.msrb.mxu1 %v10412_v10  ;;  %626 = vmatpush.msrb.mxu0 %v296_v22  ;;  %v37_v10 = vld [vmem:[%s17930_s0 + $0x20] sm:$0xff]  ;;  %v10610_v22 = vsub.f32 %v85_v32, %v10594_v46  ;;  %v247_v6 = vsub.f32 %v10627_v56, %v246_v63 }
  0x1c   :  { %1043 = vperm.xlu2 %10305, %v10060_v33   ;;  %504 = vmatpush.msrb.mxu3 %v10408_v8  ;;  %v39_v33 = vld [vmem:[%s17930_s0 + $0x30] sm:$0xff] }
  0x1d   :  { %1038 = vperm.xlu1 %10304, %v10059_v38   ;;  %1033 = vperm.xlu0 %10303, %v10058_v40   ;;  %v174_v58 = vand.u32 4294901760, %v10610_v22  ;;  %v248_v26 = vand.u32 4294901760, %v247_v6  ;;  %v10697_v38 = vsub.f32 %v91_v3, %v10685_v25  ;;  %v48_v40 = vld [vmem:[%s17930_s0 + $0x78] sm:$0xff]  ;;  %v94_v42 = vsel %vm74_vm1, %v39_v33, 0 }
  0x1e   :  { %718 = vmatpush.msrb.mxu1 %v10408_v8  ;;  %402 = vmatpush.msrb.mxu2 %v10438_v20  ;;  %v88_v8 = vsel %vm74_vm1, %v37_v10, 0  ;;  %v10061_v20 = vld [vmem:[%s17935_s5 + $0xe0] sm:$0xff]  ;;  %v848_v3 = vld [vmem:[%s17935_s5 + $0x38] sm:$0xff] }
  0x1f   :  { %161 = vmatmul.f32.gmra.mxu0 %v160_v44  ;;  %506 = vmatpush.msrb.mxu3 %v10410_v9  ;;  %v10640_v61 = vand.u32 4294901760, %v88_v8  ;;  %v845_v44 = vld [vmem:[%s17935_s5 + $0x20] sm:$0xff]  ;;  %v190_v54 = vand.u32 4294901760, %v10697_v38 }
  0x20   :  { %630 = vmatpush.msrb.mxu0 %v302_v30  ;;  %720 = vmatpush.msrb.mxu1 %v10410_v9  ;;  %v10062_v9 = vld [vmem:[%s17935_s5 + $0xe8] sm:$0xff]  ;;  %v115_v30 = vsel %vm74_vm1, %v46_v52, 0  ;;  %v844_v52 = vld [vmem:[%s17935_s5 + $0x18] sm:$0xff] }
  0x21   :  { %233 = vmatmul.f32.gmra.mxu2 %v232_v47  ;;  %355 = vmatmul.f32.gmra.mxu3 %v10464_v31  ;;  %v10646_v1 = vand.u32 4294901760, %v115_v30  ;;  %v191_v2 = vsub.f32 %v10697_v38, %v190_v54 }
  0x22   :  { %323 = vmatmul.f32.gmra.mxu1 %v10525_v60  ;;  %405 = vmatpush.msrb.mxu2 %v10446_v23  ;;  %v10657_v23 = vsub.f32 %v88_v8, %v10640_v61  ;;  %v121_v8 = vsel %vm74_vm1, %v48_v40, 0 }
  0x23   :  { %508 = vmatpush.msrb.mxu3 %v10423_v14  ;;  %634 = vmatpush.msrb.mxu0 %v308_v35  ;;  %v47_v35 = vld [vmem:[%s17930_s0 + $0x70] sm:$0xff]  ;;  %v10674_v11 = vsub.f32 %v115_v30, %v10646_v1 }
  0x24   :  { %1058 = vperm.xlu2 %10305, %v10063_v53   ;;  %722 = vmatpush.msrb.mxu1 %v10423_v14  ;;  %v175_v14 = vsub.f32 %v10610_v22, %v174_v58  ;;  %v182_v16 = vand.u32 4294901760, %v10657_v23 }
  0x25   :  { %1053 = vperm.xlu1 %10304, %v10062_v9   ;;  %1048 = vperm.xlu0 %10303, %v10061_v20   ;;  %v254_v28 = vand.u32 4294901760, %v10674_v11  ;;  %v10722_v9 = vand.u32 4294901760, %v94_v42 }
  0x26   :  { %408 = vmatpush.msrb.mxu2 %v10449_v24  ;;  %510 = vmatpush.msrb.mxu3 %v10425_v15  ;;  %v841_v24 = vld [vmem:[%s17935_s5] sm:$0xff]  ;;  %v176_v12 = vand.u32 4294901760, %v175_v14  ;;  %v183_v34 = vsub.f32 %v10657_v23, %v182_v16 }
  0x27   :  { %169 = vmatmul.f32.gmra.mxu0 %v168_v57  ;;  %724 = vmatpush.msrb.mxu1 %v10425_v15  ;;  %v10064_v15 = vld [vmem:[%s17935_s5 + $0xf8] sm:$0xff]  ;;  %v255_v47 = vsub.f32 %v10674_v11, %v254_v28  ;;  %v10725_v57 = vand.u32 4294901760, %v121_v8  ;;  %v10734_v14 = vsub.f32 %v94_v42, %v10722_v9 }
  0x28   :  { %638 = vmatpush.msrb.mxu0 %v314_v36  ;;  %v118_v36 = vsel %vm74_vm1, %v47_v35, 0  ;;  %v184_v53 = vand.u32 4294901760, %v183_v34 }
  0x29   :  { %241 = vmatmul.f32.gmra.mxu2 %v240_v62  ;;  %359 = vmatmul.f32.gmra.mxu3 %v10513_v55  ;;  %v10688_v32 = vand.u32 4294901760, %v118_v36  ;;  %v256_v20 = vand.u32 4294901760, %v255_v47  ;;  %v40_v62 = vld [vmem:[%s17930_s0 + $0x38] sm:$0xff]  ;;  %v10745_v6 = vsub.f32 %v121_v8, %v10725_v57 }
  0x2a   :  { %327 = vmatmul.f32.gmra.mxu1 %v10551_v7  ;;  %v97_v35 = vsel %vm74_vm1, %v40_v62, 0 }
  0x2b   :  { %v10711_v10 = vsub.f32 %v118_v36, %v10688_v32  ;;  %v192_v36 = vand.u32 4294901760, %v191_v2  ;;  %v270_v34 = vand.u32 4294901760, %v10745_v6  ;;  %v854_v2 = vld [vmem:[%s17935_s5 + $0x68] sm:$0xff] }
  0x2c   :  { %864 = vperm.xlu2 %10305, %v842_v4  }
  0x2d   :  { %1063 = vperm.xlu0 %10303, %v10064_v15   ;;  %859 = vperm.xlu1 %10304, %v841_v24   ;;  %v262_v30 = vand.u32 4294901760, %v10711_v10  ;;  %v846_v15 = vld [vmem:[%s17935_s5 + $0x28] sm:$0xff]  ;;  %v847_v24 = vld [vmem:[%s17935_s5 + $0x30] sm:$0xff]  ;;  %v271_v47 = vsub.f32 %v10745_v6, %v270_v34 }
  0x2f   :  { %177 = vmatmul.f32.gmra.mxu0 %v176_v12  ;;  %v263_v4 = vsub.f32 %v10711_v10, %v262_v30  ;;  %v198_v12 = vand.u32 4294901760, %v10734_v14 }
  0x31   :  { %249 = vmatmul.f32.gmra.mxu2 %v248_v26  ;;  %363 = vmatmul.f32.gmra.mxu3 %v10555_v21  ;;  %v10755_v26 = vand.u32 4294901760, %v97_v35  ;;  %v264_v33 = vand.u32 4294901760, %v263_v4  ;;  %v199_v40 = vsub.f32 %v10734_v14, %v198_v12 }
  0x32   :  { %331 = vmatmul.f32.gmra.mxu1 %v10594_v46 }
  0x33   :  { %v10762_v42 = vsub.f32 %v97_v35, %v10755_v26  ;;  %v200_v8 = vand.u32 4294901760, %v199_v40  ;;  %v852_v35 = vld [vmem:[%s17935_s5 + $0x58] sm:$0xff]  ;;  %v10082_v40 = vld [vmem:[%s17935_s5 + $0x108] sm:$0xff] }
  0x34   :  { %879 = vperm.xlu2 %10305, %v845_v44   ;;  %v851_v44 = vld [vmem:[%s17935_s5 + $0x50] sm:$0xff] }
  0x35   :  { %869 = vperm.xlu0 %10303, %v843_v17   ;;  %874 = vperm.xlu1 %10304, %v844_v52   ;;  %v849_v17 = vld [vmem:[%s17935_s5 + $0x40] sm:$0xff]  ;;  %v850_v52 = vld [vmem:[%s17935_s5 + $0x48] sm:$0xff] }
  0x37   :  { %185 = vmatmul.f32.gmra.mxu0 %v184_v53  ;;  %v206_v53 = vand.u32 4294901760, %v10762_v42 }
  0x39   :  { %257 = vmatmul.f32.gmra.mxu2 %v256_v20  ;;  %367 = vmatmul.f32.gmra.mxu3 %v10598_v50  ;;  %v272_v20 = vand.u32 4294901760, %v271_v47  ;;  %v207_v62 = vsub.f32 %v10762_v42, %v206_v53 }
  0x3a   :  { %335 = vmatmul.f32.gmra.mxu1 %v10640_v61 }
  0x3b   :  { %v208_v4 = vand.u32 4294901760, %v207_v62  ;;  %v10125_v62 = vld [vmem:[%s17935_s5 + $0x1e0] sm:$0xff] }
  0x3c   :  { %894 = vperm.xlu2 %10305, %v848_v3   ;;  %v853_v3 = vld [vmem:[%s17935_s5 + $0x60] sm:$0xff] }
  0x3d   :  { %884 = vperm.xlu0 %10303, %v846_v15   ;;  %889 = vperm.xlu1 %10304, %v847_v24   ;;  %v10081_v15 = vld [vmem:[%s17935_s5 + $0x100] sm:$0xff]  ;;  %v855_v24 = vld [vmem:[%s17935_s5 + $0x70] sm:$0xff] }
  0x3f   :  { %193 = vmatmul.f32.gmra.mxu0 %v192_v36  ;;  %v856_v36 = vld [vmem:[%s17935_s5 + $0x78] sm:$0xff] }
  0x41   :  { %265 = vmatmul.f32.gmra.mxu2 %v264_v33  ;;  %371 = vmatmul.f32.gmra.mxu3 %v10646_v1  ;;  %v10084_v33 = vld [vmem:[%s17935_s5 + $0x118] sm:$0xff] }
  0x42   :  { %339 = vmatmul.f32.gmra.mxu1 %v10685_v25 }
  0x44   :  { %909 = vperm.xlu2 %10305, %v851_v44   ;;  %v10083_v44 = vld [vmem:[%s17935_s5 + $0x110] sm:$0xff] }
  0x45   :  { %899 = vperm.xlu0 %10303, %v849_v17   ;;  %904 = vperm.xlu1 %10304, %v850_v52   ;;  %v10122_v52 = vld [vmem:[%s17935_s5 + $0x1c8] sm:$0xff] }
  0x47   :  { %201 = vmatmul.f32.gmra.mxu0 %v200_v8  ;;  %v10123_v8 = vld [vmem:[%s17935_s5 + $0x1d0] sm:$0xff] }
  0x49   :  { %273 = vmatmul.f32.gmra.mxu2 %v272_v20  ;;  %375 = vmatmul.f32.gmra.mxu3 %v10688_v32 }
  0x4a   :  { %343 = vmatmul.f32.gmra.mxu1 %v10722_v9 }
  0x4c   :  { %924 = vperm.xlu2 %10305, %v854_v2   ;;  %v10126_v2 = vld [vmem:[%s17935_s5 + $0x1e8] sm:$0xff] }
  0x4d   :  { %914 = vperm.xlu0 %10303, %v852_v35   ;;  %919 = vperm.xlu1 %10304, %v853_v3  }
  0x4f   :  { %209 = vmatmul.f32.gmra.mxu0 %v208_v4  ;;  %v10128_v4 = vld [vmem:[%s17935_s5 + $0x1f8] sm:$0xff] }
  0x51   :  { %379 = vmatmul.f32.gmra.mxu3 %v10725_v57  ;;  %411 = vmatmul.f32.vlgmr.msrb.gmra.mxu2 %v10510_v51  ;;  %v10087_v51 = vld [vmem:[%s17935_s5 + $0x130] sm:$0xff] }
  0x52   :  { %347 = vmatmul.f32.gmra.mxu1 %v10755_v26 }
  0x54   :  { %2763 = vperm.xlu2 %10305, %v10081_v15   ;;  %v10161_v15 = vld [vmem:[%s17935_s5 + $0x280] sm:$0xff] }
  0x55   :  { %929 = vperm.xlu0 %10303, %v855_v24   ;;  %934 = vperm.xlu1 %10304, %v856_v36  }
  0x57   :  { %640 = vmatmul.f32.vlgmr.msrb.gmra.mxu0 %v10492_v43 }
  0x59   :  { %416 = vmatmul.f32.gmra.mxu2 %v10548_v5  ;;  %514 = vmatmul.f32.vlgmr.msrb.gmra.mxu3 %v150_v59  ;;  %v10085_v59 = vld [vmem:[%s17935_s5 + $0x120] sm:$0xff]  ;;  %v10090_v5 = vld [vmem:[%s17935_s5 + $0x148] sm:$0xff] }
  0x5a   :  { %726 = vmatmul.f32.vlgmr.msrb.gmra.mxu1 %v10492_v43  ;;  %v10086_v43 = vld [vmem:[%s17935_s5 + $0x128] sm:$0xff] }
  0x5c   :  { %2778 = vperm.xlu2 %10305, %v10084_v33   ;;  %v10163_v33 = vld [vmem:[%s17935_s5 + $0x290] sm:$0xff] }
  0x5d   :  { %2768 = vperm.xlu0 %10303, %v10082_v40   ;;  %2773 = vperm.xlu1 %10304, %v10083_v44   ;;  %v10164_v40 = vld [vmem:[%s17935_s5 + $0x298] sm:$0xff] }
  0x5f   :  { %644 = vmatmul.f32.gmra.mxu0 %v10525_v60 }
  0x61   :  { %421 = vmatmul.f32.gmra.mxu2 %v10565_v27  ;;  %520 = vmatmul.f32.gmra.mxu3 %v158_v13  ;;  %v10088_v13 = vld [vmem:[%s17935_s5 + $0x138] sm:$0xff]  ;;  %v10093_v27 = vld [vmem:[%s17935_s5 + $0x160] sm:$0xff] }
  0x62   :  { %730 = vmatmul.f32.gmra.mxu1 %v10525_v60  ;;  %v10089_v60 = vld [vmem:[%s17935_s5 + $0x140] sm:$0xff] }
  0x64   :  { %2793 = vperm.xlu2 %10305, %v10087_v51  }
  0x65   :  { %2783 = vperm.xlu0 %10303, %v10085_v59   ;;  %2788 = vperm.xlu1 %10304, %v10086_v43   ;;  %v10166_v59 = vld [vmem:[%s17935_s5 + $0x2a8] sm:$0xff]  ;;  %v10167_v43 = vld [vmem:[%s17935_s5 + $0x2b0] sm:$0xff] }
  0x67   :  { %648 = vmatmul.f32.gmra.mxu0 %v10551_v7 }
  0x69   :  { %426 = vmatmul.f32.gmra.mxu2 %v10610_v22  ;;  %526 = vmatmul.f32.gmra.mxu3 %v166_v45  ;;  %v10091_v45 = vld [vmem:[%s17935_s5 + $0x150] sm:$0xff]  ;;  %v10096_v22 = vld [vmem:[%s17935_s5 + $0x178] sm:$0xff] }
  0x6a   :  { %734 = vmatmul.f32.gmra.mxu1 %v10551_v7  ;;  %v10092_v7 = vld [vmem:[%s17935_s5 + $0x158] sm:$0xff] }
  0x6c   :  { %2808 = vperm.xlu2 %10305, %v10090_v5  }
  0x6d   :  { %2798 = vperm.xlu0 %10303, %v10088_v13   ;;  %2803 = vperm.xlu1 %10304, %v10089_v60   ;;  %v10169_v60 = vld [vmem:[%s17935_s5 + $0x2c0] sm:$0xff] }
  0x6f   :  { %652 = vmatmul.f32.gmra.mxu0 %v10594_v46 }
  0x71   :  { %431 = vmatmul.f32.gmra.mxu2 %v10657_v23  ;;  %532 = vmatmul.f32.gmra.mxu3 %v174_v58  ;;  %v10094_v58 = vld [vmem:[%s17935_s5 + $0x168] sm:$0xff]  ;;  %v10115_v23 = vld [vmem:[%s17935_s5 + $0x190] sm:$0xff] }
  0x72   :  { %738 = vmatmul.f32.gmra.mxu1 %v10594_v46  ;;  %v10095_v46 = vld [vmem:[%s17935_s5 + $0x170] sm:$0xff] }
  0x74   :  { %2823 = vperm.xlu2 %10305, %v10093_v27   ;;  %v10170_v27 = vld [vmem:[%s17935_s5 + $0x2c8] sm:$0xff] }
  0x75   :  { %2813 = vperm.xlu0 %10303, %v10091_v45   ;;  %2818 = vperm.xlu1 %10304, %v10092_v7  }
  0x77   :  { %656 = vmatmul.f32.gmra.mxu0 %v10640_v61 }
  0x79   :  { %436 = vmatmul.f32.gmra.mxu2 %v10697_v38  ;;  %538 = vmatmul.f32.gmra.mxu3 %v182_v16  ;;  %v10113_v16 = vld [vmem:[%s17935_s5 + $0x180] sm:$0xff]  ;;  %v10118_v38 = vld [vmem:[%s17935_s5 + $0x1a8] sm:$0xff] }
  0x7a   :  { %742 = vmatmul.f32.gmra.mxu1 %v10640_v61  ;;  %v10114_v61 = vld [vmem:[%s17935_s5 + $0x188] sm:$0xff] }
  0x7c   :  { %2838 = vperm.xlu2 %10305, %v10096_v22   ;;  %v10172_v22 = vld [vmem:[%s17935_s5 + $0x2d8] sm:$0xff] }
  0x7d   :  { %2828 = vperm.xlu0 %10303, %v10094_v58   ;;  %2833 = vperm.xlu1 %10304, %v10095_v46   ;;  %v10173_v58 = vld [vmem:[%s17935_s5 + $0x2e0] sm:$0xff]  ;;  %v10080_v46 = vld [vmem:[%s17933_s3 + $0xf8] sm:$0xff] }
  0x7f   :  { %660 = vmatmul.f32.gmra.mxu0 %v10685_v25 }
  0x81   :  { %441 = vmatmul.f32.gmra.mxu2 %v10734_v14  ;;  %544 = vmatmul.f32.gmra.mxu3 %v190_v54  ;;  %v10116_v54 = vld [vmem:[%s17935_s5 + $0x198] sm:$0xff]  ;;  %v10121_v14 = vld [vmem:[%s17935_s5 + $0x1c0] sm:$0xff] }
  0x82   :  { %746 = vmatmul.f32.gmra.mxu1 %v10685_v25  ;;  %v10117_v25 = vld [vmem:[%s17935_s5 + $0x1a0] sm:$0xff] }
  0x84   :  { %3725 = vperm.xlu2 %10305, %v10115_v23   ;;  %v11076_v23 = vand.u32 4294901760, %v10080_v46 }
  0x85   :  { %3715 = vperm.xlu0 %10303, %v10113_v16   ;;  %3720 = vperm.xlu1 %10304, %v10114_v61  }
  0x86   :  { %1100 = vmatpush.msra.mxu2 %v11076_v23  ;;  %v11082_v61 = vsub.f32 %v10080_v46, %v11076_v23  ;;  %1551 = vmatpush.msra.mxu1 %v11076_v23 }
  0x87   :  { %664 = vmatmul.f32.gmra.mxu0 %v10722_v9 }
  0x88   :  { %1423 = vmatpush.msra.mxu0 %v11082_v61 }
  0x89   :  { %446 = vmatmul.f32.gmra.mxu2 %v10762_v42  ;;  %550 = vmatmul.f32.gmra.mxu3 %v198_v12  ;;  %v10119_v12 = vld [vmem:[%s17935_s5 + $0x1b0] sm:$0xff] }
  0x8a   :  { %750 = vmatmul.f32.gmra.mxu1 %v10722_v9  ;;  %v10120_v9 = vld [vmem:[%s17935_s5 + $0x1b8] sm:$0xff] }
  0x8c   :  { %3740 = vperm.xlu2 %10305, %v10118_v38   ;;  %v17942_v38 = vand.u32 4294901760, %v11082_v61 }
  0x8d   :  { %3730 = vperm.xlu0 %10303, %v10116_v54   ;;  %3735 = vperm.xlu1 %10304, %v10117_v25   ;;  %v10193_v54 = vld [vmem:[%s17935_s5 + $0x300] sm:$0xff]  ;;  %v10175_v25 = vld [vmem:[%s17935_s5 + $0x2f0] sm:$0xff] }
  0x8f   :  { %668 = vmatmul.f32.gmra.mxu0 %v10755_v26 }
  0x91   :  { %451 = vmatmul.f32.gmra.mxu2 %v10461_v29  ;;  %556 = vmatmul.f32.gmra.mxu3 %v206_v53 }
  0x92   :  { %754 = vmatmul.f32.gmra.mxu1 %v10755_v26  ;;  %v10124_v26 = vld [vmem:[%s17935_s5 + $0x1d8] sm:$0xff] }
  0x94   :  { %v10917_v47 = vpop.f32.mrf.mxu2  ;;  %3755 = vperm.xlu2 %10305, %v10121_v14   ;;  %v10919_v17 = vpop.f32.mrf.mxu0  ;;  %v10176_v14 = vld [vmem:[%s17935_s5 + $0x2f8] sm:$0xff] }
  0x95   :  { %18490 = vst [vmem:[#allocation5_spill] sm:$0xff] %v10917_v47  ;;  %3745 = vperm.xlu0 %10303, %v10119_v12   ;;  %3750 = vperm.xlu1 %10304, %v10120_v9   ;;  %v1263_v12 = vsub.f32 %v11082_v61, %v17942_v38 }
  0x97   :  { %672 = vmatmul.f32.gmra.mxu0 %v10435_v19  ;;  %v10922_v42 = vpop.f32.mrf.mxu1 }
  0x99   :  { %456 = vmatmul.f32.gmra.mxu2 %v10486_v41  ;;  %562 = vmatmul.f32.gmra.mxu3 %v214_v39 }
  0x9a   :  { %758 = vmatmul.f32.gmra.mxu1 %v10435_v19  ;;  %v10127_v19 = vld [vmem:[%s17935_s5 + $0x1f0] sm:$0xff] }
  0x9c   :  { %v10937_v53 = vpop.f32.mrf.mxu2  ;;  %v10939_v20 = vpop.f32.mrf.mxu3  ;;  %3770 = vperm.xlu2 %10305, %v10124_v26   ;;  %v1264_v26 = vand.u32 4294901760, %v1263_v12 }
  0x9d   :  { %18491 = vst [vmem:[#allocation6_spill] sm:$0xff] %v10937_v53  ;;  %3760 = vperm.xlu0 %10303, %v10122_v52   ;;  %3765 = vperm.xlu1 %10304, %v10123_v8   ;;  %v10941_v29 = vpop.f32.mrf.mxu0 }
  0x9e   :  { %18492 = vst [vmem:[#allocation7_spill] sm:$0xff] %v10939_v20  ;;  %1265 = vmatpush.msra.mxu3 %v1264_v26 }
  0x9f   :  { %676 = vmatmul.f32.gmra.mxu0 %v10464_v31  ;;  %v10944_v39 = vpop.f32.mrf.mxu1 }
  0xa1   :  { %461 = vmatmul.f32.gmra.mxu2 %v10535_v0  ;;  %568 = vmatmul.f32.gmra.mxu3 %v222_v48 }
  0xa2   :  { %762 = vmatmul.f32.gmra.mxu1 %v10464_v31  ;;  %v10162_v31 = vld [vmem:[%s17935_s5 + $0x288] sm:$0xff] }
  0xa4   :  { %v10959_v35 = vpop.f32.mrf.mxu2  ;;  %v10961_v3 = vpop.f32.mrf.mxu3  ;;  %3785 = vperm.xlu2 %10305, %v10127_v19  }
  0xa5   :  { %18493 = vst [vmem:[#allocation8_spill] sm:$0xff] %v10959_v35  ;;  %3775 = vperm.xlu0 %10303, %v10125_v62   ;;  %3780 = vperm.xlu1 %10304, %v10126_v2   ;;  %v10963_v41 = vpop.f32.mrf.mxu0  ;;  %v10196_v2 = vld [vmem:[%s17935_s5 + $0x318] sm:$0xff] }
  0xa6   :  { %18494 = vst [vmem:[#allocation9_spill] sm:$0xff] %v10961_v3 }
  0xa7   :  { %680 = vmatmul.f32.gmra.mxu0 %v10513_v55  ;;  %v10966_v48 = vpop.f32.mrf.mxu1 }
  0xa9   :  { %466 = vmatmul.f32.gmra.mxu2 %v10579_v37  ;;  %574 = vmatmul.f32.gmra.mxu3 %v230_v18 }
  0xaa   :  { %766 = vmatmul.f32.gmra.mxu1 %v10513_v55  ;;  %v10165_v55 = vld [vmem:[%s17935_s5 + $0x2a0] sm:$0xff] }
  0xac   :  { %v10981_v24 = vpop.f32.mrf.mxu2  ;;  %v10983_v36 = vpop.f32.mrf.mxu3  ;;  %5511 = vperm.xlu2 %10305, %v10162_v31   ;;  %v10194_v31 = vld [vmem:[%s17935_s5 + $0x308] sm:$0xff] }
  0xad   :  { %18495 = vst [vmem:[#allocation10_spill] sm:$0xff] %v10981_v24  ;;  %3790 = vperm.xlu0 %10303, %v10128_v4   ;;  %5506 = vperm.xlu1 %10304, %v10161_v15   ;;  %v10985_v0 = vpop.f32.mrf.mxu0  ;;  %v10195_v4 = vld [vmem:[%s17935_s5 + $0x310] sm:$0xff] }
  0xae   :  { %18496 = vst [vmem:[#allocation11_spill] sm:$0xff] %v10983_v36 }
  0xaf   :  { %684 = vmatmul.f32.gmra.mxu0 %v10555_v21  ;;  %v10988_v18 = vpop.f32.mrf.mxu1 }
  0xb1   :  { %471 = vmatmul.f32.gmra.mxu2 %v10627_v56  ;;  %580 = vmatmul.f32.gmra.mxu3 %v238_v49 }
  0xb2   :  { %770 = vmatmul.f32.gmra.mxu1 %v10555_v21  ;;  %v10168_v21 = vld [vmem:[%s17935_s5 + $0x2b8] sm:$0xff] }
  0xb4   :  { %v11003_v44 = vpop.f32.mrf.mxu2  ;;  %v11005_v51 = vpop.f32.mrf.mxu3  ;;  %5526 = vperm.xlu2 %10305, %v10165_v55  }
  0xb5   :  { %18497 = vst [vmem:[#allocation12_spill] sm:$0xff] %v11003_v44  ;;  %5516 = vperm.xlu0 %10303, %v10163_v33   ;;  %5521 = vperm.xlu1 %10304, %v10164_v40   ;;  %v11007_v37 = vpop.f32.mrf.mxu0 }
  0xb6   :  { %18498 = vst [vmem:[#allocation13_spill] sm:$0xff] %v11005_v51 }
  0xb7   :  { %688 = vmatmul.f32.gmra.mxu0 %v10598_v50  ;;  %v11010_v49 = vpop.f32.mrf.mxu1 }
  0xb8   :  { %18499 = vst [vmem:[#allocation14_spill] sm:$0xff] %v11010_v49 }
  0xb9   :  { %476 = vmatmul.f32.gmra.mxu2 %v10674_v11  ;;  %586 = vmatmul.f32.gmra.mxu3 %v246_v63 }
  0xba   :  { %774 = vmatmul.f32.gmra.mxu1 %v10598_v50  ;;  %v10171_v50 = vld [vmem:[%s17935_s5 + $0x2d0] sm:$0xff] }
  0xbc   :  { %v11025_v5 = vpop.f32.mrf.mxu2  ;;  %v11027_v13 = vpop.f32.mrf.mxu3  ;;  %5541 = vperm.xlu2 %10305, %v10168_v21   ;;  %v10078_v21 = vld [vmem:[%s17933_s3 + $0xe8] sm:$0xff] }
  0xbd   :  { %18500 = vst [vmem:[#allocation15_spill] sm:$0xff] %v11025_v5  ;;  %5531 = vperm.xlu0 %10303, %v10166_v59   ;;  %5536 = vperm.xlu1 %10304, %v10167_v43   ;;  %v11029_v56 = vpop.f32.mrf.mxu0  ;;  %v11146_v43 = vand.u32 4294901760, %v10078_v21 }
  0xbe   :  { %18501 = vst [vmem:[#allocation16_spill] sm:$0xff] %v11027_v13 }
  0xbf   :  { %18502 = vst [vmem:[#allocation17_spill] sm:$0xff] %v11029_v56  ;;  %692 = vmatmul.f32.gmra.mxu0 %v10646_v1  ;;  %v11032_v63 = vpop.f32.mrf.mxu1 }
  0xc0   :  { %18503 = vst [vmem:[#allocation18_spill] sm:$0xff] %v11032_v63 }
  0xc1   :  { %481 = vmatmul.f32.gmra.mxu2 %v10711_v10  ;;  %592 = vmatmul.f32.gmra.mxu3 %v254_v28 }
  0xc2   :  { %778 = vmatmul.f32.gmra.mxu1 %v10646_v1  ;;  %v10174_v1 = vld [vmem:[%s17935_s5 + $0x2e8] sm:$0xff] }
  0xc4   :  { %v11047_v45 = vpop.f32.mrf.mxu2  ;;  %v11049_v7 = vpop.f32.mrf.mxu3  ;;  %5556 = vperm.xlu2 %10305, %v10171_v50   ;;  %v11150_v50 = vsub.f32 %v10078_v21, %v11146_v43 }
  0xc5   :  { %18504 = vst [vmem:[#allocation19_spill] sm:$0xff] %v11047_v45  ;;  %5546 = vperm.xlu0 %10303, %v10169_v60   ;;  %5551 = vperm.xlu1 %10304, %v10170_v27   ;;  %v11051_v11 = vpop.f32.mrf.mxu0  ;;  %v10199_v27 = vld [vmem:[%s17935_s5 + $0x330] sm:$0xff] }
  0xc6   :  { %18505 = vst [vmem:[#allocation20_spill] sm:$0xff] %v11049_v7  ;;  %v10075_v45 = vld [vmem:[%s17933_s3 + $0xd0] sm:$0xff] }
  0xc7   :  { %18506 = vst [vmem:[#allocation21_spill] sm:$0xff] %v11051_v11  ;;  %696 = vmatmul.f32.gmra.mxu0 %v10688_v32  ;;  %v11054_v28 = vpop.f32.mrf.mxu1  ;;  %v11242_v5 = vand.u32 4294901760, %v10075_v45 }
  0xc8   :  { %18507 = vst [vmem:[#allocation22_spill] sm:$0xff] %v11054_v28 }
  0xc9   :  { %486 = vmatmul.f32.gmra.mxu2 %v10745_v6  ;;  %598 = vmatmul.f32.gmra.mxu3 %v262_v30  ;;  %v10079_v6 = vld [vmem:[%s17933_s3 + $0xf0] sm:$0xff] }
  0xca   :  { %782 = vmatmul.f32.gmra.mxu1 %v10688_v32  ;;  %v11112_v52 = vand.u32 4294901760, %v10079_v6 }
  0xcc   :  { %v11072_v10 = vpop.f32.mrf.mxu2  ;;  %v11074_v30 = vpop.f32.mrf.mxu3  ;;  %5571 = vperm.xlu2 %10305, %v10174_v1   ;;  %1102 = vmatpush.msra.mxu2 %v11112_v52  ;;  %v17940_v1 = vand.u32 4294901760, %v11150_v50 }
  0xcd   :  { %18508 = vst [vmem:[#allocation23_spill] sm:$0xff] %v11074_v30  ;;  %5561 = vperm.xlu0 %10303, %v10172_v22   ;;  %5566 = vperm.xlu1 %10304, %v10173_v58   ;;  %v11078_v16 = vpop.f32.mrf.mxu0  ;;  %v10197_v22 = vld [vmem:[%s17935_s5 + $0x320] sm:$0xff]  ;;  %v10198_v58 = vld [vmem:[%s17935_s5 + $0x328] sm:$0xff] }
  0xce   :  { %18509 = vst [vmem:[#allocation24_spill] sm:$0xff] %v11078_v16  ;;  %1553 = vmatpush.msra.mxu1 %v11112_v52  ;;  %1104 = vmatpush.msra.mxu2 %v11146_v43  ;;  %v1275_v46 = vsub.f32 %v11150_v50, %v17940_v1 }
  0xcf   :  { %700 = vmatmul.f32.gmra.mxu0 %v10725_v57  ;;  %v11086_v32 = vpop.f32.mrf.mxu1 }
  0xd0   :  { %18510 = vst [vmem:[#allocation25_spill] sm:$0xff] %v11086_v32  ;;  %1555 = vmatpush.msra.mxu1 %v11146_v43 }
  0xd1   :  { %604 = vmatmul.f32.gmra.mxu3 %v270_v34 }
  0xd2   :  { %786 = vmatmul.f32.gmra.mxu1 %v10725_v57  ;;  %v11118_v57 = vsub.f32 %v10079_v6, %v11112_v52  ;;  %v1276_v6 = vand.u32 4294901760, %v1275_v46 }
  0xd4   :  { %v11108_v34 = vpop.f32.mrf.mxu3  ;;  %v11110_v9 = vpop.f32.mrf.mxu2  ;;  %6458 = vperm.xlu2 %10305, %v10193_v54   ;;  %v17941_v62 = vand.u32 4294901760, %v11118_v57  ;;  %1426 = vmatpush.msra.mxu0 %v11118_v57 }
  0xd5   :  { %5576 = vperm.xlu0 %10303, %v10175_v25   ;;  %5581 = vperm.xlu1 %10304, %v10176_v14   ;;  %v11114_v8 = vpop.f32.mrf.mxu0  ;;  %v10077_v14 = vld [vmem:[%s17933_s3 + $0xe0] sm:$0xff] }
  0xd6   :  { %v1269_v15 = vsub.f32 %v11118_v57, %v17941_v62  ;;  %1429 = vmatpush.msra.mxu0 %v11150_v50  ;;  %v11178_v26 = vand.u32 4294901760, %v10077_v14 }
  0xd7   :  { %v11121_v19 = vpop.f32.mrf.mxu1 }
  0xd8   :  { %v1270_v40 = vand.u32 4294901760, %v1269_v15  ;;  %1106 = vmatpush.msra.mxu2 %v11178_v26  ;;  %1557 = vmatpush.msra.mxu1 %v11178_v26  ;;  %v10200_v15 = vld [vmem:[%s17935_s5 + $0x338] sm:$0xff] }
  0xda   :  { %1271 = vmatpush.msra.mxu3 %v1270_v40  ;;  %v10201_v40 = vld [vmem:[%s17935_s5 + $0x340] sm:$0xff] }
  0xdc   :  { %v11137_v55 = vpop.f32.mrf.mxu2  ;;  %v11139_v33 = vpop.f32.mrf.mxu3  ;;  %6473 = vperm.xlu2 %10305, %v10196_v2   ;;  %1277 = vmatpush.msra.mxu3 %v1276_v6 }
  0xdd   :  { %6463 = vperm.xlu0 %10303, %v10194_v31   ;;  %6468 = vperm.xlu1 %10304, %v10195_v4   ;;  %v11144_v59 = vpop.f32.mrf.mxu0  ;;  %v11184_v31 = vsub.f32 %v10077_v14, %v11178_v26  ;;  %v10202_v4 = vld [vmem:[%s17935_s5 + $0x348] sm:$0xff] }
  0xdf   :  { %v11153_v60 = vpop.f32.mrf.mxu1  ;;  %v17943_v21 = vand.u32 4294901760, %v11184_v31  ;;  %1432 = vmatpush.msra.mxu0 %v11184_v31 }
  0xe1   :  { %v1281_v46 = vsub.f32 %v11184_v31, %v17943_v21 }
  0xe3   :  { %v1282_v1 = vand.u32 4294901760, %v1281_v46 }
  0xe4   :  { %v11169_v54 = vpop.f32.mrf.mxu2  ;;  %v11171_v25 = vpop.f32.mrf.mxu3  ;;  %6488 = vperm.xlu2 %10305, %v10199_v27   ;;  %v10076_v27 = vld [vmem:[%s17933_s3 + $0xd8] sm:$0xff] }
  0xe5   :  { %6478 = vperm.xlu0 %10303, %v10197_v22   ;;  %6483 = vperm.xlu1 %10304, %v10198_v58   ;;  %v11176_v12 = vpop.f32.mrf.mxu0  ;;  %v11208_v14 = vand.u32 4294901760, %v10076_v27 }
  0xe6   :  { %1283 = vmatpush.msra.mxu3 %v1282_v1 }
  0xe7   :  { %v11180_v2 = vpop.f32.mrf.mxu1  ;;  %1108 = vmatpush.msra.mxu2 %v11208_v14  ;;  %v11214_v62 = vsub.f32 %v10076_v27, %v11208_v14  ;;  %1559 = vmatpush.msra.mxu1 %v11208_v14  ;;  %v10204_v27 = vld [vmem:[%s17935_s5 + $0x358] sm:$0xff] }
  0xe9   :  { %1435 = vmatpush.msra.mxu0 %v11214_v62  ;;  %1110 = vmatpush.msra.mxu2 %v11242_v5 }
  0xea   :  { %1561 = vmatpush.msra.mxu1 %v11242_v5 }
  0xec   :  { %v11201_v22 = vpop.f32.mrf.mxu2  ;;  %v11203_v58 = vpop.f32.mrf.mxu3  ;;  %6503 = vperm.xlu2 %10305, %v10202_v4   ;;  %v17944_v4 = vand.u32 4294901760, %v11214_v62 }
  0xed   :  { %6493 = vperm.xlu0 %10303, %v10200_v15   ;;  %6498 = vperm.xlu1 %10304, %v10201_v40   ;;  %v11210_v6 = vpop.f32.mrf.mxu0  ;;  %v10205_v15 = vld [vmem:[%s17935_s5 + $0x360] sm:$0xff]  ;;  %v10203_v40 = vld [vmem:[%s17935_s5 + $0x350] sm:$0xff] }
  0xee   :  { %18511 = vst [vmem:[#allocation26_spill] sm:$0xff] %v11210_v6  ;;  %v1287_v1 = vsub.f32 %v11214_v62, %v17944_v4  ;;  %v11248_v4 = vsub.f32 %v10075_v45, %v11242_v5  ;;  %v10074_v45 = vld [vmem:[%s17933_s3 + $0xc8] sm:$0xff] }
  0xef   :  { %v11217_v38 = vpop.f32.mrf.mxu1  ;;  %v11272_v24 = vand.u32 4294901760, %v10074_v45 }
  0xf0   :  { %18512 = vst [vmem:[#allocation27_spill] sm:$0xff] %v11217_v38  ;;  %v1288_v30 = vand.u32 4294901760, %v1287_v1  ;;  %1438 = vmatpush.msra.mxu0 %v11248_v4 }
  0xf1   :  { %1112 = vmatpush.msra.mxu2 %v11272_v24  ;;  %v11278_v3 = vsub.f32 %v10074_v45, %v11272_v24  ;;  %1563 = vmatpush.msra.mxu1 %v11272_v24 }
  0xf2   :  { %1289 = vmatpush.msra.mxu3 %v1288_v30  ;;  %v10207_v30 = vld [vmem:[%s17935_s5 + $0x370] sm:$0xff] }
  0xf3   :  { %1441 = vmatpush.msra.mxu0 %v11278_v3 }
  0xf4   :  { %v11233_v46 = vpop.f32.mrf.mxu2  ;;  %v11235_v21 = vpop.f32.mrf.mxu3  ;;  %6518 = vperm.xlu2 %10305, %v10205_v15   ;;  %v10208_v15 = vld [vmem:[%s17935_s5 + $0x378] sm:$0xff] }
  0xf5   :  { %18513 = vst [vmem:[#allocation28_spill] sm:$0xff] %v11233_v46  ;;  %6508 = vperm.xlu0 %10303, %v10203_v40   ;;  %6513 = vperm.xlu1 %10304, %v10204_v27   ;;  %v11240_v7 = vpop.f32.mrf.mxu0  ;;  %v10206_v40 = vld [vmem:[%s17935_s5 + $0x368] sm:$0xff]  ;;  %v17945_v27 = vand.u32 4294901760, %v11248_v4 }
  0xf6   :  { %18514 = vst [vmem:[#allocation29_spill] sm:$0xff] %v11235_v21  ;;  %v18558_v21 = vand.u32 4294901760, %v11082_v61 }
  0xf7   :  { %18515 = vst [vmem:[#allocation30_spill] sm:$0xff] %v11240_v7  ;;  %v11244_v13 = vpop.f32.mrf.mxu1  ;;  %v1293_v51 = vsub.f32 %v11248_v4, %v17945_v27 }
  0xf8   :  { %18516 = vst [vmem:[#allocation31_spill] sm:$0xff] %v11244_v13 }
  0xf9   :  { %v1294_v35 = vand.u32 4294901760, %v1293_v51  ;;  %v10225_v51 = vld [vmem:[%s17935_s5 + $0x380] sm:$0xff] }
  0xfb   :  { %1295 = vmatpush.msra.mxu3 %v1294_v35 }
  0xfc   :  { %v11265_v1 = vpop.f32.mrf.mxu2  ;;  %v11267_v44 = vpop.f32.mrf.mxu3  ;;  %6533 = vperm.xlu2 %10305, %v10208_v15   ;;  %v17946_v15 = vand.u32 4294901760, %v11278_v3 }
  0xfd   :  { %18517 = vst [vmem:[#allocation32_spill] sm:$0xff] %v11265_v1  ;;  %6523 = vperm.xlu0 %10303, %v10206_v40   ;;  %6528 = vperm.xlu1 %10304, %v10207_v30   ;;  %v11274_v36 = vpop.f32.mrf.mxu0  ;;  %v10227_v40 = vld [vmem:[%s17935_s5 + $0x390] sm:$0xff]  ;;  %v10226_v30 = vld [vmem:[%s17935_s5 + $0x388] sm:$0xff] }
  0xfe   :  { %18518 = vst [vmem:[#allocation33_spill] sm:$0xff] %v11267_v44  ;;  %v1299_v35 = vsub.f32 %v11278_v3, %v17946_v15  ;;  %v10228_v15 = vld [vmem:[%s17935_s5 + $0x398] sm:$0xff] }
  0xff   :  { %18519 = vst [vmem:[#allocation34_spill] sm:$0xff] %v11274_v36  ;;  %v11281_v53 = vpop.f32.mrf.mxu1 }
 0x100   :  { %18520 = vst [vmem:[#allocation35_spill] sm:$0xff] %v11281_v53  ;;  %v1300_v20 = vand.u32 4294901760, %v1299_v35  ;;  %v10230_v53 = vld [vmem:[%s17935_s5 + $0x3a8] sm:$0xff] }
 0x102   :  { %1301 = vmatpush.msra.mxu3 %v1300_v20 }
 0x104   :  { %v11297_v45 = vpop.f32.mrf.mxu2  ;;  %v11299_v27 = vpop.f32.mrf.mxu3  ;;  %7420 = vperm.xlu2 %10305, %v10227_v40   ;;  %v10229_v40 = vld [vmem:[%s17935_s5 + $0x3a0] sm:$0xff] }
 0x105   :  { %18521 = vst [vmem:[#allocation36_spill] sm:$0xff] %v11297_v45  ;;  %7410 = vperm.xlu0 %10303, %v10225_v51   ;;  %7415 = vperm.xlu1 %10304, %v10226_v30   ;;  %v11301_v47 = vpop.f32.mrf.mxu0  ;;  %v10073_v51 = vld [vmem:[%s17933_s3 + $0xc0] sm:$0xff] }
 0x106   :  { %18522 = vst [vmem:[#allocation37_spill] sm:$0xff] %v11299_v27  ;;  %v11317_v30 = vand.u32 4294901760, %v10073_v51 }
 0x107   :  { %18523 = vst [vmem:[#allocation38_spill] sm:$0xff] %v11301_v47  ;;  %v11303_v32 = vpop.f32.mrf.mxu1 }
 0x108   :  { %18524 = vst [vmem:[#allocation39_spill] sm:$0xff] %v11303_v32  ;;  %v10072_v32 = vld [vmem:[%s17933_s3 + $0xb8] sm:$0xff]  ;;  %v11329_v16 = vsub.f32 %v10073_v51, %v11317_v30  ;;  %1114 = vmatpush.msra.mxu2 %v11317_v30  ;;  %1565 = vmatpush.msra.mxu1 %v11317_v30 }
 0x109   :  { %v11332_v45 = vand.u32 4294901760, %v10072_v32 }
 0x10a   :  { %1444 = vmatpush.msra.mxu0 %v11329_v16 }
 0x10b   :  { %1116 = vmatpush.msra.mxu2 %v11332_v45  ;;  %1567 = vmatpush.msra.mxu1 %v11332_v45 }
 0x10c   :  { %v11319_v20 = vpop.f32.mrf.mxu2  ;;  %v11321_v35 = vpop.f32.mrf.mxu3  ;;  %7435 = vperm.xlu2 %10305, %v10230_v53  }
 0x10d   :  { %18525 = vst [vmem:[#allocation40_spill] sm:$0xff] %v11319_v20  ;;  %7425 = vperm.xlu0 %10303, %v10228_v15   ;;  %7430 = vperm.xlu1 %10304, %v10229_v40   ;;  %v11326_v47 = vpop.f32.mrf.mxu0  ;;  %v17947_v20 = vand.u32 4294901760, %v11329_v16  ;;  %v11341_v15 = vsub.f32 %v10072_v32, %v11332_v45  ;;  %v10233_v40 = vld [vmem:[%s17935_s5 + $0x3c0] sm:$0xff] }
 0x10e   :  { %18526 = vst [vmem:[#allocation41_spill] sm:$0xff] %v11321_v35 }
 0x10f   :  { %18527 = vst [vmem:[#allocation42_spill] sm:$0xff] %v11326_v47  ;;  %v11337_v53 = vpop.f32.mrf.mxu1  ;;  %v1305_v51 = vsub.f32 %v11329_v16, %v17947_v20  ;;  %v10231_v47 = vld [vmem:[%s17935_s5 + $0x3b0] sm:$0xff]  ;;  %v17948_v32 = vand.u32 4294901760, %v11341_v15  ;;  %1447 = vmatpush.msra.mxu0 %v11341_v15 }
 0x110   :  { %18528 = vst [vmem:[#allocation43_spill] sm:$0xff] %v11337_v53  ;;  %v10232_v53 = vld [vmem:[%s17935_s5 + $0x3b8] sm:$0xff] }
 0x111   :  { %v1306_v35 = vand.u32 4294901760, %v1305_v51  ;;  %v1311_v20 = vsub.f32 %v11341_v15, %v17948_v32  ;;  %v10236_v51 = vld [vmem:[%s17935_s5 + $0x3d8] sm:$0xff] }
 0x113   :  { %1307 = vmatpush.msra.mxu3 %v1306_v35  ;;  %v1312_v27 = vand.u32 4294901760, %v1311_v20  ;;  %v10235_v35 = vld [vmem:[%s17935_s5 + $0x3d0] sm:$0xff] }
 0x114   :  { %v11358_v36 = vpop.f32.mrf.mxu2  ;;  %v11360_v28 = vpop.f32.mrf.mxu3  ;;  %7450 = vperm.xlu2 %10305, %v10233_v40   ;;  %v10071_v40 = vld [vmem:[%s17933_s3 + $0xb0] sm:$0xff] }
 0x115   :  { %18529 = vst [vmem:[#allocation44_spill] sm:$0xff] %v11358_v36  ;;  %7440 = vperm.xlu0 %10303, %v10231_v47   ;;  %7445 = vperm.xlu1 %10304, %v10232_v53   ;;  %v11365_v13 = vpop.f32.mrf.mxu0  ;;  %v10234_v47 = vld [vmem:[%s17935_s5 + $0x3c8] sm:$0xff]  ;;  %v11381_v20 = vand.u32 4294901760, %v10071_v40 }
 0x116   :  { %18530 = vst [vmem:[#allocation45_spill] sm:$0xff] %v11360_v28  ;;  %1313 = vmatpush.msra.mxu3 %v1312_v27  ;;  %v10069_v28 = vld [vmem:[%s17933_s3 + $0xa0] sm:$0xff] }
 0x117   :  { %18531 = vst [vmem:[#allocation46_spill] sm:$0xff] %v11365_v13  ;;  %v11367_v11 = vpop.f32.mrf.mxu1  ;;  %1118 = vmatpush.msra.mxu2 %v11381_v20  ;;  %v11389_v32 = vsub.f32 %v10071_v40, %v11381_v20  ;;  %1569 = vmatpush.msra.mxu1 %v11381_v20  ;;  %v11432_v63 = vand.u32 4294901760, %v10069_v28 }
 0x118   :  { %18532 = vst [vmem:[#allocation47_spill] sm:$0xff] %v11367_v11  ;;  %v10070_v11 = vld [vmem:[%s17933_s3 + $0xa8] sm:$0xff] }
 0x119   :  { %v11396_v36 = vand.u32 4294901760, %v10070_v11  ;;  %1450 = vmatpush.msra.mxu0 %v11389_v32 }
 0x11b   :  { %1120 = vmatpush.msra.mxu2 %v11396_v36  ;;  %1571 = vmatpush.msra.mxu1 %v11396_v36 }
 0x11c   :  { %v11383_v53 = vpop.f32.mrf.mxu2  ;;  %v11385_v27 = vpop.f32.mrf.mxu3  ;;  %7465 = vperm.xlu2 %10305, %v10236_v51   ;;  %v11403_v51 = vsub.f32 %v10070_v11, %v11396_v36  ;;  %v10237_v11 = vld [vmem:[%s17935_s5 + $0x3e0] sm:$0xff] }
 0x11d   :  { %18533 = vst [vmem:[#allocation48_spill] sm:$0xff] %v11383_v53  ;;  %7455 = vperm.xlu0 %10303, %v10234_v47   ;;  %7460 = vperm.xlu1 %10304, %v10235_v35   ;;  %v11394_v13 = vpop.f32.mrf.mxu0  ;;  %v17949_v53 = vand.u32 4294901760, %v11389_v32  ;;  %v10239_v35 = vld [vmem:[%s17935_s5 + $0x3f0] sm:$0xff] }
 0x11e   :  { %18534 = vst [vmem:[#allocation49_spill] sm:$0xff] %v11385_v27  ;;  %1453 = vmatpush.msra.mxu0 %v11403_v51  ;;  %1122 = vmatpush.msra.mxu2 %v11432_v63 }
 0x11f   :  { %18535 = vst [vmem:[#allocation50_spill] sm:$0xff] %v11394_v13  ;;  %v11405_v40 = vpop.f32.mrf.mxu1  ;;  %v1317_v47 = vsub.f32 %v11389_v32, %v17949_v53  ;;  %v17950_v13 = vand.u32 4294901760, %v11403_v51  ;;  %1573 = vmatpush.msra.mxu1 %v11432_v63 }
 0x120   :  { %18536 = vst [vmem:[#allocation51_spill] sm:$0xff] %v11405_v40  ;;  %v10238_v40 = vld [vmem:[%s17935_s5 + $0x3e8] sm:$0xff] }
 0x121   :  { %v1318_v27 = vand.u32 4294901760, %v1317_v47  ;;  %v1323_v53 = vsub.f32 %v11403_v51, %v17950_v13  ;;  %v11438_v13 = vsub.f32 %v10069_v28, %v11432_v63  ;;  %v10257_v28 = vld [vmem:[%s17935_s5 + $0x400] sm:$0xff] }
 0x123   :  { %1319 = vmatpush.msra.mxu3 %v1318_v27  ;;  %v1324_v47 = vand.u32 4294901760, %v1323_v53  ;;  %1456 = vmatpush.msra.mxu0 %v11438_v13  ;;  %v10258_v27 = vld [vmem:[%s17935_s5 + $0x408] sm:$0xff]  ;;  %v10240_v53 = vld [vmem:[%s17935_s5 + $0x3f8] sm:$0xff] }
 0x124   :  { %v11428_v1 = vpop.f32.mrf.mxu2  ;;  %v11430_v7 = vpop.f32.mrf.mxu3  ;;  %7480 = vperm.xlu2 %10305, %v10239_v35   ;;  %v17951_v35 = vand.u32 4294901760, %v11438_v13 }
 0x125   :  { %18537 = vst [vmem:[#allocation52_spill] sm:$0xff] %v11428_v1  ;;  %7470 = vperm.xlu0 %10303, %v10237_v11   ;;  %7475 = vperm.xlu1 %10304, %v10238_v40   ;;  %v11434_v44 = vpop.f32.mrf.mxu0  ;;  %v10068_v11 = vld [vmem:[%s17933_s3 + $0x98] sm:$0xff] }
 0x126   :  { %18538 = vst [vmem:[#allocation53_spill] sm:$0xff] %v11430_v7  ;;  %1325 = vmatpush.msra.mxu3 %v1324_v47  ;;  %v1329_v40 = vsub.f32 %v11438_v13, %v17951_v35  ;;  %v11464_v7 = vand.u32 4294901760, %v10068_v11 }
 0x127   :  { %18539 = vst [vmem:[#allocation54_spill] sm:$0xff] %v11434_v44  ;;  %v11441_v1 = vpop.f32.mrf.mxu1 }
 0x128   :  { %18540 = vst [vmem:[#allocation55_spill] sm:$0xff] %v11441_v1  ;;  %v1330_v44 = vand.u32 4294901760, %v1329_v40  ;;  %1124 = vmatpush.msra.mxu2 %v11464_v7  ;;  %v11470_v35 = vsub.f32 %v10068_v11, %v11464_v7  ;;  %1575 = vmatpush.msra.mxu1 %v11464_v7  ;;  %v10067_v40 = vld [vmem:[%s17933_s3 + $0x90] sm:$0xff] }
 0x129   :  { %18543 = vst [vmem:[#allocation58_spill] sm:$0xff] %v11464_v7 }
 0x12a   :  { %1331 = vmatpush.msra.mxu3 %v1330_v44  ;;  %1459 = vmatpush.msra.mxu0 %v11470_v35  ;;  %v10259_v44 = vld [vmem:[%s17935_s5 + $0x410] sm:$0xff] }
 0x12c   :  { %v11460_v47 = vpop.f32.mrf.mxu2  ;;  %v11462_v1 = vpop.f32.mrf.mxu3  ;;  %8367 = vperm.xlu2 %10305, %v10258_v27   ;;  %v10261_v27 = vld [vmem:[%s17935_s5 + $0x420] sm:$0xff] }
 0x12d   :  { %18541 = vst [vmem:[#allocation56_spill] sm:$0xff] %v11460_v47  ;;  %7485 = vperm.xlu0 %10303, %v10240_v53   ;;  %8362 = vperm.xlu1 %10304, %v10257_v28   ;;  %v11466_v38 = vpop.f32.mrf.mxu0  ;;  %v17952_v47 = vand.u32 4294901760, %v11470_v35  ;;  %v10260_v53 = vld [vmem:[%s17935_s5 + $0x418] sm:$0xff] }
 0x12e   :  { %18542 = vst [vmem:[#allocation57_spill] sm:$0xff] %v11462_v1  ;;  %v11496_v1 = vand.u32 4294901760, %v10067_v40 }
 0x12f   :  { %18544 = vst [vmem:[#allocation59_spill] sm:$0xff] %v11466_v38  ;;  %v11473_v46 = vpop.f32.mrf.mxu1  ;;  %v1335_v28 = vsub.f32 %v11470_v35, %v17952_v47 }
 0x130   :  { %18545 = vst [vmem:[#allocation60_spill] sm:$0xff] %v11473_v46  ;;  %1126 = vmatpush.msra.mxu2 %v11496_v1  ;;  %v11502_v47 = vsub.f32 %v10067_v40, %v11496_v1  ;;  %1577 = vmatpush.msra.mxu1 %v11496_v1 }
 0x131   :  { %v1336_v38 = vand.u32 4294901760, %v1335_v28  ;;  %18548 = vst [vmem:[#allocation63_spill] sm:$0xff] %v11496_v1 }
 0x132   :  { %18550 = vst [vmem:[#allocation65_spill] sm:$0xff] %v11502_v47  ;;  %1462 = vmatpush.msra.mxu0 %v11502_v47  ;;  %v17953_v28 = vand.u32 4294901760, %v11502_v47 }
 0x133   :  { %1337 = vmatpush.msra.mxu3 %v1336_v38  ;;  %v10262_v38 = vld [vmem:[%s17935_s5 + $0x428] sm:$0xff] }
 0x134   :  { %v11492_v11 = vpop.f32.mrf.mxu2  ;;  %v11494_v46 = vpop.f32.mrf.mxu3  ;;  %8382 = vperm.xlu2 %10305, %v10261_v27   ;;  %v10264_v27 = vld [vmem:[%s17935_s5 + $0x438] sm:$0xff] }
 0x135   :  { %18546 = vst [vmem:[#allocation61_spill] sm:$0xff] %v11492_v11  ;;  %8372 = vperm.xlu0 %10303, %v10259_v44   ;;  %8377 = vperm.xlu1 %10304, %v10260_v53   ;;  %v11498_v56 = vpop.f32.mrf.mxu0  ;;  %v10066_v44 = vld [vmem:[%s17933_s3 + $0x88] sm:$0xff]  ;;  %v10263_v53 = vld [vmem:[%s17935_s5 + $0x430] sm:$0xff]  ;;  %v1341_v11 = vsub.f32 %v11502_v47, %v17953_v28  ;;  %v10065_v28 = vld [vmem:[%s17933_s3 + $0x80] sm:$0xff] }
 0x136   :  { %18547 = vst [vmem:[#allocation62_spill] sm:$0xff] %v11494_v46 }
 0x137   :  { %18549 = vst [vmem:[#allocation64_spill] sm:$0xff] %v11498_v56  ;;  %v11505_v6 = vpop.f32.mrf.mxu1  ;;  %v11525_v56 = vand.u32 4294901760, %v10066_v44 }
 0x138   :  { %18551 = vst [vmem:[#allocation66_spill] sm:$0xff] %v11505_v6 }
 0x139   :  { %18554 = vst [vmem:[#allocation69_spill] sm:$0xff] %v11525_v56  ;;  %1128 = vmatpush.msra.mxu2 %v11525_v56  ;;  %v11532_v46 = vsub.f32 %v10066_v44, %v11525_v56  ;;  %1579 = vmatpush.msra.mxu1 %v11525_v56  ;;  %v10267_v44 = vld [vmem:[%s17935_s5 + $0x450] sm:$0xff] }
 0x13b   :  { %1465 = vmatpush.msra.mxu0 %v11532_v46  ;;  %v18557_v1 = vand.u32 4294901760, %v11532_v46 }
 0x13c   :  { %v11521_v40 = vpop.f32.mrf.mxu2  ;;  %v11523_v6 = vpop.f32.mrf.mxu3  ;;  %8397 = vperm.xlu2 %10305, %v10264_v27  }
 0x13d   :  { %18552 = vst [vmem:[#allocation67_spill] sm:$0xff] %v11521_v40  ;;  %8387 = vperm.xlu0 %10303, %v10262_v38   ;;  %8392 = vperm.xlu1 %10304, %v10263_v53   ;;  %v11538_v40 = vld [vmem:[%s17932_s2] ss:$0 sm:$0xff]  ;;  %v11540_v27 = vpop.f32.mrf.mxu0  ;;  %v1342_v38 = vand.u32 4294901760, %v1341_v11  ;;  %v10266_v53 = vld [vmem:[%s17935_s5 + $0x448] sm:$0xff]  ;;  %v1347_v49 = vsub.f32 %v11532_v46, %v18557_v1 }
 0x13e   :  { %18553 = vst [vmem:[#allocation68_spill] sm:$0xff] %v11523_v6  ;;  %v11550_v6 = vand.u32 4294901760, %v10065_v28  ;;  %v155_v56 = vadd.f32 %v11538_v40, %v10919_v17  ;;  %v10265_v11 = vld [vmem:[%s17935_s5 + $0x440] sm:$0xff] }
 0x13f   :  { %18555 = vst [vmem:[#allocation70_spill] sm:$0xff] %v11540_v27  ;;  %v11560_v27 = vpop.f32.mrf.mxu1  ;;  %1343 = vmatpush.msra.mxu3 %v1342_v38  ;;  %v1348_v47 = vand.u32 4294901760, %v1347_v49  ;;  %v18559_v49 = vand.u32 4294901760, %v11118_v57  ;;  %v10268_v57 = vld [vmem:[%s17935_s5 + $0x458] sm:$0xff] }
 0x140   :  { %18556 = vst [vmem:[#allocation71_spill] sm:$0xff] %v11560_v27  ;;  %v11566_v7 = vsub.f32 %v10065_v28, %v11550_v6  ;;  %1130 = vmatpush.msra.mxu2 %v11550_v6  ;;  %1581 = vmatpush.msra.mxu1 %v11550_v6  ;;  %v321_v1 = vadd.f32 %v10922_v42, %v155_v56  ;;  %v18560_v42 = vand.u32 4294901760, %v11150_v50 }
 0x141   :  { %1349 = vmatpush.msra.mxu3 %v1348_v47  ;;  %v163_v56 = vadd.f32 %v11538_v40, %v10941_v29 }
 0x142   :  { %1682 = vmatpush.msrb.mxu2 %v18558_v21  ;;  %v1352_v38 = vand.u32 4294901760, %v11566_v7  ;;  %1468 = vmatpush.msra.mxu0 %v11566_v7  ;;  %v413_v61 = vadd.f32 %v11110_v9, %v321_v1  ;;  %v10270_v21 = vld [vmem:[%s17935_s5 + $0x468] sm:$0xff]  ;;  %v10269_v9 = vld [vmem:[%s17935_s5 + $0x460] sm:$0xff] }
 0x143   :  { %v325_v1 = vadd.f32 %v10944_v39, %v163_v56  ;;  %v171_v39 = vadd.f32 %v11538_v40, %v10963_v41 }
 0x144   :  { %v11570_v17 = vpop.f32.mrf.mxu3  ;;  %8412 = vperm.xlu2 %10305, %v10267_v44   ;;  %v11576_v27 = vpop.f32.mrf.mxu2  ;;  %v1353_v28 = vsub.f32 %v11566_v7, %v1352_v38  ;;  %1686 = vmatpush.msrb.mxu2 %v18559_v49  ;;  %v516_v47 = vadd.f32 %v11139_v33, %v413_v61  ;;  %v275_v33 = vadd.f32 %v11538_v40, %v11072_v10  ;;  %v18563_v10 = vand.u32 4294901760, %v11248_v4 }
 0x145   :  { %8402 = vperm.xlu0 %10303, %v10265_v11   ;;  %8407 = vperm.xlu1 %10304, %v10266_v53   ;;  %v11599_v44 = vpop.f32.mrf.mxu0  ;;  %v18561_v11 = vand.u32 4294901760, %v11184_v31  ;;  %v18562_v31 = vand.u32 4294901760, %v11214_v62  ;;  %v989_v49 = vpop.permute.xlu0 %988  ;;  %v418_v61 = vadd.f32 %v11137_v55, %v325_v1  ;;  %v10271_v62 = vld [vmem:[%s17935_s5 + $0x470] sm:$0xff]  ;;  %v10272_v55 = vld [vmem:[%s17935_s5 + $0x478] sm:$0xff] }
 0x146   :  { %v1354_v53 = vand.u32 4294901760, %v1353_v28  ;;  %1690 = vmatpush.msrb.mxu2 %v18560_v42  ;;  %v642_v28 = vadd.f32 %v11114_v8, %v516_v47  ;;  %v329_v42 = vadd.f32 %v10966_v48, %v171_v39  ;;  %v18566_v47 = vand.u32 4294901760, %v11329_v16 }
 0x147   :  { %v11605_v29 = vpop.f32.mrf.mxu1 }
 0x148   :  { %1355 = vmatpush.msra.mxu3 %v1354_v53  ;;  %1694 = vmatpush.msrb.mxu2 %v18561_v11  ;;  %v728_v8 = vadd.f32 %v11121_v19, %v642_v28  ;;  %v968_v19 = vld [vmem:[%s17933_s3 + $0x78] sm:$0xff] }
 0x149   :  { %v11637_v53 = vand.u32 4294901760, %v968_v19 }
 0x14a   :  { %1809 = vmatpush.msrb.mxu3 %v11076_v23  ;;  %1698 = vmatpush.msrb.mxu2 %v18562_v31  ;;  %v381_v23 = vadd.f32 %v11108_v34, %v275_v33  ;;  %v18567_v33 = vand.u32 4294901760, %v11341_v15  ;;  %v18569_v15 = vand.u32 4294901760, %v11389_v32  ;;  %v18570_v31 = vand.u32 4294901760, %v11403_v51 }
 0x14b   :  { %1906 = vmatpush.msrb.mxu0 %v11637_v53 }
 0x14c   :  { %v11603_v50 = vpop.f32.mrf.mxu3  ;;  %8427 = vperm.xlu2 %10305, %v10270_v21   ;;  %1811 = vmatpush.msrb.mxu3 %v11112_v52  ;;  %v487_v21 = vpop.f32.mrf.mxu2  ;;  %v522_v52 = vadd.f32 %v11171_v25, %v418_v61 }
 0x14d   :  { %8417 = vperm.xlu0 %10303, %v10268_v57   ;;  %8422 = vperm.xlu1 %10304, %v10269_v9   ;;  %v488_v34 = vadd.f32 %v487_v21, %v381_v23  ;;  %v701_v41 = vpop.f32.mrf.mxu0  ;;  %v423_v9 = vadd.f32 %v11169_v54, %v329_v42  ;;  %v994_v48 = vpop.permute.xlu0 %993  ;;  %v179_v54 = vadd.f32 %v11538_v40, %v10985_v0  ;;  %v18580_v42 = vld [vmem:[#allocation63_spill] sm:$0xff] }
 0x14e   :  { %1813 = vmatpush.msrb.mxu3 %v11146_v43  ;;  %1702 = vmatpush.msrb.mxu2 %v18563_v10  ;;  %v18564_v43 = vand.u32 4294901760, %v11278_v3  ;;  %v646_v3 = vadd.f32 %v11144_v59, %v522_v52  ;;  %v999_v21 = vpop.permute.xlu1 %998  ;;  %v18575_v52 = vld [vmem:[#allocation65_spill] sm:$0xff] }
 0x14f   :  { %v787_v56 = vpop.f32.mrf.mxu1  ;;  %v528_v16 = vadd.f32 %v11203_v58, %v423_v9  ;;  %v333_v32 = vadd.f32 %v10988_v18, %v179_v54  ;;  %v187_v18 = vadd.f32 %v11538_v40, %v11007_v37  ;;  %v18576_v37 = vand.u32 4294901760, %v18575_v52  ;;  %v18591_v52 = vld [vmem:[#allocation32_spill] sm:$0xff] }
 0x150   :  { %1815 = vmatpush.msrb.mxu3 %v11178_v26  ;;  %1706 = vmatpush.msrb.mxu2 %v18564_v43  ;;  %v11640_v26 = vmax.f32 %v728_v8, 0.0  ;;  %v18578_v43 = vld [vmem:[#allocation14_spill] sm:$0xff] }
 0x151   :  { %v650_v0 = vadd.f32 %v11176_v12, %v528_v16  ;;  %v428_v51 = vadd.f32 %v11201_v22, %v333_v32  ;;  %v18574_v22 = vld [vmem:[#allocation29_spill] sm:$0xff]  ;;  %v18585_v16 = vld [vmem:[#allocation28_spill] sm:$0xff] }
 0x152   :  { %1817 = vmatpush.msrb.mxu3 %v11208_v14  ;;  %18565 = vst [vmem:[#allocation72_spill] sm:$0xff] %v11640_v26  ;;  %1710 = vmatpush.msrb.mxu2 %v18566_v47  ;;  %v11648_v14 = vsub.f32 %v968_v19, %v11637_v53  ;;  %v1067_v1 = vmul.f32 %v994_v48, %v11640_v26 }
 0x153   :  { %v534_v39 = vadd.f32 %v18574_v22, %v428_v51 }
 0x154   :  { %v605_v4 = vpop.f32.mrf.mxu3  ;;  %1819 = vmatpush.msrb.mxu3 %v11242_v5  ;;  %v17966_v59 = vand.u32 4294901760, %v11648_v14  ;;  %1714 = vmatpush.msrb.mxu2 %v18567_v33  ;;  %v732_v5 = vadd.f32 %v11153_v60, %v646_v3  ;;  %v11675_v61 = vand.u32 4294901760, %v1067_v1  ;;  %v18581_v3 = vand.u32 4294901760, %v11532_v46 }
 0x155   :  { %v606_v25 = vadd.f32 %v605_v4, %v488_v34  ;;  %8432 = vperm.xlu0 %10303, %v10271_v62   ;;  %8437 = vperm.xlu1 %10304, %v10272_v55   ;;  %v18577_v62 = vld [vmem:[#allocation58_spill] sm:$0xff]  ;;  %v337_v4 = vadd.f32 %v18578_v43, %v187_v18  ;;  %v18593_v43 = vld [vmem:[#allocation37_spill] sm:$0xff] }
 0x156   :  { %1821 = vmatpush.msrb.mxu3 %v11272_v24  ;;  %v2069_v24 = vsub.f32 %v11648_v14, %v17966_v59  ;;  %1718 = vmatpush.msrb.mxu2 %v18569_v15  ;;  %v1140_v10 = vsub.f32 %v1067_v1, %v11675_v61  ;;  %v1004_v33 = vpop.permute.xlu1 %1003 }
 0x157   :  { %v702_v57 = vadd.f32 %v701_v41, %v606_v25  ;;  %v433_v1 = vadd.f32 %v18585_v16, %v337_v4 }
 0x158   :  { %1823 = vmatpush.msrb.mxu3 %v11317_v30  ;;  %v2070_v58 = vand.u32 4294901760, %v2069_v24  ;;  %1722 = vmatpush.msrb.mxu2 %v18570_v31  ;;  %v11672_v30 = vmax.f32 %v732_v5, 0.0  ;;  %v1141_v19 = vand.u32 4294901760, %v1140_v10  ;;  %v18584_v5 = vld [vmem:[#allocation17_spill] sm:$0xff] }
 0x159   :  { %v788_v11 = vadd.f32 %v787_v56, %v702_v57  ;;  %v18582_v56 = vld [vmem:[#allocation26_spill] sm:$0xff]  ;;  %v195_v46 = vadd.f32 %v11538_v40, %v18584_v5  ;;  %v18587_v31 = vld [vmem:[#allocation33_spill] sm:$0xff] }
 0x15a   :  { %1825 = vmatpush.msrb.mxu3 %v11332_v45  ;;  %18571 = vst [vmem:[#allocation74_spill] sm:$0xff] %v11672_v30  ;;  %2071 = vmatpush.msrb.mxu1 %v2070_v58  ;;  %v18572_v45 = vand.u32 4294901760, %v11438_v13  ;;  %v1068_v13 = vmul.f32 %v999_v21, %v11672_v30  ;;  %v654_v47 = vadd.f32 %v18582_v56, %v534_v39 }
 0x15b   :  { %v11661_v28 = vmax.f32 %v788_v11, 0.0  ;;  %v18583_v11 = vld [vmem:[#allocation69_spill] sm:$0xff]  ;;  %v1142_v15 = vsub.f32 %v1140_v10, %v1141_v19 }
 0x15c   :  { %1827 = vmatpush.msrb.mxu3 %v11381_v20  ;;  %1726 = vmatpush.msrb.mxu2 %v18572_v45  ;;  %v736_v20 = vadd.f32 %v11180_v2, %v650_v0  ;;  %v966_v2 = vld [vmem:[%s17933_s3 + $0x68] sm:$0xff]  ;;  %v11716_v25 = vand.u32 4294901760, %v1068_v13  ;;  %v540_v0 = vadd.f32 %v18587_v31, %v433_v1  ;;  %v965_v45 = vld [vmem:[%s17933_s3 + $0x60] sm:$0xff]  ;;  %v18598_v31 = vld [vmem:[#allocation36_spill] sm:$0xff] }
 0x15d   :  { %18568 = vst [vmem:[#allocation73_spill] sm:$0xff] %v11661_v28  ;;  %v1066_v60 = vmul.f32 %v989_v49, %v11661_v28  ;;  %v18573_v49 = vand.u32 4294901760, %v11470_v35  ;;  %v11711_v34 = vand.u32 4294901760, %v966_v2  ;;  %v11752_v51 = vand.u32 4294901760, %v965_v45  ;;  %v18596_v1 = vld [vmem:[#allocation34_spill] sm:$0xff] }
 0x15e   :  { %1829 = vmatpush.msrb.mxu3 %v11396_v36  ;;  %v967_v36 = vld [vmem:[%s17933_s3 + $0x70] sm:$0xff]  ;;  %v11714_v41 = vmax.f32 %v736_v20, 0.0  ;;  %v1143_v18 = vand.u32 4294901760, %v1142_v15 }
 0x15f   :  { %v11679_v23 = vand.u32 4294901760, %v1066_v60  ;;  %1730 = vmatpush.msrb.mxu2 %v18573_v49  ;;  %v11699_v8 = vand.u32 4294901760, %v967_v36  ;;  %v11725_v48 = vsub.f32 %v966_v2, %v11711_v34  ;;  %v11763_v39 = vsub.f32 %v965_v45, %v11752_v51  ;;  %v18599_v45 = vld [vmem:[#allocation24_spill] sm:$0xff] }
 0x160   :  { %1831 = vmatpush.msrb.mxu3 %v11432_v63  ;;  %18579 = vst [vmem:[#allocation29_spill] sm:$0xff] %v11714_v41  ;;  %v1069_v7 = vmul.f32 %v1004_v33, %v11714_v41 }
 0x161   :  { %1357 = vmatmul.f32.vlgmr.msra.gmra.mxu3 %v11679_v23  ;;  %v1132_v12 = vsub.f32 %v1066_v60, %v11679_v23  ;;  %1734 = vmatpush.msrb.mxu2 %v18576_v37  ;;  %v11709_v63 = vsub.f32 %v967_v36, %v11699_v8  ;;  %v17963_v24 = vand.u32 4294901760, %v11725_v48  ;;  %v1148_v60 = vsub.f32 %v1068_v13, %v11716_v25  ;;  %v18590_v13 = vld [vmem:[#allocation30_spill] sm:$0xff] }
 0x162   :  { %1833 = vmatpush.msrb.mxu3 %v18577_v62  ;;  %1908 = vmatpush.msrb.mxu0 %v11699_v8  ;;  %v658_v36 = vadd.f32 %v18590_v13, %v540_v0  ;;  %v11759_v22 = vand.u32 4294901760, %v1069_v7  ;;  %v17961_v2 = vand.u32 4294901760, %v11763_v39  ;;  %v18592_v62 = vld [vmem:[#allocation21_spill] sm:$0xff] }
 0x163   :  { %1471 = vmatmul.f32.vlgmr.msra.gmra.mxu0 %v1132_v12  ;;  %v1133_v35 = vand.u32 4294901760, %v1132_v12  ;;  %1738 = vmatpush.msrb.mxu2 %v18581_v3  ;;  %v17964_v9 = vand.u32 4294901760, %v11709_v63  ;;  %v2081_v32 = vsub.f32 %v11725_v48, %v17963_v24  ;;  %v1149_v20 = vand.u32 4294901760, %v1148_v60  ;;  %v18634_v24 = vld [vmem:[#allocation13_spill] sm:$0xff] }
 0x164   :  { %1835 = vmatpush.msrb.mxu3 %v18580_v42  ;;  %1910 = vmatpush.msrb.mxu0 %v11711_v34  ;;  %v18594_v42 = vld [vmem:[#allocation31_spill] sm:$0xff]  ;;  %v1156_v56 = vsub.f32 %v1069_v7, %v11759_v22 }
 0x165   :  { %1585 = vmatmul.f32.vlgmr.msra.gmra.mxu1 %v1133_v35  ;;  %v1134_v55 = vsub.f32 %v1132_v12, %v1133_v35  ;;  %1742 = vmatpush.msrb.mxu2 %v1352_v38  ;;  %v2075_v54 = vsub.f32 %v11709_v63, %v17964_v9  ;;  %v18586_v38 = vld [vmem:[#allocation27_spill] sm:$0xff]  ;;  %v18588_v12 = vld [vmem:[#allocation18_spill] sm:$0xff]  ;;  %v1009_v35 = vpop.permute.xlu2 %1008  ;;  %v744_v3 = vadd.f32 %v18594_v42, %v658_v36 }
 0x166   :  { %1837 = vmatpush.msrb.mxu3 %v18583_v11  ;;  %v740_v58 = vadd.f32 %v18586_v38, %v654_v47  ;;  %v341_v49 = vadd.f32 %v18588_v12, %v195_v46  ;;  %1912 = vmatpush.msrb.mxu0 %v11752_v51  ;;  %v964_v11 = vld [vmem:[%s17933_s3 + $0x58] sm:$0xff]  ;;  %v18595_v46 = vld [vmem:[#allocation22_spill] sm:$0xff]  ;;  %v1157_v7 = vand.u32 4294901760, %v1156_v56  ;;  %v18600_v12 = vld [vmem:[#allocation35_spill] sm:$0xff] }
 0x167   :  { %v1135_v57 = vand.u32 4294901760, %v1134_v55  ;;  %v2076_v21 = vand.u32 4294901760, %v2075_v54  ;;  %v203_v55 = vadd.f32 %v11538_v40, %v18592_v62  ;;  %v11784_v5 = vand.u32 4294901760, %v964_v11  ;;  %v18604_v42 = vld [vmem:[#allocation38_spill] sm:$0xff] }
 0x168   :  { %1839 = vmatpush.msrb.mxu3 %v11550_v6  ;;  %v2082_v6 = vand.u32 4294901760, %v2081_v32  ;;  %v438_v37 = vadd.f32 %v18591_v52, %v341_v49  ;;  %v1158_v13 = vsub.f32 %v1156_v56, %v1157_v7 }
 0x169   :  { %1136 = vmatmul.f32.vlgmr.msra.gmra.mxu2 %v1135_v57  ;;  %1361 = vmatmul.f32.gmra.mxu3 %v11675_v61  ;;  %v2087_v57 = vsub.f32 %v11763_v39, %v17961_v2  ;;  %v345_v16 = vadd.f32 %v18595_v46, %v203_v55 }
 0x16a   :  { %2229 = vmatpush.msra.mxu2 %v11648_v14  ;;  %2357 = vmatpush.msra.mxu3 %v11637_v53  ;;  %v546_v4 = vadd.f32 %v18593_v43, %v438_v37  ;;  %v963_v37 = vld [vmem:[%s17933_s3 + $0x50] sm:$0xff]  ;;  %v18602_v43 = vld [vmem:[#allocation25_spill] sm:$0xff] }
 0x16b   :  { %1476 = vmatmul.f32.gmra.mxu0 %v1140_v10  ;;  %2077 = vmatpush.msrb.mxu1 %v2076_v21  ;;  %v11756_v10 = vmax.f32 %v740_v58, 0.0  ;;  %v2088_v33 = vand.u32 4294901760, %v2087_v57  ;;  %v11794_v58 = vsub.f32 %v964_v11, %v11784_v5  ;;  %v443_v0 = vadd.f32 %v18598_v31, %v345_v16  ;;  %v1019_v16 = vpop.permute.xlu0 %1018 }
 0x16c   :  { %2232 = vmatpush.msra.mxu2 %v11709_v63  ;;  %2359 = vmatpush.msra.mxu3 %v11699_v8  ;;  %v662_v54 = vadd.f32 %v18596_v1, %v546_v4  ;;  %v11813_v55 = vand.u32 4294901760, %v963_v37 }
 0x16d   :  { %1591 = vmatmul.f32.gmra.mxu1 %v1141_v19  ;;  %18589 = vst [vmem:[#allocation65_spill] sm:$0xff] %v11756_v10  ;;  %v1150_v19 = vsub.f32 %v1148_v60, %v1149_v20  ;;  %v1070_v47 = vmul.f32 %v1009_v35, %v11756_v10  ;;  %1914 = vmatpush.msrb.mxu0 %v11784_v5  ;;  %v17960_v21 = vand.u32 4294901760, %v11794_v58  ;;  %v1014_v32 = vpop.permute.xlu2 %1013 }
 0x16e   :  { %2235 = vmatpush.msra.mxu2 %v11725_v48  ;;  %2083 = vmatpush.msrb.mxu1 %v2082_v6  ;;  %v211_v6 = vadd.f32 %v11538_v40, %v18599_v45  ;;  %v748_v49 = vadd.f32 %v18600_v12, %v662_v54  ;;  %v11823_v11 = vsub.f32 %v963_v37, %v11813_v55  ;;  %v18607_v54 = vld [vmem:[#allocation39_spill] sm:$0xff] }
 0x16f   :  { %2361 = vmatpush.msra.mxu3 %v11711_v34  ;;  %v1151_v15 = vand.u32 4294901760, %v1150_v19  ;;  %v11790_v38 = vand.u32 4294901760, %v1070_v47  ;;  %v2093_v52 = vsub.f32 %v11794_v58, %v17960_v21  ;;  %1916 = vmatpush.msrb.mxu0 %v11813_v55 }
 0x170   :  { %2238 = vmatpush.msra.mxu2 %v11763_v39  ;;  %2089 = vmatpush.msrb.mxu1 %v2088_v33  ;;  %v349_v4 = vadd.f32 %v18602_v43, %v211_v6  ;;  %v11816_v19 = vmax.f32 %v748_v49, 0.0  ;;  %v18606_v33 = vld [vmem:[#allocation40_spill] sm:$0xff]  ;;  %v17959_v1 = vand.u32 4294901760, %v11823_v11 }
 0x171   :  { %1144 = vmatmul.f32.gmra.mxu2 %v1143_v18  ;;  %1365 = vmatmul.f32.gmra.mxu3 %v11716_v25  ;;  %v18601_v18 = vld [vmem:[#allocation41_spill] sm:$0xff]  ;;  %v1164_v36 = vsub.f32 %v1070_v47, %v11790_v38  ;;  %v2094_v62 = vand.u32 4294901760, %v2093_v52 }
 0x172   :  { %2363 = vmatpush.msra.mxu3 %v11752_v51  ;;  %2241 = vmatpush.msra.mxu2 %v11794_v58  ;;  %18603 = vst [vmem:[#allocation14_spill] sm:$0xff] %v11816_v19  ;;  %v448_v46 = vadd.f32 %v18606_v33, %v349_v4  ;;  %v2099_v49 = vsub.f32 %v11823_v11, %v17959_v1  ;;  %v18616_v33 = vld [vmem:[#allocation43_spill] sm:$0xff] }
 0x173   :  { %1481 = vmatmul.f32.gmra.mxu0 %v1148_v60  ;;  %v11788_v60 = vmax.f32 %v744_v3, 0.0  ;;  %v1165_v47 = vand.u32 4294901760, %v1164_v36  ;;  %2095 = vmatpush.msrb.mxu1 %v2094_v62  ;;  %v18613_v62 = vld [vmem:[#allocation7_spill] sm:$0xff] }
 0x174   :  { %2365 = vmatpush.msra.mxu3 %v11784_v5  ;;  %2244 = vmatpush.msra.mxu2 %v11823_v11 }
 0x175   :  { %1597 = vmatmul.f32.gmra.mxu1 %v1149_v20  ;;  %18597 = vst [vmem:[#allocation58_spill] sm:$0xff] %v11788_v60  ;;  %v552_v20 = vadd.f32 %v18601_v18, %v443_v0  ;;  %v1071_v35 = vmul.f32 %v1014_v32, %v11788_v60  ;;  %v1072_v0 = vmul.f32 %v1019_v16, %v11816_v19  ;;  %v18609_v32 = vld [vmem:[#allocation5_spill] sm:$0xff]  ;;  %v2100_v18 = vand.u32 4294901760, %v2099_v49 }
 0x176   :  { %2367 = vmatpush.msra.mxu3 %v11813_v55  ;;  %v219_v45 = vadd.f32 %v11538_v40, %v18609_v32  ;;  %v1166_v6 = vsub.f32 %v1164_v36, %v1165_v47 }
 0x177   :  { %v666_v3 = vadd.f32 %v18604_v42, %v552_v20  ;;  %v11819_v57 = vand.u32 4294901760, %v1071_v35  ;;  %v11842_v37 = vand.u32 4294901760, %v1072_v0  ;;  %2101 = vmatpush.msrb.mxu1 %v2100_v18  ;;  %v18618_v18 = vld [vmem:[#allocation9_spill] sm:$0xff] }
 0x178   :  { %v353_v43 = vadd.f32 %v18613_v62, %v219_v45  ;;  %v1167_v4 = vand.u32 4294901760, %v1166_v6  ;;  %v961_v6 = vld [vmem:[%s17933_s3 + $0x40] sm:$0xff] }
 0x179   :  { %1152 = vmatmul.f32.gmra.mxu2 %v1151_v15  ;;  %1369 = vmatmul.f32.gmra.mxu3 %v11759_v22  ;;  %18605 = vst [vmem:[#allocation63_spill] sm:$0xff] %v11819_v57  ;;  %v752_v15 = vadd.f32 %v18607_v54, %v666_v3  ;;  %v1172_v12 = vsub.f32 %v1071_v35, %v11819_v57  ;;  %v18614_v3 = vld [vmem:[#allocation44_spill] sm:$0xff]  ;;  %v11865_v49 = vand.u32 4294901760, %v961_v6 }
 0x17a   :  { %18612 = vst [vmem:[#allocation69_spill] sm:$0xff] %v11842_v37  ;;  %v453_v35 = vadd.f32 %v18614_v3, %v353_v43  ;;  %v1180_v16 = vsub.f32 %v1072_v0, %v11842_v37  ;;  %v18621_v43 = vld [vmem:[#allocation46_spill] sm:$0xff] }
 0x17b   :  { %1486 = vmatmul.f32.gmra.mxu0 %v1156_v56  ;;  %v1159_v56 = vand.u32 4294901760, %v1158_v13  ;;  %v11839_v20 = vmax.f32 %v752_v15, 0.0  ;;  %v18611_v13 = vld [vmem:[#allocation42_spill] sm:$0xff]  ;;  %v1173_v42 = vand.u32 4294901760, %v1172_v12  ;;  %v11877_v3 = vsub.f32 %v961_v6, %v11865_v49 }
 0x17c   :  { %v962_v15 = vld [vmem:[%s17933_s3 + $0x48] sm:$0xff]  ;;  %v1181_v62 = vand.u32 4294901760, %v1180_v16 }
 0x17d   :  { %1603 = vmatmul.f32.gmra.mxu1 %v1157_v7  ;;  %v18608_v7 = vld [vmem:[#allocation45_spill] sm:$0xff]  ;;  %18610 = vst [vmem:[#allocation26_spill] sm:$0xff] %v11839_v20  ;;  %v1174_v32 = vsub.f32 %v1172_v12, %v1173_v42  ;;  %v11856_v45 = vand.u32 4294901760, %v962_v15 }
 0x17e   :  { %v558_v31 = vadd.f32 %v18608_v7, %v448_v46  ;;  %v18617_v7 = vld [vmem:[#allocation49_spill] sm:$0xff] }
 0x17f   :  { %1918 = vmatpush.msrb.mxu0 %v11856_v45  ;;  %v11863_v0 = vsub.f32 %v962_v15, %v11856_v45  ;;  %2369 = vmatpush.msra.mxu3 %v11856_v45  ;;  %v18623_v15 = vld [vmem:[#allocation8_spill] sm:$0xff] }
 0x180   :  { %v670_v52 = vadd.f32 %v18611_v13, %v558_v31  ;;  %v564_v31 = vadd.f32 %v18617_v7, %v453_v35  ;;  %v1029_v35 = vpop.permute.xlu2 %1028  ;;  %v235_v7 = vadd.f32 %v11538_v40, %v18623_v15  ;;  %v960_v15 = vld [vmem:[%s17933_s3 + $0x38] sm:$0xff] }
 0x181   :  { %1160 = vmatmul.f32.gmra.mxu2 %v1159_v56  ;;  %1373 = vmatmul.f32.gmra.mxu3 %v11790_v38  ;;  %v18615_v56 = vld [vmem:[#allocation6_spill] sm:$0xff]  ;;  %v11900_v1 = vand.u32 4294901760, %v960_v15 }
 0x182   :  { %v756_v46 = vadd.f32 %v18616_v33, %v670_v52  ;;  %1920 = vmatpush.msrb.mxu0 %v11865_v49  ;;  %2247 = vmatpush.msra.mxu2 %v11863_v0 }
 0x183   :  { %1491 = vmatmul.f32.gmra.mxu0 %v1164_v36  ;;  %v1024_v36 = vpop.permute.xlu1 %1023  ;;  %2371 = vmatpush.msra.mxu3 %v11865_v49 }
 0x184   :  { %v1073_v54 = vmul.f32 %v1024_v36, %v11839_v20  ;;  %v11868_v52 = vmax.f32 %v756_v46, 0.0  ;;  %v1175_v36 = vand.u32 4294901760, %v1174_v32  ;;  %v17962_v46 = vand.u32 4294901760, %v11877_v3  ;;  %2250 = vmatpush.msra.mxu2 %v11877_v3  ;;  %1922 = vmatpush.msrb.mxu0 %v11900_v1 }
 0x185   :  { %1609 = vmatmul.f32.gmra.mxu1 %v1165_v47  ;;  %v227_v47 = vadd.f32 %v11538_v40, %v18615_v56  ;;  %v18622_v56 = vld [vmem:[#allocation48_spill] sm:$0xff]  ;;  %2373 = vmatpush.msra.mxu3 %v11900_v1 }
 0x186   :  { %18619 = vst [vmem:[#allocation17_spill] sm:$0xff] %v11868_v52  ;;  %v1074_v6 = vmul.f32 %v1029_v35, %v11868_v52  ;;  %v18626_v35 = vld [vmem:[#allocation11_spill] sm:$0xff] }
 0x187   :  { %v357_v13 = vadd.f32 %v18618_v18, %v227_v47  ;;  %v18624_v18 = vld [vmem:[#allocation47_spill] sm:$0xff]  ;;  %v361_v21 = vadd.f32 %v18626_v35, %v235_v7 }
 0x189   :  { %1168 = vmatmul.f32.gmra.mxu2 %v1167_v4  ;;  %1377 = vmatmul.f32.gmra.mxu3 %v11819_v57  ;;  %v674_v4 = vadd.f32 %v18621_v43, %v564_v31  ;;  %v458_v47 = vadd.f32 %v18622_v56, %v357_v13  ;;  %v1182_v31 = vsub.f32 %v1180_v16, %v1181_v62  ;;  %v18625_v43 = vld [vmem:[#allocation53_spill] sm:$0xff]  ;;  %v18655_v57 = vld [vmem:[#allocation67_spill] sm:$0xff] }
 0x18b   :  { %1496 = vmatmul.f32.gmra.mxu0 %v1172_v12  ;;  %v11870_v12 = vand.u32 4294901760, %v1073_v54  ;;  %v760_v13 = vadd.f32 %v18624_v18, %v674_v4  ;;  %v11903_v4 = vand.u32 4294901760, %v1074_v6  ;;  %v1183_v18 = vand.u32 4294901760, %v1182_v31 }
 0x18d   :  { %1615 = vmatmul.f32.gmra.mxu1 %v1173_v42  ;;  %18620 = vst [vmem:[#allocation28_spill] sm:$0xff] %v11870_v12  ;;  %v17958_v42 = vand.u32 4294901760, %v11863_v0  ;;  %v1188_v32 = vsub.f32 %v1073_v54, %v11870_v12  ;;  %v1196_v35 = vsub.f32 %v1074_v6, %v11903_v4 }
 0x18e   :  { %18627 = vst [vmem:[#allocation27_spill] sm:$0xff] %v11903_v4 }
 0x18f   :  { %v2105_v33 = vsub.f32 %v11863_v0, %v17958_v42  ;;  %v2111_v42 = vsub.f32 %v11877_v3, %v17962_v46  ;;  %v1189_v2 = vand.u32 4294901760, %v1188_v32  ;;  %v18633_v46 = vld [vmem:[#allocation57_spill] sm:$0xff] }
 0x191   :  { %1176 = vmatmul.f32.gmra.mxu2 %v1175_v36  ;;  %1381 = vmatmul.f32.gmra.mxu3 %v11842_v37  ;;  %v570_v36 = vadd.f32 %v18625_v43, %v458_v47  ;;  %v2106_v56 = vand.u32 4294901760, %v2105_v33  ;;  %v2112_v54 = vand.u32 4294901760, %v2111_v42  ;;  %v18629_v47 = vld [vmem:[#allocation50_spill] sm:$0xff]  ;;  %v11910_v43 = vsub.f32 %v960_v15, %v11900_v1  ;;  %v18632_v15 = vld [vmem:[#allocation51_spill] sm:$0xff] }
 0x192   :  { %v1190_v31 = vsub.f32 %v1188_v32, %v1189_v2 }
 0x193   :  { %1501 = vmatmul.f32.gmra.mxu0 %v1180_v16  ;;  %2107 = vmatpush.msrb.mxu1 %v2106_v56  ;;  %v11905_v16 = vmax.f32 %v760_v13, 0.0  ;;  %v678_v33 = vadd.f32 %v18629_v47, %v570_v36  ;;  %v17965_v7 = vand.u32 4294901760, %v11910_v43  ;;  %v1034_v13 = vpop.permute.xlu0 %1033  ;;  %v18631_v56 = vld [vmem:[#allocation10_spill] sm:$0xff] }
 0x194   :  { %v243_v36 = vadd.f32 %v11538_v40, %v18631_v56  ;;  %2253 = vmatpush.msra.mxu2 %v11910_v43 }
 0x195   :  { %1621 = vmatmul.f32.gmra.mxu1 %v1181_v62  ;;  %18628 = vst [vmem:[#allocation33_spill] sm:$0xff] %v11905_v16  ;;  %v18630_v62 = vld [vmem:[#allocation52_spill] sm:$0xff]  ;;  %v764_v47 = vadd.f32 %v18632_v15, %v678_v33  ;;  %v1191_v33 = vand.u32 4294901760, %v1190_v31  ;;  %v1197_v15 = vand.u32 4294901760, %v1196_v35 }
 0x196   :  { %2113 = vmatpush.msrb.mxu1 %v2112_v54  ;;  %v463_v42 = vadd.f32 %v18630_v62, %v361_v21  ;;  %v1075_v21 = vmul.f32 %v1034_v13, %v11905_v16  ;;  %v959_v62 = vld [vmem:[%s17933_s3 + $0x30] sm:$0xff]  ;;  %v365_v9 = vadd.f32 %v18634_v24, %v243_v36  ;;  %v1039_v36 = vpop.permute.xlu1 %1038  ;;  %v18639_v31 = vld [vmem:[#allocation12_spill] sm:$0xff] }
 0x197   :  { %v11929_v6 = vand.u32 4294901760, %v959_v62 }
 0x198   :  { %v576_v54 = vadd.f32 %v18633_v46, %v463_v42  ;;  %v11932_v46 = vmax.f32 %v764_v47, 0.0  ;;  %v11935_v13 = vand.u32 4294901760, %v1075_v21  ;;  %v251_v47 = vadd.f32 %v11538_v40, %v18639_v31  ;;  %v958_v31 = vld [vmem:[%s17933_s3 + $0x28] sm:$0xff] }
 0x199   :  { %1184 = vmatmul.f32.gmra.mxu2 %v1183_v18  ;;  %1385 = vmatmul.f32.gmra.mxu3 %v11870_v12  ;;  %v2117_v18 = vsub.f32 %v11910_v43, %v17965_v7  ;;  %v11939_v7 = vsub.f32 %v959_v62, %v11929_v6  ;;  %v18641_v62 = vld [vmem:[#allocation55_spill] sm:$0xff] }
 0x19a   :  { %18635 = vst [vmem:[#allocation18_spill] sm:$0xff] %v11932_v46  ;;  %1924 = vmatpush.msrb.mxu0 %v11929_v6  ;;  %2375 = vmatpush.msra.mxu3 %v11929_v6 }
 0x19b   :  { %1506 = vmatmul.f32.gmra.mxu0 %v1188_v32  ;;  %v2118_v56 = vand.u32 4294901760, %v2117_v18  ;;  %v18636_v32 = vld [vmem:[#allocation54_spill] sm:$0xff]  ;;  %18637 = vst [vmem:[#allocation30_spill] sm:$0xff] %v11935_v13  ;;  %v17973_v24 = vand.u32 4294901760, %v11939_v7  ;;  %2256 = vmatpush.msra.mxu2 %v11939_v7 }
 0x19c   :  { %v682_v42 = vadd.f32 %v18636_v32, %v576_v54  ;;  %v18640_v54 = vld [vmem:[#allocation62_spill] sm:$0xff]  ;;  %v1198_v32 = vsub.f32 %v1196_v35, %v1197_v15 }
 0x19d   :  { %1627 = vmatmul.f32.gmra.mxu1 %v1189_v2  ;;  %v18638_v2 = vld [vmem:[#allocation56_spill] sm:$0xff] }
 0x19e   :  { %2119 = vmatpush.msrb.mxu1 %v2118_v56  ;;  %v468_v18 = vadd.f32 %v18638_v2, %v365_v9  ;;  %v768_v59 = vadd.f32 %v18641_v62, %v682_v42  ;;  %v1204_v9 = vsub.f32 %v1075_v21, %v11935_v13  ;;  %v2123_v2 = vsub.f32 %v11939_v7, %v17973_v24  ;;  %v18643_v42 = vld [vmem:[#allocation59_spill] sm:$0xff] }
 0x19f   :  { %v1199_v62 = vand.u32 4294901760, %v1198_v32  ;;  %v18648_v32 = vld [vmem:[#allocation60_spill] sm:$0xff] }
 0x1a0   :  { %v582_v56 = vadd.f32 %v18640_v54, %v468_v18  ;;  %v2124_v18 = vand.u32 4294901760, %v2123_v2  ;;  %v11958_v54 = vand.u32 4294901760, %v958_v31  ;;  %v11962_v21 = vmax.f32 %v768_v59, 0.0  ;;  %v1044_v59 = vpop.permute.xlu2 %1043 }
 0x1a1   :  { %1192 = vmatmul.f32.gmra.mxu2 %v1191_v33  ;;  %1389 = vmatmul.f32.gmra.mxu3 %v11903_v4  ;;  %v1076_v33 = vmul.f32 %v1039_v36, %v11932_v46  ;;  %v18642_v4 = vld [vmem:[#allocation16_spill] sm:$0xff]  ;;  %v1205_v36 = vand.u32 4294901760, %v1204_v9 }
 0x1a2   :  { %v369_v12 = vadd.f32 %v18642_v4, %v251_v47  ;;  %18644 = vst [vmem:[#allocation32_spill] sm:$0xff] %v11962_v21  ;;  %2125 = vmatpush.msrb.mxu1 %v2124_v18  ;;  %1926 = vmatpush.msrb.mxu0 %v11958_v54  ;;  %v11968_v24 = vsub.f32 %v958_v31, %v11958_v54  ;;  %v18647_v47 = vld [vmem:[#allocation15_spill] sm:$0xff] }
 0x1a3   :  { %1511 = vmatmul.f32.gmra.mxu0 %v1196_v35  ;;  %v686_v35 = vadd.f32 %v18643_v42, %v582_v56  ;;  %v11964_v46 = vand.u32 4294901760, %v1076_v33  ;;  %2377 = vmatpush.msra.mxu3 %v11958_v54  ;;  %v259_v56 = vadd.f32 %v11538_v40, %v18647_v47  ;;  %v18649_v42 = vld [vmem:[#allocation68_spill] sm:$0xff]  ;;  %v1206_v31 = vsub.f32 %v1204_v9, %v1205_v36  ;;  %v957_v47 = vld [vmem:[%s17933_s3 + $0x20] sm:$0xff] }
 0x1a4   :  { %v17982_v4 = vand.u32 4294901760, %v11968_v24  ;;  %2259 = vmatpush.msra.mxu2 %v11968_v24 }
 0x1a5   :  { %1633 = vmatmul.f32.gmra.mxu1 %v1197_v15  ;;  %18645 = vst [vmem:[#allocation21_spill] sm:$0xff] %v11964_v46  ;;  %v18646_v15 = vld [vmem:[#allocation61_spill] sm:$0xff]  ;;  %v772_v18 = vadd.f32 %v18648_v32, %v686_v35  ;;  %v11987_v32 = vand.u32 4294901760, %v957_v47  ;;  %v1207_v16 = vand.u32 4294901760, %v1206_v31 }
 0x1a6   :  { %v473_v2 = vadd.f32 %v18646_v15, %v369_v12  ;;  %v1212_v12 = vsub.f32 %v1076_v33, %v11964_v46  ;;  %v2129_v15 = vsub.f32 %v11968_v24, %v17982_v4 }
 0x1a7   :  { %1928 = vmatpush.msrb.mxu0 %v11987_v32  ;;  %v11997_v4 = vsub.f32 %v957_v47, %v11987_v32  ;;  %2379 = vmatpush.msra.mxu3 %v11987_v32 }
 0x1a8   :  { %v588_v37 = vadd.f32 %v18649_v42, %v473_v2  ;;  %v2130_v35 = vand.u32 4294901760, %v2129_v15  ;;  %v18650_v2 = vld [vmem:[#allocation20_spill] sm:$0xff] }
 0x1a9   :  { %1200 = vmatmul.f32.gmra.mxu2 %v1199_v62  ;;  %1393 = vmatmul.f32.gmra.mxu3 %v11935_v13  ;;  %v1077_v62 = vmul.f32 %v1044_v59, %v11962_v21  ;;  %v373_v42 = vadd.f32 %v18650_v2, %v259_v56  ;;  %v11990_v13 = vmax.f32 %v772_v18, 0.0  ;;  %v1213_v59 = vand.u32 4294901760, %v1212_v12  ;;  %v1049_v56 = vpop.permute.xlu0 %1048  ;;  %v18656_v18 = vld [vmem:[#allocation66_spill] sm:$0xff]  ;;  %v956_v2 = vld [vmem:[%s17933_s3 + $0x18] sm:$0xff] }
 0x1aa   :  { %2131 = vmatpush.msrb.mxu1 %v2130_v35  ;;  %2262 = vmatpush.msra.mxu2 %v11997_v4 }
 0x1ab   :  { %1516 = vmatmul.f32.gmra.mxu0 %v1204_v9  ;;  %18651 = vst [vmem:[#allocation37_spill] sm:$0xff] %v11990_v13  ;;  %v18652_v9 = vld [vmem:[#allocation64_spill] sm:$0xff]  ;;  %v11993_v21 = vand.u32 4294901760, %v1077_v62  ;;  %v478_v52 = vadd.f32 %v18655_v57, %v373_v42  ;;  %v1214_v47 = vsub.f32 %v1212_v12, %v1213_v59  ;;  %v1078_v57 = vmul.f32 %v1049_v56, %v11990_v13  ;;  %v18657_v42 = vld [vmem:[#allocation23_spill] sm:$0xff] }
 0x1ac   :  { %v690_v33 = vadd.f32 %v18652_v9, %v588_v37  ;;  %v17987_v37 = vand.u32 4294901760, %v11997_v4 }
 0x1ad   :  { %1639 = vmatmul.f32.gmra.mxu1 %v1205_v36  ;;  %18653 = vst [vmem:[#allocation31_spill] sm:$0xff] %v11993_v21  ;;  %v18654_v36 = vld [vmem:[#allocation19_spill] sm:$0xff]  ;;  %v594_v35 = vadd.f32 %v11570_v17, %v478_v52 }
 0x1ae   :  { %v267_v15 = vadd.f32 %v11538_v40, %v18654_v36  ;;  %v776_v31 = vadd.f32 %v18656_v18, %v690_v33  ;;  %v1220_v40 = vsub.f32 %v1077_v62, %v11993_v21  ;;  %v12017_v33 = vand.u32 4294901760, %v956_v2 }
 0x1af   :  { %v1215_v18 = vand.u32 4294901760, %v1214_v47 }
 0x1b0   :  { %v377_v9 = vadd.f32 %v18657_v42, %v267_v15  ;;  %1930 = vmatpush.msrb.mxu0 %v12017_v33  ;;  %v12023_v36 = vsub.f32 %v956_v2, %v12017_v33  ;;  %2381 = vmatpush.msra.mxu3 %v12017_v33  ;;  %v12026_v56 = vmax.f32 %v776_v31, 0.0  ;;  %v12028_v15 = vand.u32 4294901760, %v1078_v57 }
 0x1b1   :  { %1208 = vmatmul.f32.gmra.mxu2 %v1207_v16  ;;  %1397 = vmatmul.f32.gmra.mxu3 %v11964_v46  ;;  %v2135_v16 = vsub.f32 %v11997_v4, %v17987_v37  ;;  %v1221_v37 = vand.u32 4294901760, %v1220_v40 }
 0x1b2   :  { %v483_v52 = vadd.f32 %v11576_v27, %v377_v9  ;;  %18659 = vst [vmem:[#allocation22_spill] sm:$0xff] %v12026_v56  ;;  %v17988_v27 = vand.u32 4294901760, %v12023_v36  ;;  %2265 = vmatpush.msra.mxu2 %v12023_v36  ;;  %v1228_v42 = vsub.f32 %v1078_v57, %v12028_v15  ;;  %v955_v9 = vld [vmem:[%s17933_s3 + $0x10] sm:$0xff] }
 0x1b3   :  { %1521 = vmatmul.f32.gmra.mxu0 %v1212_v12  ;;  %v2136_v17 = vand.u32 4294901760, %v2135_v16  ;;  %v18658_v12 = vld [vmem:[#allocation70_spill] sm:$0xff]  ;;  %18660 = vst [vmem:[#allocation34_spill] sm:$0xff] %v12028_v15  ;;  %v18661_v16 = vld [vmem:[#allocation71_spill] sm:$0xff]  ;;  %v1222_v47 = vsub.f32 %v1220_v40, %v1221_v37 }
 0x1b4   :  { %v694_v62 = vadd.f32 %v18658_v12, %v594_v35  ;;  %v1054_v35 = vpop.permute.xlu1 %1053  ;;  %v2141_v31 = vsub.f32 %v12023_v36, %v17988_v27  ;;  %v12044_v12 = vand.u32 4294901760, %v955_v9 }
 0x1b5   :  { %1645 = vmatmul.f32.gmra.mxu1 %v1213_v59  ;;  %v600_v59 = vadd.f32 %v11603_v50, %v483_v52  ;;  %v1079_v50 = vmul.f32 %v1054_v35, %v12026_v56  ;;  %v1223_v57 = vand.u32 4294901760, %v1222_v47 }
 0x1b6   :  { %2137 = vmatpush.msrb.mxu1 %v2136_v17  ;;  %v780_v2 = vadd.f32 %v18661_v16, %v694_v62  ;;  %v2142_v52 = vand.u32 4294901760, %v2141_v31  ;;  %1932 = vmatpush.msrb.mxu0 %v12044_v12  ;;  %v1059_v16 = vpop.permute.xlu2 %1058 }
 0x1b7   :  { %v698_v17 = vadd.f32 %v11599_v44, %v600_v59  ;;  %v12052_v35 = vand.u32 4294901760, %v1079_v50  ;;  %2383 = vmatpush.msra.mxu3 %v12044_v12 }
 0x1b8   :  { %v12046_v62 = vmax.f32 %v780_v2, 0.0  ;;  %2143 = vmatpush.msrb.mxu1 %v2142_v52  ;;  %v822_v2 = vlaneseq }
 0x1b9   :  { %1216 = vmatmul.f32.gmra.mxu2 %v1215_v18  ;;  %1401 = vmatmul.f32.gmra.mxu3 %v11993_v21  ;;  %v1229_v18 = vand.u32 4294901760, %v1228_v42  ;;  %18663 = vst [vmem:[#allocation24_spill] sm:$0xff] %v12052_v35  ;;  %v784_v44 = vadd.f32 %v11605_v29, %v698_v17  ;;  %v1236_v52 = vsub.f32 %v1079_v50, %v12052_v35  ;;  %v821_v50 = vrot.slane %v11661_v28, 7 }
 0x1ba   :  { %18662 = vst [vmem:[#allocation36_spill] sm:$0xff] %v12046_v62  ;;  %v1080_v47 = vmul.f32 %v1059_v16, %v12046_v62 }
 0x1bb   :  { %1526 = vmatmul.f32.gmra.mxu0 %v1220_v40  ;;  %v12050_v40 = vsub.f32 %v955_v9, %v12044_v12  ;;  %v953_v9 = vld [vmem:[%s17933_s3] sm:$0xff]  ;;  %v1230_v17 = vsub.f32 %v1228_v42, %v1229_v18  ;;  %v12078_v16 = vmax.f32 %v784_v44, 0.0 }
 0x1bc   :  { %v12072_v27 = vand.u32 4294901760, %v953_v9  ;;  %v860_v46 = vpop.permute.xlu1 %859 }
 0x1bd   :  { %1651 = vmatmul.f32.gmra.mxu1 %v1221_v37  ;;  %v17991_v59 = vand.u32 4294901760, %v12050_v40  ;;  %v954_v37 = vld [vmem:[%s17933_s3 + $0x8] sm:$0xff]  ;;  %2268 = vmatpush.msra.mxu2 %v12050_v40  ;;  %18664 = vst [vmem:[#allocation35_spill] sm:$0xff] %v12078_v16  ;;  %v1231_v44 = vand.u32 4294901760, %v1230_v17  ;;  %v18006_v28 = vrot.slane %v12078_v16, 7 }
 0x1be   :  { %v12062_v31 = vand.u32 4294901760, %v954_v37 }
 0x1bf   :  { %v2147_v29 = vsub.f32 %v12050_v40, %v17991_v59  ;;  %v12081_v59 = vshrl.u32 %v822_v2, 7 }
 0x1c0   :  { %2385 = vmatpush.msra.mxu3 %v12062_v31  ;;  %1934 = vmatpush.msrb.mxu0 %v12062_v31 }
 0x1c1   :  { %1224 = vmatmul.f32.gmra.mxu2 %v1223_v57  ;;  %1405 = vmatmul.f32.gmra.mxu3 %v12028_v15  ;;  %v12075_v57 = vsub.f32 %v954_v37, %v12062_v31  ;;  %v2148_v15 = vand.u32 4294901760, %v2147_v29  ;;  %18665 = vst [vmem:[#allocation41_spill] sm:$0xff] %v12081_v59  ;;  %v12089_v37 = vand.u32 4294901760, %v1080_v47  ;;  %v1237_v29 = vand.u32 4294901760, %v1236_v52 }
 0x1c2   :  { %1936 = vmatpush.msrb.mxu0 %v12072_v27  ;;  %2387 = vmatpush.msra.mxu3 %v12072_v27  ;;  %vm824_vm2 = vcmp.lt.s32.totalorder %v12081_v59, 1 }
 0x1c3   :  { %1531 = vmatmul.f32.gmra.mxu0 %v1228_v42  ;;  %v17996_v21 = vand.u32 4294901760, %v12075_v57  ;;  %v12085_v42 = vsub.f32 %v953_v9, %v12072_v27  ;;  %2271 = vmatpush.msra.mxu2 %v12075_v57  ;;  %v18666_v9 = vand.u32 4294901760, %v11648_v14  ;;  %v12110_v14 = vsel %vm824_vm2, %v18006_v28, %v821_v50 }
 0x1c4   :  { %2149 = vmatpush.msrb.mxu1 %v2148_v15  ;;  %18667 = vst [vmem:[#allocation25_spill] sm:$0xff] %v12110_v14  ;;  %v1238_v62 = vsub.f32 %v1236_v52, %v1237_v29  ;;  %v937_v56 = vmul.f32 %v860_v46, %v12110_v14  ;;  %v18670_v28 = vand.u32 4294901760, %v11763_v39 }
 0x1c5   :  { %1657 = vmatmul.f32.gmra.mxu1 %v1229_v18  ;;  %v2153_v18 = vsub.f32 %v12075_v57, %v17996_v21  ;;  %v18003_v2 = vand.u32 4294901760, %v12085_v42  ;;  %2488 = vmatpush.msra.mxu0 %v18666_v9  ;;  %v1064_v21 = vpop.permute.xlu0 %1063  ;;  %v18668_v9 = vand.u32 4294901760, %v11709_v63 }
 0x1c6   :  { %2274 = vmatpush.msra.mxu2 %v12085_v42  ;;  %v1239_v63 = vand.u32 4294901760, %v1238_v62  ;;  %v18674_v62 = vand.u32 4294901760, %v11863_v0 }
 0x1c7   :  { %v2154_v15 = vand.u32 4294901760, %v2153_v18  ;;  %v2159_v17 = vsub.f32 %v12085_v42, %v18003_v2  ;;  %2492 = vmatpush.msra.mxu0 %v18668_v9  ;;  %v1081_v18 = vmul.f32 %v1064_v21, %v12078_v16  ;;  %v18669_v2 = vand.u32 4294901760, %v11725_v48 }
 0x1c8   :  { %v806_v21 = vrot.slane %v11640_v26, 7  ;;  %v12127_v48 = vand.u32 4294901760, %v937_v56 }
 0x1c9   :  { %1232 = vmatmul.f32.gmra.mxu2 %v1231_v44  ;;  %1409 = vmatmul.f32.gmra.mxu3 %v12052_v35  ;;  %v1244_v44 = vsub.f32 %v1080_v47, %v12089_v37  ;;  %v2160_v35 = vand.u32 4294901760, %v2159_v17  ;;  %v18671_v47 = vand.u32 4294901760, %v11794_v58  ;;  %v865_v58 = vpop.permute.xlu2 %864 }
 0x1ca   :  { %2155 = vmatpush.msrb.mxu1 %v2154_v15  ;;  %2496 = vmatpush.msra.mxu0 %v18669_v2  ;;  %v12132_v39 = vsel %vm824_vm2, %v821_v50, %v806_v21  ;;  %v18679_v15 = vand.u32 4294901760, %v11968_v24 }
 0x1cb   :  { %1536 = vmatmul.f32.gmra.mxu0 %v1236_v52  ;;  %v1245_v9 = vand.u32 4294901760, %v1244_v44  ;;  %v12121_v52 = vand.u32 4294901760, %v1081_v18  ;;  %18672 = vst [vmem:[#allocation38_spill] sm:$0xff] %v12132_v39  ;;  %v938_v50 = vmul.f32 %v865_v58, %v12132_v39 }
 0x1cc   :  { %2161 = vmatpush.msrb.mxu1 %v2160_v35  ;;  %2500 = vmatpush.msra.mxu0 %v18670_v28  ;;  %v18673_v28 = vand.u32 4294901760, %v11823_v11  ;;  %v12142_v35 = vsub.f32 %v937_v56, %v12127_v48  ;;  %v18675_v11 = vand.u32 4294901760, %v11877_v3  ;;  %v18678_v3 = vand.u32 4294901760, %v11939_v7 }
 0x1cd   :  { %1663 = vmatmul.f32.gmra.mxu1 %v1237_v29  ;;  %v1252_v46 = vsub.f32 %v1081_v18, %v12121_v52  ;;  %v12154_v56 = vand.u32 4294901760, %v938_v50  ;;  %v808_v7 = vrot.slane %v11714_v41, 7  ;;  %v18680_v18 = vand.u32 4294901760, %v11997_v4 }
 0x1ce   :  { %2615 = vmatpush.msra.mxu1 %v11637_v53  ;;  %2504 = vmatpush.msra.mxu0 %v18671_v47  ;;  %v1246_v53 = vsub.f32 %v1244_v44, %v1245_v9  ;;  %v18012_v0 = vand.u32 4294901760, %v12142_v35 }
 0x1cf   :  { %v1253_v2 = vand.u32 4294901760, %v1252_v46 }
 0x1d0   :  { %2617 = vmatpush.msra.mxu1 %v11699_v8  ;;  %2508 = vmatpush.msra.mxu0 %v18673_v28  ;;  %v807_v8 = vrot.slane %v11672_v30, 7  ;;  %v1247_v29 = vand.u32 4294901760, %v1246_v53  ;;  %v18684_v53 = vand.u32 4294901760, %v12075_v57 }
 0x1d1   :  { %1240 = vmatmul.f32.gmra.mxu2 %v1239_v63  ;;  %1413 = vmatmul.f32.gmra.mxu3 %v12089_v37  ;;  %v18681_v63 = vand.u32 4294901760, %v12023_v36  ;;  %v875_v36 = vpop.permute.xlu1 %874 }
 0x1d2   :  { %2619 = vmatpush.msra.mxu1 %v11711_v34  ;;  %2512 = vmatpush.msra.mxu0 %v18674_v62  ;;  %v18676_v34 = vand.u32 4294901760, %v11910_v43  ;;  %v870_v43 = vpop.permute.xlu0 %869 }
 0x1d3   :  { %1541 = vmatmul.f32.gmra.mxu0 %v1244_v44  ;;  %v1940_v44 = vsub.f32 %v12142_v35, %v18012_v0 }
 0x1d4   :  { %2621 = vmatpush.msra.mxu1 %v11752_v51  ;;  %2516 = vmatpush.msra.mxu0 %v18675_v11  ;;  %v12158_v51 = vsel %vm824_vm2, %v806_v21, %v807_v8 }
 0x1d5   :  { %1669 = vmatmul.f32.gmra.mxu1 %v1245_v9  ;;  %18677 = vst [vmem:[#allocation40_spill] sm:$0xff] %v12158_v51  ;;  %v939_v17 = vmul.f32 %v870_v43, %v12158_v51  ;;  %v1941_v21 = vand.u32 4294901760, %v1940_v44 }
 0x1d6   :  { %2623 = vmatpush.msra.mxu1 %v11784_v5  ;;  %2520 = vmatpush.msra.mxu0 %v18676_v34  ;;  %v1254_v5 = vsub.f32 %v1252_v46, %v1253_v2 }
 0x1d7   :  { %v12180_v9 = vand.u32 4294901760, %v939_v17 }
 0x1d8   :  { %2625 = vmatpush.msra.mxu1 %v11813_v55  ;;  %2524 = vmatpush.msra.mxu0 %v18678_v3  ;;  %v12171_v55 = vsub.f32 %v938_v50, %v12154_v56 }
 0x1d9   :  { %1248 = vmatmul.f32.gmra.mxu2 %v1247_v29  ;;  %1417 = vmatmul.f32.gmra.mxu3 %v12121_v52 }
 0x1da   :  { %2627 = vmatpush.msra.mxu1 %v11856_v45  ;;  %2528 = vmatpush.msra.mxu0 %v18679_v15  ;;  %v1255_v45 = vand.u32 4294901760, %v1254_v5  ;;  %v18011_v47 = vand.u32 4294901760, %v12171_v55 }
 0x1db   :  { %1546 = vmatmul.f32.gmra.mxu0 %v1252_v46  ;;  %v12197_v46 = vsub.f32 %v939_v17, %v12180_v9 }
 0x1dc   :  { %2629 = vmatpush.msra.mxu1 %v11865_v49  ;;  %2532 = vmatpush.msra.mxu0 %v18680_v18  ;;  %v12186_v49 = vsel %vm824_vm2, %v807_v8, %v808_v7  ;;  %v885_v18 = vpop.permute.xlu0 %884 }
 0x1dd   :  { %1675 = vmatmul.f32.gmra.mxu1 %v1253_v2  ;;  %18682 = vst [vmem:[#allocation39_spill] sm:$0xff] %v12186_v49  ;;  %v940_v58 = vmul.f32 %v875_v36, %v12186_v49  ;;  %v18010_v8 = vand.u32 4294901760, %v12197_v46 }
 0x1de   :  { %2631 = vmatpush.msra.mxu1 %v11900_v1  ;;  %2536 = vmatpush.msra.mxu0 %v18681_v63  ;;  %v18683_v1 = vand.u32 4294901760, %v12050_v40  ;;  %v809_v40 = vrot.slane %v11756_v10, 7 }
 0x1df   :  { %v12209_v62 = vand.u32 4294901760, %v940_v58  ;;  %v1956_v3 = vsub.f32 %v12197_v46, %v18010_v8 }
 0x1e0   :  { %v1472_v24 = vpop.f32.mrf.mxu0  ;;  %2633 = vmatpush.msra.mxu1 %v11929_v6  ;;  %2540 = vmatpush.msra.mxu0 %v18683_v1  ;;  %v1948_v6 = vsub.f32 %v12171_v55, %v18011_v47  ;;  %v12216_v11 = vsel %vm824_vm2, %v808_v7, %v809_v40  ;;  %v811_v1 = vrot.slane %v11816_v19, 7 }
 0x1e1   :  { %1256 = vmatmul.f32.gmra.mxu2 %v1255_v45  ;;  %1841 = vmatmul.f32.vlgmr.msrb.gmra.mxu3 %v11679_v23  ;;  %18686 = vst [vmem:[#allocation45_spill] sm:$0xff] %v12216_v11  ;;  %v12224_v2 = vsub.f32 %v940_v58, %v12209_v62  ;;  %v1957_v15 = vand.u32 4294901760, %v1956_v3 }
 0x1e2   :  { %v12188_v4 = vpop.f32.mrf.mxu1  ;;  %2635 = vmatpush.msra.mxu1 %v11958_v54  ;;  %2544 = vmatpush.msra.mxu0 %v18684_v53  ;;  %v18685_v54 = vand.u32 4294901760, %v12085_v42  ;;  %v1949_v50 = vand.u32 4294901760, %v1948_v6  ;;  %v880_v42 = vpop.permute.xlu2 %879 }
 0x1e3   :  { %1942 = vmatmul.f32.vlgmr.msrb.gmra.mxu0 %v1941_v21  ;;  %v18008_v17 = vand.u32 4294901760, %v12224_v2 }
 0x1e4   :  { %v1358_v28 = vpop.f32.mrf.mxu3  ;;  %2637 = vmatpush.msra.mxu1 %v11987_v32  ;;  %2548 = vmatpush.msra.mxu0 %v18685_v54 }
 0x1e5   :  { %2163 = vmatmul.f32.vlgmr.msrb.gmra.mxu1 %v12127_v48  ;;  %v1964_v21 = vsub.f32 %v12224_v2, %v18008_v17 }
 0x1e6   :  { %2639 = vmatpush.msra.mxu1 %v12017_v33 }
 0x1e7   :  { %v1965_v58 = vand.u32 4294901760, %v1964_v21 }
 0x1e8   :  { %v1477_v57 = vpop.f32.mrf.mxu0  ;;  %2641 = vmatpush.msra.mxu1 %v12044_v12  ;;  %v810_v12 = vrot.slane %v11788_v60, 7 }
 0x1e9   :  { %1744 = vmatmul.f32.vlgmr.msrb.gmra.mxu2 %v11679_v23  ;;  %1845 = vmatmul.f32.gmra.mxu3 %v11675_v61  ;;  %v941_v23 = vmul.f32 %v880_v42, %v12216_v11 }
 0x1ea   :  { %v12218_v32 = vpop.f32.mrf.mxu1  ;;  %2643 = vmatpush.msra.mxu1 %v12062_v31  ;;  %v12241_v44 = vsel %vm824_vm2, %v809_v40, %v810_v12  ;;  %v12263_v40 = vsel %vm824_vm2, %v810_v12, %v811_v1 }
 0x1eb   :  { %1950 = vmatmul.f32.gmra.mxu0 %v1949_v50  ;;  %v12234_v31 = vand.u32 4294901760, %v941_v23  ;;  %18687 = vst [vmem:[#allocation5_spill] sm:$0xff] %v12241_v44  ;;  %v890_v50 = vpop.permute.xlu1 %889 }
 0x1ec   :  { %v1137_v33 = vpop.f32.mrf.mxu2  ;;  %v1362_v29 = vpop.f32.mrf.mxu3  ;;  %2645 = vmatpush.msra.mxu1 %v12072_v27  ;;  %18688 = vst [vmem:[#allocation42_spill] sm:$0xff] %v12263_v40 }
 0x1ed   :  { %v1359_v34 = vadd.f32 %v1358_v28, %v1137_v33  ;;  %2167 = vmatmul.f32.gmra.mxu1 %v12154_v56 }
 0x1ef   :  { %v12232_v5 = vadd.f32 %v1472_v24, %v1359_v34  ;;  %v12246_v24 = vsub.f32 %v941_v23, %v12234_v31  ;;  %v812_v34 = vrot.slane %v11839_v20, 7 }
 0x1f0   :  { %v1482_v43 = vpop.f32.mrf.mxu0 }
 0x1f1   :  { %1748 = vmatmul.f32.gmra.mxu2 %v11675_v61  ;;  %1849 = vmatmul.f32.gmra.mxu3 %v11716_v25  ;;  %v942_v61 = vmul.f32 %v885_v18, %v12241_v44  ;;  %v18007_v6 = vand.u32 4294901760, %v12246_v24 }
 0x1f2   :  { %v12243_v7 = vpop.f32.mrf.mxu1 }
 0x1f3   :  { %1958 = vmatmul.f32.gmra.mxu0 %v1957_v15  ;;  %v12256_v53 = vand.u32 4294901760, %v942_v61  ;;  %v1972_v23 = vsub.f32 %v12246_v24, %v18007_v6 }
 0x1f4   :  { %v1145_v27 = vpop.f32.mrf.mxu2  ;;  %v1366_v45 = vpop.f32.mrf.mxu3 }
 0x1f5   :  { %v1363_v63 = vadd.f32 %v1362_v29, %v1145_v27  ;;  %2171 = vmatmul.f32.gmra.mxu1 %v12180_v9  ;;  %v12268_v33 = vsub.f32 %v942_v61, %v12256_v53  ;;  %v1973_v18 = vand.u32 4294901760, %v1972_v23 }
 0x1f7   :  { %v12254_v36 = vadd.f32 %v1477_v57, %v1363_v63  ;;  %v18009_v27 = vand.u32 4294901760, %v12268_v33  ;;  %v895_v63 = vpop.permute.xlu2 %894 }
 0x1f8   :  { %v1487_v28 = vpop.f32.mrf.mxu0 }
 0x1f9   :  { %1752 = vmatmul.f32.gmra.mxu2 %v11716_v25  ;;  %1853 = vmatmul.f32.gmra.mxu3 %v11759_v22  ;;  %v943_v25 = vmul.f32 %v890_v50, %v12263_v40 }
 0x1fa   :  { %v12265_v54 = vpop.f32.mrf.mxu1 }
 0x1fb   :  { %1966 = vmatmul.f32.gmra.mxu0 %v1965_v58  ;;  %v12278_v15 = vand.u32 4294901760, %v943_v25 }
 0x1fc   :  { %v1153_v57 = vpop.f32.mrf.mxu2  ;;  %v1370_v42 = vpop.f32.mrf.mxu3 }
 0x1fd   :  { %v1367_v29 = vadd.f32 %v1366_v45, %v1153_v57  ;;  %2175 = vmatmul.f32.gmra.mxu1 %v12209_v62  ;;  %v12285_v45 = vsel %vm824_vm2, %v811_v1, %v812_v34  ;;  %v12290_v58 = vsub.f32 %v943_v25, %v12278_v15  ;;  %v1980_v57 = vsub.f32 %v12268_v33, %v18009_v27  ;;  %v18690_v1 = vld [vmem:[#allocation17_spill] sm:$0xff]  ;;  %v18691_v25 = vld [vmem:[#allocation63_spill] sm:$0xff]  ;;  %v900_v27 = vpop.permute.xlu0 %899 }
 0x1fe   :  { %18689 = vst [vmem:[#allocation7_spill] sm:$0xff] %v12285_v45 }
 0x1ff   :  { %v12276_v3 = vadd.f32 %v1482_v43, %v1367_v29  ;;  %v813_v29 = vrot.slane %v18690_v1, 7  ;;  %v1981_v17 = vand.u32 4294901760, %v1980_v57 }
 0x200   :  { %v1492_v12 = vpop.f32.mrf.mxu0 }
 0x201   :  { %1756 = vmatmul.f32.gmra.mxu2 %v11759_v22  ;;  %1857 = vmatmul.f32.gmra.mxu3 %v11790_v38  ;;  %v944_v22 = vmul.f32 %v895_v63, %v12285_v45  ;;  %v12307_v63 = vsel %vm824_vm2, %v812_v34, %v813_v29  ;;  %v18693_v34 = vld [vmem:[#allocation33_spill] sm:$0xff] }
 0x202   :  { %v12287_v61 = vpop.f32.mrf.mxu1  ;;  %18692 = vst [vmem:[#allocation44_spill] sm:$0xff] %v12307_v63  ;;  %v945_v8 = vmul.f32 %v900_v27, %v12307_v63  ;;  %v814_v0 = vrot.slane %v18693_v34, 7  ;;  %v18694_v27 = vld [vmem:[#allocation69_spill] sm:$0xff] }
 0x203   :  { %1974 = vmatmul.f32.gmra.mxu0 %v1973_v18  ;;  %v12300_v18 = vand.u32 4294901760, %v944_v22 }
 0x204   :  { %v1161_v43 = vpop.f32.mrf.mxu2  ;;  %v1374_v21 = vpop.f32.mrf.mxu3 }
 0x205   :  { %v1371_v50 = vadd.f32 %v1370_v42, %v1161_v43  ;;  %2179 = vmatmul.f32.gmra.mxu1 %v12234_v31  ;;  %v18019_v42 = vand.u32 4294901760, %v12290_v58  ;;  %v12313_v47 = vsub.f32 %v944_v22, %v12300_v18 }
 0x207   :  { %v12298_v23 = vadd.f32 %v1487_v28, %v1371_v50  ;;  %v1988_v57 = vsub.f32 %v12290_v58, %v18019_v42  ;;  %v905_v42 = vpop.permute.xlu1 %904 }
 0x208   :  { %v1497_v6 = vpop.f32.mrf.mxu0 }
 0x209   :  { %1760 = vmatmul.f32.gmra.mxu2 %v11790_v38  ;;  %1861 = vmatmul.f32.gmra.mxu3 %v18691_v25  ;;  %v1989_v22 = vand.u32 4294901760, %v1988_v57 }
 0x20a   :  { %v12309_v43 = vpop.f32.mrf.mxu1 }
 0x20b   :  { %1982 = vmatmul.f32.gmra.mxu0 %v1981_v17  ;;  %v12322_v17 = vand.u32 4294901760, %v945_v8 }
 0x20c   :  { %v1169_v28 = vpop.f32.mrf.mxu2  ;;  %v1378_v50 = vpop.f32.mrf.mxu3 }
 0x20d   :  { %v1375_v38 = vadd.f32 %v1374_v21, %v1169_v28  ;;  %2183 = vmatmul.f32.gmra.mxu1 %v12256_v53  ;;  %v18032_v21 = vand.u32 4294901760, %v12313_v47  ;;  %v12329_v28 = vsel %vm824_vm2, %v813_v29, %v814_v0  ;;  %v12334_v40 = vsub.f32 %v945_v8, %v12322_v17  ;;  %v18696_v29 = vld [vmem:[#allocation18_spill] sm:$0xff]  ;;  %v18698_v8 = vld [vmem:[#allocation28_spill] sm:$0xff] }
 0x20e   :  { %18695 = vst [vmem:[#allocation6_spill] sm:$0xff] %v12329_v28  ;;  %v815_v11 = vrot.slane %v18696_v29, 7 }
 0x20f   :  { %v12320_v14 = vadd.f32 %v1492_v12, %v1375_v38  ;;  %v1996_v57 = vsub.f32 %v12313_v47, %v18032_v21  ;;  %v910_v21 = vpop.permute.xlu2 %909 }
 0x210   :  { %v1502_v45 = vpop.f32.mrf.mxu0 }
 0x211   :  { %1764 = vmatmul.f32.gmra.mxu2 %v18691_v25  ;;  %1865 = vmatmul.f32.gmra.mxu3 %v18694_v27  ;;  %v946_v25 = vmul.f32 %v905_v42, %v12329_v28  ;;  %v1997_v39 = vand.u32 4294901760, %v1996_v57  ;;  %v18039_v42 = vand.u32 4294901760, %v12334_v40 }
 0x212   :  { %v12331_v63 = vpop.f32.mrf.mxu1 }
 0x213   :  { %1990 = vmatmul.f32.gmra.mxu0 %v1989_v22  ;;  %v12344_v22 = vand.u32 4294901760, %v946_v25  ;;  %v2004_v57 = vsub.f32 %v12334_v40, %v18039_v42  ;;  %v915_v42 = vpop.permute.xlu0 %914 }
 0x214   :  { %v1177_v12 = vpop.f32.mrf.mxu2  ;;  %v1382_v38 = vpop.f32.mrf.mxu3 }
 0x215   :  { %v1379_v44 = vadd.f32 %v1378_v50, %v1177_v12  ;;  %2187 = vmatmul.f32.gmra.mxu1 %v12278_v15  ;;  %18697 = vst [vmem:[#allocation43_spill] sm:$0xff] %v12344_v22  ;;  %v12351_v50 = vsel %vm824_vm2, %v814_v0, %v815_v11  ;;  %v12356_v28 = vsub.f32 %v946_v25, %v12344_v22  ;;  %v18700_v0 = vld [vmem:[#allocation32_spill] sm:$0xff]  ;;  %v18701_v25 = vld [vmem:[#allocation27_spill] sm:$0xff]  ;;  %v2005_v19 = vand.u32 4294901760, %v2004_v57 }
 0x216   :  { %18699 = vst [vmem:[#allocation49_spill] sm:$0xff] %v12351_v50  ;;  %v816_v34 = vrot.slane %v18700_v0, 7 }
 0x217   :  { %v12342_v49 = vadd.f32 %v1497_v6, %v1379_v44 }
 0x218   :  { %v1507_v51 = vpop.f32.mrf.mxu0 }
 0x219   :  { %1768 = vmatmul.f32.gmra.mxu2 %v18694_v27  ;;  %1869 = vmatmul.f32.gmra.mxu3 %v18698_v8  ;;  %v947_v27 = vmul.f32 %v910_v21, %v12351_v50  ;;  %v18048_v21 = vand.u32 4294901760, %v12356_v28 }
 0x21a   :  { %v12353_v12 = vpop.f32.mrf.mxu1 }
 0x21b   :  { %1998 = vmatmul.f32.gmra.mxu0 %v1997_v39  ;;  %v12366_v39 = vand.u32 4294901760, %v947_v27  ;;  %v2012_v57 = vsub.f32 %v12356_v28, %v18048_v21  ;;  %v920_v21 = vpop.permute.xlu1 %919 }
 0x21c   :  { %v1185_v44 = vpop.f32.mrf.mxu2  ;;  %v1386_v6 = vpop.f32.mrf.mxu3 }
 0x21d   :  { %v1383_v29 = vadd.f32 %v1382_v38, %v1185_v44  ;;  %2191 = vmatmul.f32.gmra.mxu1 %v12300_v18  ;;  %v12373_v38 = vsel %vm824_vm2, %v815_v11, %v816_v34  ;;  %v12379_v0 = vsub.f32 %v947_v27, %v12366_v39  ;;  %v817_v11 = vrot.slane %v11990_v13, 7 }
 0x21e   :  { %18702 = vst [vmem:[#allocation9_spill] sm:$0xff] %v12373_v38  ;;  %v948_v50 = vmul.f32 %v915_v42, %v12373_v38  ;;  %v18705_v42 = vld [vmem:[#allocation30_spill] sm:$0xff]  ;;  %v2013_v27 = vand.u32 4294901760, %v2012_v57 }
 0x21f   :  { %v12364_v1 = vadd.f32 %v1502_v45, %v1383_v29  ;;  %18704 = vst [vmem:[#allocation48_spill] sm:$0xff] %v12379_v0 }
 0x220   :  { %v1512_v20 = vpop.f32.mrf.mxu0 }
 0x221   :  { %1772 = vmatmul.f32.gmra.mxu2 %v18698_v8  ;;  %1873 = vmatmul.f32.gmra.mxu3 %v18701_v25 }
 0x222   :  { %v12375_v44 = vpop.f32.mrf.mxu1 }
 0x223   :  { %18703 = vst [vmem:[#allocation46_spill] sm:$0xff] %v12375_v44  ;;  %2006 = vmatmul.f32.gmra.mxu0 %v2005_v19  ;;  %v12388_v19 = vand.u32 4294901760, %v948_v50 }
 0x224   :  { %v1193_v45 = vpop.f32.mrf.mxu2  ;;  %v1390_v29 = vpop.f32.mrf.mxu3 }
 0x225   :  { %v1387_v8 = vadd.f32 %v1386_v6, %v1193_v45  ;;  %2195 = vmatmul.f32.gmra.mxu1 %v12322_v17  ;;  %v18057_v6 = vand.u32 4294901760, %v12379_v0  ;;  %v12395_v45 = vsel %vm824_vm2, %v816_v34, %v817_v11  ;;  %v12400_v13 = vsub.f32 %v948_v50, %v12388_v19  ;;  %v18709_v34 = vld [vmem:[#allocation22_spill] sm:$0xff]  ;;  %v18711_v50 = vld [vmem:[#allocation21_spill] sm:$0xff] }
 0x226   :  { %18706 = vst [vmem:[#allocation8_spill] sm:$0xff] %v12395_v45  ;;  %v818_v30 = vrot.slane %v18709_v34, 7 }
 0x227   :  { %v12386_v60 = vadd.f32 %v1507_v51, %v1387_v8  ;;  %18708 = vst [vmem:[#allocation53_spill] sm:$0xff] %v12400_v13  ;;  %v2020_v57 = vsub.f32 %v12379_v0, %v18057_v6  ;;  %v925_v6 = vpop.permute.xlu2 %924 }
 0x228   :  { %v1517_v10 = vpop.f32.mrf.mxu0 }
 0x229   :  { %1776 = vmatmul.f32.gmra.mxu2 %v18701_v25  ;;  %1877 = vmatmul.f32.gmra.mxu3 %v18705_v42  ;;  %v949_v25 = vmul.f32 %v920_v21, %v12395_v45  ;;  %v2021_v44 = vand.u32 4294901760, %v2020_v57  ;;  %v18064_v21 = vand.u32 4294901760, %v12400_v13 }
 0x22a   :  { %v12397_v38 = vpop.f32.mrf.mxu1 }
 0x22b   :  { %18707 = vst [vmem:[#allocation47_spill] sm:$0xff] %v12397_v38  ;;  %2014 = vmatmul.f32.gmra.mxu0 %v2013_v27  ;;  %v12410_v27 = vand.u32 4294901760, %v949_v25  ;;  %v2028_v57 = vsub.f32 %v12400_v13, %v18064_v21  ;;  %v930_v21 = vpop.permute.xlu0 %929 }
 0x22c   :  { %v1201_v51 = vpop.f32.mrf.mxu2  ;;  %v1394_v8 = vpop.f32.mrf.mxu3 }
 0x22d   :  { %v1391_v41 = vadd.f32 %v1390_v29, %v1201_v51  ;;  %2199 = vmatmul.f32.gmra.mxu1 %v12344_v22  ;;  %v12417_v29 = vsel %vm824_vm2, %v817_v11, %v818_v30  ;;  %v12422_v45 = vsub.f32 %v949_v25, %v12410_v27  ;;  %v18715_v11 = vld [vmem:[#allocation36_spill] sm:$0xff]  ;;  %v18716_v25 = vld [vmem:[#allocation31_spill] sm:$0xff]  ;;  %v2029_v22 = vand.u32 4294901760, %v2028_v57 }
 0x22e   :  { %18712 = vst [vmem:[#allocation50_spill] sm:$0xff] %v12417_v29  ;;  %v819_v0 = vrot.slane %v18715_v11, 7 }
 0x22f   :  { %v12408_v26 = vadd.f32 %v1512_v20, %v1391_v41  ;;  %18714 = vst [vmem:[#allocation10_spill] sm:$0xff] %v12422_v45 }
 0x230   :  { %v1522_v38 = vpop.f32.mrf.mxu0 }
 0x231   :  { %18710 = vst [vmem:[#allocation11_spill] sm:$0xff] %v12408_v26  ;;  %1780 = vmatmul.f32.gmra.mxu2 %v18705_v42  ;;  %1881 = vmatmul.f32.gmra.mxu3 %v18711_v50  ;;  %v950_v42 = vmul.f32 %v925_v6, %v12417_v29  ;;  %v18071_v6 = vand.u32 4294901760, %v12422_v45 }
 0x232   :  { %v12419_v51 = vpop.f32.mrf.mxu1 }
 0x233   :  { %18713 = vst [vmem:[#allocation52_spill] sm:$0xff] %v12419_v51  ;;  %2022 = vmatmul.f32.gmra.mxu0 %v2021_v44  ;;  %v12432_v44 = vand.u32 4294901760, %v950_v42  ;;  %v2036_v57 = vsub.f32 %v12422_v45, %v18071_v6 }
 0x234   :  { %v1209_v41 = vpop.f32.mrf.mxu2  ;;  %v1398_v20 = vpop.f32.mrf.mxu3 }
 0x235   :  { %v1395_v34 = vadd.f32 %v1394_v8, %v1209_v41  ;;  %2203 = vmatmul.f32.gmra.mxu1 %v12366_v39  ;;  %v12439_v8 = vsel %vm824_vm2, %v818_v30, %v819_v0  ;;  %v12445_v11 = vsub.f32 %v950_v42, %v12432_v44 }
 0x236   :  { %18717 = vst [vmem:[#allocation51_spill] sm:$0xff] %v12439_v8  ;;  %v951_v29 = vmul.f32 %v930_v21, %v12439_v8  ;;  %v2037_v21 = vand.u32 4294901760, %v2036_v57 }
 0x237   :  { %v12430_v26 = vadd.f32 %v1517_v10, %v1395_v34  ;;  %v18078_v42 = vand.u32 4294901760, %v12445_v11 }
 0x238   :  { %v1527_v51 = vpop.f32.mrf.mxu0 }
 0x239   :  { %1784 = vmatmul.f32.gmra.mxu2 %v18711_v50  ;;  %1885 = vmatmul.f32.gmra.mxu3 %v18716_v25 }
 0x23a   :  { %v12441_v41 = vpop.f32.mrf.mxu1 }
 0x23b   :  { %18718 = vst [vmem:[#allocation57_spill] sm:$0xff] %v12441_v41  ;;  %2030 = vmatmul.f32.gmra.mxu0 %v2029_v22  ;;  %v12453_v41 = vand.u32 4294901760, %v951_v29  ;;  %v18719_v22 = vld [vmem:[#allocation34_spill] sm:$0xff] }
 0x23c   :  { %v1217_v10 = vpop.f32.mrf.mxu2  ;;  %v1402_v34 = vpop.f32.mrf.mxu3 }
 0x23d   :  { %v1399_v50 = vadd.f32 %v1398_v20, %v1217_v10  ;;  %2207 = vmatmul.f32.gmra.mxu1 %v12388_v19  ;;  %v18720_v20 = vrot.slane %v12078_v16, 7  ;;  %v12467_v45 = vsub.f32 %v951_v29, %v12453_v41  ;;  %v2044_v16 = vsub.f32 %v12445_v11, %v18078_v42 }
 0x23f   :  { %v12451_v30 = vadd.f32 %v1522_v38, %v1399_v50  ;;  %v12462_v10 = vsel %vm824_vm2, %v819_v0, %v18720_v20  ;;  %v935_v38 = vpop.permute.xlu1 %934  ;;  %18723 = vst [vmem:[#allocation56_spill] sm:$0xff] %v12467_v45  ;;  %v2045_v29 = vand.u32 4294901760, %v2044_v16 }
 0x240   :  { %v1532_v13 = vpop.f32.mrf.mxu0  ;;  %18721 = vst [vmem:[#allocation13_spill] sm:$0xff] %v12462_v10 }
 0x241   :  { %1788 = vmatmul.f32.gmra.mxu2 %v18716_v25  ;;  %1889 = vmatmul.f32.gmra.mxu3 %v18719_v22  ;;  %v952_v25 = vmul.f32 %v935_v38, %v12462_v10 }
 0x242   :  { %v12464_v8 = vpop.f32.mrf.mxu1 }
 0x243   :  { %18722 = vst [vmem:[#allocation54_spill] sm:$0xff] %v12464_v8  ;;  %2038 = vmatmul.f32.gmra.mxu0 %v2037_v21  ;;  %v12476_v59 = vand.u32 4294901760, %v952_v25  ;;  %v18724_v21 = vld [vmem:[#allocation24_spill] sm:$0xff]  ;;  %v18082_v8 = vand.u32 4294901760, %v12467_v45 }
 0x244   :  { %v1225_v50 = vpop.f32.mrf.mxu2  ;;  %v1406_v6 = vpop.f32.mrf.mxu3 }
 0x245   :  { %v1403_v57 = vadd.f32 %v1402_v34, %v1225_v50  ;;  %2211 = vmatmul.f32.gmra.mxu1 %v12410_v27  ;;  %v10112_v34 = vld [vmem:[%s17933_s3 + $0x178] sm:$0xff]  ;;  %v12494_v16 = vsub.f32 %v952_v25, %v12476_v59  ;;  %v2052_v10 = vsub.f32 %v12467_v45, %v18082_v8 }
 0x246   :  { %v12486_v50 = vand.u32 4294901760, %v10112_v34 }
 0x247   :  { %v12474_v0 = vadd.f32 %v1527_v51, %v1403_v57  ;;  %18727 = vst [vmem:[#allocation55_spill] sm:$0xff] %v12494_v16  ;;  %v18086_v25 = vand.u32 4294901760, %v12494_v16 }
 0x248   :  { %v1537_v20 = vpop.f32.mrf.mxu0  ;;  %18726 = vst [vmem:[#allocation62_spill] sm:$0xff] %v12486_v50  ;;  %2875 = vmatpush.msrb.mxu2 %v12486_v50  ;;  %3326 = vmatpush.msrb.mxu1 %v12486_v50 }
 0x249   :  { %1792 = vmatmul.f32.gmra.mxu2 %v18719_v22  ;;  %1893 = vmatmul.f32.gmra.mxu3 %v18724_v21  ;;  %v12490_v22 = vsub.f32 %v10112_v34, %v12486_v50 }
 0x24a   :  { %v12484_v38 = vpop.f32.mrf.mxu1 }
 0x24b   :  { %18725 = vst [vmem:[#allocation12_spill] sm:$0xff] %v12484_v38  ;;  %2046 = vmatmul.f32.gmra.mxu0 %v2045_v29  ;;  %v18085_v29 = vand.u32 4294901760, %v12490_v22 }
 0x24c   :  { %v1233_v51 = vpop.f32.mrf.mxu2  ;;  %v1410_v57 = vpop.f32.mrf.mxu3  ;;  %3198 = vmatpush.msrb.mxu0 %v12490_v22 }
 0x24d   :  { %v1407_v42 = vadd.f32 %v1406_v6, %v1233_v51  ;;  %2215 = vmatmul.f32.gmra.mxu1 %v12432_v44  ;;  %v3038_v50 = vsub.f32 %v12490_v22, %v18085_v29  ;;  %v2053_v6 = vand.u32 4294901760, %v2052_v10  ;;  %v10111_v51 = vld [vmem:[%s17933_s3 + $0x170] sm:$0xff]  ;;  %v2060_v29 = vsub.f32 %v12494_v16, %v18086_v25 }
 0x24f   :  { %v12502_v38 = vadd.f32 %v1532_v13, %v1407_v42  ;;  %v3039_v13 = vand.u32 4294901760, %v3038_v50  ;;  %v12515_v42 = vand.u32 4294901760, %v10111_v51 }
 0x250   :  { %v1542_v34 = vpop.f32.mrf.mxu0 }
 0x251   :  { %18728 = vst [vmem:[#allocation16_spill] sm:$0xff] %v12502_v38  ;;  %1796 = vmatmul.f32.gmra.mxu2 %v18724_v21  ;;  %1897 = vmatmul.f32.gmra.mxu3 %v12089_v37  ;;  %v12519_v21 = vsub.f32 %v10111_v51, %v12515_v42 }
 0x252   :  { %v12513_v8 = vpop.f32.mrf.mxu1  ;;  %3040 = vmatpush.msrb.mxu3 %v3039_v13  ;;  %2877 = vmatpush.msrb.mxu2 %v12515_v42 }
 0x253   :  { %18729 = vst [vmem:[#allocation59_spill] sm:$0xff] %v12513_v8  ;;  %2054 = vmatmul.f32.gmra.mxu0 %v2053_v6  ;;  %v18089_v50 = vand.u32 4294901760, %v12519_v21  ;;  %3328 = vmatpush.msrb.mxu1 %v12515_v42 }
 0x254   :  { %v1241_v45 = vpop.f32.mrf.mxu2  ;;  %v1414_v38 = vpop.f32.mrf.mxu3  ;;  %3201 = vmatpush.msrb.mxu0 %v12519_v21 }
 0x255   :  { %v1411_v10 = vadd.f32 %v1410_v57, %v1241_v45  ;;  %2219 = vmatmul.f32.gmra.mxu1 %v12453_v41  ;;  %v3044_v51 = vsub.f32 %v12519_v21, %v18089_v50  ;;  %v2061_v45 = vand.u32 4294901760, %v2060_v29  ;;  %v10110_v57 = vld [vmem:[%s17933_s3 + $0x168] sm:$0xff] }
 0x256   :  { %v12540_v16 = vand.u32 4294901760, %v10110_v57 }
 0x257   :  { %v12528_v6 = vadd.f32 %v1537_v20, %v1411_v10  ;;  %v3045_v8 = vand.u32 4294901760, %v3044_v51 }
 0x258   :  { %v1547_v13 = vpop.f32.mrf.mxu0  ;;  %2879 = vmatpush.msrb.mxu2 %v12540_v16  ;;  %3330 = vmatpush.msrb.mxu1 %v12540_v16 }
 0x259   :  { %1800 = vmatmul.f32.gmra.mxu2 %v12089_v37  ;;  %1901 = vmatmul.f32.gmra.mxu3 %v12121_v52  ;;  %v12544_v37 = vsub.f32 %v10110_v57, %v12540_v16  ;;  %v10109_v57 = vld [vmem:[%s17933_s3 + $0x160] sm:$0xff] }
 0x25a   :  { %v12538_v25 = vpop.f32.mrf.mxu1  ;;  %3046 = vmatpush.msrb.mxu3 %v3045_v8 }
 0x25b   :  { %18730 = vst [vmem:[#allocation61_spill] sm:$0xff] %v12538_v25  ;;  %2062 = vmatmul.f32.gmra.mxu0 %v2061_v45  ;;  %v18090_v29 = vand.u32 4294901760, %v12544_v37 }
 0x25c   :  { %v1249_v20 = vpop.f32.mrf.mxu2  ;;  %v1418_v10 = vpop.f32.mrf.mxu3  ;;  %3204 = vmatpush.msrb.mxu0 %v12544_v37 }
 0x25d   :  { %v1415_v50 = vadd.f32 %v1414_v38, %v1249_v20  ;;  %2223 = vmatmul.f32.gmra.mxu1 %v12476_v59  ;;  %v3050_v8 = vsub.f32 %v12544_v37, %v18090_v29  ;;  %v18732_v38 = vand.u32 4294901760, %v12142_v35 }
 0x25f   :  { %v12550_v51 = vadd.f32 %v1542_v34, %v1415_v50  ;;  %v3051_v25 = vand.u32 4294901760, %v3050_v8  ;;  %v12565_v34 = vand.u32 4294901760, %v10109_v57 }
 0x260   :  { %v12552_v45 = vpop.f32.mrf.mxu0 }
 0x261   :  { %18731 = vst [vmem:[#allocation15_spill] sm:$0xff] %v12552_v45  ;;  %1804 = vmatmul.f32.gmra.mxu2 %v12121_v52  ;;  %2391 = vmatmul.f32.vlgmr.msra.gmra.mxu3 %v18732_v38  ;;  %v12570_v52 = vsub.f32 %v10109_v57, %v12565_v34 }
 0x262   :  { %v12563_v20 = vpop.f32.mrf.mxu1  ;;  %3052 = vmatpush.msrb.mxu3 %v3051_v25  ;;  %2881 = vmatpush.msrb.mxu2 %v12565_v34 }
 0x263   :  { %18733 = vst [vmem:[#allocation60_spill] sm:$0xff] %v12563_v20  ;;  %2550 = vmatmul.f32.vlgmr.msra.gmra.mxu0 %v12127_v48  ;;  %v18091_v29 = vand.u32 4294901760, %v12570_v52  ;;  %3332 = vmatpush.msrb.mxu1 %v12565_v34 }
 0x264   :  { %v1257_v50 = vpop.f32.mrf.mxu2  ;;  %v1842_v45 = vpop.f32.mrf.mxu3  ;;  %3207 = vmatpush.msrb.mxu0 %v12570_v52 }
 0x265   :  { %v1419_v38 = vadd.f32 %v1418_v10, %v1257_v50  ;;  %2647 = vmatmul.f32.vlgmr.msra.gmra.mxu1 %v12127_v48  ;;  %v3056_v25 = vsub.f32 %v12570_v52, %v18091_v29  ;;  %v18735_v10 = vand.u32 4294901760, %v12171_v55  ;;  %v10108_v48 = vld [vmem:[%s17933_s3 + $0x158] sm:$0xff] }
 0x267   :  { %v12576_v8 = vadd.f32 %v1547_v13, %v1419_v38  ;;  %v3057_v50 = vand.u32 4294901760, %v3056_v25  ;;  %v12591_v13 = vand.u32 4294901760, %v10108_v48  ;;  %v1587_v38 = vadd.f32 %v12188_v4, %v12232_v5 }
 0x268   :  { %v12578_v20 = vpop.f32.mrf.mxu0 }
 0x269   :  { %18734 = vst [vmem:[#allocation68_spill] sm:$0xff] %v12578_v20  ;;  %2277 = vmatmul.f32.vlgmr.msra.gmra.mxu2 %v12142_v35  ;;  %2397 = vmatmul.f32.gmra.mxu3 %v18735_v10  ;;  %v12598_v35 = vsub.f32 %v10108_v48, %v12591_v13 }
 0x26a   :  { %v12589_v57 = vpop.f32.mrf.mxu1  ;;  %3058 = vmatpush.msrb.mxu3 %v3057_v50  ;;  %2883 = vmatpush.msrb.mxu2 %v12591_v13 }
 0x26b   :  { %18736 = vst [vmem:[#allocation20_spill] sm:$0xff] %v12589_v57  ;;  %2554 = vmatmul.f32.gmra.mxu0 %v12154_v56  ;;  %v18092_v25 = vand.u32 4294901760, %v12598_v35  ;;  %3334 = vmatpush.msrb.mxu1 %v12591_v13 }
 0x26c   :  { %v1745_v29 = vpop.f32.mrf.mxu2  ;;  %v1846_v20 = vpop.f32.mrf.mxu3  ;;  %3210 = vmatpush.msrb.mxu0 %v12598_v35 }
 0x26d   :  { %v1746_v10 = vadd.f32 %v1745_v29, %v1587_v38  ;;  %2651 = vmatmul.f32.gmra.mxu1 %v12154_v56  ;;  %v3062_v5 = vsub.f32 %v12598_v35, %v18092_v25  ;;  %v18737_v29 = vand.u32 4294901760, %v12197_v46  ;;  %v10107_v56 = vld [vmem:[%s17933_s3 + $0x150] sm:$0xff]  ;;  %v1593_v38 = vadd.f32 %v12218_v32, %v12254_v36 }
 0x26f   :  { %v12604_v57 = vadd.f32 %v1842_v45, %v1746_v10  ;;  %v3063_v50 = vand.u32 4294901760, %v3062_v5  ;;  %v12619_v45 = vand.u32 4294901760, %v10107_v56 }
 0x270   :  { %v12606_v4 = vpop.f32.mrf.mxu0 }
 0x271   :  { %2282 = vmatmul.f32.gmra.mxu2 %v12171_v55  ;;  %2403 = vmatmul.f32.gmra.mxu3 %v18737_v29  ;;  %v12626_v55 = vsub.f32 %v10107_v56, %v12619_v45  ;;  %v18739_v56 = vand.u32 4294901760, %v12224_v2 }
 0x272   :  { %v12617_v48 = vpop.f32.mrf.mxu1  ;;  %3064 = vmatpush.msrb.mxu3 %v3063_v50  ;;  %2885 = vmatpush.msrb.mxu2 %v12619_v45 }
 0x273   :  { %18738 = vst [vmem:[#allocation64_spill] sm:$0xff] %v12617_v48  ;;  %2558 = vmatmul.f32.gmra.mxu0 %v12180_v9  ;;  %v18093_v5 = vand.u32 4294901760, %v12626_v55  ;;  %3336 = vmatpush.msrb.mxu1 %v12619_v45 }
 0x274   :  { %v1749_v10 = vpop.f32.mrf.mxu2  ;;  %v1850_v25 = vpop.f32.mrf.mxu3  ;;  %3213 = vmatpush.msrb.mxu0 %v12626_v55 }
 0x275   :  { %v1750_v29 = vadd.f32 %v1749_v10, %v1593_v38  ;;  %2655 = vmatmul.f32.gmra.mxu1 %v12180_v9  ;;  %v3068_v36 = vsub.f32 %v12626_v55, %v18093_v5  ;;  %v10106_v9 = vld [vmem:[%s17933_s3 + $0x148] sm:$0xff]  ;;  %v1599_v10 = vadd.f32 %v12243_v7, %v12276_v3 }
 0x277   :  { %v12632_v48 = vadd.f32 %v1846_v20, %v1750_v29  ;;  %v3069_v38 = vand.u32 4294901760, %v3068_v36  ;;  %v12647_v20 = vand.u32 4294901760, %v10106_v9 }
 0x278   :  { %v12634_v32 = vpop.f32.mrf.mxu0 }
 0x279   :  { %2287 = vmatmul.f32.gmra.mxu2 %v12197_v46  ;;  %2409 = vmatmul.f32.gmra.mxu3 %v18739_v56  ;;  %v12654_v46 = vsub.f32 %v10106_v9, %v12647_v20  ;;  %v18741_v9 = vand.u32 4294901760, %v12246_v24 }
 0x27a   :  { %v12645_v50 = vpop.f32.mrf.mxu1  ;;  %3070 = vmatpush.msrb.mxu3 %v3069_v38  ;;  %2887 = vmatpush.msrb.mxu2 %v12647_v20 }
 0x27b   :  { %18740 = vst [vmem:[#allocation19_spill] sm:$0xff] %v12645_v50  ;;  %2562 = vmatmul.f32.gmra.mxu0 %v12209_v62  ;;  %v18094_v36 = vand.u32 4294901760, %v12654_v46  ;;  %3338 = vmatpush.msrb.mxu1 %v12647_v20 }
 0x27c   :  { %v1753_v29 = vpop.f32.mrf.mxu2  ;;  %v1854_v5 = vpop.f32.mrf.mxu3  ;;  %3216 = vmatpush.msrb.mxu0 %v12654_v46 }
 0x27d   :  { %v1754_v56 = vadd.f32 %v1753_v29, %v1599_v10  ;;  %2659 = vmatmul.f32.gmra.mxu1 %v12209_v62  ;;  %v3074_v3 = vsub.f32 %v12654_v46, %v18094_v36  ;;  %v10105_v62 = vld [vmem:[%s17933_s3 + $0x140] sm:$0xff]  ;;  %v1605_v29 = vadd.f32 %v12265_v54, %v12298_v23 }
 0x27f   :  { %v12660_v50 = vadd.f32 %v1850_v25, %v1754_v56  ;;  %v3075_v10 = vand.u32 4294901760, %v3074_v3  ;;  %v12675_v25 = vand.u32 4294901760, %v10105_v62 }
 0x280   :  { %v12662_v7 = vpop.f32.mrf.mxu0 }
 0x281   :  { %2292 = vmatmul.f32.gmra.mxu2 %v12224_v2  ;;  %2415 = vmatmul.f32.gmra.mxu3 %v18741_v9  ;;  %v12682_v2 = vsub.f32 %v10105_v62, %v12675_v25  ;;  %v18743_v62 = vand.u32 4294901760, %v12268_v33 }
 0x282   :  { %v12673_v38 = vpop.f32.mrf.mxu1  ;;  %3076 = vmatpush.msrb.mxu3 %v3075_v10  ;;  %2889 = vmatpush.msrb.mxu2 %v12675_v25 }
 0x283   :  { %18742 = vst [vmem:[#allocation67_spill] sm:$0xff] %v12673_v38  ;;  %2566 = vmatmul.f32.gmra.mxu0 %v12234_v31  ;;  %v18095_v3 = vand.u32 4294901760, %v12682_v2  ;;  %3340 = vmatpush.msrb.mxu1 %v12675_v25 }
 0x284   :  { %v1757_v56 = vpop.f32.mrf.mxu2  ;;  %v1858_v36 = vpop.f32.mrf.mxu3  ;;  %3219 = vmatpush.msrb.mxu0 %v12682_v2 }
 0x285   :  { %v1758_v9 = vadd.f32 %v1757_v56, %v1605_v29  ;;  %2663 = vmatmul.f32.gmra.mxu1 %v12234_v31  ;;  %v3080_v23 = vsub.f32 %v12682_v2, %v18095_v3  ;;  %v10104_v31 = vld [vmem:[%s17933_s3 + $0x138] sm:$0xff]  ;;  %v1611_v56 = vadd.f32 %v12287_v61, %v12320_v14 }
 0x287   :  { %v12688_v38 = vadd.f32 %v1854_v5, %v1758_v9  ;;  %v3081_v29 = vand.u32 4294901760, %v3080_v23  ;;  %v12703_v5 = vand.u32 4294901760, %v10104_v31 }
 0x288   :  { %v12690_v54 = vpop.f32.mrf.mxu0 }
 0x289   :  { %2297 = vmatmul.f32.gmra.mxu2 %v12246_v24  ;;  %2421 = vmatmul.f32.gmra.mxu3 %v18743_v62  ;;  %v12710_v24 = vsub.f32 %v10104_v31, %v12703_v5  ;;  %v18745_v31 = vand.u32 4294901760, %v12290_v58 }
 0x28a   :  { %v12701_v10 = vpop.f32.mrf.mxu1  ;;  %3082 = vmatpush.msrb.mxu3 %v3081_v29  ;;  %2891 = vmatpush.msrb.mxu2 %v12703_v5 }
 0x28b   :  { %18744 = vst [vmem:[#allocation66_spill] sm:$0xff] %v12701_v10  ;;  %2570 = vmatmul.f32.gmra.mxu0 %v12256_v53  ;;  %v18096_v23 = vand.u32 4294901760, %v12710_v24  ;;  %3342 = vmatpush.msrb.mxu1 %v12703_v5 }
 0x28c   :  { %v1761_v9 = vpop.f32.mrf.mxu2  ;;  %v1862_v3 = vpop.f32.mrf.mxu3  ;;  %3222 = vmatpush.msrb.mxu0 %v12710_v24 }
 0x28d   :  { %v1762_v62 = vadd.f32 %v1761_v9, %v1611_v56  ;;  %2667 = vmatmul.f32.gmra.mxu1 %v12256_v53  ;;  %v3086_v61 = vsub.f32 %v12710_v24, %v18096_v23  ;;  %v10103_v53 = vld [vmem:[%s17933_s3 + $0x130] sm:$0xff]  ;;  %v1617_v9 = vadd.f32 %v12309_v43, %v12342_v49 }
 0x28f   :  { %v12716_v10 = vadd.f32 %v1858_v36, %v1762_v62  ;;  %v3087_v56 = vand.u32 4294901760, %v3086_v61  ;;  %v12731_v36 = vand.u32 4294901760, %v10103_v53 }
 0x290   :  { %v12718_v14 = vpop.f32.mrf.mxu0 }
 0x291   :  { %2302 = vmatmul.f32.gmra.mxu2 %v12268_v33  ;;  %2427 = vmatmul.f32.gmra.mxu3 %v18745_v31  ;;  %v12738_v33 = vsub.f32 %v10103_v53, %v12731_v36  ;;  %v18748_v53 = vand.u32 4294901760, %v12313_v47 }
 0x292   :  { %v12729_v29 = vpop.f32.mrf.mxu1  ;;  %3088 = vmatpush.msrb.mxu3 %v3087_v56  ;;  %2893 = vmatpush.msrb.mxu2 %v12731_v36 }
 0x293   :  { %18746 = vst [vmem:[#allocation23_spill] sm:$0xff] %v12729_v29  ;;  %2574 = vmatmul.f32.gmra.mxu0 %v12278_v15  ;;  %v18097_v61 = vand.u32 4294901760, %v12738_v33  ;;  %3344 = vmatpush.msrb.mxu1 %v12731_v36 }
 0x294   :  { %v1765_v62 = vpop.f32.mrf.mxu2  ;;  %v1866_v23 = vpop.f32.mrf.mxu3  ;;  %3225 = vmatpush.msrb.mxu0 %v12738_v33 }
 0x295   :  { %v1766_v31 = vadd.f32 %v1765_v62, %v1617_v9  ;;  %2671 = vmatmul.f32.gmra.mxu1 %v12278_v15  ;;  %v3092_v43 = vsub.f32 %v12738_v33, %v18097_v61  ;;  %v10102_v15 = vld [vmem:[%s17933_s3 + $0x128] sm:$0xff]  ;;  %v1623_v62 = vadd.f32 %v12331_v63, %v12364_v1 }
 0x297   :  { %v12744_v29 = vadd.f32 %v1862_v3, %v1766_v31  ;;  %v3093_v9 = vand.u32 4294901760, %v3092_v43  ;;  %v12759_v3 = vand.u32 4294901760, %v10102_v15 }
 0x298   :  { %v12746_v49 = vpop.f32.mrf.mxu0 }
 0x299   :  { %18747 = vst [vmem:[#allocation70_spill] sm:$0xff] %v12746_v49  ;;  %2307 = vmatmul.f32.gmra.mxu2 %v12290_v58  ;;  %2433 = vmatmul.f32.gmra.mxu3 %v18748_v53  ;;  %v12766_v58 = vsub.f32 %v10102_v15, %v12759_v3  ;;  %v18751_v15 = vand.u32 4294901760, %v12334_v40 }
 0x29a   :  { %v12757_v56 = vpop.f32.mrf.mxu1  ;;  %3094 = vmatpush.msrb.mxu3 %v3093_v9  ;;  %2895 = vmatpush.msrb.mxu2 %v12759_v3 }
 0x29b   :  { %18749 = vst [vmem:[#allocation71_spill] sm:$0xff] %v12757_v56  ;;  %2578 = vmatmul.f32.gmra.mxu0 %v12300_v18  ;;  %v18098_v43 = vand.u32 4294901760, %v12766_v58  ;;  %3346 = vmatpush.msrb.mxu1 %v12759_v3 }
 0x29c   :  { %v1769_v31 = vpop.f32.mrf.mxu2  ;;  %v1870_v61 = vpop.f32.mrf.mxu3  ;;  %3228 = vmatpush.msrb.mxu0 %v12766_v58 }
 0x29d   :  { %v1770_v53 = vadd.f32 %v1769_v31, %v1623_v62  ;;  %2675 = vmatmul.f32.gmra.mxu1 %v12300_v18  ;;  %v3098_v63 = vsub.f32 %v12766_v58, %v18098_v43  ;;  %v10101_v18 = vld [vmem:[%s17933_s3 + $0x120] sm:$0xff]  ;;  %v1629_v31 = vadd.f32 %v12353_v12, %v12386_v60 }
 0x29f   :  { %v12772_v56 = vadd.f32 %v1866_v23, %v1770_v53  ;;  %v3099_v62 = vand.u32 4294901760, %v3098_v63  ;;  %v12787_v23 = vand.u32 4294901760, %v10101_v18 }
 0x2a0   :  { %v12774_v1 = vpop.f32.mrf.mxu0 }
 0x2a1   :  { %18750 = vst [vmem:[#allocation63_spill] sm:$0xff] %v12774_v1  ;;  %2312 = vmatmul.f32.gmra.mxu2 %v12313_v47  ;;  %2439 = vmatmul.f32.gmra.mxu3 %v18751_v15  ;;  %v12794_v47 = vsub.f32 %v10101_v18, %v12787_v23  ;;  %v18754_v18 = vand.u32 4294901760, %v12356_v28 }
 0x2a2   :  { %v12785_v9 = vpop.f32.mrf.mxu1  ;;  %3100 = vmatpush.msrb.mxu3 %v3099_v62  ;;  %2897 = vmatpush.msrb.mxu2 %v12787_v23 }
 0x2a3   :  { %18752 = vst [vmem:[#allocation69_spill] sm:$0xff] %v12785_v9  ;;  %2582 = vmatmul.f32.gmra.mxu0 %v12322_v17  ;;  %v18099_v63 = vand.u32 4294901760, %v12794_v47  ;;  %3348 = vmatpush.msrb.mxu1 %v12787_v23 }
 0x2a4   :  { %v1773_v53 = vpop.f32.mrf.mxu2  ;;  %v1874_v43 = vpop.f32.mrf.mxu3  ;;  %3231 = vmatpush.msrb.mxu0 %v12794_v47 }
 0x2a5   :  { %v1774_v15 = vadd.f32 %v1773_v53, %v1629_v31  ;;  %2679 = vmatmul.f32.gmra.mxu1 %v12322_v17  ;;  %v3104_v12 = vsub.f32 %v12794_v47, %v18099_v63  ;;  %v10100_v17 = vld [vmem:[%s17933_s3 + $0x118] sm:$0xff]  ;;  %v18756_v53 = vld [vmem:[#allocation43_spill] sm:$0xff] }
 0x2a7   :  { %v12800_v9 = vadd.f32 %v1870_v61, %v1774_v15  ;;  %v3105_v31 = vand.u32 4294901760, %v3104_v12  ;;  %v12815_v61 = vand.u32 4294901760, %v10100_v17  ;;  %v18757_v15 = vld [vmem:[#allocation11_spill] sm:$0xff] }
 0x2a8   :  { %v12802_v60 = vpop.f32.mrf.mxu0 }
 0x2a9   :  { %18753 = vst [vmem:[#allocation28_spill] sm:$0xff] %v12802_v60  ;;  %2317 = vmatmul.f32.gmra.mxu2 %v12334_v40  ;;  %2445 = vmatmul.f32.gmra.mxu3 %v18754_v18  ;;  %v18758_v60 = vld [vmem:[#allocation46_spill] sm:$0xff]  ;;  %v12822_v40 = vsub.f32 %v10100_v17, %v12815_v61  ;;  %v18761_v17 = vld [vmem:[#allocation48_spill] sm:$0xff] }
 0x2aa   :  { %v12813_v62 = vpop.f32.mrf.mxu1  ;;  %v1635_v1 = vadd.f32 %v18758_v60, %v18757_v15  ;;  %3106 = vmatpush.msrb.mxu3 %v3105_v31  ;;  %2899 = vmatpush.msrb.mxu2 %v12815_v61 }
 0x2ab   :  { %18755 = vst [vmem:[#allocation27_spill] sm:$0xff] %v12813_v62  ;;  %2586 = vmatmul.f32.gmra.mxu0 %v18756_v53  ;;  %v18100_v12 = vand.u32 4294901760, %v12822_v40  ;;  %3350 = vmatpush.msrb.mxu1 %v12815_v61 }
 0x2ac   :  { %v1777_v63 = vpop.f32.mrf.mxu2  ;;  %v1878_v49 = vpop.f32.mrf.mxu3  ;;  %3234 = vmatpush.msrb.mxu0 %v12822_v40 }
 0x2ad   :  { %v1778_v18 = vadd.f32 %v1777_v63, %v1635_v1  ;;  %2683 = vmatmul.f32.gmra.mxu1 %v18756_v53  ;;  %v3110_v31 = vsub.f32 %v12822_v40, %v18100_v12  ;;  %v18762_v1 = vand.u32 4294901760, %v18761_v17  ;;  %v10099_v63 = vld [vmem:[%s17933_s3 + $0x110] sm:$0xff] }
 0x2af   :  { %v12828_v62 = vadd.f32 %v1874_v43, %v1778_v18  ;;  %v3111_v15 = vand.u32 4294901760, %v3110_v31  ;;  %v12843_v43 = vand.u32 4294901760, %v10099_v63  ;;  %v18764_v18 = vld [vmem:[#allocation47_spill] sm:$0xff] }
 0x2b0   :  { %v12830_v60 = vpop.f32.mrf.mxu0 }
 0x2b1   :  { %18759 = vst [vmem:[#allocation30_spill] sm:$0xff] %v12828_v62  ;;  %2322 = vmatmul.f32.gmra.mxu2 %v12356_v28  ;;  %2451 = vmatmul.f32.gmra.mxu3 %v18762_v1  ;;  %v12850_v28 = vsub.f32 %v10099_v63, %v12843_v43  ;;  %v18767_v63 = vld [vmem:[#allocation53_spill] sm:$0xff] }
 0x2b2   :  { %18760 = vst [vmem:[#allocation21_spill] sm:$0xff] %v12830_v60  ;;  %v12841_v53 = vpop.f32.mrf.mxu1  ;;  %v1641_v60 = vadd.f32 %v18764_v18, %v12430_v26  ;;  %3112 = vmatpush.msrb.mxu3 %v3111_v15  ;;  %2901 = vmatpush.msrb.mxu2 %v12843_v43 }
 0x2b3   :  { %18763 = vst [vmem:[#allocation31_spill] sm:$0xff] %v12841_v53  ;;  %2590 = vmatmul.f32.gmra.mxu0 %v12366_v39  ;;  %v18101_v31 = vand.u32 4294901760, %v12850_v28  ;;  %3352 = vmatpush.msrb.mxu1 %v12843_v43 }
 0x2b4   :  { %v1781_v12 = vpop.f32.mrf.mxu2  ;;  %v1882_v62 = vpop.f32.mrf.mxu3  ;;  %3237 = vmatpush.msrb.mxu0 %v12850_v28 }
 0x2b5   :  { %v1782_v1 = vadd.f32 %v1781_v12, %v1641_v60  ;;  %2687 = vmatmul.f32.gmra.mxu1 %v12366_v39  ;;  %v3116_v15 = vsub.f32 %v12850_v28, %v18101_v31  ;;  %v18768_v12 = vand.u32 4294901760, %v18767_v63  ;;  %v10098_v39 = vld [vmem:[%s17933_s3 + $0x108] sm:$0xff] }
 0x2b7   :  { %v12856_v53 = vadd.f32 %v1878_v49, %v1782_v1  ;;  %v3117_v18 = vand.u32 4294901760, %v3116_v15  ;;  %v12871_v49 = vand.u32 4294901760, %v10098_v39  ;;  %v18770_v1 = vld [vmem:[#allocation52_spill] sm:$0xff] }
 0x2b8   :  { %v12858_v26 = vpop.f32.mrf.mxu0 }
 0x2b9   :  { %18765 = vst [vmem:[#allocation34_spill] sm:$0xff] %v12856_v53  ;;  %2327 = vmatmul.f32.gmra.mxu2 %v18761_v17  ;;  %2457 = vmatmul.f32.gmra.mxu3 %v18768_v12  ;;  %v12878_v17 = vsub.f32 %v10098_v39, %v12871_v49 }
 0x2ba   :  { %18766 = vst [vmem:[#allocation24_spill] sm:$0xff] %v12858_v26  ;;  %v12869_v60 = vpop.f32.mrf.mxu1  ;;  %v1647_v26 = vadd.f32 %v18770_v1, %v12451_v30  ;;  %3118 = vmatpush.msrb.mxu3 %v3117_v18  ;;  %2903 = vmatpush.msrb.mxu2 %v12871_v49 }
 0x2bb   :  { %18769 = vst [vmem:[#allocation43_spill] sm:$0xff] %v12869_v60  ;;  %2594 = vmatmul.f32.gmra.mxu0 %v12388_v19  ;;  %v18102_v15 = vand.u32 4294901760, %v12878_v17  ;;  %3354 = vmatpush.msrb.mxu1 %v12871_v49 }
 0x2bc   :  { %v1785_v31 = vpop.f32.mrf.mxu2  ;;  %v1886_v53 = vpop.f32.mrf.mxu3  ;;  %3240 = vmatpush.msrb.mxu0 %v12878_v17 }
 0x2bd   :  { %v1786_v12 = vadd.f32 %v1785_v31, %v1647_v26  ;;  %2691 = vmatmul.f32.gmra.mxu1 %v12388_v19  ;;  %v3122_v18 = vsub.f32 %v12878_v17, %v18102_v15  ;;  %v10097_v31 = vld [vmem:[%s17933_s3 + $0x100] sm:$0xff]  ;;  %v18773_v19 = vld [vmem:[#allocation10_spill] sm:$0xff] }
 0x2be   :  { %v18774_v26 = vand.u32 4294901760, %v18773_v19  ;;  %v12897_v39 = vand.u32 4294901760, %v10097_v31 }
 0x2bf   :  { %v12884_v60 = vadd.f32 %v1882_v62, %v1786_v12  ;;  %v3123_v62 = vand.u32 4294901760, %v3122_v18  ;;  %v18776_v12 = vld [vmem:[#allocation57_spill] sm:$0xff] }
 0x2c0   :  { %v12886_v30 = vpop.f32.mrf.mxu0  ;;  %v12905_v15 = vsub.f32 %v10097_v31, %v12897_v39  ;;  %2905 = vmatpush.msrb.mxu2 %v12897_v39  ;;  %3356 = vmatpush.msrb.mxu1 %v12897_v39 }
 0x2c1   :  { %18771 = vst [vmem:[#allocation11_spill] sm:$0xff] %v12884_v60  ;;  %2332 = vmatmul.f32.gmra.mxu2 %v18767_v63  ;;  %2463 = vmatmul.f32.gmra.mxu3 %v18774_v26 }
 0x2c2   :  { %18772 = vst [vmem:[#allocation46_spill] sm:$0xff] %v12886_v30  ;;  %v12899_v1 = vpop.f32.mrf.mxu1  ;;  %v1653_v30 = vadd.f32 %v18776_v12, %v12474_v0  ;;  %3124 = vmatpush.msrb.mxu3 %v3123_v62  ;;  %v18103_v18 = vand.u32 4294901760, %v12905_v15  ;;  %3243 = vmatpush.msrb.mxu0 %v12905_v15  ;;  %v18779_v62 = vand.u32 4294901760, %v12519_v21 }
 0x2c3   :  { %18775 = vst [vmem:[#allocation48_spill] sm:$0xff] %v12899_v1  ;;  %2598 = vmatmul.f32.gmra.mxu0 %v12410_v27  ;;  %v18777_v1 = vand.u32 4294901760, %v12490_v22  ;;  %v18782_v22 = vand.u32 4294901760, %v12544_v37  ;;  %v18788_v37 = vld [vmem:[#allocation72_spill] sm:$0xff] }
 0x2c4   :  { %v1789_v60 = vpop.f32.mrf.mxu2  ;;  %v1890_v63 = vpop.f32.mrf.mxu3  ;;  %v3128_v31 = vsub.f32 %v12905_v15, %v18103_v18  ;;  %v18785_v18 = vld [vmem:[#allocation73_spill] sm:$0xff] }
 0x2c5   :  { %v1790_v26 = vadd.f32 %v1789_v60, %v1653_v30  ;;  %2695 = vmatmul.f32.gmra.mxu1 %v12410_v27  ;;  %3457 = vmatpush.msra.mxu2 %v18777_v1  ;;  %v18780_v27 = vand.u32 4294901760, %v12445_v11  ;;  %v18784_v1 = vld [vmem:[#allocation54_spill] sm:$0xff]  ;;  %v18105_v21 = vrot.slane %v18785_v18, 1 }
 0x2c6   :  { %v3129_v60 = vand.u32 4294901760, %v3128_v31 }
 0x2c7   :  { %v12914_v0 = vadd.f32 %v1886_v53, %v1790_v26  ;;  %3461 = vmatpush.msra.mxu2 %v18779_v62  ;;  %v18783_v53 = vld [vmem:[#allocation16_spill] sm:$0xff] }
 0x2c8   :  { %v12919_v12 = vpop.f32.mrf.mxu0  ;;  %v1659_v26 = vadd.f32 %v18784_v1, %v18783_v53  ;;  %3130 = vmatpush.msrb.mxu3 %v3129_v60  ;;  %v18790_v60 = vld [vmem:[#allocation41_spill] sm:$0xff] }
 0x2c9   :  { %18778 = vst [vmem:[#allocation47_spill] sm:$0xff] %v12919_v12  ;;  %2337 = vmatmul.f32.gmra.mxu2 %v18773_v19  ;;  %2469 = vmatmul.f32.gmra.mxu3 %v18780_v27  ;;  %v18786_v19 = vld [vmem:[#allocation62_spill] sm:$0xff]  ;;  %v18787_v27 = vand.u32 4294901760, %v12570_v52  ;;  %vm2727_vm3 = vcmp.lt.s32.totalorder %v18790_v60, 7 }
 0x2ca   :  { %v12926_v30 = vpop.f32.mrf.mxu1  ;;  %3465 = vmatpush.msra.mxu2 %v18782_v22  ;;  %3584 = vmatpush.msra.mxu3 %v18786_v19  ;;  %v2711_v22 = vrot.slane %v18788_v37, 1 }
 0x2cb   :  { %18781 = vst [vmem:[#allocation53_spill] sm:$0xff] %v12926_v30  ;;  %2602 = vmatmul.f32.gmra.mxu0 %v12432_v44  ;;  %v18789_v30 = vand.u32 4294901760, %v12598_v35 }
 0x2cc   :  { %v1793_v62 = vpop.f32.mrf.mxu2  ;;  %v1894_v12 = vpop.f32.mrf.mxu3  ;;  %3469 = vmatpush.msra.mxu2 %v18787_v27  ;;  %3586 = vmatpush.msra.mxu3 %v12515_v42  ;;  %v12949_v52 = vsel %vm2727_vm3, %v18105_v21, %v2711_v22  ;;  %v18793_v42 = vld [vmem:[#allocation56_spill] sm:$0xff] }
 0x2cd   :  { %v1794_v31 = vadd.f32 %v1793_v62, %v1659_v26  ;;  %2699 = vmatmul.f32.gmra.mxu1 %v12432_v44  ;;  %18791 = vst [vmem:[#allocation52_spill] sm:$0xff] %v12949_v52  ;;  %v18792_v44 = vand.u32 4294901760, %v12626_v55  ;;  %v18794_v35 = vand.u32 4294901760, %v18793_v42  ;;  %v18795_v26 = vand.u32 4294901760, %v12654_v46  ;;  %v18796_v62 = vld [vmem:[#allocation74_spill] sm:$0xff]  ;;  %v18797_v55 = vld [vmem:[#allocation12_spill] sm:$0xff] }
 0x2ce   :  { %3473 = vmatpush.msra.mxu2 %v18789_v30  ;;  %3588 = vmatpush.msra.mxu3 %v12540_v16  ;;  %v2712_v19 = vrot.slane %v18796_v62, 1  ;;  %v10144_v27 = vld [vmem:[%s17933_s3 + $0x1f8] sm:$0xff] }
 0x2cf   :  { %v12943_v53 = vadd.f32 %v1890_v63, %v1794_v31  ;;  %v2764_v63 = vpop.permute.xlu2 %2763 }
 0x2d0   :  { %v12951_v1 = vpop.f32.mrf.mxu0  ;;  %3477 = vmatpush.msra.mxu2 %v18792_v44  ;;  %3590 = vmatpush.msra.mxu3 %v12565_v34  ;;  %v2841_v16 = vmul.f32 %v2764_v63, %v12949_v52  ;;  %v18798_v34 = vand.u32 4294901760, %v12682_v2  ;;  %v12985_v63 = vsel %vm2727_vm3, %v2711_v22, %v2712_v19  ;;  %v18800_v2 = vand.u32 4294901760, %v12710_v24 }
 0x2d1   :  { %2342 = vmatmul.f32.gmra.mxu2 %v12445_v11  ;;  %2475 = vmatmul.f32.gmra.mxu3 %v18794_v35  ;;  %v1665_v11 = vadd.f32 %v18797_v55, %v12528_v6  ;;  %v12972_v35 = vand.u32 4294901760, %v10144_v27  ;;  %18799 = vst [vmem:[#allocation10_spill] sm:$0xff] %v12985_v63  ;;  %v18803_v24 = vand.u32 4294901760, %v12738_v33 }
 0x2d2   :  { %v12959_v30 = vpop.f32.mrf.mxu1  ;;  %3481 = vmatpush.msra.mxu2 %v18795_v26  ;;  %3592 = vmatpush.msra.mxu3 %v12591_v13  ;;  %v12987_v26 = vand.u32 4294901760, %v2841_v16 }
 0x2d3   :  { %2606 = vmatmul.f32.gmra.mxu0 %v12453_v41  ;;  %v12980_v6 = vsub.f32 %v10144_v27, %v12972_v35 }
 0x2d4   :  { %v1797_v31 = vpop.f32.mrf.mxu2  ;;  %v1898_v44 = vpop.f32.mrf.mxu3  ;;  %3485 = vmatpush.msra.mxu2 %v18798_v34  ;;  %3827 = vmatpush.msra.mxu0 %v12972_v35 }
 0x2d5   :  { %v1798_v46 = vadd.f32 %v1797_v31, %v1665_v11  ;;  %2703 = vmatmul.f32.gmra.mxu1 %v12453_v41  ;;  %3594 = vmatpush.msra.mxu3 %v12619_v45  ;;  %v2769_v41 = vpop.permute.xlu0 %2768  ;;  %v18801_v11 = vld [vmem:[#allocation55_spill] sm:$0xff]  ;;  %v18104_v22 = vand.u32 4294901760, %v12980_v6 }
 0x2d6   :  { %3489 = vmatpush.msra.mxu2 %v18800_v2  ;;  %v18802_v45 = vand.u32 4294901760, %v18801_v11  ;;  %v2842_v27 = vmul.f32 %v2769_v41, %v12985_v63 }
 0x2d7   :  { %v12989_v13 = vadd.f32 %v1894_v12, %v1798_v46  ;;  %3596 = vmatpush.msra.mxu3 %v12647_v20  ;;  %v18804_v12 = vld [vmem:[#allocation29_spill] sm:$0xff]  ;;  %v2907_v20 = vsub.f32 %v2841_v16, %v12987_v26  ;;  %v3990_v2 = vsub.f32 %v12980_v6, %v18104_v22  ;;  %v18806_v16 = vand.u32 4294901760, %v12766_v58 }
 0x2d8   :  { %v12993_v55 = vpop.f32.mrf.mxu0  ;;  %3493 = vmatpush.msra.mxu2 %v18803_v24  ;;  %v2713_v34 = vrot.slane %v18804_v12, 1 }
 0x2d9   :  { %2347 = vmatmul.f32.gmra.mxu2 %v18793_v42  ;;  %2481 = vmatmul.f32.gmra.mxu3 %v18802_v45  ;;  %v18805_v42 = vld [vmem:[#allocation59_spill] sm:$0xff]  ;;  %v2908_v21 = vand.u32 4294901760, %v2907_v20 }
 0x2da   :  { %v13001_v31 = vpop.f32.mrf.mxu1  ;;  %3598 = vmatpush.msra.mxu3 %v12675_v25  ;;  %v1671_v46 = vadd.f32 %v18805_v42, %v12550_v51  ;;  %v10143_v25 = vld [vmem:[%s17933_s3 + $0x1f0] sm:$0xff]  ;;  %3497 = vmatpush.msra.mxu2 %v18806_v16  ;;  %v3991_v51 = vand.u32 4294901760, %v3990_v2  ;;  %v13023_v42 = vand.u32 4294901760, %v2842_v27  ;;  %v13029_v22 = vsel %vm2727_vm3, %v2712_v19, %v2713_v34 }
 0x2db   :  { %2610 = vmatmul.f32.gmra.mxu0 %v12476_v59  ;;  %v13017_v45 = vand.u32 4294901760, %v10143_v25  ;;  %18807 = vst [vmem:[#allocation57_spill] sm:$0xff] %v13029_v22 }
 0x2dc   :  { %v1801_v41 = vpop.f32.mrf.mxu2  ;;  %v1902_v33 = vpop.f32.mrf.mxu3  ;;  %3600 = vmatpush.msra.mxu3 %v12703_v5  ;;  %3992 = vmatpush.msra.mxu1 %v3991_v51  ;;  %v18808_v5 = vand.u32 4294901760, %v12794_v47  ;;  %v2915_v47 = vsub.f32 %v2842_v27, %v13023_v42 }
 0x2dd   :  { %v1802_v24 = vadd.f32 %v1801_v41, %v1671_v46  ;;  %2707 = vmatmul.f32.gmra.mxu1 %v12476_v59  ;;  %3829 = vmatpush.msra.mxu0 %v13017_v45  ;;  %v2774_v59 = vpop.permute.xlu1 %2773  ;;  %v2909_v41 = vsub.f32 %v2907_v20, %v2908_v21 }
 0x2de   :  { %3602 = vmatpush.msra.mxu3 %v12731_v36  ;;  %3501 = vmatpush.msra.mxu2 %v18808_v5  ;;  %v13041_v36 = vsub.f32 %v10143_v25, %v13017_v45  ;;  %v2843_v19 = vmul.f32 %v2774_v59, %v13029_v22 }
 0x2df   :  { %v13031_v52 = vadd.f32 %v1898_v44, %v1802_v24  ;;  %v18809_v44 = vld [vmem:[#allocation65_spill] sm:$0xff]  ;;  %v10142_v24 = vld [vmem:[%s17933_s3 + $0x1e8] sm:$0xff] }
 0x2e0   :  { %v13035_v58 = vpop.f32.mrf.mxu0  ;;  %3604 = vmatpush.msra.mxu3 %v12759_v3  ;;  %v2714_v46 = vrot.slane %v18809_v44, 1  ;;  %v18811_v3 = vand.u32 4294901760, %v12822_v40  ;;  %v18108_v25 = vand.u32 4294901760, %v13041_v36  ;;  %v13057_v59 = vand.u32 4294901760, %v10142_v24 }
 0x2e1   :  { %2352 = vmatmul.f32.gmra.mxu2 %v18801_v11  ;;  %3132 = vmatmul.f32.vlgmr.msrb.gmra.mxu3 %v12987_v26  ;;  %v18812_v11 = vld [vmem:[#allocation61_spill] sm:$0xff]  ;;  %v13065_v27 = vand.u32 4294901760, %v2843_v19 }
 0x2e2   :  { %v13045_v2 = vpop.f32.mrf.mxu1  ;;  %3606 = vmatpush.msra.mxu3 %v12787_v23  ;;  %3505 = vmatpush.msra.mxu2 %v18811_v3  ;;  %v1677_v16 = vadd.f32 %v18812_v11, %v12576_v8  ;;  %v18813_v23 = vand.u32 4294901760, %v12850_v28  ;;  %v3996_v8 = vsub.f32 %v13041_v36, %v18108_v25  ;;  %v2916_v3 = vand.u32 4294901760, %v2915_v47 }
 0x2e3   :  { %18810 = vst [vmem:[#allocation16_spill] sm:$0xff] %v13045_v2  ;;  %3246 = vmatmul.f32.vlgmr.msrb.gmra.mxu0 %v2907_v20  ;;  %v13069_v20 = vsel %vm2727_vm3, %v2713_v34, %v2714_v46  ;;  %v2910_v28 = vand.u32 4294901760, %v2909_v41  ;;  %v2779_v34 = vpop.permute.xlu2 %2778 }
 0x2e4   :  { %v1805_v51 = vpop.f32.mrf.mxu2  ;;  %v2392_v5 = vpop.f32.mrf.mxu3  ;;  %3608 = vmatpush.msra.mxu3 %v12815_v61  ;;  %3509 = vmatpush.msra.mxu2 %v18813_v23  ;;  %18814 = vst [vmem:[#allocation54_spill] sm:$0xff] %v13065_v27 }
 0x2e5   :  { %v1806_v40 = vadd.f32 %v1805_v51, %v1677_v16  ;;  %3360 = vmatmul.f32.vlgmr.msrb.gmra.mxu1 %v2908_v21  ;;  %18815 = vst [vmem:[#allocation62_spill] sm:$0xff] %v13069_v20  ;;  %3831 = vmatpush.msra.mxu0 %v13057_v59  ;;  %v18816_v21 = vld [vmem:[#allocation15_spill] sm:$0xff]  ;;  %v3997_v16 = vand.u32 4294901760, %v3996_v8  ;;  %v18817_v51 = vand.u32 4294901760, %v12878_v17  ;;  %v2923_v17 = vsub.f32 %v2843_v19, %v13065_v27 }
 0x2e6   :  { %3610 = vmatpush.msra.mxu3 %v12843_v43  ;;  %v1944_v11 = vadd.f32 %v18816_v21, %v12604_v57  ;;  %v13084_v43 = vsub.f32 %v10142_v24, %v13057_v59  ;;  %v10141_v24 = vld [vmem:[%s17933_s3 + $0x1e0] sm:$0xff] }
 0x2e7   :  { %v13073_v61 = vadd.f32 %v1902_v33, %v1806_v40  ;;  %3513 = vmatpush.msra.mxu2 %v18817_v51  ;;  %v18818_v33 = vld [vmem:[#allocation58_spill] sm:$0xff]  ;;  %v2844_v40 = vmul.f32 %v2779_v34, %v13069_v20  ;;  %3998 = vmatpush.msra.mxu1 %v3997_v16  ;;  %v18821_v51 = vand.u32 4294901760, %v12905_v15  ;;  %v13099_v20 = vand.u32 4294901760, %v10141_v24 }
 0x2e8   :  { %v13079_v23 = vpop.f32.mrf.mxu0  ;;  %3612 = vmatpush.msra.mxu3 %v12871_v49  ;;  %v2715_v41 = vrot.slane %v18818_v33, 1  ;;  %v18820_v49 = vld [vmem:[#allocation60_spill] sm:$0xff]  ;;  %v18111_v21 = vand.u32 4294901760, %v13084_v43 }
 0x2e9   :  { %2911 = vmatmul.f32.vlgmr.msrb.gmra.mxu2 %v2910_v28  ;;  %3136 = vmatmul.f32.gmra.mxu3 %v13023_v42  ;;  %v2165_v8 = vadd.f32 %v18820_v49, %v1944_v11  ;;  %v2917_v28 = vsub.f32 %v2915_v47, %v2916_v3  ;;  %v2924_v11 = vand.u32 4294901760, %v2923_v17 }
 0x2ea   :  { %v13088_v57 = vpop.f32.mrf.mxu1  ;;  %3614 = vmatpush.msra.mxu3 %v12897_v39  ;;  %3517 = vmatpush.msra.mxu2 %v18821_v51  ;;  %v4002_v19 = vsub.f32 %v13084_v43, %v18111_v21  ;;  %v13110_v15 = vsel %vm2727_vm3, %v2714_v46, %v2715_v41  ;;  %v2784_v21 = vpop.permute.xlu0 %2783 }
 0x2eb   :  { %18819 = vst [vmem:[#allocation41_spill] sm:$0xff] %v13088_v57  ;;  %3251 = vmatmul.f32.gmra.mxu0 %v2915_v47  ;;  %v13106_v47 = vand.u32 4294901760, %v2844_v40  ;;  %v2918_v49 = vand.u32 4294901760, %v2917_v28  ;;  %v18826_v28 = vld [vmem:[#allocation14_spill] sm:$0xff] }
 0x2ec   :  { %v2278_v34 = vpop.f32.mrf.mxu2  ;;  %v2398_v25 = vpop.f32.mrf.mxu3  ;;  %4150 = vmatpush.msrb.mxu2 %v12980_v6  ;;  %4278 = vmatpush.msrb.mxu3 %v12972_v35  ;;  %18823 = vst [vmem:[#allocation12_spill] sm:$0xff] %v13110_v15  ;;  %v4003_v51 = vand.u32 4294901760, %v4002_v19  ;;  %v18850_v57 = vld [vmem:[#allocation18_spill] sm:$0xff] }
 0x2ed   :  { %v2279_v39 = vadd.f32 %v2278_v34, %v2165_v8  ;;  %3366 = vmatmul.f32.gmra.mxu1 %v2916_v3  ;;  %18822 = vst [vmem:[#allocation56_spill] sm:$0xff] %v13106_v47  ;;  %3833 = vmatpush.msra.mxu0 %v13099_v20  ;;  %v18824_v8 = vld [vmem:[#allocation68_spill] sm:$0xff] }
 0x2ee   :  { %4153 = vmatpush.msrb.mxu2 %v13041_v36  ;;  %v1952_v3 = vadd.f32 %v18824_v8, %v12632_v48  ;;  %4280 = vmatpush.msrb.mxu3 %v13017_v45  ;;  %v2845_v48 = vmul.f32 %v2784_v21, %v13110_v15  ;;  %v2931_v8 = vsub.f32 %v2844_v40, %v13106_v47 }
 0x2ef   :  { %v2393_v16 = vadd.f32 %v2392_v5, %v2279_v39  ;;  %v13125_v5 = vsub.f32 %v10141_v24, %v13099_v20  ;;  %v2716_v39 = vrot.slane %v18826_v28, 1  ;;  %4004 = vmatpush.msra.mxu1 %v4003_v51  ;;  %v10140_v24 = vld [vmem:[%s17933_s3 + $0x1d8] sm:$0xff] }
 0x2f0   :  { %v13117_v34 = vpop.f32.mrf.mxu0  ;;  %4156 = vmatpush.msrb.mxu2 %v13084_v43  ;;  %4282 = vmatpush.msrb.mxu3 %v13057_v59  ;;  %v13139_v63 = vand.u32 4294901760, %v10140_v24  ;;  %v13149_v51 = vand.u32 4294901760, %v2845_v48 }
 0x2f1   :  { %v13121_v46 = vadd.f32 %v13035_v58, %v2393_v16  ;;  %2919 = vmatmul.f32.gmra.mxu2 %v2918_v49  ;;  %3140 = vmatmul.f32.gmra.mxu3 %v13065_v27  ;;  %v18828_v58 = vld [vmem:[#allocation20_spill] sm:$0xff]  ;;  %v2925_v49 = vsub.f32 %v2923_v17, %v2924_v11  ;;  %v18118_v22 = vand.u32 4294901760, %v13125_v5  ;;  %v18888_v27 = vld [vmem:[#allocation35_spill] sm:$0xff] }
 0x2f2   :  { %v13129_v19 = vpop.f32.mrf.mxu1  ;;  %v2169_v16 = vadd.f32 %v18828_v58, %v1952_v3  ;;  %4159 = vmatpush.msrb.mxu2 %v13125_v5  ;;  %4284 = vmatpush.msrb.mxu3 %v13099_v20  ;;  %v13147_v3 = vsel %vm2727_vm3, %v2715_v41, %v2716_v39  ;;  %18830 = vst [vmem:[#allocation15_spill] sm:$0xff] %v13149_v51  ;;  %v2932_v58 = vand.u32 4294901760, %v2931_v8 }
 0x2f3   :  { %18825 = vst [vmem:[#allocation55_spill] sm:$0xff] %v13121_v46  ;;  %3256 = vmatmul.f32.gmra.mxu0 %v2923_v17  ;;  %v4008_v17 = vsub.f32 %v13125_v5, %v18118_v22  ;;  %v2926_v33 = vand.u32 4294901760, %v2925_v49  ;;  %v2789_v22 = vpop.permute.xlu1 %2788  ;;  %v13162_v41 = vsub.f32 %v10140_v24, %v13139_v63 }
 0x2f4   :  { %18827 = vst [vmem:[#allocation59_spill] sm:$0xff] %v13129_v19  ;;  %v2283_v21 = vpop.f32.mrf.mxu2  ;;  %v2404_v15 = vpop.f32.mrf.mxu3  ;;  %3835 = vmatpush.msra.mxu0 %v13139_v63  ;;  %4286 = vmatpush.msrb.mxu3 %v13139_v63  ;;  %v2846_v12 = vmul.f32 %v2789_v22, %v13147_v3 }
 0x2f5   :  { %v2284_v40 = vadd.f32 %v2283_v21, %v2169_v16  ;;  %3372 = vmatmul.f32.gmra.mxu1 %v2924_v11  ;;  %18829 = vst [vmem:[#allocation61_spill] sm:$0xff] %v13147_v3  ;;  %v1960_v11 = vadd.f32 %v12606_v4, %v12660_v50  ;;  %v4009_v16 = vand.u32 4294901760, %v4008_v17  ;;  %v2933_v4 = vsub.f32 %v2931_v8, %v2932_v58  ;;  %v18834_v50 = vld [vmem:[#allocation64_spill] sm:$0xff] }
 0x2f6   :  { %4162 = vmatpush.msrb.mxu2 %v13162_v41 }
 0x2f7   :  { %v2399_v28 = vadd.f32 %v2398_v25, %v2284_v40  ;;  %v18832_v25 = vld [vmem:[#allocation26_spill] sm:$0xff]  ;;  %4010 = vmatpush.msra.mxu1 %v4009_v16  ;;  %v2173_v17 = vadd.f32 %v18834_v50, %v1960_v11  ;;  %v13180_v11 = vand.u32 4294901760, %v2846_v12  ;;  %v2934_v16 = vand.u32 4294901760, %v2933_v4 }
 0x2f8   :  { %v13155_v21 = vpop.f32.mrf.mxu0  ;;  %v2717_v49 = vrot.slane %v18832_v25, 1 }
 0x2f9   :  { %v13158_v44 = vadd.f32 %v13079_v23, %v2399_v28  ;;  %2927 = vmatmul.f32.gmra.mxu2 %v2926_v33  ;;  %3144 = vmatmul.f32.gmra.mxu3 %v13106_v47  ;;  %v2939_v23 = vsub.f32 %v2845_v48, %v13149_v51  ;;  %v18121_v33 = vand.u32 4294901760, %v13162_v41  ;;  %v10139_v28 = vld [vmem:[%s17933_s3 + $0x1d0] sm:$0xff]  ;;  %18835 = vst [vmem:[#allocation20_spill] sm:$0xff] %v13180_v11 }
 0x2fa   :  { %v13166_v40 = vpop.f32.mrf.mxu1  ;;  %v13175_v3 = vand.u32 4294901760, %v10139_v28  ;;  %v13184_v48 = vsel %vm2727_vm3, %v2716_v39, %v2717_v49 }
 0x2fb   :  { %18831 = vst [vmem:[#allocation60_spill] sm:$0xff] %v13158_v44  ;;  %3261 = vmatmul.f32.gmra.mxu0 %v2931_v8  ;;  %v4014_v8 = vsub.f32 %v13162_v41, %v18121_v33  ;;  %v2794_v33 = vpop.permute.xlu2 %2793  ;;  %v2720_v44 = vrot.slane %v18850_v57, 1 }
 0x2fc   :  { %18833 = vst [vmem:[#allocation68_spill] sm:$0xff] %v13166_v40  ;;  %v2288_v22 = vpop.f32.mrf.mxu2  ;;  %v2410_v24 = vpop.f32.mrf.mxu3  ;;  %3837 = vmatpush.msra.mxu0 %v13175_v3  ;;  %4288 = vmatpush.msrb.mxu3 %v13175_v3  ;;  %v13197_v39 = vsub.f32 %v10139_v28, %v13175_v3  ;;  %v2847_v4 = vmul.f32 %v2794_v33, %v13184_v48  ;;  %v10138_v28 = vld [vmem:[%s17933_s3 + $0x1c8] sm:$0xff] }
 0x2fd   :  { %v2289_v25 = vadd.f32 %v2288_v22, %v2173_v17  ;;  %3378 = vmatmul.f32.gmra.mxu1 %v2932_v58  ;;  %18836 = vst [vmem:[#allocation64_spill] sm:$0xff] %v13184_v48  ;;  %v1968_v17 = vadd.f32 %v12634_v32, %v12688_v38  ;;  %v2940_v58 = vand.u32 4294901760, %v2939_v23  ;;  %v4015_v22 = vand.u32 4294901760, %v4014_v8  ;;  %v18840_v38 = vld [vmem:[#allocation19_spill] sm:$0xff] }
 0x2fe   :  { %v2947_v32 = vsub.f32 %v2846_v12, %v13180_v11  ;;  %4165 = vmatpush.msrb.mxu2 %v13197_v39  ;;  %v13210_v48 = vand.u32 4294901760, %v10138_v28 }
 0x2ff   :  { %v2405_v50 = vadd.f32 %v2404_v15, %v2289_v25  ;;  %v18838_v15 = vld [vmem:[#allocation17_spill] sm:$0xff]  ;;  %4016 = vmatpush.msra.mxu1 %v4015_v22  ;;  %v2177_v8 = vadd.f32 %v18840_v38, %v1968_v17  ;;  %v13215_v17 = vand.u32 4294901760, %v2847_v4 }
 0x300   :  { %v13190_v62 = vpop.f32.mrf.mxu0  ;;  %v2718_v25 = vrot.slane %v18838_v15, 1  ;;  %v2948_v22 = vand.u32 4294901760, %v2947_v32  ;;  %3839 = vmatpush.msra.mxu0 %v13210_v48  ;;  %4290 = vmatpush.msrb.mxu3 %v13210_v48 }
 0x301   :  { %v13193_v37 = vadd.f32 %v13117_v34, %v2405_v50  ;;  %2935 = vmatmul.f32.gmra.mxu2 %v2934_v16  ;;  %3148 = vmatmul.f32.gmra.mxu3 %v13149_v51  ;;  %v2941_v34 = vsub.f32 %v2939_v23, %v2940_v58  ;;  %v18124_v16 = vand.u32 4294901760, %v13197_v39  ;;  %18841 = vst [vmem:[#allocation19_spill] sm:$0xff] %v13215_v17 }
 0x302   :  { %v13201_v40 = vpop.f32.mrf.mxu1 }
 0x303   :  { %18837 = vst [vmem:[#allocation75_spill] sm:$0xff] %v13193_v37  ;;  %3266 = vmatmul.f32.gmra.mxu0 %v2939_v23  ;;  %v4020_v12 = vsub.f32 %v13197_v39, %v18124_v16  ;;  %v13219_v23 = vsel %vm2727_vm3, %v2717_v49, %v2718_v25  ;;  %v2799_v16 = vpop.permute.xlu0 %2798  ;;  %v13232_v49 = vsub.f32 %v10138_v28, %v13210_v48  ;;  %v10137_v28 = vld [vmem:[%s17933_s3 + $0x1c0] sm:$0xff] }
 0x304   :  { %18839 = vst [vmem:[#allocation76_spill] sm:$0xff] %v13201_v40  ;;  %v2293_v33 = vpop.f32.mrf.mxu2  ;;  %v2416_v50 = vpop.f32.mrf.mxu3  ;;  %v2942_v40 = vand.u32 4294901760, %v2941_v34  ;;  %v2848_v37 = vmul.f32 %v2799_v16, %v13219_v23 }
 0x305   :  { %v2294_v15 = vadd.f32 %v2293_v33, %v2177_v8  ;;  %3384 = vmatmul.f32.gmra.mxu1 %v2940_v58  ;;  %18842 = vst [vmem:[#allocation77_spill] sm:$0xff] %v13219_v23  ;;  %v1976_v58 = vadd.f32 %v12662_v7, %v12716_v10  ;;  %v4021_v8 = vand.u32 4294901760, %v4020_v12  ;;  %v2955_v7 = vsub.f32 %v2847_v4, %v13215_v17  ;;  %v18846_v10 = vld [vmem:[#allocation67_spill] sm:$0xff] }
 0x306   :  { %4168 = vmatpush.msrb.mxu2 %v13232_v49  ;;  %v13245_v23 = vand.u32 4294901760, %v10137_v28 }
 0x307   :  { %v2411_v38 = vadd.f32 %v2410_v24, %v2294_v15  ;;  %v18844_v24 = vld [vmem:[#allocation33_spill] sm:$0xff]  ;;  %4022 = vmatpush.msra.mxu1 %v4021_v8  ;;  %v2181_v12 = vadd.f32 %v18846_v10, %v1976_v58  ;;  %v13250_v58 = vand.u32 4294901760, %v2848_v37  ;;  %v2956_v8 = vand.u32 4294901760, %v2955_v7 }
 0x308   :  { %v13225_v33 = vpop.f32.mrf.mxu0  ;;  %v2719_v15 = vrot.slane %v18844_v24, 1  ;;  %3841 = vmatpush.msra.mxu0 %v13245_v23  ;;  %4292 = vmatpush.msrb.mxu3 %v13245_v23 }
 0x309   :  { %v13228_v19 = vadd.f32 %v13155_v21, %v2411_v38  ;;  %2943 = vmatmul.f32.gmra.mxu2 %v2942_v40  ;;  %3152 = vmatmul.f32.gmra.mxu3 %v13180_v11  ;;  %v2949_v21 = vsub.f32 %v2947_v32, %v2948_v22  ;;  %v18127_v40 = vand.u32 4294901760, %v13232_v49  ;;  %18847 = vst [vmem:[#allocation67_spill] sm:$0xff] %v13250_v58 }
 0x30a   :  { %v13236_v34 = vpop.f32.mrf.mxu1 }
 0x30b   :  { %18843 = vst [vmem:[#allocation78_spill] sm:$0xff] %v13228_v19  ;;  %3271 = vmatmul.f32.gmra.mxu0 %v2947_v32  ;;  %v4026_v4 = vsub.f32 %v13232_v49, %v18127_v40  ;;  %v13254_v32 = vsel %vm2727_vm3, %v2718_v25, %v2719_v15  ;;  %v2804_v40 = vpop.permute.xlu1 %2803  ;;  %v13267_v25 = vsub.f32 %v10137_v28, %v13245_v23  ;;  %v10136_v28 = vld [vmem:[%s17933_s3 + $0x1b8] sm:$0xff] }
 0x30c   :  { %18845 = vst [vmem:[#allocation79_spill] sm:$0xff] %v13236_v34  ;;  %v2298_v16 = vpop.f32.mrf.mxu2  ;;  %v2422_v38 = vpop.f32.mrf.mxu3  ;;  %v2950_v34 = vand.u32 4294901760, %v2949_v21 }
 0x30d   :  { %v2299_v24 = vadd.f32 %v2298_v16, %v2181_v12  ;;  %3390 = vmatmul.f32.gmra.mxu1 %v2948_v22  ;;  %18848 = vst [vmem:[#allocation80_spill] sm:$0xff] %v13254_v32  ;;  %v1984_v22 = vadd.f32 %v12690_v54, %v12744_v29  ;;  %v4027_v12 = vand.u32 4294901760, %v4026_v4  ;;  %v2963_v54 = vsub.f32 %v2848_v37, %v13250_v58  ;;  %v18852_v29 = vld [vmem:[#allocation66_spill] sm:$0xff] }
 0x30e   :  { %4171 = vmatpush.msrb.mxu2 %v13267_v25 }
 0x30f   :  { %v2417_v10 = vadd.f32 %v2416_v50, %v2299_v24  ;;  %v2849_v50 = vmul.f32 %v2804_v40, %v13254_v32  ;;  %4028 = vmatpush.msra.mxu1 %v4027_v12  ;;  %v2185_v21 = vadd.f32 %v18852_v29, %v1984_v22  ;;  %v13280_v40 = vand.u32 4294901760, %v10136_v28 }
 0x310   :  { %v13260_v16 = vpop.f32.mrf.mxu0  ;;  %v2964_v12 = vand.u32 4294901760, %v2963_v54 }
 0x311   :  { %v13263_v19 = vadd.f32 %v13190_v62, %v2417_v10  ;;  %2951 = vmatmul.f32.gmra.mxu2 %v2950_v34  ;;  %3156 = vmatmul.f32.gmra.mxu3 %v13215_v17  ;;  %v2957_v62 = vsub.f32 %v2955_v7, %v2956_v8  ;;  %v18130_v34 = vand.u32 4294901760, %v13267_v25  ;;  %v13289_v22 = vand.u32 4294901760, %v2849_v50  ;;  %v18871_v17 = vld [vmem:[#allocation22_spill] sm:$0xff] }
 0x312   :  { %v13271_v24 = vpop.f32.mrf.mxu1  ;;  %3843 = vmatpush.msra.mxu0 %v13280_v40  ;;  %4294 = vmatpush.msrb.mxu3 %v13280_v40  ;;  %v2723_v11 = vrot.slane %v18871_v17, 1  ;;  %v18877_v17 = vld [vmem:[#allocation34_spill] sm:$0xff] }
 0x313   :  { %18849 = vst [vmem:[#allocation81_spill] sm:$0xff] %v13263_v19  ;;  %3276 = vmatmul.f32.gmra.mxu0 %v2955_v7  ;;  %v4032_v37 = vsub.f32 %v13267_v25, %v18130_v34  ;;  %v13287_v7 = vsel %vm2727_vm3, %v2719_v15, %v2720_v44  ;;  %v2958_v57 = vand.u32 4294901760, %v2957_v62  ;;  %v2809_v34 = vpop.permute.xlu2 %2808  ;;  %v13302_v15 = vsub.f32 %v10136_v28, %v13280_v40  ;;  %v10135_v28 = vld [vmem:[%s17933_s3 + $0x1b0] sm:$0xff] }
 0x314   :  { %18851 = vst [vmem:[#allocation82_spill] sm:$0xff] %v13271_v24  ;;  %v2303_v4 = vpop.f32.mrf.mxu2  ;;  %v2428_v10 = vpop.f32.mrf.mxu3  ;;  %v2850_v19 = vmul.f32 %v2809_v34, %v13287_v7 }
 0x315   :  { %v2304_v32 = vadd.f32 %v2303_v4, %v2185_v21  ;;  %3396 = vmatmul.f32.gmra.mxu1 %v2956_v8  ;;  %18853 = vst [vmem:[#allocation66_spill] sm:$0xff] %v13287_v7  ;;  %v1992_v8 = vadd.f32 %v12718_v14, %v12772_v56  ;;  %v4033_v21 = vand.u32 4294901760, %v4032_v37  ;;  %v2965_v14 = vsub.f32 %v2963_v54, %v2964_v12  ;;  %v18858_v56 = vld [vmem:[#allocation23_spill] sm:$0xff] }
 0x316   :  { %18854 = vst [vmem:[#allocation83_spill] sm:$0xff] %v13289_v22  ;;  %4174 = vmatpush.msrb.mxu2 %v13302_v15  ;;  %v13315_v7 = vand.u32 4294901760, %v10135_v28 }
 0x317   :  { %v2423_v29 = vadd.f32 %v2422_v38, %v2304_v32  ;;  %v18856_v38 = vld [vmem:[#allocation32_spill] sm:$0xff]  ;;  %4034 = vmatpush.msra.mxu1 %v4033_v21  ;;  %v2189_v37 = vadd.f32 %v18858_v56, %v1992_v8  ;;  %v13320_v8 = vand.u32 4294901760, %v2850_v19  ;;  %v2966_v21 = vand.u32 4294901760, %v2965_v14 }
 0x318   :  { %v13295_v4 = vpop.f32.mrf.mxu0  ;;  %v2721_v32 = vrot.slane %v18856_v38, 1  ;;  %3845 = vmatpush.msra.mxu0 %v13315_v7  ;;  %4296 = vmatpush.msrb.mxu3 %v13315_v7 }
 0x319   :  { %v13298_v24 = vadd.f32 %v13225_v33, %v2423_v29  ;;  %2959 = vmatmul.f32.gmra.mxu2 %v2958_v57  ;;  %3160 = vmatmul.f32.gmra.mxu3 %v13250_v58  ;;  %v2971_v33 = vsub.f32 %v2849_v50, %v13289_v22  ;;  %v18133_v57 = vand.u32 4294901760, %v13302_v15  ;;  %18859 = vst [vmem:[#allocation23_spill] sm:$0xff] %v13320_v8 }
 0x31a   :  { %v13306_v62 = vpop.f32.mrf.mxu1  ;;  %v13324_v50 = vsel %vm2727_vm3, %v2720_v44, %v2721_v32  ;;  %v13337_v44 = vsub.f32 %v10135_v28, %v13315_v7  ;;  %v10134_v28 = vld [vmem:[%s17933_s3 + $0x1a8] sm:$0xff] }
 0x31b   :  { %18855 = vst [vmem:[#allocation84_spill] sm:$0xff] %v13298_v24  ;;  %3281 = vmatmul.f32.gmra.mxu0 %v2963_v54  ;;  %v4038_v54 = vsub.f32 %v13302_v15, %v18133_v57  ;;  %v2814_v57 = vpop.permute.xlu0 %2813 }
 0x31c   :  { %18857 = vst [vmem:[#allocation85_spill] sm:$0xff] %v13306_v62  ;;  %v2308_v34 = vpop.f32.mrf.mxu2  ;;  %v2434_v29 = vpop.f32.mrf.mxu3  ;;  %v18861_v62 = vld [vmem:[#allocation70_spill] sm:$0xff]  ;;  %v2851_v14 = vmul.f32 %v2814_v57, %v13324_v50  ;;  %4177 = vmatpush.msrb.mxu2 %v13337_v44 }
 0x31d   :  { %v2309_v38 = vadd.f32 %v2308_v34, %v2189_v37  ;;  %3402 = vmatmul.f32.gmra.mxu1 %v2964_v12  ;;  %18860 = vst [vmem:[#allocation86_spill] sm:$0xff] %v13324_v50  ;;  %v2000_v37 = vadd.f32 %v18861_v62, %v12800_v9  ;;  %v2972_v12 = vand.u32 4294901760, %v2971_v33  ;;  %v4039_v34 = vand.u32 4294901760, %v4038_v54  ;;  %v18865_v62 = vld [vmem:[#allocation71_spill] sm:$0xff] }
 0x31e   :  { %v2979_v9 = vsub.f32 %v2850_v19, %v13320_v8  ;;  %v13350_v50 = vand.u32 4294901760, %v10134_v28 }
 0x31f   :  { %v2429_v56 = vadd.f32 %v2428_v10, %v2309_v38  ;;  %v18863_v10 = vld [vmem:[#allocation37_spill] sm:$0xff]  ;;  %4040 = vmatpush.msra.mxu1 %v4039_v34  ;;  %v2193_v54 = vadd.f32 %v18865_v62, %v2000_v37  ;;  %v13355_v37 = vand.u32 4294901760, %v2851_v14 }
 0x320   :  { %v13330_v24 = vpop.f32.mrf.mxu0  ;;  %v2722_v38 = vrot.slane %v18863_v10, 1  ;;  %v2980_v34 = vand.u32 4294901760, %v2979_v9  ;;  %3847 = vmatpush.msra.mxu0 %v13350_v50  ;;  %4298 = vmatpush.msrb.mxu3 %v13350_v50 }
 0x321   :  { %v13333_v2 = vadd.f32 %v13260_v16, %v2429_v56  ;;  %2967 = vmatmul.f32.gmra.mxu2 %v2966_v21  ;;  %3164 = vmatmul.f32.gmra.mxu3 %v13289_v22  ;;  %v2973_v16 = vsub.f32 %v2971_v33, %v2972_v12  ;;  %v18138_v21 = vand.u32 4294901760, %v13337_v44  ;;  %18866 = vst [vmem:[#allocation71_spill] sm:$0xff] %v13355_v37 }
 0x322   :  { %v13341_v46 = vpop.f32.mrf.mxu1 }
 0x323   :  { %18862 = vst [vmem:[#allocation70_spill] sm:$0xff] %v13333_v2  ;;  %3286 = vmatmul.f32.gmra.mxu0 %v2971_v33  ;;  %v4044_v19 = vsub.f32 %v13337_v44, %v18138_v21  ;;  %v13359_v33 = vsel %vm2727_vm3, %v2721_v32, %v2722_v38  ;;  %v18868_v2 = vld [vmem:[#allocation30_spill] sm:$0xff]  ;;  %v2819_v21 = vpop.permute.xlu1 %2818  ;;  %v13372_v32 = vsub.f32 %v10134_v28, %v13350_v50  ;;  %v10133_v28 = vld [vmem:[%s17933_s3 + $0x1a0] sm:$0xff] }
 0x324   :  { %18864 = vst [vmem:[#allocation87_spill] sm:$0xff] %v13341_v46  ;;  %v2313_v57 = vpop.f32.mrf.mxu2  ;;  %v2440_v56 = vpop.f32.mrf.mxu3  ;;  %v2974_v46 = vand.u32 4294901760, %v2973_v16  ;;  %v18873_v16 = vld [vmem:[#allocation69_spill] sm:$0xff] }
 0x325   :  { %v2314_v10 = vadd.f32 %v2313_v57, %v2193_v54  ;;  %3408 = vmatmul.f32.gmra.mxu1 %v2972_v12  ;;  %18867 = vst [vmem:[#allocation88_spill] sm:$0xff] %v13359_v33  ;;  %v18869_v54 = vld [vmem:[#allocation63_spill] sm:$0xff]  ;;  %v4045_v57 = vand.u32 4294901760, %v4044_v19  ;;  %4180 = vmatpush.msrb.mxu2 %v13372_v32 }
 0x326   :  { %v2008_v12 = vadd.f32 %v18869_v54, %v18868_v2  ;;  %v2981_v2 = vsub.f32 %v2979_v9, %v2980_v34 }
 0x327   :  { %v2435_v62 = vadd.f32 %v2434_v29, %v2314_v10  ;;  %v2852_v29 = vmul.f32 %v2819_v21, %v13359_v33  ;;  %4046 = vmatpush.msra.mxu1 %v4045_v57  ;;  %v13385_v21 = vand.u32 4294901760, %v10133_v28 }
 0x328   :  { %v13365_v22 = vpop.f32.mrf.mxu0  ;;  %v2197_v19 = vadd.f32 %v18873_v16, %v2008_v12  ;;  %v2982_v57 = vand.u32 4294901760, %v2981_v2 }
 0x329   :  { %v13368_v58 = vadd.f32 %v13295_v4, %v2435_v62  ;;  %2975 = vmatmul.f32.gmra.mxu2 %v2974_v46  ;;  %3168 = vmatmul.f32.gmra.mxu3 %v13320_v8  ;;  %v2987_v4 = vsub.f32 %v2851_v14, %v13355_v37  ;;  %v18147_v46 = vand.u32 4294901760, %v13372_v32  ;;  %18874 = vst [vmem:[#allocation69_spill] sm:$0xff] %v13385_v21  ;;  %v13394_v12 = vand.u32 4294901760, %v2852_v29 }
 0x32a   :  { %v13376_v10 = vpop.f32.mrf.mxu1  ;;  %v13392_v14 = vsel %vm2727_vm3, %v2722_v38, %v2723_v11  ;;  %3849 = vmatpush.msra.mxu0 %v13385_v21  ;;  %4300 = vmatpush.msrb.mxu3 %v13385_v21  ;;  %v13407_v38 = vsub.f32 %v10133_v28, %v13385_v21  ;;  %v10132_v28 = vld [vmem:[%s17933_s3 + $0x198] sm:$0xff]  ;;  %v2725_v21 = vrot.slane %v18888_v27, 1 }
 0x32b   :  { %18870 = vst [vmem:[#allocation30_spill] sm:$0xff] %v13368_v58  ;;  %3291 = vmatmul.f32.gmra.mxu0 %v2979_v9  ;;  %v4050_v9 = vsub.f32 %v13372_v32, %v18147_v46  ;;  %v2824_v46 = vpop.permute.xlu2 %2823  ;;  %v18892_v27 = vld [vmem:[#allocation24_spill] sm:$0xff] }
 0x32c   :  { %18872 = vst [vmem:[#allocation63_spill] sm:$0xff] %v13376_v10  ;;  %v2318_v62 = vpop.f32.mrf.mxu2  ;;  %v2446_v54 = vpop.f32.mrf.mxu3  ;;  %v18878_v10 = vld [vmem:[#allocation28_spill] sm:$0xff]  ;;  %v2853_v2 = vmul.f32 %v2824_v46, %v13392_v14  ;;  %4183 = vmatpush.msrb.mxu2 %v13407_v38 }
 0x32d   :  { %v2319_v33 = vadd.f32 %v2318_v62, %v2197_v19  ;;  %3414 = vmatmul.f32.gmra.mxu1 %v2980_v34  ;;  %18875 = vst [vmem:[#allocation89_spill] sm:$0xff] %v13392_v14  ;;  %v2016_v19 = vadd.f32 %v18878_v10, %v18877_v17  ;;  %v2988_v34 = vand.u32 4294901760, %v2987_v4  ;;  %v4051_v62 = vand.u32 4294901760, %v4050_v9  ;;  %v18882_v10 = vld [vmem:[#allocation27_spill] sm:$0xff] }
 0x32e   :  { %18876 = vst [vmem:[#allocation90_spill] sm:$0xff] %v13394_v12  ;;  %v2995_v17 = vsub.f32 %v2852_v29, %v13394_v12  ;;  %v13420_v14 = vand.u32 4294901760, %v10132_v28 }
 0x32f   :  { %v2441_v16 = vadd.f32 %v2440_v56, %v2319_v33  ;;  %v18880_v56 = vld [vmem:[#allocation36_spill] sm:$0xff]  ;;  %4052 = vmatpush.msra.mxu1 %v4051_v62  ;;  %v2201_v9 = vadd.f32 %v18882_v10, %v2016_v19  ;;  %v13425_v19 = vand.u32 4294901760, %v2853_v2 }
 0x330   :  { %v13400_v58 = vpop.f32.mrf.mxu0  ;;  %v2724_v33 = vrot.slane %v18880_v56, 1  ;;  %v2996_v62 = vand.u32 4294901760, %v2995_v17  ;;  %3851 = vmatpush.msra.mxu0 %v13420_v14  ;;  %4302 = vmatpush.msrb.mxu3 %v13420_v14 }
 0x331   :  { %v13403_v8 = vadd.f32 %v13330_v24, %v2441_v16  ;;  %2983 = vmatmul.f32.gmra.mxu2 %v2982_v57  ;;  %3172 = vmatmul.f32.gmra.mxu3 %v13355_v37  ;;  %v2989_v24 = vsub.f32 %v2987_v4, %v2988_v34  ;;  %v18156_v57 = vand.u32 4294901760, %v13407_v38  ;;  %18883 = vst [vmem:[#allocation27_spill] sm:$0xff] %v13425_v19 }
 0x332   :  { %v13411_v51 = vpop.f32.mrf.mxu1 }
 0x333   :  { %18879 = vst [vmem:[#allocation34_spill] sm:$0xff] %v13403_v8  ;;  %3296 = vmatmul.f32.gmra.mxu0 %v2987_v4  ;;  %v4056_v29 = vsub.f32 %v13407_v38, %v18156_v57  ;;  %v13429_v4 = vsel %vm2727_vm3, %v2723_v11, %v2724_v33  ;;  %v18885_v8 = vld [vmem:[#allocation11_spill] sm:$0xff]  ;;  %v2829_v57 = vpop.permute.xlu0 %2828  ;;  %v13442_v11 = vsub.f32 %v10132_v28, %v13420_v14 }
 0x334   :  { %18881 = vst [vmem:[#allocation28_spill] sm:$0xff] %v13411_v51  ;;  %v2323_v46 = vpop.f32.mrf.mxu2  ;;  %v2452_v16 = vpop.f32.mrf.mxu3  ;;  %v2990_v51 = vand.u32 4294901760, %v2989_v24  ;;  %v18890_v24 = vld [vmem:[#allocation31_spill] sm:$0xff] }
 0x335   :  { %v2324_v56 = vadd.f32 %v2323_v46, %v2201_v9  ;;  %3420 = vmatmul.f32.gmra.mxu1 %v2988_v34  ;;  %18884 = vst [vmem:[#allocation91_spill] sm:$0xff] %v13429_v4  ;;  %v18886_v9 = vld [vmem:[#allocation21_spill] sm:$0xff]  ;;  %v4057_v46 = vand.u32 4294901760, %v4056_v29  ;;  %v10131_v28 = vld [vmem:[%s17933_s3 + $0x190] sm:$0xff]  ;;  %4186 = vmatpush.msrb.mxu2 %v13442_v11 }
 0x336   :  { %v2024_v34 = vadd.f32 %v18886_v9, %v18885_v8  ;;  %v2997_v8 = vsub.f32 %v2995_v17, %v2996_v62 }
 0x337   :  { %v2447_v10 = vadd.f32 %v2446_v54, %v2324_v56  ;;  %v2854_v54 = vmul.f32 %v2829_v57, %v13429_v4  ;;  %4058 = vmatpush.msra.mxu1 %v4057_v46  ;;  %v13455_v57 = vand.u32 4294901760, %v10131_v28 }
 0x338   :  { %v13435_v37 = vpop.f32.mrf.mxu0  ;;  %v2205_v29 = vadd.f32 %v18890_v24, %v2024_v34  ;;  %v2998_v46 = vand.u32 4294901760, %v2997_v8 }
 0x339   :  { %v13438_v47 = vadd.f32 %v13365_v22, %v2447_v10  ;;  %2991 = vmatmul.f32.gmra.mxu2 %v2990_v51  ;;  %3176 = vmatmul.f32.gmra.mxu3 %v13394_v12  ;;  %v3003_v22 = vsub.f32 %v2853_v2, %v13425_v19  ;;  %v18164_v51 = vand.u32 4294901760, %v13442_v11  ;;  %v13460_v34 = vand.u32 4294901760, %v2854_v54 }
 0x33a   :  { %v13446_v56 = vpop.f32.mrf.mxu1  ;;  %v13464_v2 = vsel %vm2727_vm3, %v2724_v33, %v2725_v21  ;;  %3853 = vmatpush.msra.mxu0 %v13455_v57  ;;  %4304 = vmatpush.msrb.mxu3 %v13455_v57  ;;  %v13477_v33 = vsub.f32 %v10131_v28, %v13455_v57  ;;  %v18896_v28 = vld [vmem:[#allocation43_spill] sm:$0xff] }
 0x33b   :  { %18887 = vst [vmem:[#allocation11_spill] sm:$0xff] %v13438_v47  ;;  %3301 = vmatmul.f32.gmra.mxu0 %v2995_v17  ;;  %v4062_v17 = vsub.f32 %v13442_v11, %v18164_v51  ;;  %v2834_v51 = vpop.permute.xlu1 %2833 }
 0x33c   :  { %18889 = vst [vmem:[#allocation21_spill] sm:$0xff] %v13446_v56  ;;  %v2328_v10 = vpop.f32.mrf.mxu2  ;;  %v2458_v9 = vpop.f32.mrf.mxu3  ;;  %4189 = vmatpush.msrb.mxu2 %v13477_v33 }
 0x33d   :  { %v2329_v4 = vadd.f32 %v2328_v10, %v2205_v29  ;;  %3426 = vmatmul.f32.gmra.mxu1 %v2996_v62  ;;  %18891 = vst [vmem:[#allocation31_spill] sm:$0xff] %v13464_v2  ;;  %v2032_v29 = vadd.f32 %v18892_v27, %v12914_v0  ;;  %v3004_v62 = vand.u32 4294901760, %v3003_v22  ;;  %v4063_v10 = vand.u32 4294901760, %v4062_v17 }
 0x33e   :  { %v2855_v0 = vmul.f32 %v2834_v51, %v13464_v2 }
 0x33f   :  { %v2453_v24 = vadd.f32 %v2452_v16, %v2329_v4  ;;  %v10130_v16 = vld [vmem:[%s17933_s3 + $0x188] sm:$0xff]  ;;  %v3011_v4 = vsub.f32 %v2854_v54, %v13460_v34  ;;  %4064 = vmatpush.msra.mxu1 %v4063_v10  ;;  %v2209_v17 = vadd.f32 %v18896_v28, %v2032_v29  ;;  %v18897_v29 = vrot.slane %v18785_v18, 1 }
 0x340   :  { %v13470_v56 = vpop.f32.mrf.mxu0  ;;  %v13486_v8 = vand.u32 4294901760, %v10130_v16  ;;  %v18900_v18 = vand.u32 4294901760, %v12980_v6 }
 0x341   :  { %v13473_v47 = vadd.f32 %v13400_v58, %v2453_v24  ;;  %2999 = vmatmul.f32.gmra.mxu2 %v2998_v46  ;;  %3180 = vmatmul.f32.gmra.mxu3 %v13425_v19  ;;  %v10129_v58 = vld [vmem:[%s17933_s3 + $0x180] sm:$0xff]  ;;  %v3005_v46 = vsub.f32 %v3003_v22, %v3004_v62  ;;  %v18169_v24 = vand.u32 4294901760, %v13477_v33  ;;  %v13508_v28 = vsel %vm2727_vm3, %v2725_v21, %v18897_v29  ;;  %v2839_v29 = vpop.permute.xlu2 %2838 }
 0x342   :  { %v13483_v27 = vpop.f32.mrf.mxu1  ;;  %18895 = vst [vmem:[#allocation93_spill] sm:$0xff] %v13486_v8  ;;  %3855 = vmatpush.msra.mxu0 %v13486_v8  ;;  %v13495_v54 = vand.u32 4294901760, %v10129_v58  ;;  %v13498_v10 = vsub.f32 %v10130_v16, %v13486_v8  ;;  %4306 = vmatpush.msrb.mxu3 %v13486_v8  ;;  %v3012_v19 = vand.u32 4294901760, %v3011_v4 }
 0x343   :  { %18893 = vst [vmem:[#allocation24_spill] sm:$0xff] %v13473_v47  ;;  %3306 = vmatmul.f32.gmra.mxu0 %v3003_v22  ;;  %v4068_v22 = vsub.f32 %v13477_v33, %v18169_v24  ;;  %v13510_v47 = vand.u32 4294901760, %v2855_v0 }
 0x344   :  { %18894 = vst [vmem:[#allocation92_spill] sm:$0xff] %v13483_v27  ;;  %v2333_v51 = vpop.f32.mrf.mxu2  ;;  %v2464_v2 = vpop.f32.mrf.mxu3  ;;  %3857 = vmatpush.msra.mxu0 %v13495_v54  ;;  %v18174_v16 = vand.u32 4294901760, %v13498_v10  ;;  %4192 = vmatpush.msrb.mxu2 %v13498_v10 }
 0x345   :  { %v2334_v27 = vadd.f32 %v2333_v51, %v2209_v17  ;;  %3432 = vmatmul.f32.gmra.mxu1 %v3004_v62  ;;  %18898 = vst [vmem:[#allocation43_spill] sm:$0xff] %v13508_v28  ;;  %v3006_v17 = vand.u32 4294901760, %v3005_v46  ;;  %v18899_v51 = vld [vmem:[#allocation46_spill] sm:$0xff]  ;;  %v4069_v12 = vand.u32 4294901760, %v4068_v22  ;;  %4308 = vmatpush.msrb.mxu3 %v13495_v54  ;;  %v18903_v46 = vand.u32 4294901760, %v13041_v36  ;;  %v3716_v22 = vpop.permute.xlu0 %3715 }
 0x346   :  { %v2040_v24 = vadd.f32 %v18899_v51, %v12943_v53  ;;  %4409 = vmatpush.msrb.mxu0 %v18900_v18  ;;  %v4074_v21 = vsub.f32 %v13498_v10, %v18174_v16  ;;  %v13530_v53 = vsub.f32 %v10129_v58, %v13495_v54  ;;  %v2856_v18 = vmul.f32 %v2839_v29, %v13508_v28 }
 0x347   :  { %v2459_v62 = vadd.f32 %v2458_v9, %v2334_v27  ;;  %v3013_v9 = vsub.f32 %v3011_v4, %v3012_v19  ;;  %4070 = vmatpush.msra.mxu1 %v4069_v12  ;;  %v18905_v16 = vand.u32 4294901760, %v13084_v43  ;;  %v18906_v12 = vld [vmem:[#allocation38_spill] sm:$0xff] }
 0x348   :  { %v13520_v60 = vpop.f32.mrf.mxu0  ;;  %v4075_v27 = vand.u32 4294901760, %v4074_v21  ;;  %4413 = vmatpush.msrb.mxu0 %v18903_v46  ;;  %v4079_v51 = vand.u32 4294901760, %v13530_v53  ;;  %4195 = vmatpush.msrb.mxu2 %v13530_v53  ;;  %v3793_v21 = vmul.f32 %v3716_v22, %v18906_v12  ;;  %v18907_v46 = vand.u32 4294901760, %v13125_v5  ;;  %v3721_v5 = vpop.permute.xlu1 %3720 }
 0x349   :  { %v13526_v8 = vadd.f32 %v13435_v37, %v2459_v62  ;;  %3007 = vmatmul.f32.gmra.mxu2 %v3006_v17  ;;  %3184 = vmatmul.f32.gmra.mxu3 %v13460_v34  ;;  %v18904_v37 = vld [vmem:[#allocation48_spill] sm:$0xff]  ;;  %v3019_v17 = vsub.f32 %v2855_v0, %v13510_v47  ;;  %v3014_v0 = vand.u32 4294901760, %v3013_v9  ;;  %v18909_v22 = vand.u32 4294901760, %v13162_v41 }
 0x34a   :  { %v13533_v6 = vpop.f32.mrf.mxu1  ;;  %v2213_v62 = vadd.f32 %v18904_v37, %v2040_v24  ;;  %4076 = vmatpush.msra.mxu1 %v4075_v27  ;;  %4417 = vmatpush.msrb.mxu0 %v18905_v16  ;;  %v13547_v24 = vand.u32 4294901760, %v2856_v18  ;;  %v18908_v27 = vld [vmem:[#allocation47_spill] sm:$0xff] }
 0x34b   :  { %18901 = vst [vmem:[#allocation46_spill] sm:$0xff] %v13526_v8  ;;  %3311 = vmatmul.f32.gmra.mxu0 %v3011_v4  ;;  %v4080_v4 = vsub.f32 %v13530_v53, %v4079_v51  ;;  %v2048_v28 = vadd.f32 %v18908_v27, %v12989_v13  ;;  %v3020_v43 = vand.u32 4294901760, %v3019_v17  ;;  %v18912_v13 = vand.u32 4294901760, %v13197_v39  ;;  %v18955_v8 = vld [vmem:[#allocation51_spill] sm:$0xff] }
 0x34c   :  { %18902 = vst [vmem:[#allocation94_spill] sm:$0xff] %v13533_v6  ;;  %v2338_v58 = vpop.f32.mrf.mxu2  ;;  %v2470_v29 = vpop.f32.mrf.mxu3  ;;  %4421 = vmatpush.msrb.mxu0 %v18907_v46  ;;  %v18915_v46 = vld [vmem:[#allocation40_spill] sm:$0xff] }
 0x34d   :  { %v2339_v36 = vadd.f32 %v2338_v58, %v2213_v62  ;;  %3438 = vmatmul.f32.gmra.mxu1 %v3012_v19  ;;  %v4081_v16 = vand.u32 4294901760, %v4080_v4  ;;  %v13555_v19 = vand.u32 4294901760, %v3793_v21  ;;  %v3021_v41 = vsub.f32 %v3019_v17, %v3020_v43 }
 0x34e   :  { %4425 = vmatpush.msrb.mxu0 %v18909_v22  ;;  %v18917_v22 = vand.u32 4294901760, %v13302_v15 }
 0x34f   :  { %v2465_v37 = vadd.f32 %v2464_v2, %v2339_v36  ;;  %4082 = vmatpush.msra.mxu1 %v4081_v16  ;;  %v18913_v2 = vld [vmem:[#allocation53_spill] sm:$0xff]  ;;  %v3027_v36 = vsub.f32 %v2856_v18, %v13547_v24  ;;  %v13572_v27 = vsub.f32 %v3793_v21, %v13555_v19 }
 0x350   :  { %v2607_v6 = vpop.f32.mrf.mxu0  ;;  %4429 = vmatpush.msrb.mxu0 %v18912_v13  ;;  %v2217_v58 = vadd.f32 %v18913_v2, %v2048_v28  ;;  %v18916_v28 = vand.u32 4294901760, %v13267_v25  ;;  %v18922_v2 = vld [vmem:[#allocation39_spill] sm:$0xff]  ;;  %v3736_v53 = vpop.permute.xlu1 %3735 }
 0x351   :  { %v13558_v62 = vadd.f32 %v13470_v56, %v2465_v37  ;;  %3015 = vmatmul.f32.gmra.mxu2 %v3014_v0  ;;  %3188 = vmatmul.f32.gmra.mxu3 %v13510_v47  ;;  %v18914_v0 = vand.u32 4294901760, %v13232_v49  ;;  %v3794_v37 = vmul.f32 %v3721_v5, %v18915_v46  ;;  %v3028_v16 = vand.u32 4294901760, %v3027_v36 }
 0x352   :  { %v13561_v9 = vpop.f32.mrf.mxu1  ;;  %4536 = vmatpush.msrb.mxu1 %v12972_v35  ;;  %v2056_v35 = vadd.f32 %v12951_v1, %v13031_v52  ;;  %v18920_v52 = vand.u32 4294901760, %v13337_v44  ;;  %v3726_v1 = vpop.permute.xlu2 %3725  ;;  %v18921_v5 = vand.u32 4294901760, %v13372_v32  ;;  %v2064_v32 = vadd.f32 %v12993_v55, %v13073_v61 }
 0x353   :  { %18910 = vst [vmem:[#allocation48_spill] sm:$0xff] %v13558_v62  ;;  %3316 = vmatmul.f32.gmra.mxu0 %v3019_v17  ;;  %v3022_v17 = vand.u32 4294901760, %v3021_v41  ;;  %v13582_v21 = vand.u32 4294901760, %v3794_v37  ;;  %v3029_v15 = vsub.f32 %v3027_v36, %v3028_v16  ;;  %v18926_v55 = vand.u32 4294901760, %v13477_v33 }
 0x354   :  { %18911 = vst [vmem:[#allocation47_spill] sm:$0xff] %v13561_v9  ;;  %v2343_v56 = vpop.f32.mrf.mxu2  ;;  %v2476_v4 = vpop.f32.mrf.mxu3  ;;  %4433 = vmatpush.msrb.mxu0 %v18914_v0  ;;  %4538 = vmatpush.msrb.mxu1 %v13017_v45  ;;  %v18183_v45 = vand.u32 4294901760, %v13572_v27  ;;  %v2225_v61 = vadd.f32 %v13001_v31, %v2064_v32 }
 0x355   :  { %v2344_v39 = vadd.f32 %v2343_v56, %v2217_v58  ;;  %3444 = vmatmul.f32.gmra.mxu1 %v3020_v43  ;;  %v13599_v13 = vsub.f32 %v3794_v37, %v13582_v21  ;;  %v3030_v41 = vand.u32 4294901760, %v3029_v15  ;;  %v18924_v56 = vand.u32 4294901760, %v13442_v11 }
 0x356   :  { %4437 = vmatpush.msrb.mxu0 %v18916_v28  ;;  %4540 = vmatpush.msrb.mxu1 %v13057_v59  ;;  %v2221_v59 = vadd.f32 %v12959_v30, %v2056_v35  ;;  %v3861_v44 = vsub.f32 %v13572_v27, %v18183_v45  ;;  %v18923_v30 = vand.u32 4294901760, %v13407_v38  ;;  %v18928_v28 = vld [vmem:[#allocation45_spill] sm:$0xff] }
 0x357   :  { %v2471_v18 = vadd.f32 %v2470_v29, %v2344_v39  ;;  %v18181_v38 = vand.u32 4294901760, %v13599_v13 }
 0x358   :  { %v2611_v49 = vpop.f32.mrf.mxu0  ;;  %4441 = vmatpush.msrb.mxu0 %v18917_v22  ;;  %4542 = vmatpush.msrb.mxu1 %v13099_v20  ;;  %v3795_v20 = vmul.f32 %v3726_v1, %v18922_v2 }
 0x359   :  { %v13585_v43 = vadd.f32 %v13520_v60, %v2471_v18  ;;  %3023 = vmatmul.f32.gmra.mxu2 %v3022_v17  ;;  %3192 = vmatmul.f32.gmra.mxu3 %v13547_v24 }
 0x35a   :  { %v13589_v25 = vpop.f32.mrf.mxu1  ;;  %4445 = vmatpush.msrb.mxu0 %v18920_v52  ;;  %4544 = vmatpush.msrb.mxu1 %v13139_v63  ;;  %v13613_v0 = vand.u32 4294901760, %v3795_v20 }
 0x35b   :  { %18918 = vst [vmem:[#allocation53_spill] sm:$0xff] %v13585_v43  ;;  %3321 = vmatmul.f32.gmra.mxu0 %v3027_v36 }
 0x35c   :  { %18919 = vst [vmem:[#allocation95_spill] sm:$0xff] %v13589_v25  ;;  %v2348_v29 = vpop.f32.mrf.mxu2  ;;  %v2482_v60 = vpop.f32.mrf.mxu3  ;;  %4449 = vmatpush.msrb.mxu0 %v18921_v5  ;;  %4546 = vmatpush.msrb.mxu1 %v13175_v3  ;;  %v3862_v3 = vand.u32 4294901760, %v3861_v44  ;;  %v13630_v17 = vsub.f32 %v3795_v20, %v13613_v0  ;;  %v18932_v5 = vld [vmem:[#allocation93_spill] sm:$0xff]  ;;  %v18933_v20 = vld [vmem:[#allocation54_spill] sm:$0xff] }
 0x35d   :  { %v2349_v58 = vadd.f32 %v2348_v29, %v2221_v59  ;;  %3450 = vmatmul.f32.gmra.mxu1 %v3028_v16 }
 0x35e   :  { %4453 = vmatpush.msrb.mxu0 %v18923_v30  ;;  %4548 = vmatpush.msrb.mxu1 %v13210_v48  ;;  %v18180_v22 = vand.u32 4294901760, %v13630_v17 }
 0x35f   :  { %v2477_v63 = vadd.f32 %v2476_v4, %v2349_v58  ;;  %v3731_v4 = vpop.permute.xlu0 %3730 }
 0x360   :  { %v3247_v36 = vpop.f32.mrf.mxu0  ;;  %4457 = vmatpush.msrb.mxu0 %v18924_v56  ;;  %4550 = vmatpush.msrb.mxu1 %v13245_v23  ;;  %v3796_v18 = vmul.f32 %v3731_v4, %v18928_v28  ;;  %v3869_v23 = vsub.f32 %v13599_v13, %v18181_v38  ;;  %v3877_v15 = vsub.f32 %v13630_v17, %v18180_v22 }
 0x361   :  { %v13615_v37 = vadd.f32 %v2607_v6, %v2477_v63  ;;  %3031 = vmatmul.f32.gmra.mxu2 %v3030_v41  ;;  %3616 = vmatmul.f32.vlgmr.msra.gmra.mxu3 %v12987_v26  ;;  %v18927_v6 = vand.u32 4294901760, %v13498_v10  ;;  %v3741_v63 = vpop.permute.xlu2 %3740 }
 0x362   :  { %v13619_v39 = vpop.f32.mrf.mxu1  ;;  %4461 = vmatpush.msrb.mxu0 %v18926_v55  ;;  %4552 = vmatpush.msrb.mxu1 %v13280_v40  ;;  %v13640_v33 = vand.u32 4294901760, %v3796_v18  ;;  %v3870_v16 = vand.u32 4294901760, %v3869_v23  ;;  %v3878_v58 = vand.u32 4294901760, %v3877_v15 }
 0x363   :  { %18925 = vst [vmem:[#allocation96_spill] sm:$0xff] %v13615_v37  ;;  %3863 = vmatmul.f32.vlgmr.msra.gmra.mxu0 %v3862_v3 }
 0x364   :  { %v2353_v48 = vpop.f32.mrf.mxu2  ;;  %v3133_v11 = vpop.f32.mrf.mxu3  ;;  %4465 = vmatpush.msrb.mxu0 %v18927_v6  ;;  %4554 = vmatpush.msrb.mxu1 %v13315_v7  ;;  %v18930_v7 = vld [vmem:[#allocation69_spill] sm:$0xff] }
 0x365   :  { %v2354_v35 = vadd.f32 %v2353_v48, %v2225_v61  ;;  %4084 = vmatmul.f32.vlgmr.msra.gmra.mxu1 %v13555_v19  ;;  %v18935_v61 = vld [vmem:[#allocation56_spill] sm:$0xff] }
 0x366   :  { %4469 = vmatpush.msrb.mxu0 %v4079_v51  ;;  %4556 = vmatpush.msrb.mxu1 %v13350_v50  ;;  %v13652_v50 = vsub.f32 %v3796_v18, %v13640_v33 }
 0x367   :  { %v2483_v31 = vadd.f32 %v2482_v60, %v2354_v35  ;;  %v3746_v18 = vpop.permute.xlu0 %3745 }
 0x368   :  { %v3252_v40 = vpop.f32.mrf.mxu0  ;;  %4558 = vmatpush.msrb.mxu1 %v18930_v7  ;;  %v18179_v44 = vand.u32 4294901760, %v13652_v50 }
 0x369   :  { %v13642_v10 = vadd.f32 %v2611_v49, %v2483_v31  ;;  %3519 = vmatmul.f32.vlgmr.msra.gmra.mxu2 %v12987_v26  ;;  %3620 = vmatmul.f32.gmra.mxu3 %v13023_v42  ;;  %v18931_v49 = vld [vmem:[#allocation5_spill] sm:$0xff] }
 0x36a   :  { %v13647_v52 = vpop.f32.mrf.mxu1  ;;  %4560 = vmatpush.msrb.mxu1 %v13420_v14  ;;  %v3797_v26 = vmul.f32 %v3736_v53, %v18931_v49 }
 0x36b   :  { %18929 = vst [vmem:[#allocation97_spill] sm:$0xff] %v13642_v10  ;;  %3871 = vmatmul.f32.gmra.mxu0 %v3870_v16 }
 0x36c   :  { %v2912_v51 = vpop.f32.mrf.mxu2  ;;  %v3137_v1 = vpop.f32.mrf.mxu3  ;;  %4562 = vmatpush.msrb.mxu1 %v13455_v57  ;;  %v13663_v14 = vand.u32 4294901760, %v3797_v26 }
 0x36d   :  { %v3134_v59 = vadd.f32 %v3133_v11, %v2912_v51  ;;  %4088 = vmatmul.f32.gmra.mxu1 %v13582_v21 }
 0x36e   :  { %4564 = vmatpush.msrb.mxu1 %v18932_v5  ;;  %v13672_v32 = vsub.f32 %v3797_v26, %v13663_v14 }
 0x36f   :  { %v13660_v29 = vadd.f32 %v3247_v36, %v3134_v59  ;;  %v18934_v36 = vld [vmem:[#allocation42_spill] sm:$0xff]  ;;  %v18937_v59 = vld [vmem:[#allocation15_spill] sm:$0xff] }
 0x370   :  { %v3257_v60 = vpop.f32.mrf.mxu0  ;;  %4566 = vmatpush.msrb.mxu1 %v13495_v54  ;;  %v3798_v56 = vmul.f32 %v3741_v63, %v18934_v36  ;;  %v18178_v11 = vand.u32 4294901760, %v13672_v32 }
 0x371   :  { %3523 = vmatmul.f32.gmra.mxu2 %v13023_v42  ;;  %3624 = vmatmul.f32.gmra.mxu3 %v18933_v20  ;;  %v3885_v42 = vsub.f32 %v13652_v50, %v18179_v44 }
 0x372   :  { %v13668_v30 = vpop.f32.mrf.mxu1  ;;  %v13681_v54 = vand.u32 4294901760, %v3798_v56  ;;  %v3893_v53 = vsub.f32 %v13672_v32, %v18178_v11 }
 0x373   :  { %3879 = vmatmul.f32.gmra.mxu0 %v3878_v58  ;;  %v3886_v48 = vand.u32 4294901760, %v3885_v42  ;;  %v3751_v58 = vpop.permute.xlu1 %3750 }
 0x374   :  { %v2920_v57 = vpop.f32.mrf.mxu2  ;;  %v3141_v41 = vpop.f32.mrf.mxu3  ;;  %v13689_v31 = vsub.f32 %v3798_v56, %v13681_v54  ;;  %v3894_v15 = vand.u32 4294901760, %v3893_v53 }
 0x375   :  { %v3138_v3 = vadd.f32 %v3137_v1, %v2920_v57  ;;  %4092 = vmatmul.f32.gmra.mxu1 %v13613_v0 }
 0x376   :  { %v18177_v5 = vand.u32 4294901760, %v13689_v31 }
 0x377   :  { %v13679_v4 = vadd.f32 %v3252_v40, %v3138_v3  ;;  %v18936_v40 = vld [vmem:[#allocation7_spill] sm:$0xff] }
 0x378   :  { %v3262_v55 = vpop.f32.mrf.mxu0  ;;  %v3799_v16 = vmul.f32 %v3746_v18, %v18936_v40  ;;  %v3901_v42 = vsub.f32 %v13689_v31, %v18177_v5  ;;  %v18944_v40 = vld [vmem:[#allocation9_spill] sm:$0xff] }
 0x379   :  { %3527 = vmatmul.f32.gmra.mxu2 %v18933_v20  ;;  %3628 = vmatmul.f32.gmra.mxu3 %v18935_v61 }
 0x37a   :  { %v13686_v6 = vpop.f32.mrf.mxu1  ;;  %v13698_v26 = vand.u32 4294901760, %v3799_v16 }
 0x37b   :  { %3887 = vmatmul.f32.gmra.mxu0 %v3886_v48 }
 0x37c   :  { %v2928_v35 = vpop.f32.mrf.mxu2  ;;  %v3145_v23 = vpop.f32.mrf.mxu3 }
 0x37d   :  { %v3142_v7 = vadd.f32 %v3141_v41, %v2928_v35  ;;  %4096 = vmatmul.f32.gmra.mxu1 %v13640_v33  ;;  %v18938_v41 = vld [vmem:[#allocation44_spill] sm:$0xff] }
 0x37e   :  { %v3800_v56 = vmul.f32 %v3751_v58, %v18938_v41  ;;  %v18939_v35 = vld [vmem:[#allocation20_spill] sm:$0xff] }
 0x37f   :  { %v13696_v51 = vadd.f32 %v3257_v60, %v3142_v7  ;;  %v13707_v60 = vsub.f32 %v3799_v16, %v13698_v26  ;;  %v3902_v7 = vand.u32 4294901760, %v3901_v42 }
 0x380   :  { %v3267_v1 = vpop.f32.mrf.mxu0  ;;  %v13715_v18 = vand.u32 4294901760, %v3800_v56 }
 0x381   :  { %3531 = vmatmul.f32.gmra.mxu2 %v18935_v61  ;;  %3632 = vmatmul.f32.gmra.mxu3 %v18937_v59  ;;  %v18182_v16 = vand.u32 4294901760, %v13707_v60 }
 0x382   :  { %v13703_v20 = vpop.f32.mrf.mxu1 }
 0x383   :  { %3895 = vmatmul.f32.gmra.mxu0 %v3894_v15 }
 0x384   :  { %v2936_v63 = vpop.f32.mrf.mxu2  ;;  %v3149_v57 = vpop.f32.mrf.mxu3 }
 0x385   :  { %v3146_v3 = vadd.f32 %v3145_v23, %v2936_v63  ;;  %4100 = vmatmul.f32.gmra.mxu1 %v13663_v14  ;;  %v3756_v23 = vpop.permute.xlu2 %3755  ;;  %v13723_v63 = vsub.f32 %v3800_v56, %v13715_v18 }
 0x387   :  { %v13713_v61 = vadd.f32 %v3262_v55, %v3146_v3  ;;  %v18940_v55 = vld [vmem:[#allocation6_spill] sm:$0xff]  ;;  %v18184_v22 = vand.u32 4294901760, %v13723_v63 }
 0x388   :  { %v3272_v48 = vpop.f32.mrf.mxu0  ;;  %v3801_v3 = vmul.f32 %v3756_v23, %v18940_v55 }
 0x389   :  { %3535 = vmatmul.f32.gmra.mxu2 %v18937_v59  ;;  %3636 = vmatmul.f32.gmra.mxu3 %v18939_v35  ;;  %v3909_v59 = vsub.f32 %v13707_v60, %v18182_v16 }
 0x38a   :  { %v13720_v53 = vpop.f32.mrf.mxu1  ;;  %v13732_v44 = vand.u32 4294901760, %v3801_v3 }
 0x38b   :  { %3903 = vmatmul.f32.gmra.mxu0 %v3902_v7  ;;  %v18941_v7 = vld [vmem:[#allocation19_spill] sm:$0xff]  ;;  %v3910_v56 = vand.u32 4294901760, %v3909_v59 }
 0x38c   :  { %v2944_v15 = vpop.f32.mrf.mxu2  ;;  %v3153_v58 = vpop.f32.mrf.mxu3  ;;  %v13740_v16 = vsub.f32 %v3801_v3, %v13732_v44 }
 0x38d   :  { %v3150_v5 = vadd.f32 %v3149_v57, %v2944_v15  ;;  %4104 = vmatmul.f32.gmra.mxu1 %v13681_v54  ;;  %v3761_v57 = vpop.permute.xlu0 %3760 }
 0x38e   :  { %v18185_v41 = vand.u32 4294901760, %v13740_v16 }
 0x38f   :  { %v13730_v42 = vadd.f32 %v3267_v1, %v3150_v5  ;;  %v18942_v1 = vld [vmem:[#allocation49_spill] sm:$0xff] }
 0x390   :  { %v3277_v11 = vpop.f32.mrf.mxu0  ;;  %v3802_v5 = vmul.f32 %v3761_v57, %v18942_v1 }
 0x391   :  { %3539 = vmatmul.f32.gmra.mxu2 %v18939_v35  ;;  %3640 = vmatmul.f32.gmra.mxu3 %v18941_v7  ;;  %v3917_v35 = vsub.f32 %v13723_v63, %v18184_v22 }
 0x392   :  { %v13737_v23 = vpop.f32.mrf.mxu1  ;;  %v13749_v55 = vand.u32 4294901760, %v3802_v5 }
 0x393   :  { %3911 = vmatmul.f32.gmra.mxu0 %v3910_v56  ;;  %v18943_v56 = vld [vmem:[#allocation67_spill] sm:$0xff]  ;;  %v3918_v3 = vand.u32 4294901760, %v3917_v35 }
 0x394   :  { %v2952_v15 = vpop.f32.mrf.mxu2  ;;  %v3157_v38 = vpop.f32.mrf.mxu3 }
 0x395   :  { %v3154_v45 = vadd.f32 %v3153_v58, %v2952_v15  ;;  %4108 = vmatmul.f32.gmra.mxu1 %v13698_v26  ;;  %v3766_v58 = vpop.permute.xlu1 %3765 }
 0x396   :  { %v3803_v22 = vmul.f32 %v3766_v58, %v18944_v40 }
 0x397   :  { %v13747_v59 = vadd.f32 %v3272_v48, %v3154_v45  ;;  %v13758_v45 = vsub.f32 %v3802_v5, %v13749_v55 }
 0x398   :  { %v3282_v12 = vpop.f32.mrf.mxu0  ;;  %v13766_v49 = vand.u32 4294901760, %v3803_v22 }
 0x399   :  { %3543 = vmatmul.f32.gmra.mxu2 %v18941_v7  ;;  %3644 = vmatmul.f32.gmra.mxu3 %v18943_v56  ;;  %v3925_v7 = vsub.f32 %v13740_v16, %v18185_v41  ;;  %v18186_v5 = vand.u32 4294901760, %v13758_v45 }
 0x39a   :  { %v13754_v57 = vpop.f32.mrf.mxu1  ;;  %18945 = vst [vmem:[#allocation69_spill] sm:$0xff] %v13766_v49  ;;  %v13774_v41 = vsub.f32 %v3803_v22, %v13766_v49 }
 0x39b   :  { %3919 = vmatmul.f32.gmra.mxu0 %v3918_v3  ;;  %v18946_v3 = vld [vmem:[#allocation83_spill] sm:$0xff]  ;;  %v3926_v58 = vand.u32 4294901760, %v3925_v7 }
 0x39c   :  { %v2960_v15 = vpop.f32.mrf.mxu2  ;;  %v3161_v1 = vpop.f32.mrf.mxu3  ;;  %18947 = vst [vmem:[#allocation93_spill] sm:$0xff] %v13774_v41  ;;  %v18187_v10 = vand.u32 4294901760, %v13774_v41 }
 0x39d   :  { %v3158_v48 = vadd.f32 %v3157_v38, %v2960_v15  ;;  %4112 = vmatmul.f32.gmra.mxu1 %v13715_v18  ;;  %v3771_v38 = vpop.permute.xlu2 %3770 }
 0x39f   :  { %v13764_v35 = vadd.f32 %v3277_v11, %v3158_v48  ;;  %v18948_v11 = vld [vmem:[#allocation8_spill] sm:$0xff] }
 0x3a0   :  { %v3287_v36 = vpop.f32.mrf.mxu0  ;;  %v3804_v48 = vmul.f32 %v3771_v38, %v18948_v11 }
 0x3a1   :  { %3547 = vmatmul.f32.gmra.mxu2 %v18943_v56  ;;  %3648 = vmatmul.f32.gmra.mxu3 %v18946_v3  ;;  %v3933_v56 = vsub.f32 %v13758_v45, %v18186_v5 }
 0x3a2   :  { %v13771_v40 = vpop.f32.mrf.mxu1  ;;  %v13783_v25 = vand.u32 4294901760, %v3804_v48 }
 0x3a3   :  { %3927 = vmatmul.f32.gmra.mxu0 %v3926_v58  ;;  %v18949_v58 = vld [vmem:[#allocation23_spill] sm:$0xff]  ;;  %v3934_v22 = vand.u32 4294901760, %v3933_v56 }
 0x3a4   :  { %v2968_v15 = vpop.f32.mrf.mxu2  ;;  %v3165_v28 = vpop.f32.mrf.mxu3  ;;  %v13791_v5 = vsub.f32 %v3804_v48, %v13783_v25 }
 0x3a5   :  { %v3162_v2 = vadd.f32 %v3161_v1, %v2968_v15  ;;  %4116 = vmatmul.f32.gmra.mxu1 %v13732_v44  ;;  %v3776_v1 = vpop.permute.xlu0 %3775 }
 0x3a6   :  { %18951 = vst [vmem:[#allocation56_spill] sm:$0xff] %v13791_v5  ;;  %v18190_v62 = vand.u32 4294901760, %v13791_v5 }
 0x3a7   :  { %v13781_v7 = vadd.f32 %v3282_v12, %v3162_v2  ;;  %v18952_v12 = vld [vmem:[#allocation50_spill] sm:$0xff] }
 0x3a8   :  { %v3292_v46 = vpop.f32.mrf.mxu0  ;;  %v3805_v2 = vmul.f32 %v3776_v1, %v18952_v12 }
 0x3a9   :  { %3551 = vmatmul.f32.gmra.mxu2 %v18946_v3  ;;  %3652 = vmatmul.f32.gmra.mxu3 %v18949_v58  ;;  %v3941_v3 = vsub.f32 %v13774_v41, %v18187_v10 }
 0x3aa   :  { %v13788_v38 = vpop.f32.mrf.mxu1  ;;  %v13800_v43 = vand.u32 4294901760, %v3805_v2 }
 0x3ab   :  { %18950 = vst [vmem:[#allocation54_spill] sm:$0xff] %v13788_v38  ;;  %3935 = vmatmul.f32.gmra.mxu0 %v3934_v22  ;;  %v18953_v22 = vld [vmem:[#allocation71_spill] sm:$0xff]  ;;  %v3942_v48 = vand.u32 4294901760, %v3941_v3 }
 0x3ac   :  { %v2976_v15 = vpop.f32.mrf.mxu2  ;;  %v3169_v11 = vpop.f32.mrf.mxu3 }
 0x3ad   :  { %v3166_v9 = vadd.f32 %v3165_v28, %v2976_v15  ;;  %4120 = vmatmul.f32.gmra.mxu1 %v13749_v55  ;;  %v3781_v28 = vpop.permute.xlu1 %3780 }
 0x3ae   :  { %v3806_v10 = vmul.f32 %v3781_v28, %v18955_v8 }
 0x3af   :  { %v13798_v56 = vadd.f32 %v3287_v36, %v3166_v9  ;;  %v13809_v9 = vsub.f32 %v3805_v2, %v13800_v43 }
 0x3b0   :  { %v3297_v37 = vpop.f32.mrf.mxu0 }
 0x3b1   :  { %3555 = vmatmul.f32.gmra.mxu2 %v18949_v58  ;;  %3656 = vmatmul.f32.gmra.mxu3 %v18953_v22  ;;  %18956 = vst [vmem:[#allocation20_spill] sm:$0xff] %v13809_v9  ;;  %v3949_v58 = vsub.f32 %v13791_v5, %v18190_v62  ;;  %v18195_v2 = vand.u32 4294901760, %v13809_v9 }
 0x3b2   :  { %v13805_v1 = vpop.f32.mrf.mxu1 }
 0x3b3   :  { %18954 = vst [vmem:[#allocation15_spill] sm:$0xff] %v13805_v1  ;;  %3943 = vmatmul.f32.gmra.mxu0 %v3942_v48  ;;  %v13817_v1 = vand.u32 4294901760, %v3806_v10  ;;  %v18958_v48 = vld [vmem:[#allocation90_spill] sm:$0xff]  ;;  %v3950_v28 = vand.u32 4294901760, %v3949_v58 }
 0x3b4   :  { %v2984_v15 = vpop.f32.mrf.mxu2  ;;  %v3173_v12 = vpop.f32.mrf.mxu3 }
 0x3b5   :  { %v3170_v36 = vadd.f32 %v3169_v11, %v2984_v15  ;;  %4124 = vmatmul.f32.gmra.mxu1 %v13766_v49  ;;  %v3786_v11 = vpop.permute.xlu2 %3785  ;;  %v13825_v62 = vsub.f32 %v3806_v10, %v13817_v1 }
 0x3b7   :  { %v13815_v3 = vadd.f32 %v3292_v46, %v3170_v36  ;;  %v18960_v46 = vld [vmem:[#allocation13_spill] sm:$0xff]  ;;  %v18198_v41 = vand.u32 4294901760, %v13825_v62 }
 0x3b8   :  { %v3302_v38 = vpop.f32.mrf.mxu0  ;;  %v3807_v36 = vmul.f32 %v3786_v11, %v18960_v46 }
 0x3b9   :  { %18957 = vst [vmem:[#allocation19_spill] sm:$0xff] %v13815_v3  ;;  %3559 = vmatmul.f32.gmra.mxu2 %v18953_v22  ;;  %3660 = vmatmul.f32.gmra.mxu3 %v18958_v48  ;;  %v3957_v22 = vsub.f32 %v13809_v9, %v18195_v2 }
 0x3ba   :  { %v13822_v8 = vpop.f32.mrf.mxu1 }
 0x3bb   :  { %18959 = vst [vmem:[#allocation67_spill] sm:$0xff] %v13822_v8  ;;  %3951 = vmatmul.f32.gmra.mxu0 %v3950_v28  ;;  %v13834_v8 = vand.u32 4294901760, %v3807_v36  ;;  %v18962_v28 = vld [vmem:[#allocation27_spill] sm:$0xff]  ;;  %v3958_v10 = vand.u32 4294901760, %v3957_v22 }
 0x3bc   :  { %v2992_v15 = vpop.f32.mrf.mxu2  ;;  %v3177_v49 = vpop.f32.mrf.mxu3 }
 0x3bd   :  { %v3174_v5 = vadd.f32 %v3173_v12, %v2992_v15  ;;  %4128 = vmatmul.f32.gmra.mxu1 %v13783_v25  ;;  %v3791_v12 = vpop.permute.xlu0 %3790  ;;  %v13842_v2 = vsub.f32 %v3807_v36, %v13834_v8 }
 0x3bf   :  { %v13832_v58 = vadd.f32 %v3297_v37, %v3174_v5  ;;  %18964 = vst [vmem:[#allocation71_spill] sm:$0xff] %v13842_v2  ;;  %v18965_v37 = vld [vmem:[#allocation25_spill] sm:$0xff] }
 0x3c0   :  { %v3307_v3 = vpop.f32.mrf.mxu0  ;;  %v3808_v5 = vmul.f32 %v3791_v12, %v18965_v37 }
 0x3c1   :  { %18961 = vst [vmem:[#allocation83_spill] sm:$0xff] %v13832_v58  ;;  %3563 = vmatmul.f32.gmra.mxu2 %v18958_v48  ;;  %3664 = vmatmul.f32.gmra.mxu3 %v18962_v28  ;;  %v3965_v48 = vsub.f32 %v13825_v62, %v18198_v41 }
 0x3c2   :  { %v13839_v11 = vpop.f32.mrf.mxu1 }
 0x3c3   :  { %18963 = vst [vmem:[#allocation23_spill] sm:$0xff] %v13839_v11  ;;  %3959 = vmatmul.f32.gmra.mxu0 %v3958_v10  ;;  %v13851_v11 = vand.u32 4294901760, %v3808_v5  ;;  %v3966_v36 = vand.u32 4294901760, %v3965_v48  ;;  %v18200_v10 = vand.u32 4294901760, %v13842_v2 }
 0x3c4   :  { %v3000_v15 = vpop.f32.mrf.mxu2  ;;  %v3181_v46 = vpop.f32.mrf.mxu3 }
 0x3c5   :  { %v3178_v9 = vadd.f32 %v3177_v49, %v3000_v15  ;;  %4132 = vmatmul.f32.gmra.mxu1 %v13800_v43  ;;  %v10160_v49 = vld [vmem:[%s17933_s3 + $0x278] sm:$0xff]  ;;  %v13869_v48 = vsub.f32 %v3808_v5, %v13851_v11  ;;  %v3973_v37 = vsub.f32 %v13842_v2, %v18200_v10 }
 0x3c6   :  { %v13861_v15 = vand.u32 4294901760, %v10160_v49 }
 0x3c7   :  { %v13849_v22 = vadd.f32 %v3302_v38, %v3178_v9  ;;  %18968 = vst [vmem:[#allocation98_spill] sm:$0xff] %v13869_v48  ;;  %v18204_v5 = vand.u32 4294901760, %v13869_v48 }
 0x3c8   :  { %v3312_v58 = vpop.f32.mrf.mxu0  ;;  %18967 = vst [vmem:[#allocation27_spill] sm:$0xff] %v13861_v15  ;;  %4666 = vmatpush.msra.mxu2 %v13861_v15  ;;  %5117 = vmatpush.msra.mxu1 %v13861_v15 }
 0x3c9   :  { %3567 = vmatmul.f32.gmra.mxu2 %v18962_v28  ;;  %3668 = vmatmul.f32.gmra.mxu3 %v13460_v34  ;;  %v13865_v28 = vsub.f32 %v10160_v49, %v13861_v15 }
 0x3ca   :  { %v13859_v12 = vpop.f32.mrf.mxu1 }
 0x3cb   :  { %18966 = vst [vmem:[#allocation90_spill] sm:$0xff] %v13859_v12  ;;  %3967 = vmatmul.f32.gmra.mxu0 %v3966_v36  ;;  %v18203_v36 = vand.u32 4294901760, %v13865_v28 }
 0x3cc   :  { %v3008_v38 = vpop.f32.mrf.mxu2  ;;  %v3185_v9 = vpop.f32.mrf.mxu3  ;;  %4989 = vmatpush.msra.mxu0 %v13865_v28 }
 0x3cd   :  { %v3182_v41 = vadd.f32 %v3181_v46, %v3008_v38  ;;  %4136 = vmatmul.f32.gmra.mxu1 %v13817_v1  ;;  %v4829_v15 = vsub.f32 %v13865_v28, %v18203_v36  ;;  %v3974_v46 = vand.u32 4294901760, %v3973_v37  ;;  %v10159_v38 = vld [vmem:[%s17933_s3 + $0x270] sm:$0xff]  ;;  %v3981_v36 = vsub.f32 %v13869_v48, %v18204_v5 }
 0x3cf   :  { %v13877_v12 = vadd.f32 %v3307_v3, %v3182_v41  ;;  %v4830_v41 = vand.u32 4294901760, %v4829_v15  ;;  %v13890_v3 = vand.u32 4294901760, %v10159_v38 }
 0x3d0   :  { %v3317_v49 = vpop.f32.mrf.mxu0 }
 0x3d1   :  { %18969 = vst [vmem:[#allocation99_spill] sm:$0xff] %v13877_v12  ;;  %3571 = vmatmul.f32.gmra.mxu2 %v13460_v34  ;;  %3672 = vmatmul.f32.gmra.mxu3 %v13510_v47  ;;  %v13894_v34 = vsub.f32 %v10159_v38, %v13890_v3 }
 0x3d2   :  { %v13888_v10 = vpop.f32.mrf.mxu1  ;;  %4831 = vmatpush.msra.mxu3 %v4830_v41  ;;  %4668 = vmatpush.msra.mxu2 %v13890_v3 }
 0x3d3   :  { %18970 = vst [vmem:[#allocation100_spill] sm:$0xff] %v13888_v10  ;;  %3975 = vmatmul.f32.gmra.mxu0 %v3974_v46  ;;  %v18207_v15 = vand.u32 4294901760, %v13894_v34  ;;  %5119 = vmatpush.msra.mxu1 %v13890_v3 }
 0x3d4   :  { %v3016_v2 = vpop.f32.mrf.mxu2  ;;  %v3189_v12 = vpop.f32.mrf.mxu3  ;;  %4992 = vmatpush.msra.mxu0 %v13894_v34 }
 0x3d5   :  { %v3186_v37 = vadd.f32 %v3185_v9, %v3016_v2  ;;  %4140 = vmatmul.f32.gmra.mxu1 %v13834_v8  ;;  %v4835_v38 = vsub.f32 %v13894_v34, %v18207_v15  ;;  %v3982_v2 = vand.u32 4294901760, %v3981_v36  ;;  %v10158_v9 = vld [vmem:[%s17933_s3 + $0x268] sm:$0xff] }
 0x3d6   :  { %v13915_v48 = vand.u32 4294901760, %v10158_v9 }
 0x3d7   :  { %v13903_v46 = vadd.f32 %v3312_v58, %v3186_v37  ;;  %v4836_v10 = vand.u32 4294901760, %v4835_v38 }
 0x3d8   :  { %v3322_v41 = vpop.f32.mrf.mxu0  ;;  %4670 = vmatpush.msra.mxu2 %v13915_v48  ;;  %5121 = vmatpush.msra.mxu1 %v13915_v48 }
 0x3d9   :  { %3575 = vmatmul.f32.gmra.mxu2 %v13510_v47  ;;  %3676 = vmatmul.f32.gmra.mxu3 %v13547_v24  ;;  %v13919_v47 = vsub.f32 %v10158_v9, %v13915_v48  ;;  %v10157_v9 = vld [vmem:[%s17933_s3 + $0x260] sm:$0xff] }
 0x3da   :  { %v13913_v5 = vpop.f32.mrf.mxu1  ;;  %4837 = vmatpush.msra.mxu3 %v4836_v10 }
 0x3db   :  { %18971 = vst [vmem:[#allocation101_spill] sm:$0xff] %v13913_v5  ;;  %3983 = vmatmul.f32.gmra.mxu0 %v3982_v2  ;;  %v18208_v36 = vand.u32 4294901760, %v13919_v47 }
 0x3dc   :  { %v3024_v58 = vpop.f32.mrf.mxu2  ;;  %v3193_v37 = vpop.f32.mrf.mxu3  ;;  %4995 = vmatpush.msra.mxu0 %v13919_v47 }
 0x3dd   :  { %v3190_v15 = vadd.f32 %v3189_v12, %v3024_v58  ;;  %4144 = vmatmul.f32.gmra.mxu1 %v13851_v11  ;;  %v4841_v10 = vsub.f32 %v13919_v47, %v18208_v36  ;;  %v18974_v12 = vand.u32 4294901760, %v13572_v27 }
 0x3df   :  { %v13925_v38 = vadd.f32 %v3317_v49, %v3190_v15  ;;  %v4842_v5 = vand.u32 4294901760, %v4841_v10  ;;  %v13940_v49 = vand.u32 4294901760, %v10157_v9 }
 0x3e0   :  { %v13927_v2 = vpop.f32.mrf.mxu0 }
 0x3e1   :  { %18972 = vst [vmem:[#allocation102_spill] sm:$0xff] %v13925_v38  ;;  %3579 = vmatmul.f32.gmra.mxu2 %v13547_v24  ;;  %4312 = vmatmul.f32.vlgmr.msrb.gmra.mxu3 %v18974_v12  ;;  %v13945_v24 = vsub.f32 %v10157_v9, %v13940_v49 }
 0x3e2   :  { %18973 = vst [vmem:[#allocation103_spill] sm:$0xff] %v13927_v2  ;;  %v13938_v58 = vpop.f32.mrf.mxu1  ;;  %4843 = vmatpush.msra.mxu3 %v4842_v5  ;;  %4672 = vmatpush.msra.mxu2 %v13940_v49 }
 0x3e3   :  { %18975 = vst [vmem:[#allocation104_spill] sm:$0xff] %v13938_v58  ;;  %4471 = vmatmul.f32.vlgmr.msrb.gmra.mxu0 %v13555_v19  ;;  %v18209_v36 = vand.u32 4294901760, %v13945_v24  ;;  %5123 = vmatpush.msra.mxu1 %v13940_v49 }
 0x3e4   :  { %v3032_v15 = vpop.f32.mrf.mxu2  ;;  %v3617_v2 = vpop.f32.mrf.mxu3  ;;  %4998 = vmatpush.msra.mxu0 %v13945_v24 }
 0x3e5   :  { %v3194_v12 = vadd.f32 %v3193_v37, %v3032_v15  ;;  %4568 = vmatmul.f32.vlgmr.msrb.gmra.mxu1 %v13555_v19  ;;  %v4847_v5 = vsub.f32 %v13945_v24, %v18209_v36  ;;  %v18978_v37 = vand.u32 4294901760, %v13599_v13  ;;  %v10156_v19 = vld [vmem:[%s17933_s3 + $0x258] sm:$0xff] }
 0x3e7   :  { %v13951_v10 = vadd.f32 %v3322_v41, %v3194_v12  ;;  %v4848_v15 = vand.u32 4294901760, %v4847_v5  ;;  %v13966_v41 = vand.u32 4294901760, %v10156_v19  ;;  %v3362_v12 = vadd.f32 %v13619_v39, %v13660_v29 }
 0x3e8   :  { %v13953_v58 = vpop.f32.mrf.mxu0 }
 0x3e9   :  { %18976 = vst [vmem:[#allocation105_spill] sm:$0xff] %v13951_v10  ;;  %4198 = vmatmul.f32.vlgmr.msrb.gmra.mxu2 %v13572_v27  ;;  %4318 = vmatmul.f32.gmra.mxu3 %v18978_v37  ;;  %v13973_v27 = vsub.f32 %v10156_v19, %v13966_v41  ;;  %v18981_v10 = vld [vmem:[#allocation16_spill] sm:$0xff] }
 0x3ea   :  { %18977 = vst [vmem:[#allocation106_spill] sm:$0xff] %v13953_v58  ;;  %v13964_v9 = vpop.f32.mrf.mxu1  ;;  %4849 = vmatpush.msra.mxu3 %v4848_v15  ;;  %4674 = vmatpush.msra.mxu2 %v13966_v41 }
 0x3eb   :  { %18979 = vst [vmem:[#allocation107_spill] sm:$0xff] %v13964_v9  ;;  %4475 = vmatmul.f32.gmra.mxu0 %v13582_v21  ;;  %v18210_v5 = vand.u32 4294901760, %v13973_v27  ;;  %5125 = vmatpush.msra.mxu1 %v13966_v41  ;;  %v18980_v9 = vld [vmem:[#allocation55_spill] sm:$0xff] }
 0x3ec   :  { %v3520_v36 = vpop.f32.mrf.mxu2  ;;  %v3621_v58 = vpop.f32.mrf.mxu3  ;;  %5001 = vmatpush.msra.mxu0 %v13973_v27  ;;  %v2649_v39 = vadd.f32 %v18981_v10, %v18980_v9  ;;  %v3368_v9 = vadd.f32 %v13647_v52, %v13679_v4 }
 0x3ed   :  { %v3521_v37 = vadd.f32 %v3520_v36, %v3362_v12  ;;  %4572 = vmatmul.f32.gmra.mxu1 %v13582_v21  ;;  %v4853_v19 = vsub.f32 %v13973_v27, %v18210_v5  ;;  %v18983_v21 = vand.u32 4294901760, %v13630_v17  ;;  %v10155_v36 = vld [vmem:[%s17933_s3 + $0x250] sm:$0xff]  ;;  %v18985_v5 = vld [vmem:[#allocation41_spill] sm:$0xff] }
 0x3ee   :  { %v13996_v10 = vand.u32 4294901760, %v10155_v36 }
 0x3ef   :  { %v3618_v29 = vadd.f32 %v3617_v2, %v3521_v37  ;;  %v4854_v2 = vand.u32 4294901760, %v4853_v19 }
 0x3f0   :  { %v13981_v38 = vpop.f32.mrf.mxu0  ;;  %4676 = vmatpush.msra.mxu2 %v13996_v10  ;;  %5127 = vmatpush.msra.mxu1 %v13996_v10 }
 0x3f1   :  { %v13986_v15 = vadd.f32 %v3618_v29, %v2649_v39  ;;  %4203 = vmatmul.f32.gmra.mxu2 %v13599_v13  ;;  %4324 = vmatmul.f32.gmra.mxu3 %v18983_v21  ;;  %v14003_v13 = vsub.f32 %v10155_v36, %v13996_v10  ;;  %v18984_v21 = vld [vmem:[#allocation60_spill] sm:$0xff] }
 0x3f2   :  { %v13994_v12 = vpop.f32.mrf.mxu1  ;;  %4855 = vmatpush.msra.mxu3 %v4854_v2  ;;  %v2653_v52 = vadd.f32 %v18985_v5, %v18984_v21 }
 0x3f3   :  { %18982 = vst [vmem:[#allocation55_spill] sm:$0xff] %v13986_v15  ;;  %4479 = vmatmul.f32.gmra.mxu0 %v13613_v0  ;;  %v18211_v19 = vand.u32 4294901760, %v14003_v13 }
 0x3f4   :  { %v3524_v37 = vpop.f32.mrf.mxu2  ;;  %v3625_v39 = vpop.f32.mrf.mxu3  ;;  %5004 = vmatpush.msra.mxu0 %v14003_v13 }
 0x3f5   :  { %v3525_v29 = vadd.f32 %v3524_v37, %v3368_v9  ;;  %4576 = vmatmul.f32.gmra.mxu1 %v13613_v0  ;;  %v4859_v36 = vsub.f32 %v14003_v13, %v18211_v19  ;;  %v18987_v0 = vand.u32 4294901760, %v13652_v50  ;;  %v10154_v9 = vld [vmem:[%s17933_s3 + $0x248] sm:$0xff]  ;;  %v18989_v19 = vld [vmem:[#allocation59_spill] sm:$0xff] }
 0x3f6   :  { %v14026_v5 = vand.u32 4294901760, %v10154_v9 }
 0x3f7   :  { %v3622_v4 = vadd.f32 %v3621_v58, %v3525_v29  ;;  %v4860_v58 = vand.u32 4294901760, %v4859_v36  ;;  %v3374_v29 = vadd.f32 %v13668_v30, %v13696_v51 }
 0x3f8   :  { %v14011_v15 = vpop.f32.mrf.mxu0  ;;  %4678 = vmatpush.msra.mxu2 %v14026_v5  ;;  %5129 = vmatpush.msra.mxu1 %v14026_v5 }
 0x3f9   :  { %v14016_v2 = vadd.f32 %v3622_v4, %v2653_v52  ;;  %4208 = vmatmul.f32.gmra.mxu2 %v13630_v17  ;;  %4330 = vmatmul.f32.gmra.mxu3 %v18987_v0  ;;  %v14033_v17 = vsub.f32 %v10154_v9, %v14026_v5  ;;  %v18988_v0 = vld [vmem:[#allocation75_spill] sm:$0xff] }
 0x3fa   :  { %v14024_v37 = vpop.f32.mrf.mxu1  ;;  %4861 = vmatpush.msra.mxu3 %v4860_v58  ;;  %v2657_v30 = vadd.f32 %v18989_v19, %v18988_v0 }
 0x3fb   :  { %18986 = vst [vmem:[#allocation16_spill] sm:$0xff] %v14016_v2  ;;  %4483 = vmatmul.f32.gmra.mxu0 %v13640_v33  ;;  %v18212_v36 = vand.u32 4294901760, %v14033_v17 }
 0x3fc   :  { %v3528_v21 = vpop.f32.mrf.mxu2  ;;  %v3629_v52 = vpop.f32.mrf.mxu3  ;;  %5007 = vmatpush.msra.mxu0 %v14033_v17 }
 0x3fd   :  { %v3529_v4 = vadd.f32 %v3528_v21, %v3374_v29  ;;  %4580 = vmatmul.f32.gmra.mxu1 %v13640_v33  ;;  %v4865_v9 = vsub.f32 %v14033_v17, %v18212_v36  ;;  %v18991_v33 = vand.u32 4294901760, %v13672_v32  ;;  %v10153_v29 = vld [vmem:[%s17933_s3 + $0x240] sm:$0xff]  ;;  %v18993_v36 = vld [vmem:[#allocation68_spill] sm:$0xff] }
 0x3fe   :  { %v14056_v19 = vand.u32 4294901760, %v10153_v29 }
 0x3ff   :  { %v3626_v51 = vadd.f32 %v3625_v39, %v3529_v4  ;;  %v4866_v39 = vand.u32 4294901760, %v4865_v9  ;;  %v3380_v4 = vadd.f32 %v13686_v6, %v13713_v61 }
 0x400   :  { %v14041_v2 = vpop.f32.mrf.mxu0  ;;  %4680 = vmatpush.msra.mxu2 %v14056_v19  ;;  %5131 = vmatpush.msra.mxu1 %v14056_v19 }
 0x401   :  { %v14046_v58 = vadd.f32 %v3626_v51, %v2657_v30  ;;  %4213 = vmatmul.f32.gmra.mxu2 %v13652_v50  ;;  %4336 = vmatmul.f32.gmra.mxu3 %v18991_v33  ;;  %v14063_v50 = vsub.f32 %v10153_v29, %v14056_v19  ;;  %v18992_v33 = vld [vmem:[#allocation78_spill] sm:$0xff] }
 0x402   :  { %v14054_v21 = vpop.f32.mrf.mxu1  ;;  %4867 = vmatpush.msra.mxu3 %v4866_v39  ;;  %v2661_v6 = vadd.f32 %v18993_v36, %v18992_v33 }
 0x403   :  { %18990 = vst [vmem:[#allocation60_spill] sm:$0xff] %v14046_v58  ;;  %4487 = vmatmul.f32.gmra.mxu0 %v13663_v14  ;;  %v18213_v9 = vand.u32 4294901760, %v14063_v50 }
 0x404   :  { %v3532_v0 = vpop.f32.mrf.mxu2  ;;  %v3633_v30 = vpop.f32.mrf.mxu3  ;;  %5010 = vmatpush.msra.mxu0 %v14063_v50 }
 0x405   :  { %v3533_v51 = vadd.f32 %v3532_v0, %v3380_v4  ;;  %4584 = vmatmul.f32.gmra.mxu1 %v13663_v14  ;;  %v4871_v29 = vsub.f32 %v14063_v50, %v18213_v9  ;;  %v18995_v14 = vand.u32 4294901760, %v13689_v31  ;;  %v10152_v4 = vld [vmem:[%s17933_s3 + $0x238] sm:$0xff] }
 0x406   :  { %v14086_v36 = vand.u32 4294901760, %v10152_v4  ;;  %v18997_v9 = vld [vmem:[#allocation76_spill] sm:$0xff] }
 0x407   :  { %v3630_v61 = vadd.f32 %v3629_v52, %v3533_v51  ;;  %v4872_v52 = vand.u32 4294901760, %v4871_v29  ;;  %v3386_v51 = vadd.f32 %v13703_v20, %v13730_v42 }
 0x408   :  { %v14071_v58 = vpop.f32.mrf.mxu0  ;;  %4682 = vmatpush.msra.mxu2 %v14086_v36  ;;  %5133 = vmatpush.msra.mxu1 %v14086_v36 }
 0x409   :  { %v14076_v39 = vadd.f32 %v3630_v61, %v2661_v6  ;;  %4218 = vmatmul.f32.gmra.mxu2 %v13672_v32  ;;  %4342 = vmatmul.f32.gmra.mxu3 %v18995_v14  ;;  %v14093_v32 = vsub.f32 %v10152_v4, %v14086_v36  ;;  %v18996_v14 = vld [vmem:[#allocation81_spill] sm:$0xff] }
 0x40a   :  { %v14084_v0 = vpop.f32.mrf.mxu1  ;;  %4873 = vmatpush.msra.mxu3 %v4872_v52  ;;  %v2665_v20 = vadd.f32 %v18997_v9, %v18996_v14 }
 0x40b   :  { %18994 = vst [vmem:[#allocation41_spill] sm:$0xff] %v14076_v39  ;;  %4491 = vmatmul.f32.gmra.mxu0 %v13681_v54  ;;  %v18214_v29 = vand.u32 4294901760, %v14093_v32 }
 0x40c   :  { %v3536_v33 = vpop.f32.mrf.mxu2  ;;  %v3637_v6 = vpop.f32.mrf.mxu3  ;;  %5013 = vmatpush.msra.mxu0 %v14093_v32 }
 0x40d   :  { %v3537_v61 = vadd.f32 %v3536_v33, %v3386_v51  ;;  %4588 = vmatmul.f32.gmra.mxu1 %v13681_v54  ;;  %v4877_v4 = vsub.f32 %v14093_v32, %v18214_v29  ;;  %v18999_v54 = vand.u32 4294901760, %v13707_v60  ;;  %v10151_v51 = vld [vmem:[%s17933_s3 + $0x230] sm:$0xff] }
 0x40e   :  { %v14116_v9 = vand.u32 4294901760, %v10151_v51  ;;  %v19001_v29 = vld [vmem:[#allocation79_spill] sm:$0xff] }
 0x40f   :  { %v3634_v42 = vadd.f32 %v3633_v30, %v3537_v61  ;;  %v4878_v30 = vand.u32 4294901760, %v4877_v4  ;;  %v3392_v61 = vadd.f32 %v13720_v53, %v13747_v59 }
 0x410   :  { %v14101_v39 = vpop.f32.mrf.mxu0  ;;  %4684 = vmatpush.msra.mxu2 %v14116_v9  ;;  %5135 = vmatpush.msra.mxu1 %v14116_v9 }
 0x411   :  { %v14106_v52 = vadd.f32 %v3634_v42, %v2665_v20  ;;  %4223 = vmatmul.f32.gmra.mxu2 %v13689_v31  ;;  %4348 = vmatmul.f32.gmra.mxu3 %v18999_v54  ;;  %v14123_v31 = vsub.f32 %v10151_v51, %v14116_v9  ;;  %v19000_v54 = vld [vmem:[#allocation84_spill] sm:$0xff] }
 0x412   :  { %v14114_v33 = vpop.f32.mrf.mxu1  ;;  %4879 = vmatpush.msra.mxu3 %v4878_v30  ;;  %v2669_v53 = vadd.f32 %v19001_v29, %v19000_v54 }
 0x413   :  { %18998 = vst [vmem:[#allocation75_spill] sm:$0xff] %v14106_v52  ;;  %4495 = vmatmul.f32.gmra.mxu0 %v13698_v26  ;;  %v18215_v4 = vand.u32 4294901760, %v14123_v31 }
 0x414   :  { %v3540_v14 = vpop.f32.mrf.mxu2  ;;  %v3641_v20 = vpop.f32.mrf.mxu3  ;;  %5016 = vmatpush.msra.mxu0 %v14123_v31 }
 0x415   :  { %v3541_v42 = vadd.f32 %v3540_v14, %v3392_v61  ;;  %4592 = vmatmul.f32.gmra.mxu1 %v13698_v26  ;;  %v4883_v51 = vsub.f32 %v14123_v31, %v18215_v4  ;;  %v19003_v26 = vand.u32 4294901760, %v13723_v63  ;;  %v10150_v61 = vld [vmem:[%s17933_s3 + $0x228] sm:$0xff] }
 0x416   :  { %v14146_v29 = vand.u32 4294901760, %v10150_v61  ;;  %v19005_v4 = vld [vmem:[#allocation82_spill] sm:$0xff] }
 0x417   :  { %v3638_v59 = vadd.f32 %v3637_v6, %v3541_v42  ;;  %v4884_v6 = vand.u32 4294901760, %v4883_v51  ;;  %v3398_v42 = vadd.f32 %v13737_v23, %v13764_v35 }
 0x418   :  { %v14131_v52 = vpop.f32.mrf.mxu0  ;;  %4686 = vmatpush.msra.mxu2 %v14146_v29  ;;  %5137 = vmatpush.msra.mxu1 %v14146_v29 }
 0x419   :  { %v14136_v30 = vadd.f32 %v3638_v59, %v2669_v53  ;;  %4228 = vmatmul.f32.gmra.mxu2 %v13707_v60  ;;  %4354 = vmatmul.f32.gmra.mxu3 %v19003_v26  ;;  %v14153_v60 = vsub.f32 %v10150_v61, %v14146_v29  ;;  %v19004_v26 = vld [vmem:[#allocation70_spill] sm:$0xff] }
 0x41a   :  { %v14144_v14 = vpop.f32.mrf.mxu1  ;;  %4885 = vmatpush.msra.mxu3 %v4884_v6  ;;  %v2673_v23 = vadd.f32 %v19005_v4, %v19004_v26 }
 0x41b   :  { %19002 = vst [vmem:[#allocation59_spill] sm:$0xff] %v14136_v30  ;;  %4499 = vmatmul.f32.gmra.mxu0 %v13715_v18  ;;  %v18216_v51 = vand.u32 4294901760, %v14153_v60 }
 0x41c   :  { %v3544_v54 = vpop.f32.mrf.mxu2  ;;  %v3645_v53 = vpop.f32.mrf.mxu3  ;;  %5019 = vmatpush.msra.mxu0 %v14153_v60 }
 0x41d   :  { %v3545_v59 = vadd.f32 %v3544_v54, %v3398_v42  ;;  %4596 = vmatmul.f32.gmra.mxu1 %v13715_v18  ;;  %v4889_v61 = vsub.f32 %v14153_v60, %v18216_v51  ;;  %v19008_v18 = vand.u32 4294901760, %v13740_v16  ;;  %v10149_v42 = vld [vmem:[%s17933_s3 + $0x220] sm:$0xff] }
 0x41e   :  { %v14176_v4 = vand.u32 4294901760, %v10149_v42  ;;  %v19011_v51 = vld [vmem:[#allocation85_spill] sm:$0xff] }
 0x41f   :  { %v3642_v35 = vadd.f32 %v3641_v20, %v3545_v59  ;;  %v4890_v20 = vand.u32 4294901760, %v4889_v61  ;;  %v3404_v59 = vadd.f32 %v13754_v57, %v13781_v7 }
 0x420   :  { %v14161_v30 = vpop.f32.mrf.mxu0  ;;  %4688 = vmatpush.msra.mxu2 %v14176_v4  ;;  %5139 = vmatpush.msra.mxu1 %v14176_v4 }
 0x421   :  { %19006 = vst [vmem:[#allocation78_spill] sm:$0xff] %v14161_v30  ;;  %v14166_v6 = vadd.f32 %v3642_v35, %v2673_v23  ;;  %4233 = vmatmul.f32.gmra.mxu2 %v13723_v63  ;;  %4360 = vmatmul.f32.gmra.mxu3 %v19008_v18  ;;  %v14183_v63 = vsub.f32 %v10149_v42, %v14176_v4  ;;  %v19010_v18 = vld [vmem:[#allocation30_spill] sm:$0xff] }
 0x422   :  { %v14174_v54 = vpop.f32.mrf.mxu1  ;;  %4891 = vmatpush.msra.mxu3 %v4890_v20  ;;  %v2677_v57 = vadd.f32 %v19011_v51, %v19010_v18 }
 0x423   :  { %19007 = vst [vmem:[#allocation68_spill] sm:$0xff] %v14166_v6  ;;  %4503 = vmatmul.f32.gmra.mxu0 %v13732_v44  ;;  %v18217_v61 = vand.u32 4294901760, %v14183_v63 }
 0x424   :  { %19009 = vst [vmem:[#allocation81_spill] sm:$0xff] %v14174_v54  ;;  %v3548_v26 = vpop.f32.mrf.mxu2  ;;  %v3649_v23 = vpop.f32.mrf.mxu3  ;;  %5022 = vmatpush.msra.mxu0 %v14183_v63 }
 0x425   :  { %v3549_v35 = vadd.f32 %v3548_v26, %v3404_v59  ;;  %4600 = vmatmul.f32.gmra.mxu1 %v13732_v44  ;;  %v4895_v42 = vsub.f32 %v14183_v63, %v18217_v61  ;;  %v19014_v44 = vand.u32 4294901760, %v13758_v45  ;;  %v10148_v59 = vld [vmem:[%s17933_s3 + $0x218] sm:$0xff]  ;;  %v19017_v61 = vld [vmem:[#allocation87_spill] sm:$0xff] }
 0x426   :  { %v14206_v51 = vand.u32 4294901760, %v10148_v59 }
 0x427   :  { %v3646_v7 = vadd.f32 %v3645_v53, %v3549_v35  ;;  %v4896_v53 = vand.u32 4294901760, %v4895_v42  ;;  %v3410_v35 = vadd.f32 %v13771_v40, %v13798_v56 }
 0x428   :  { %v14191_v6 = vpop.f32.mrf.mxu0  ;;  %4690 = vmatpush.msra.mxu2 %v14206_v51  ;;  %5141 = vmatpush.msra.mxu1 %v14206_v51 }
 0x429   :  { %19012 = vst [vmem:[#allocation76_spill] sm:$0xff] %v14191_v6  ;;  %v14196_v20 = vadd.f32 %v3646_v7, %v2677_v57  ;;  %4238 = vmatmul.f32.gmra.mxu2 %v13740_v16  ;;  %4366 = vmatmul.f32.gmra.mxu3 %v19014_v44  ;;  %v14213_v16 = vsub.f32 %v10148_v59, %v14206_v51  ;;  %v19016_v44 = vld [vmem:[#allocation34_spill] sm:$0xff] }
 0x42a   :  { %v14204_v26 = vpop.f32.mrf.mxu1  ;;  %4897 = vmatpush.msra.mxu3 %v4896_v53  ;;  %v2681_v40 = vadd.f32 %v19017_v61, %v19016_v44  ;;  %v19024_v44 = vld [vmem:[#allocation19_spill] sm:$0xff] }
 0x42b   :  { %19013 = vst [vmem:[#allocation84_spill] sm:$0xff] %v14196_v20  ;;  %4507 = vmatmul.f32.gmra.mxu0 %v13749_v55  ;;  %v18218_v42 = vand.u32 4294901760, %v14213_v16 }
 0x42c   :  { %19015 = vst [vmem:[#allocation79_spill] sm:$0xff] %v14204_v26  ;;  %v3552_v18 = vpop.f32.mrf.mxu2  ;;  %v3653_v57 = vpop.f32.mrf.mxu3  ;;  %5025 = vmatpush.msra.mxu0 %v14213_v16 }
 0x42d   :  { %v3553_v7 = vadd.f32 %v3552_v18, %v3410_v35  ;;  %4604 = vmatmul.f32.gmra.mxu1 %v13749_v55  ;;  %v4901_v59 = vsub.f32 %v14213_v16, %v18218_v42  ;;  %v19020_v55 = vld [vmem:[#allocation93_spill] sm:$0xff]  ;;  %v10147_v18 = vld [vmem:[%s17933_s3 + $0x210] sm:$0xff]  ;;  %v19025_v42 = vld [vmem:[#allocation54_spill] sm:$0xff] }
 0x42e   :  { %v19021_v35 = vand.u32 4294901760, %v19020_v55  ;;  %v14236_v61 = vand.u32 4294901760, %v10147_v18 }
 0x42f   :  { %v3650_v56 = vadd.f32 %v3649_v23, %v3553_v7  ;;  %v4902_v23 = vand.u32 4294901760, %v4901_v59  ;;  %v19023_v7 = vld [vmem:[#allocation69_spill] sm:$0xff] }
 0x430   :  { %v14221_v20 = vpop.f32.mrf.mxu0  ;;  %4692 = vmatpush.msra.mxu2 %v14236_v61  ;;  %5143 = vmatpush.msra.mxu1 %v14236_v61 }
 0x431   :  { %19018 = vst [vmem:[#allocation70_spill] sm:$0xff] %v14221_v20  ;;  %v14226_v53 = vadd.f32 %v3650_v56, %v2681_v40  ;;  %4243 = vmatmul.f32.gmra.mxu2 %v13758_v45  ;;  %4372 = vmatmul.f32.gmra.mxu3 %v19021_v35  ;;  %v3416_v40 = vadd.f32 %v19025_v42, %v19024_v44  ;;  %v19027_v20 = vld [vmem:[#allocation63_spill] sm:$0xff] }
 0x432   :  { %v14234_v26 = vpop.f32.mrf.mxu1  ;;  %4903 = vmatpush.msra.mxu3 %v4902_v23  ;;  %v14243_v45 = vsub.f32 %v10147_v18, %v14236_v61 }
 0x433   :  { %19019 = vst [vmem:[#allocation82_spill] sm:$0xff] %v14226_v53  ;;  %4511 = vmatmul.f32.gmra.mxu0 %v19023_v7 }
 0x434   :  { %19022 = vst [vmem:[#allocation30_spill] sm:$0xff] %v14234_v26  ;;  %v3556_v56 = vpop.f32.mrf.mxu2  ;;  %v3657_v53 = vpop.f32.mrf.mxu3  ;;  %v18219_v59 = vand.u32 4294901760, %v14243_v45  ;;  %5028 = vmatpush.msra.mxu0 %v14243_v45  ;;  %v19026_v26 = vld [vmem:[#allocation11_spill] sm:$0xff] }
 0x435   :  { %v3557_v35 = vadd.f32 %v3556_v56, %v3416_v40  ;;  %4608 = vmatmul.f32.gmra.mxu1 %v19023_v7  ;;  %v2685_v42 = vadd.f32 %v19027_v20, %v19026_v26  ;;  %v19030_v7 = vld [vmem:[#allocation56_spill] sm:$0xff]  ;;  %v10146_v56 = vld [vmem:[%s17933_s3 + $0x208] sm:$0xff] }
 0x436   :  { %v4907_v18 = vsub.f32 %v14243_v45, %v18219_v59  ;;  %v19031_v40 = vand.u32 4294901760, %v19030_v7  ;;  %v14266_v26 = vand.u32 4294901760, %v10146_v56 }
 0x437   :  { %v3654_v44 = vadd.f32 %v3653_v57, %v3557_v35  ;;  %v19033_v57 = vld [vmem:[#allocation83_spill] sm:$0xff] }
 0x438   :  { %v14251_v6 = vpop.f32.mrf.mxu0  ;;  %v4908_v20 = vand.u32 4294901760, %v4907_v18  ;;  %v19034_v35 = vld [vmem:[#allocation15_spill] sm:$0xff]  ;;  %4694 = vmatpush.msra.mxu2 %v14266_v26  ;;  %5145 = vmatpush.msra.mxu1 %v14266_v26 }
 0x439   :  { %19028 = vst [vmem:[#allocation85_spill] sm:$0xff] %v14251_v6  ;;  %v14256_v23 = vadd.f32 %v3654_v44, %v2685_v42  ;;  %4248 = vmatmul.f32.gmra.mxu2 %v19020_v55  ;;  %4378 = vmatmul.f32.gmra.mxu3 %v19031_v40  ;;  %v3422_v42 = vadd.f32 %v19034_v35, %v19033_v57 }
 0x43a   :  { %v14264_v54 = vpop.f32.mrf.mxu1  ;;  %4909 = vmatpush.msra.mxu3 %v4908_v20  ;;  %v14273_v55 = vsub.f32 %v10146_v56, %v14266_v26 }
 0x43b   :  { %19029 = vst [vmem:[#allocation34_spill] sm:$0xff] %v14256_v23  ;;  %4515 = vmatmul.f32.gmra.mxu0 %v13783_v25  ;;  %v19035_v23 = vld [vmem:[#allocation24_spill] sm:$0xff] }
 0x43c   :  { %19032 = vst [vmem:[#allocation87_spill] sm:$0xff] %v14264_v54  ;;  %v3560_v44 = vpop.f32.mrf.mxu2  ;;  %v3661_v59 = vpop.f32.mrf.mxu3  ;;  %v18220_v18 = vand.u32 4294901760, %v14273_v55  ;;  %5031 = vmatpush.msra.mxu0 %v14273_v55  ;;  %v19036_v54 = vld [vmem:[#allocation28_spill] sm:$0xff] }
 0x43d   :  { %v3561_v40 = vadd.f32 %v3560_v44, %v3422_v42  ;;  %4612 = vmatmul.f32.gmra.mxu1 %v13783_v25  ;;  %v2689_v57 = vadd.f32 %v19036_v54, %v19035_v23  ;;  %v19038_v25 = vld [vmem:[#allocation20_spill] sm:$0xff]  ;;  %v10145_v44 = vld [vmem:[%s17933_s3 + $0x200] sm:$0xff]  ;;  %v19041_v23 = vld [vmem:[#allocation67_spill] sm:$0xff] }
 0x43e   :  { %v4913_v56 = vsub.f32 %v14273_v55, %v18220_v18  ;;  %v19039_v42 = vand.u32 4294901760, %v19038_v25 }
 0x43f   :  { %v3658_v35 = vadd.f32 %v3657_v53, %v3561_v40  ;;  %v14296_v53 = vand.u32 4294901760, %v10145_v44  ;;  %v3428_v40 = vadd.f32 %v19041_v23, %v13849_v22  ;;  %v19043_v22 = vld [vmem:[#allocation46_spill] sm:$0xff]  ;;  %v19044_v23 = vld [vmem:[#allocation21_spill] sm:$0xff] }
 0x440   :  { %v14281_v6 = vpop.f32.mrf.mxu0  ;;  %v4914_v54 = vand.u32 4294901760, %v4913_v56  ;;  %v19042_v56 = vand.u32 4294901760, %v13865_v28 }
 0x441   :  { %v14286_v20 = vadd.f32 %v3658_v35, %v2689_v57  ;;  %4253 = vmatmul.f32.gmra.mxu2 %v19030_v7  ;;  %4384 = vmatmul.f32.gmra.mxu3 %v19039_v42  ;;  %v14302_v7 = vsub.f32 %v10145_v44, %v14296_v53  ;;  %v19045_v44 = vand.u32 4294901760, %v13894_v34  ;;  %v19049_v34 = vld [vmem:[#allocation99_spill] sm:$0xff] }
 0x442   :  { %v14294_v30 = vpop.f32.mrf.mxu1  ;;  %4915 = vmatpush.msra.mxu3 %v4914_v54  ;;  %4696 = vmatpush.msra.mxu2 %v14296_v53  ;;  %v2693_v54 = vadd.f32 %v19044_v23, %v19043_v22 }
 0x443   :  { %19037 = vst [vmem:[#allocation93_spill] sm:$0xff] %v14286_v20  ;;  %4519 = vmatmul.f32.gmra.mxu0 %v13800_v43  ;;  %v18221_v18 = vand.u32 4294901760, %v14302_v7  ;;  %5147 = vmatpush.msra.mxu1 %v14296_v53 }
 0x444   :  { %19040 = vst [vmem:[#allocation69_spill] sm:$0xff] %v14294_v30  ;;  %v3564_v57 = vpop.f32.mrf.mxu2  ;;  %v3665_v35 = vpop.f32.mrf.mxu3  ;;  %5248 = vmatpush.msrb.mxu2 %v19042_v56  ;;  %5034 = vmatpush.msra.mxu0 %v14302_v7 }
 0x445   :  { %v3565_v42 = vadd.f32 %v3564_v57, %v3428_v40  ;;  %4616 = vmatmul.f32.gmra.mxu1 %v13800_v43  ;;  %v4919_v43 = vsub.f32 %v14302_v7, %v18221_v18  ;;  %v19047_v40 = vand.u32 4294901760, %v13825_v62 }
 0x446   :  { %5252 = vmatpush.msrb.mxu2 %v19045_v44 }
 0x447   :  { %v3662_v20 = vadd.f32 %v3661_v59, %v3565_v42  ;;  %v4920_v56 = vand.u32 4294901760, %v4919_v43  ;;  %v19048_v59 = vand.u32 4294901760, %v13919_v47  ;;  %v19050_v42 = vld [vmem:[#allocation23_spill] sm:$0xff]  ;;  %v19053_v43 = vand.u32 4294901760, %v13973_v27  ;;  %v19054_v47 = vld [vmem:[#allocation48_spill] sm:$0xff] }
 0x448   :  { %v14315_v30 = vpop.f32.mrf.mxu0  ;;  %v3434_v22 = vadd.f32 %v19050_v42, %v19049_v34 }
 0x449   :  { %v14320_v28 = vadd.f32 %v3662_v20, %v2693_v54  ;;  %4258 = vmatmul.f32.gmra.mxu2 %v19038_v25  ;;  %4390 = vmatmul.f32.gmra.mxu3 %v19047_v40  ;;  %v19051_v20 = vand.u32 4294901760, %v13945_v24  ;;  %v19052_v54 = vld [vmem:[#allocation27_spill] sm:$0xff]  ;;  %v19055_v40 = vld [vmem:[#allocation92_spill] sm:$0xff] }
 0x44a   :  { %v14325_v57 = vpop.f32.mrf.mxu1  ;;  %5256 = vmatpush.msrb.mxu2 %v19048_v59  ;;  %4921 = vmatpush.msra.mxu3 %v4920_v56  ;;  %v2697_v59 = vadd.f32 %v19055_v40, %v19054_v47  ;;  %v19056_v56 = vand.u32 4294901760, %v14003_v13 }
 0x44b   :  { %19046 = vst [vmem:[#allocation19_spill] sm:$0xff] %v14320_v28  ;;  %4523 = vmatmul.f32.gmra.mxu0 %v13817_v1 }
 0x44c   :  { %v3568_v23 = vpop.f32.mrf.mxu2  ;;  %v3669_v44 = vpop.f32.mrf.mxu3  ;;  %5260 = vmatpush.msrb.mxu2 %v19051_v20  ;;  %5375 = vmatpush.msrb.mxu3 %v19052_v54  ;;  %v19064_v20 = vld [vmem:[#allocation94_spill] sm:$0xff] }
 0x44d   :  { %v3569_v25 = vadd.f32 %v3568_v23, %v3434_v22  ;;  %4620 = vmatmul.f32.gmra.mxu1 %v13817_v1  ;;  %v19058_v1 = vld [vmem:[#allocation71_spill] sm:$0xff] }
 0x44e   :  { %5264 = vmatpush.msrb.mxu2 %v19053_v43  ;;  %5377 = vmatpush.msrb.mxu3 %v13890_v3  ;;  %v19059_v42 = vand.u32 4294901760, %v19058_v1  ;;  %v19061_v3 = vld [vmem:[#allocation90_spill] sm:$0xff]  ;;  %v19065_v43 = vld [vmem:[#allocation72_spill] sm:$0xff] }
 0x44f   :  { %v3666_v18 = vadd.f32 %v3665_v35, %v3569_v25  ;;  %v19060_v35 = vand.u32 4294901760, %v14033_v17  ;;  %v3440_v13 = vadd.f32 %v19061_v3, %v13903_v46  ;;  %v19063_v46 = vld [vmem:[#allocation53_spill] sm:$0xff]  ;;  %v14372_v47 = vand.u32 4294901760, %v19065_v43  ;;  %v10191_v3 = vld [vmem:[%s17933_s3 + $0x2f0] sm:$0xff] }
 0x450   :  { %v14341_v34 = vpop.f32.mrf.mxu0  ;;  %5268 = vmatpush.msrb.mxu2 %v19056_v56  ;;  %5379 = vmatpush.msrb.mxu3 %v13915_v48  ;;  %v19062_v48 = vand.u32 4294901760, %v14063_v50  ;;  %v2701_v25 = vadd.f32 %v19064_v20, %v19063_v46  ;;  %v19070_v56 = vand.u32 4294901760, %v14123_v31  ;;  %v19073_v31 = vand.u32 4294901760, %v14153_v60  ;;  %v19075_v20 = vld [vmem:[#allocation96_spill] sm:$0xff] }
 0x451   :  { %v14345_v24 = vadd.f32 %v3666_v18, %v2697_v59  ;;  %4263 = vmatmul.f32.gmra.mxu2 %v13825_v62  ;;  %4396 = vmatmul.f32.gmra.mxu3 %v19059_v42  ;;  %v10192_v18 = vld [vmem:[%s17933_s3 + $0x2f8] sm:$0xff] }
 0x452   :  { %v14350_v27 = vpop.f32.mrf.mxu1  ;;  %5272 = vmatpush.msrb.mxu2 %v19060_v35  ;;  %v14361_v23 = vand.u32 4294901760, %v10192_v18  ;;  %5381 = vmatpush.msrb.mxu3 %v13940_v49  ;;  %v19066_v49 = vand.u32 4294901760, %v14093_v32  ;;  %v19071_v32 = vld [vmem:[#allocation102_spill] sm:$0xff]  ;;  %v19072_v42 = vld [vmem:[#allocation100_spill] sm:$0xff] }
 0x453   :  { %19057 = vst [vmem:[#allocation54_spill] sm:$0xff] %v14345_v24  ;;  %4527 = vmatmul.f32.gmra.mxu0 %v13834_v8  ;;  %v3446_v35 = vadd.f32 %v19072_v42, %v19071_v32  ;;  %v19080_v32 = vld [vmem:[#allocation101_spill] sm:$0xff]  ;;  %v4106_v24 = vadd.f32 %v14084_v0, %v14071_v58 }
 0x454   :  { %v3572_v62 = vpop.f32.mrf.mxu2  ;;  %v3673_v22 = vpop.f32.mrf.mxu3  ;;  %5276 = vmatpush.msrb.mxu2 %v19062_v48  ;;  %5618 = vmatpush.msrb.mxu0 %v14361_v23  ;;  %v14375_v40 = vsub.f32 %v10192_v18, %v14361_v23  ;;  %v19109_v0 = vld [vmem:[#allocation33_spill] sm:$0xff] }
 0x455   :  { %v3573_v17 = vadd.f32 %v3572_v62, %v3440_v13  ;;  %4624 = vmatmul.f32.gmra.mxu1 %v13834_v8  ;;  %5383 = vmatpush.msrb.mxu3 %v13966_v41  ;;  %v19068_v41 = vld [vmem:[#allocation98_spill] sm:$0xff] }
 0x456   :  { %5280 = vmatpush.msrb.mxu2 %v19066_v49  ;;  %v19069_v59 = vand.u32 4294901760, %v19068_v41 }
 0x457   :  { %v3670_v54 = vadd.f32 %v3669_v44, %v3573_v17  ;;  %5385 = vmatpush.msrb.mxu3 %v13996_v10  ;;  %v4698_v10 = vsub.f32 %v19065_v43, %v14372_v47  ;;  %v19074_v17 = vld [vmem:[#allocation74_spill] sm:$0xff] }
 0x458   :  { %v14379_v50 = vpop.f32.mrf.mxu0  ;;  %5284 = vmatpush.msrb.mxu2 %v19070_v56  ;;  %v14411_v46 = vand.u32 4294901760, %v19074_v17 }
 0x459   :  { %v14382_v8 = vadd.f32 %v3670_v54, %v2701_v25  ;;  %4268 = vmatmul.f32.gmra.mxu2 %v19058_v1  ;;  %4402 = vmatmul.f32.gmra.mxu3 %v19069_v59  ;;  %v18224_v1 = vand.u32 4294901760, %v14375_v40  ;;  %v19076_v25 = vld [vmem:[#allocation47_spill] sm:$0xff]  ;;  %v4699_v60 = vand.u32 4294901760, %v4698_v10  ;;  %v19077_v59 = vand.u32 4294901760, %v14183_v63  ;;  %v19079_v63 = vld [vmem:[#allocation105_spill] sm:$0xff] }
 0x45a   :  { %v14387_v44 = vpop.f32.mrf.mxu1  ;;  %5387 = vmatpush.msrb.mxu3 %v14026_v5  ;;  %v14401_v5 = vand.u32 4294901760, %v10191_v3  ;;  %5288 = vmatpush.msrb.mxu2 %v19073_v31  ;;  %v3452_v42 = vadd.f32 %v19080_v32, %v19079_v63 }
 0x45b   :  { %19067 = vst [vmem:[#allocation11_spill] sm:$0xff] %v14382_v8  ;;  %4531 = vmatmul.f32.gmra.mxu0 %v13851_v11  ;;  %v5781_v48 = vsub.f32 %v14375_v40, %v18224_v1 }
 0x45c   :  { %v3576_v13 = vpop.f32.mrf.mxu2  ;;  %v3677_v18 = vpop.f32.mrf.mxu3  ;;  %5389 = vmatpush.msrb.mxu3 %v14056_v19  ;;  %5620 = vmatpush.msrb.mxu0 %v14401_v5  ;;  %v2705_v19 = vadd.f32 %v19076_v25, %v19075_v20  ;;  %v19083_v25 = vld [vmem:[#allocation29_spill] sm:$0xff] }
 0x45d   :  { %v3577_v62 = vadd.f32 %v3576_v13, %v3446_v35  ;;  %4628 = vmatmul.f32.gmra.mxu1 %v13851_v11  ;;  %v5782_v49 = vand.u32 4294901760, %v5781_v48  ;;  %5292 = vmatpush.msrb.mxu2 %v19077_v59  ;;  %v4700_v35 = vsub.f32 %v4698_v10, %v4699_v60  ;;  %v19081_v13 = vand.u32 4294901760, %v14213_v16  ;;  %v19085_v16 = vld [vmem:[#allocation97_spill] sm:$0xff] }
 0x45e   :  { %5391 = vmatpush.msrb.mxu3 %v14086_v36 }
 0x45f   :  { %v3674_v54 = vadd.f32 %v3673_v22, %v3577_v62  ;;  %v4706_v22 = vsub.f32 %v19074_v17, %v14411_v46  ;;  %5783 = vmatpush.msrb.mxu1 %v5782_v49  ;;  %5296 = vmatpush.msrb.mxu2 %v19081_v13  ;;  %v19091_v13 = vld [vmem:[#allocation104_spill] sm:$0xff]  ;;  %v4098_v17 = vadd.f32 %v14024_v37, %v14011_v15  ;;  %v19103_v37 = vld [vmem:[#allocation26_spill] sm:$0xff] }
 0x460   :  { %v14419_v11 = vpop.f32.mrf.mxu0  ;;  %5393 = vmatpush.msrb.mxu3 %v14116_v9  ;;  %v14434_v9 = vsub.f32 %v10191_v3, %v14401_v5  ;;  %v19082_v3 = vand.u32 4294901760, %v14243_v45  ;;  %v19087_v45 = vand.u32 4294901760, %v14273_v55  ;;  %v19089_v55 = vand.u32 4294901760, %v14302_v7 }
 0x461   :  { %v14422_v56 = vadd.f32 %v3674_v54, %v2705_v19  ;;  %4273 = vmatmul.f32.gmra.mxu2 %v19068_v41  ;;  %4923 = vmatmul.f32.vlgmr.msra.gmra.mxu3 %v14372_v47  ;;  %v10190_v41 = vld [vmem:[%s17933_s3 + $0x2e8] sm:$0xff]  ;;  %v4707_v20 = vand.u32 4294901760, %v4706_v22  ;;  %v14448_v19 = vand.u32 4294901760, %v19083_v25  ;;  %v19086_v54 = vld [vmem:[#allocation95_spill] sm:$0xff] }
 0x462   :  { %v14426_v36 = vpop.f32.mrf.mxu1  ;;  %5395 = vmatpush.msrb.mxu3 %v14146_v29  ;;  %v14441_v48 = vand.u32 4294901760, %v10190_v41  ;;  %5300 = vmatpush.msrb.mxu2 %v19082_v3  ;;  %v2709_v49 = vadd.f32 %v19086_v54, %v19085_v16  ;;  %v10189_v3 = vld [vmem:[%s17933_s3 + $0x2e0] sm:$0xff] }
 0x463   :  { %19078 = vst [vmem:[#allocation63_spill] sm:$0xff] %v14422_v56  ;;  %5037 = vmatmul.f32.vlgmr.msra.gmra.mxu0 %v4698_v10  ;;  %v18223_v10 = vand.u32 4294901760, %v14434_v9  ;;  %v4102_v56 = vadd.f32 %v14054_v21, %v14041_v2  ;;  %v19106_v21 = vld [vmem:[#allocation17_spill] sm:$0xff] }
 0x464   :  { %v3580_v31 = vpop.f32.mrf.mxu2  ;;  %v4313_v62 = vpop.f32.mrf.mxu3  ;;  %5397 = vmatpush.msrb.mxu3 %v14176_v4  ;;  %19084 = vst [vmem:[#allocation56_spill] sm:$0xff] %v14448_v19  ;;  %5622 = vmatpush.msrb.mxu0 %v14441_v48  ;;  %v4701_v4 = vand.u32 4294901760, %v4700_v35  ;;  %v19090_v35 = vld [vmem:[#allocation103_spill] sm:$0xff] }
 0x465   :  { %v3581_v29 = vadd.f32 %v3580_v31, %v3452_v42  ;;  %5151 = vmatmul.f32.vlgmr.msra.gmra.mxu1 %v4699_v60  ;;  %v5787_v60 = vsub.f32 %v14434_v9, %v18223_v10  ;;  %5304 = vmatpush.msrb.mxu2 %v19087_v45  ;;  %v4086_v31 = vadd.f32 %v19091_v13, %v19090_v35  ;;  %v19094_v13 = vld [vmem:[#allocation106_spill] sm:$0xff] }
 0x466   :  { %5399 = vmatpush.msrb.mxu3 %v14206_v51 }
 0x467   :  { %v3678_v59 = vadd.f32 %v3677_v18, %v3581_v29  ;;  %v5788_v51 = vand.u32 4294901760, %v5787_v60  ;;  %v4714_v18 = vsub.f32 %v19083_v25, %v14448_v19  ;;  %5308 = vmatpush.msrb.mxu2 %v19089_v55  ;;  %v14475_v29 = vsub.f32 %v10190_v41, %v14441_v48  ;;  %v19092_v41 = vld [vmem:[#allocation65_spill] sm:$0xff] }
 0x468   :  { %v14459_v63 = vpop.f32.mrf.mxu0  ;;  %5401 = vmatpush.msrb.mxu3 %v14236_v61  ;;  %v4708_v61 = vsub.f32 %v4706_v22, %v4707_v20 }
 0x469   :  { %v14462_v32 = vadd.f32 %v3678_v59, %v2709_v49  ;;  %4702 = vmatmul.f32.vlgmr.msra.gmra.mxu2 %v4701_v4  ;;  %4927 = vmatmul.f32.gmra.mxu3 %v14411_v46  ;;  %v14480_v49 = vand.u32 4294901760, %v10189_v3  ;;  %v18222_v7 = vand.u32 4294901760, %v14475_v29  ;;  %v14487_v59 = vand.u32 4294901760, %v19092_v41 }
 0x46a   :  { %v14465_v42 = vpop.f32.mrf.mxu1  ;;  %5403 = vmatpush.msrb.mxu3 %v14266_v26  ;;  %5789 = vmatpush.msrb.mxu1 %v5788_v51  ;;  %v4709_v60 = vand.u32 4294901760, %v4708_v61 }
 0x46b   :  { %19088 = vst [vmem:[#allocation83_spill] sm:$0xff] %v14462_v32  ;;  %5042 = vmatmul.f32.gmra.mxu0 %v4706_v22  ;;  %5941 = vmatpush.msra.mxu2 %v14375_v40  ;;  %v4715_v22 = vand.u32 4294901760, %v4714_v18 }
 0x46c   :  { %v4199_v16 = vpop.f32.mrf.mxu2  ;;  %v4319_v54 = vpop.f32.mrf.mxu3  ;;  %5405 = vmatpush.msrb.mxu3 %v14296_v53  ;;  %19093 = vst [vmem:[#allocation15_spill] sm:$0xff] %v14487_v59  ;;  %5624 = vmatpush.msrb.mxu0 %v14480_v49  ;;  %v5793_v53 = vsub.f32 %v14475_v29, %v18222_v7 }
 0x46d   :  { %v4200_v26 = vadd.f32 %v4199_v16, %v4086_v31  ;;  %5157 = vmatmul.f32.gmra.mxu1 %v4707_v20  ;;  %5944 = vmatpush.msra.mxu2 %v14434_v9  ;;  %v4716_v35 = vsub.f32 %v4714_v18, %v4715_v22  ;;  %v19095_v31 = vld [vmem:[#allocation107_spill] sm:$0xff] }
 0x46e   :  { %6069 = vmatpush.msra.mxu3 %v14361_v23  ;;  %v5794_v51 = vand.u32 4294901760, %v5793_v53  ;;  %v4090_v61 = vadd.f32 %v19095_v31, %v19094_v13 }
 0x46f   :  { %v4314_v4 = vadd.f32 %v4313_v62, %v4200_v26  ;;  %5947 = vmatpush.msra.mxu2 %v14475_v29  ;;  %v4722_v62 = vsub.f32 %v19092_v41, %v14487_v59  ;;  %v10188_v26 = vld [vmem:[%s17933_s3 + $0x2d8] sm:$0xff]  ;;  %v4717_v13 = vand.u32 4294901760, %v4716_v35 }
 0x470   :  { %6071 = vmatpush.msra.mxu3 %v14401_v5  ;;  %v4480_v20 = vpop.f32.mrf.mxu0  ;;  %5795 = vmatpush.msrb.mxu1 %v5794_v51  ;;  %v14512_v53 = vand.u32 4294901760, %v10188_v26 }
 0x471   :  { %v4473_v45 = vadd.f32 %v14419_v11, %v4314_v4  ;;  %4710 = vmatmul.f32.gmra.mxu2 %v4709_v60  ;;  %4931 = vmatmul.f32.gmra.mxu3 %v14448_v19  ;;  %v14507_v11 = vsub.f32 %v10189_v3, %v14480_v49  ;;  %v19138_v19 = vand.u32 4294901760, %v14375_v40  ;;  %v19141_v40 = vld [vmem:[#allocation10_spill] sm:$0xff] }
 0x472   :  { %v4577_v55 = vpop.f32.mrf.mxu1  ;;  %6073 = vmatpush.msra.mxu3 %v14441_v48  ;;  %5626 = vmatpush.msrb.mxu0 %v14512_v53  ;;  %v14535_v35 = vsub.f32 %v10188_v26, %v14512_v53 }
 0x473   :  { %v14504_v16 = vadd.f32 %v14426_v36, %v4473_v45  ;;  %5047 = vmatmul.f32.gmra.mxu0 %v4714_v18  ;;  %v18226_v36 = vand.u32 4294901760, %v14507_v11  ;;  %5950 = vmatpush.msra.mxu2 %v14507_v11  ;;  %v4723_v18 = vand.u32 4294901760, %v4722_v62  ;;  %v19097_v45 = vld [vmem:[#allocation58_spill] sm:$0xff] }
 0x474   :  { %v4204_v4 = vpop.f32.mrf.mxu2  ;;  %v4325_v60 = vpop.f32.mrf.mxu3  ;;  %6075 = vmatpush.msra.mxu3 %v14480_v49  ;;  %v14518_v3 = vand.u32 4294901760, %v19097_v45 }
 0x475   :  { %19096 = vst [vmem:[#allocation24_spill] sm:$0xff] %v14504_v16  ;;  %v4205_v7 = vadd.f32 %v4204_v4, %v4090_v61  ;;  %5163 = vmatmul.f32.gmra.mxu1 %v4715_v22  ;;  %v5799_v31 = vsub.f32 %v14507_v11, %v18226_v36  ;;  %v4724_v1 = vsub.f32 %v4722_v62, %v4723_v18  ;;  %v19123_v16 = vld [vmem:[#allocation79_spill] sm:$0xff] }
 0x476   :  { %19098 = vst [vmem:[#allocation28_spill] sm:$0xff] %v14518_v3  ;;  %6077 = vmatpush.msra.mxu3 %v14512_v53  ;;  %v4730_v43 = vsub.f32 %v19097_v45, %v14518_v3  ;;  %5953 = vmatpush.msra.mxu2 %v14535_v35 }
 0x477   :  { %v4320_v51 = vadd.f32 %v4319_v54, %v4205_v7  ;;  %v5800_v4 = vand.u32 4294901760, %v5799_v31  ;;  %v4094_v54 = vadd.f32 %v13994_v12, %v13981_v38  ;;  %v18231_v38 = vand.u32 4294901760, %v14535_v35 }
 0x478   :  { %v4484_v61 = vpop.f32.mrf.mxu0  ;;  %v4731_v12 = vand.u32 4294901760, %v4730_v43 }
 0x479   :  { %v4477_v22 = vadd.f32 %v14459_v63, %v4320_v51  ;;  %4718 = vmatmul.f32.gmra.mxu2 %v4717_v13  ;;  %4935 = vmatmul.f32.gmra.mxu3 %v14487_v59  ;;  %v10187_v63 = vld [vmem:[%s17933_s3 + $0x2d0] sm:$0xff] }
 0x47a   :  { %v4581_v10 = vpop.f32.mrf.mxu1  ;;  %5801 = vmatpush.msrb.mxu1 %v5800_v4  ;;  %v14540_v31 = vand.u32 4294901760, %v10187_v63  ;;  %v5805_v4 = vsub.f32 %v14535_v35, %v18231_v38  ;;  %v4732_v41 = vsub.f32 %v4730_v43, %v4731_v12 }
 0x47b   :  { %v14532_v7 = vadd.f32 %v14465_v42, %v4477_v22  ;;  %5052 = vmatmul.f32.gmra.mxu0 %v4722_v62  ;;  %v19100_v42 = vld [vmem:[#allocation14_spill] sm:$0xff]  ;;  %v4725_v22 = vand.u32 4294901760, %v4724_v1 }
 0x47c   :  { %v4209_v51 = vpop.f32.mrf.mxu2  ;;  %v4331_v13 = vpop.f32.mrf.mxu3  ;;  %v14545_v62 = vand.u32 4294901760, %v19100_v42  ;;  %5628 = vmatpush.msrb.mxu0 %v14540_v31  ;;  %6079 = vmatpush.msra.mxu3 %v14540_v31  ;;  %v14560_v1 = vsub.f32 %v10187_v63, %v14540_v31  ;;  %v4733_v63 = vand.u32 4294901760, %v4732_v41 }
 0x47d   :  { %19099 = vst [vmem:[#allocation20_spill] sm:$0xff] %v14532_v7  ;;  %v4210_v36 = vadd.f32 %v4209_v51, %v4094_v54  ;;  %5169 = vmatmul.f32.gmra.mxu1 %v4723_v18  ;;  %v5806_v51 = vand.u32 4294901760, %v5805_v4  ;;  %v19118_v7 = vld [vmem:[#allocation81_spill] sm:$0xff] }
 0x47e   :  { %19101 = vst [vmem:[#allocation67_spill] sm:$0xff] %v14545_v62  ;;  %v4738_v25 = vsub.f32 %v19100_v42, %v14545_v62  ;;  %v18233_v38 = vand.u32 4294901760, %v14560_v1  ;;  %5956 = vmatpush.msra.mxu2 %v14560_v1 }
 0x47f   :  { %v4326_v26 = vadd.f32 %v4325_v60, %v4210_v36  ;;  %5807 = vmatpush.msrb.mxu1 %v5806_v51 }
 0x480   :  { %v4488_v54 = vpop.f32.mrf.mxu0  ;;  %v4739_v15 = vand.u32 4294901760, %v4738_v25 }
 0x481   :  { %v4481_v18 = vadd.f32 %v4480_v20, %v4326_v26  ;;  %4726 = vmatmul.f32.gmra.mxu2 %v4725_v22  ;;  %4939 = vmatmul.f32.gmra.mxu3 %v14518_v3  ;;  %v10186_v20 = vld [vmem:[%s17933_s3 + $0x2c8] sm:$0xff] }
 0x482   :  { %v4585_v45 = vpop.f32.mrf.mxu1  ;;  %v14565_v22 = vand.u32 4294901760, %v10186_v20  ;;  %v4740_v42 = vsub.f32 %v4738_v25, %v4739_v15 }
 0x483   :  { %v14557_v60 = vadd.f32 %v4577_v55, %v4481_v18  ;;  %5057 = vmatmul.f32.gmra.mxu0 %v4730_v43  ;;  %v14570_v43 = vand.u32 4294901760, %v19103_v37  ;;  %v5811_v18 = vsub.f32 %v14560_v1, %v18233_v38 }
 0x484   :  { %v4214_v36 = vpop.f32.mrf.mxu2  ;;  %v4337_v26 = vpop.f32.mrf.mxu3  ;;  %5630 = vmatpush.msrb.mxu0 %v14565_v22  ;;  %6081 = vmatpush.msra.mxu3 %v14565_v22  ;;  %v14585_v41 = vsub.f32 %v10186_v20, %v14565_v22  ;;  %v4741_v20 = vand.u32 4294901760, %v4740_v42 }
 0x485   :  { %19102 = vst [vmem:[#allocation46_spill] sm:$0xff] %v14557_v60  ;;  %v4215_v4 = vadd.f32 %v4214_v36, %v4098_v17  ;;  %5175 = vmatmul.f32.gmra.mxu1 %v4731_v12  ;;  %v5812_v51 = vand.u32 4294901760, %v5811_v18  ;;  %v4746_v32 = vsub.f32 %v19103_v37, %v14570_v43  ;;  %v19117_v60 = vld [vmem:[#allocation78_spill] sm:$0xff] }
 0x486   :  { %19104 = vst [vmem:[#allocation21_spill] sm:$0xff] %v14570_v43  ;;  %v18235_v38 = vand.u32 4294901760, %v14585_v41  ;;  %5959 = vmatpush.msra.mxu2 %v14585_v41 }
 0x487   :  { %v4332_v55 = vadd.f32 %v4331_v13, %v4215_v4  ;;  %5813 = vmatpush.msrb.mxu1 %v5812_v51  ;;  %v4747_v2 = vand.u32 4294901760, %v4746_v32 }
 0x488   :  { %v4492_v17 = vpop.f32.mrf.mxu0 }
 0x489   :  { %v4485_v12 = vadd.f32 %v4484_v61, %v4332_v55  ;;  %4734 = vmatmul.f32.gmra.mxu2 %v4733_v63  ;;  %4943 = vmatmul.f32.gmra.mxu3 %v14545_v62  ;;  %v10185_v61 = vld [vmem:[%s17933_s3 + $0x2c0] sm:$0xff]  ;;  %v4748_v37 = vsub.f32 %v4746_v32, %v4747_v2 }
 0x48a   :  { %v4589_v36 = vpop.f32.mrf.mxu1  ;;  %v14590_v63 = vand.u32 4294901760, %v10185_v61  ;;  %v19133_v62 = vld [vmem:[#allocation85_spill] sm:$0xff] }
 0x48b   :  { %v14582_v13 = vadd.f32 %v4581_v10, %v4485_v12  ;;  %5062 = vmatmul.f32.gmra.mxu0 %v4738_v25  ;;  %v14595_v10 = vand.u32 4294901760, %v19106_v21  ;;  %v5817_v12 = vsub.f32 %v14585_v41, %v18235_v38 }
 0x48c   :  { %v4219_v4 = vpop.f32.mrf.mxu2  ;;  %v4343_v55 = vpop.f32.mrf.mxu3  ;;  %5632 = vmatpush.msrb.mxu0 %v14590_v63  ;;  %6083 = vmatpush.msra.mxu3 %v14590_v63  ;;  %v14610_v42 = vsub.f32 %v10185_v61, %v14590_v63  ;;  %v4749_v61 = vand.u32 4294901760, %v4748_v37 }
 0x48d   :  { %19105 = vst [vmem:[#allocation99_spill] sm:$0xff] %v14582_v13  ;;  %v4220_v18 = vadd.f32 %v4219_v4, %v4102_v56  ;;  %5181 = vmatmul.f32.gmra.mxu1 %v4739_v15  ;;  %v5818_v51 = vand.u32 4294901760, %v5817_v12  ;;  %v4754_v8 = vsub.f32 %v19106_v21, %v14595_v10  ;;  %v4114_v13 = vadd.f32 %v14144_v14, %v14131_v52  ;;  %v19115_v14 = vld [vmem:[#allocation32_spill] sm:$0xff] }
 0x48e   :  { %19107 = vst [vmem:[#allocation23_spill] sm:$0xff] %v14595_v10  ;;  %v18237_v38 = vand.u32 4294901760, %v14610_v42  ;;  %5962 = vmatpush.msra.mxu2 %v14610_v42 }
 0x48f   :  { %v4338_v25 = vadd.f32 %v4337_v26, %v4220_v18  ;;  %5819 = vmatpush.msrb.mxu1 %v5818_v51  ;;  %v4755_v58 = vand.u32 4294901760, %v4754_v8 }
 0x490   :  { %v4496_v56 = vpop.f32.mrf.mxu0 }
 0x491   :  { %v4489_v15 = vadd.f32 %v4488_v54, %v4338_v25  ;;  %4742 = vmatmul.f32.gmra.mxu2 %v4741_v20  ;;  %4947 = vmatmul.f32.gmra.mxu3 %v14570_v43  ;;  %v10184_v54 = vld [vmem:[%s17933_s3 + $0x2b8] sm:$0xff]  ;;  %v4756_v21 = vsub.f32 %v4754_v8, %v4755_v58 }
 0x492   :  { %v4593_v4 = vpop.f32.mrf.mxu1  ;;  %v14615_v20 = vand.u32 4294901760, %v10184_v54 }
 0x493   :  { %v14607_v26 = vadd.f32 %v4585_v45, %v4489_v15  ;;  %5067 = vmatmul.f32.gmra.mxu0 %v4746_v32  ;;  %v14620_v32 = vand.u32 4294901760, %v19109_v0  ;;  %v5823_v15 = vsub.f32 %v14610_v42, %v18237_v38 }
 0x494   :  { %v4224_v18 = vpop.f32.mrf.mxu2  ;;  %v4349_v25 = vpop.f32.mrf.mxu3  ;;  %5634 = vmatpush.msrb.mxu0 %v14615_v20  ;;  %6085 = vmatpush.msra.mxu3 %v14615_v20  ;;  %v14635_v37 = vsub.f32 %v10184_v54, %v14615_v20  ;;  %v4757_v54 = vand.u32 4294901760, %v4756_v21 }
 0x495   :  { %19108 = vst [vmem:[#allocation27_spill] sm:$0xff] %v14607_v26  ;;  %v4225_v12 = vadd.f32 %v4224_v18, %v4106_v24  ;;  %5187 = vmatmul.f32.gmra.mxu1 %v4747_v2  ;;  %v5824_v51 = vand.u32 4294901760, %v5823_v15  ;;  %v4762_v28 = vsub.f32 %v19109_v0, %v14620_v32  ;;  %v4110_v26 = vadd.f32 %v14114_v33, %v14101_v39  ;;  %v19112_v33 = vld [vmem:[#allocation18_spill] sm:$0xff] }
 0x496   :  { %19110 = vst [vmem:[#allocation48_spill] sm:$0xff] %v14620_v32  ;;  %v18239_v38 = vand.u32 4294901760, %v14635_v37  ;;  %5965 = vmatpush.msra.mxu2 %v14635_v37 }
 0x497   :  { %v4344_v45 = vadd.f32 %v4343_v55, %v4225_v12  ;;  %5825 = vmatpush.msrb.mxu1 %v5824_v51  ;;  %v4763_v39 = vand.u32 4294901760, %v4762_v28 }
 0x498   :  { %v4500_v24 = vpop.f32.mrf.mxu0 }
 0x499   :  { %v4493_v2 = vadd.f32 %v4492_v17, %v4344_v45  ;;  %4750 = vmatmul.f32.gmra.mxu2 %v4749_v61  ;;  %4951 = vmatmul.f32.gmra.mxu3 %v14595_v10  ;;  %v10183_v17 = vld [vmem:[%s17933_s3 + $0x2b0] sm:$0xff]  ;;  %v4764_v0 = vsub.f32 %v4762_v28, %v4763_v39 }
 0x49a   :  { %v4597_v18 = vpop.f32.mrf.mxu1  ;;  %v14640_v61 = vand.u32 4294901760, %v10183_v17 }
 0x49b   :  { %v14632_v55 = vadd.f32 %v4589_v36, %v4493_v2  ;;  %5072 = vmatmul.f32.gmra.mxu0 %v4754_v8  ;;  %v14645_v8 = vand.u32 4294901760, %v19112_v33  ;;  %v5829_v2 = vsub.f32 %v14635_v37, %v18239_v38 }
 0x49c   :  { %v4229_v12 = vpop.f32.mrf.mxu2  ;;  %v4355_v45 = vpop.f32.mrf.mxu3  ;;  %5636 = vmatpush.msrb.mxu0 %v14640_v61  ;;  %6087 = vmatpush.msra.mxu3 %v14640_v61  ;;  %v14660_v21 = vsub.f32 %v10183_v17, %v14640_v61  ;;  %v4765_v17 = vand.u32 4294901760, %v4764_v0 }
 0x49d   :  { %19111 = vst [vmem:[#allocation92_spill] sm:$0xff] %v14632_v55  ;;  %v4230_v15 = vadd.f32 %v4229_v12, %v4110_v26  ;;  %5193 = vmatmul.f32.gmra.mxu1 %v4755_v58  ;;  %v5830_v51 = vand.u32 4294901760, %v5829_v2  ;;  %v4770_v55 = vsub.f32 %v19112_v33, %v14645_v8 }
 0x49e   :  { %19113 = vst [vmem:[#allocation71_spill] sm:$0xff] %v14645_v8  ;;  %v18243_v38 = vand.u32 4294901760, %v14660_v21  ;;  %5968 = vmatpush.msra.mxu2 %v14660_v21 }
 0x49f   :  { %v4350_v36 = vadd.f32 %v4349_v25, %v4230_v15  ;;  %5831 = vmatpush.msrb.mxu1 %v5830_v51  ;;  %v4771_v52 = vand.u32 4294901760, %v4770_v55 }
 0x4a0   :  { %v4504_v26 = vpop.f32.mrf.mxu0 }
 0x4a1   :  { %v4497_v58 = vadd.f32 %v4496_v56, %v4350_v36  ;;  %4758 = vmatmul.f32.gmra.mxu2 %v4757_v54  ;;  %4955 = vmatmul.f32.gmra.mxu3 %v14620_v32  ;;  %v10182_v56 = vld [vmem:[%s17933_s3 + $0x2a8] sm:$0xff]  ;;  %v4772_v33 = vsub.f32 %v4770_v55, %v4771_v52  ;;  %v4118_v32 = vadd.f32 %v19118_v7, %v19117_v60  ;;  %v19120_v60 = vld [vmem:[#allocation37_spill] sm:$0xff] }
 0x4a2   :  { %v4601_v12 = vpop.f32.mrf.mxu1  ;;  %v14665_v54 = vand.u32 4294901760, %v10182_v56 }
 0x4a3   :  { %v14657_v25 = vadd.f32 %v4593_v4, %v4497_v58  ;;  %5077 = vmatmul.f32.gmra.mxu0 %v4762_v28  ;;  %v14670_v28 = vand.u32 4294901760, %v19115_v14  ;;  %v5835_v58 = vsub.f32 %v14660_v21, %v18243_v38 }
 0x4a4   :  { %v4234_v15 = vpop.f32.mrf.mxu2  ;;  %v4361_v36 = vpop.f32.mrf.mxu3  ;;  %5638 = vmatpush.msrb.mxu0 %v14665_v54  ;;  %6089 = vmatpush.msra.mxu3 %v14665_v54  ;;  %v14685_v0 = vsub.f32 %v10182_v56, %v14665_v54  ;;  %v4773_v56 = vand.u32 4294901760, %v4772_v33 }
 0x4a5   :  { %19114 = vst [vmem:[#allocation90_spill] sm:$0xff] %v14657_v25  ;;  %v4235_v2 = vadd.f32 %v4234_v15, %v4114_v13  ;;  %5199 = vmatmul.f32.gmra.mxu1 %v4763_v39  ;;  %v5836_v51 = vand.u32 4294901760, %v5835_v58  ;;  %v4778_v25 = vsub.f32 %v19115_v14, %v14670_v28 }
 0x4a6   :  { %19116 = vst [vmem:[#allocation53_spill] sm:$0xff] %v14670_v28  ;;  %v18249_v38 = vand.u32 4294901760, %v14685_v0  ;;  %5971 = vmatpush.msra.mxu2 %v14685_v0 }
 0x4a7   :  { %v4356_v4 = vadd.f32 %v4355_v45, %v4235_v2  ;;  %5837 = vmatpush.msrb.mxu1 %v5836_v51  ;;  %v4779_v7 = vand.u32 4294901760, %v4778_v25 }
 0x4a8   :  { %v4508_v13 = vpop.f32.mrf.mxu0 }
 0x4a9   :  { %v4501_v39 = vadd.f32 %v4500_v24, %v4356_v4  ;;  %4766 = vmatmul.f32.gmra.mxu2 %v4765_v17  ;;  %4959 = vmatmul.f32.gmra.mxu3 %v14645_v8  ;;  %v10181_v24 = vld [vmem:[%s17933_s3 + $0x2a0] sm:$0xff]  ;;  %v4780_v14 = vsub.f32 %v4778_v25, %v4779_v7  ;;  %v19122_v8 = vld [vmem:[#allocation76_spill] sm:$0xff] }
 0x4aa   :  { %v4605_v15 = vpop.f32.mrf.mxu1  ;;  %v14690_v17 = vand.u32 4294901760, %v10181_v24  ;;  %v4122_v10 = vadd.f32 %v19123_v16, %v19122_v8  ;;  %v19125_v8 = vld [vmem:[#allocation22_spill] sm:$0xff] }
 0x4ab   :  { %v14682_v45 = vadd.f32 %v4597_v18, %v4501_v39  ;;  %5082 = vmatmul.f32.gmra.mxu0 %v4770_v55  ;;  %v14695_v18 = vand.u32 4294901760, %v19120_v60  ;;  %v5841_v39 = vsub.f32 %v14685_v0, %v18249_v38 }
 0x4ac   :  { %v4239_v2 = vpop.f32.mrf.mxu2  ;;  %v4367_v4 = vpop.f32.mrf.mxu3  ;;  %5640 = vmatpush.msrb.mxu0 %v14690_v17  ;;  %6091 = vmatpush.msra.mxu3 %v14690_v17  ;;  %v14710_v33 = vsub.f32 %v10181_v24, %v14690_v17  ;;  %v4781_v24 = vand.u32 4294901760, %v4780_v14 }
 0x4ad   :  { %19119 = vst [vmem:[#allocation94_spill] sm:$0xff] %v14682_v45  ;;  %v4240_v58 = vadd.f32 %v4239_v2, %v4118_v32  ;;  %5205 = vmatmul.f32.gmra.mxu1 %v4771_v52  ;;  %v5842_v51 = vand.u32 4294901760, %v5841_v39  ;;  %v4786_v45 = vsub.f32 %v19120_v60, %v14695_v18 }
 0x4ae   :  { %19121 = vst [vmem:[#allocation98_spill] sm:$0xff] %v14695_v18  ;;  %v18253_v38 = vand.u32 4294901760, %v14710_v33  ;;  %5974 = vmatpush.msra.mxu2 %v14710_v33 }
 0x4af   :  { %v4362_v55 = vadd.f32 %v4361_v36, %v4240_v58  ;;  %5843 = vmatpush.msrb.mxu1 %v5842_v51  ;;  %v4787_v16 = vand.u32 4294901760, %v4786_v45 }
 0x4b0   :  { %v4512_v32 = vpop.f32.mrf.mxu0 }
 0x4b1   :  { %v4505_v52 = vadd.f32 %v4504_v26, %v4362_v55  ;;  %4774 = vmatmul.f32.gmra.mxu2 %v4773_v56  ;;  %4963 = vmatmul.f32.gmra.mxu3 %v14670_v28  ;;  %v10180_v26 = vld [vmem:[%s17933_s3 + $0x298] sm:$0xff]  ;;  %v4788_v60 = vsub.f32 %v4786_v45, %v4787_v16  ;;  %v19127_v28 = vld [vmem:[#allocation70_spill] sm:$0xff] }
 0x4b2   :  { %v4609_v2 = vpop.f32.mrf.mxu1  ;;  %v14715_v56 = vand.u32 4294901760, %v10180_v26 }
 0x4b3   :  { %v14707_v36 = vadd.f32 %v4601_v12, %v4505_v52  ;;  %5087 = vmatmul.f32.gmra.mxu0 %v4778_v25  ;;  %v14720_v12 = vand.u32 4294901760, %v19125_v8  ;;  %v5847_v52 = vsub.f32 %v14710_v33, %v18253_v38 }
 0x4b4   :  { %v4244_v58 = vpop.f32.mrf.mxu2  ;;  %v4373_v55 = vpop.f32.mrf.mxu3  ;;  %5642 = vmatpush.msrb.mxu0 %v14715_v56  ;;  %6093 = vmatpush.msra.mxu3 %v14715_v56  ;;  %v14739_v38 = vsub.f32 %v10180_v26, %v14715_v56 }
 0x4b5   :  { %19124 = vst [vmem:[#allocation102_spill] sm:$0xff] %v14707_v36  ;;  %v4245_v39 = vadd.f32 %v4244_v58, %v4122_v10  ;;  %5211 = vmatmul.f32.gmra.mxu1 %v4779_v7  ;;  %v5848_v51 = vand.u32 4294901760, %v5847_v52  ;;  %v4794_v36 = vsub.f32 %v19125_v8, %v14720_v12 }
 0x4b6   :  { %19126 = vst [vmem:[#allocation100_spill] sm:$0xff] %v14720_v12  ;;  %v18261_v8 = vand.u32 4294901760, %v14739_v38  ;;  %5977 = vmatpush.msra.mxu2 %v14739_v38 }
 0x4b7   :  { %v4368_v25 = vadd.f32 %v4367_v4, %v4245_v39  ;;  %v19128_v4 = vld [vmem:[#allocation30_spill] sm:$0xff]  ;;  %5849 = vmatpush.msrb.mxu1 %v5848_v51 }
 0x4b8   :  { %v14727_v10 = vpop.f32.mrf.mxu0  ;;  %v4126_v14 = vadd.f32 %v19128_v4, %v19127_v28  ;;  %v4795_v28 = vand.u32 4294901760, %v4794_v36  ;;  %v5853_v51 = vsub.f32 %v14739_v38, %v18261_v8 }
 0x4b9   :  { %v4509_v7 = vadd.f32 %v4508_v13, %v4368_v25  ;;  %4782 = vmatmul.f32.gmra.mxu2 %v4781_v24  ;;  %4967 = vmatmul.f32.gmra.mxu3 %v14695_v18  ;;  %v10179_v13 = vld [vmem:[%s17933_s3 + $0x290] sm:$0xff] }
 0x4ba   :  { %v14730_v58 = vpop.f32.mrf.mxu1  ;;  %v14744_v52 = vand.u32 4294901760, %v10179_v13 }
 0x4bb   :  { %v14736_v39 = vadd.f32 %v4605_v15, %v4509_v7  ;;  %5092 = vmatmul.f32.gmra.mxu0 %v4786_v45  ;;  %v19131_v15 = vld [vmem:[#allocation36_spill] sm:$0xff]  ;;  %v4789_v7 = vand.u32 4294901760, %v4788_v60 }
 0x4bc   :  { %v4249_v25 = vpop.f32.mrf.mxu2  ;;  %v4379_v24 = vpop.f32.mrf.mxu3  ;;  %19130 = vst [vmem:[#allocation47_spill] sm:$0xff] %v14744_v52  ;;  %v14749_v45 = vand.u32 4294901760, %v19131_v15  ;;  %5644 = vmatpush.msrb.mxu0 %v14744_v52  ;;  %6095 = vmatpush.msra.mxu3 %v14744_v52  ;;  %v14768_v8 = vsub.f32 %v10179_v13, %v14744_v52  ;;  %v19137_v13 = vld [vmem:[#allocation35_spill] sm:$0xff] }
 0x4bd   :  { %19129 = vst [vmem:[#allocation96_spill] sm:$0xff] %v14736_v39  ;;  %v4250_v18 = vadd.f32 %v4249_v25, %v4126_v14  ;;  %5217 = vmatmul.f32.gmra.mxu1 %v4787_v16  ;;  %v5854_v14 = vand.u32 4294901760, %v5853_v51  ;;  %v4796_v39 = vsub.f32 %v4794_v36, %v4795_v28 }
 0x4be   :  { %19132 = vst [vmem:[#allocation105_spill] sm:$0xff] %v14749_v45  ;;  %v4802_v43 = vsub.f32 %v19131_v15, %v14749_v45  ;;  %5980 = vmatpush.msra.mxu2 %v14768_v8 }
 0x4bf   :  { %v4374_v26 = vadd.f32 %v4373_v55, %v4250_v18  ;;  %v19134_v18 = vld [vmem:[#allocation87_spill] sm:$0xff]  ;;  %5855 = vmatpush.msrb.mxu1 %v5854_v14 }
 0x4c0   :  { %v14756_v4 = vpop.f32.mrf.mxu0  ;;  %v4130_v60 = vadd.f32 %v19134_v18, %v19133_v62 }
 0x4c1   :  { %v4513_v16 = vadd.f32 %v4512_v32, %v4374_v26  ;;  %4790 = vmatmul.f32.gmra.mxu2 %v4789_v7  ;;  %4971 = vmatmul.f32.gmra.mxu3 %v14720_v12  ;;  %v10178_v32 = vld [vmem:[%s17933_s3 + $0x288] sm:$0xff]  ;;  %v10177_v26 = vld [vmem:[%s17933_s3 + $0x280] sm:$0xff] }
 0x4c2   :  { %v14759_v25 = vpop.f32.mrf.mxu1  ;;  %v14776_v15 = vand.u32 4294901760, %v10178_v32  ;;  %v14784_v14 = vand.u32 4294901760, %v10177_v26 }
 0x4c3   :  { %v14765_v55 = vadd.f32 %v4609_v2, %v4513_v16  ;;  %5097 = vmatmul.f32.gmra.mxu0 %v4794_v36  ;;  %v18267_v2 = vand.u32 4294901760, %v14768_v8  ;;  %v4803_v36 = vand.u32 4294901760, %v4802_v43  ;;  %v14781_v16 = vand.u32 4294901760, %v19137_v13 }
 0x4c4   :  { %v4254_v7 = vpop.f32.mrf.mxu2  ;;  %v4385_v51 = vpop.f32.mrf.mxu3  ;;  %19136 = vst [vmem:[#allocation97_spill] sm:$0xff] %v14776_v15  ;;  %5646 = vmatpush.msrb.mxu0 %v14776_v15  ;;  %v14787_v18 = vsub.f32 %v10178_v32, %v14776_v15  ;;  %6097 = vmatpush.msra.mxu3 %v14776_v15 }
 0x4c5   :  { %19135 = vst [vmem:[#allocation101_spill] sm:$0xff] %v14765_v55  ;;  %v4255_v62 = vadd.f32 %v4254_v7, %v4130_v60  ;;  %5223 = vmatmul.f32.gmra.mxu1 %v4795_v28  ;;  %v4797_v60 = vand.u32 4294901760, %v4796_v39  ;;  %v5859_v28 = vsub.f32 %v14768_v8, %v18267_v2  ;;  %v4810_v2 = vsub.f32 %v19137_v13, %v14781_v16 }
 0x4c6   :  { %5648 = vmatpush.msrb.mxu0 %v14784_v14  ;;  %v18276_v12 = vand.u32 4294901760, %v14787_v18  ;;  %5983 = vmatpush.msra.mxu2 %v14787_v18 }
 0x4c7   :  { %v4380_v55 = vadd.f32 %v4379_v24, %v4255_v62  ;;  %v5860_v32 = vand.u32 4294901760, %v5859_v28  ;;  %v5507_v24 = vpop.permute.xlu1 %5506  ;;  %v4804_v62 = vsub.f32 %v4802_v43, %v4803_v36  ;;  %6099 = vmatpush.msra.mxu3 %v14784_v14  ;;  %v14816_v28 = vsub.f32 %v10177_v26, %v14784_v14 }
 0x4c8   :  { %v14793_v7 = vpop.f32.mrf.mxu0  ;;  %v5865_v59 = vsub.f32 %v14787_v18, %v18276_v12  ;;  %6200 = vmatpush.msra.mxu0 %v19138_v19  ;;  %v19140_v12 = vand.u32 4294901760, %v14434_v9  ;;  %v5584_v19 = vmul.f32 %v5507_v24, %v19141_v40 }
 0x4c9   :  { %v4517_v3 = vadd.f32 %v14727_v10, %v4380_v55  ;;  %4798 = vmatmul.f32.gmra.mxu2 %v4797_v60  ;;  %4975 = vmatmul.f32.gmra.mxu3 %v14749_v45  ;;  %v19139_v10 = vld [vmem:[#allocation69_spill] sm:$0xff]  ;;  %v4805_v26 = vand.u32 4294901760, %v4804_v62  ;;  %v19145_v62 = vand.u32 4294901760, %v14535_v35 }
 0x4ca   :  { %v14800_v39 = vpop.f32.mrf.mxu1  ;;  %v4134_v55 = vadd.f32 %v19139_v10, %v14281_v6  ;;  %5861 = vmatpush.msrb.mxu1 %v5860_v32  ;;  %v5866_v15 = vand.u32 4294901760, %v5865_v59  ;;  %6204 = vmatpush.msra.mxu0 %v19140_v12  ;;  %v5870_v6 = vand.u32 4294901760, %v14816_v28  ;;  %v19143_v32 = vld [vmem:[#allocation73_spill] sm:$0xff]  ;;  %v4138_v10 = vadd.f32 %v14325_v57, %v14315_v30 }
 0x4cb   :  { %v14813_v60 = vadd.f32 %v14730_v58, %v4517_v3  ;;  %5102 = vmatmul.f32.gmra.mxu0 %v4802_v43  ;;  %5986 = vmatpush.msra.mxu2 %v14816_v28  ;;  %v4811_v3 = vand.u32 4294901760, %v4810_v2  ;;  %v19142_v43 = vand.u32 4294901760, %v14475_v29  ;;  %v14826_v59 = vand.u32 4294901760, %v19143_v32  ;;  %v19147_v35 = vld [vmem:[#allocation57_spill] sm:$0xff] }
 0x4cc   :  { %v4259_v13 = vpop.f32.mrf.mxu2  ;;  %v4391_v45 = vpop.f32.mrf.mxu3  ;;  %5867 = vmatpush.msrb.mxu1 %v5866_v15  ;;  %v5871_v9 = vsub.f32 %v14816_v28, %v5870_v6  ;;  %v19148_v57 = vand.u32 4294901760, %v14585_v41 }
 0x4cd   :  { %v4260_v52 = vadd.f32 %v4259_v13, %v4134_v55  ;;  %5229 = vmatmul.f32.gmra.mxu1 %v4803_v36  ;;  %6208 = vmatpush.msra.mxu0 %v19142_v43  ;;  %v19144_v36 = vand.u32 4294901760, %v14507_v11  ;;  %v14835_v13 = vand.u32 4294901760, %v5584_v19  ;;  %v4812_v24 = vsub.f32 %v4810_v2, %v4811_v3 }
 0x4ce   :  { %v5872_v29 = vand.u32 4294901760, %v5871_v9 }
 0x4cf   :  { %v4386_v58 = vadd.f32 %v4385_v51, %v4260_v52  ;;  %6212 = vmatpush.msra.mxu0 %v19144_v36  ;;  %v5512_v52 = vpop.permute.xlu2 %5511  ;;  %v14855_v9 = vsub.f32 %v5584_v19, %v14835_v13 }
 0x4d0   :  { %v14831_v12 = vpop.f32.mrf.mxu0  ;;  %5873 = vmatpush.msrb.mxu1 %v5872_v29 }
 0x4d1   :  { %v4521_v15 = vadd.f32 %v14756_v4, %v4386_v58  ;;  %4806 = vmatmul.f32.gmra.mxu2 %v4805_v26  ;;  %4979 = vmatmul.f32.gmra.mxu3 %v14781_v16  ;;  %v4818_v4 = vsub.f32 %v19143_v32, %v14826_v59  ;;  %v19146_v58 = vand.u32 4294901760, %v14560_v1  ;;  %v5585_v26 = vmul.f32 %v5512_v52, %v19147_v35 }
 0x4d2   :  { %v14839_v51 = vpop.f32.mrf.mxu1  ;;  %6216 = vmatpush.msra.mxu0 %v19145_v62  ;;  %6327 = vmatpush.msra.mxu1 %v14361_v23  ;;  %v19149_v23 = vand.u32 4294901760, %v14610_v42  ;;  %v18284_v19 = vand.u32 4294901760, %v14855_v9  ;;  %v19153_v62 = vand.u32 4294901760, %v14685_v0  ;;  %v5522_v0 = vpop.permute.xlu1 %5521 }
 0x4d3   :  { %v14846_v11 = vadd.f32 %v14759_v25, %v4521_v15  ;;  %5107 = vmatmul.f32.gmra.mxu0 %v4810_v2  ;;  %v4813_v2 = vand.u32 4294901760, %v4812_v24  ;;  %v4819_v36 = vand.u32 4294901760, %v4818_v4  ;;  %v14863_v1 = vand.u32 4294901760, %v5585_v26 }
 0x4d4   :  { %v4264_v55 = vpop.f32.mrf.mxu2  ;;  %v4397_v43 = vpop.f32.mrf.mxu3  ;;  %6220 = vmatpush.msra.mxu0 %v19146_v58  ;;  %6329 = vmatpush.msra.mxu1 %v14401_v5  ;;  %v19151_v24 = vand.u32 4294901760, %v14660_v21 }
 0x4d5   :  { %v4265_v30 = vadd.f32 %v4264_v55, %v4138_v10  ;;  %5235 = vmatmul.f32.gmra.mxu1 %v4811_v3  ;;  %v5517_v5 = vpop.permute.xlu0 %5516  ;;  %v4820_v29 = vsub.f32 %v4818_v4, %v4819_v36 }
 0x4d6   :  { %6224 = vmatpush.msra.mxu0 %v19148_v57  ;;  %6331 = vmatpush.msra.mxu1 %v14441_v48  ;;  %v4142_v48 = vadd.f32 %v14350_v27, %v14341_v34  ;;  %v19152_v34 = vld [vmem:[#allocation62_spill] sm:$0xff] }
 0x4d7   :  { %v4392_v25 = vadd.f32 %v4391_v45, %v4265_v30  ;;  %v19150_v45 = vand.u32 4294901760, %v14635_v37  ;;  %v5652_v37 = vsub.f32 %v14855_v9, %v18284_v19  ;;  %v5586_v27 = vmul.f32 %v5517_v5, %v19152_v34  ;;  %v5527_v5 = vpop.permute.xlu2 %5526 }
 0x4d8   :  { %v4532_v15 = vpop.f32.mrf.mxu0  ;;  %6228 = vmatpush.msra.mxu0 %v19149_v23  ;;  %6333 = vmatpush.msra.mxu1 %v14480_v49  ;;  %v14880_v49 = vsub.f32 %v5585_v26, %v14863_v1  ;;  %v4821_v10 = vand.u32 4294901760, %v4820_v29 }
 0x4d9   :  { %v4525_v3 = vadd.f32 %v14793_v7, %v4392_v25  ;;  %4814 = vmatmul.f32.gmra.mxu2 %v4813_v2  ;;  %4983 = vmatmul.f32.gmra.mxu3 %v14826_v59  ;;  %v5653_v55 = vand.u32 4294901760, %v5652_v37  ;;  %v14892_v58 = vand.u32 4294901760, %v5586_v27  ;;  %v19156_v25 = vand.u32 4294901760, %v14768_v8 }
 0x4da   :  { %v4629_v41 = vpop.f32.mrf.mxu1  ;;  %6232 = vmatpush.msra.mxu0 %v19150_v45  ;;  %6335 = vmatpush.msra.mxu1 %v14512_v53 }
 0x4db   :  { %v14874_v42 = vadd.f32 %v14800_v39, %v4525_v3  ;;  %5112 = vmatmul.f32.gmra.mxu0 %v4818_v4  ;;  %v19154_v4 = vand.u32 4294901760, %v14710_v33  ;;  %v4146_v33 = vadd.f32 %v14387_v44, %v14379_v50  ;;  %v14911_v2 = vsub.f32 %v5586_v27, %v14892_v58 }
 0x4dc   :  { %v4269_v52 = vpop.f32.mrf.mxu2  ;;  %v4403_v7 = vpop.f32.mrf.mxu3  ;;  %6236 = vmatpush.msra.mxu0 %v19151_v24  ;;  %6337 = vmatpush.msra.mxu1 %v14540_v31  ;;  %v18283_v31 = vand.u32 4294901760, %v14880_v49  ;;  %v19158_v44 = vand.u32 4294901760, %v14787_v18  ;;  %v19162_v24 = vld [vmem:[#allocation56_spill] sm:$0xff] }
 0x4dd   :  { %v4270_v39 = vadd.f32 %v4269_v52, %v4142_v48  ;;  %5241 = vmatmul.f32.gmra.mxu1 %v4819_v36 }
 0x4de   :  { %6240 = vmatpush.msra.mxu0 %v19153_v62  ;;  %6339 = vmatpush.msra.mxu1 %v14565_v22  ;;  %v19155_v22 = vand.u32 4294901760, %v14739_v38  ;;  %v5660_v50 = vsub.f32 %v14880_v49, %v18283_v31 }
 0x4df   :  { %v4398_v53 = vadd.f32 %v4397_v43, %v4270_v39  ;;  %v5532_v39 = vpop.permute.xlu0 %5531 }
 0x4e0   :  { %v5038_v21 = vpop.f32.mrf.mxu0  ;;  %6244 = vmatpush.msra.mxu0 %v19154_v4  ;;  %6341 = vmatpush.msra.mxu1 %v14590_v63  ;;  %v19157_v63 = vld [vmem:[#allocation12_spill] sm:$0xff]  ;;  %v5661_v3 = vand.u32 4294901760, %v5660_v50 }
 0x4e1   :  { %v4529_v26 = vadd.f32 %v14831_v12, %v4398_v53  ;;  %4822 = vmatmul.f32.gmra.mxu2 %v4821_v10  ;;  %5407 = vmatmul.f32.vlgmr.msrb.gmra.mxu3 %v14372_v47  ;;  %v5587_v38 = vmul.f32 %v5522_v0, %v19157_v63  ;;  %v19163_v4 = vld [vmem:[#allocation64_spill] sm:$0xff] }
 0x4e2   :  { %v14897_v30 = vpop.f32.mrf.mxu1  ;;  %6248 = vmatpush.msra.mxu0 %v19155_v22  ;;  %6343 = vmatpush.msra.mxu1 %v14615_v20 }
 0x4e3   :  { %v14905_v43 = vadd.f32 %v14839_v51, %v4529_v26  ;;  %5654 = vmatmul.f32.vlgmr.msrb.gmra.mxu0 %v5653_v55  ;;  %v14924_v51 = vand.u32 4294901760, %v5587_v38  ;;  %v5589_v55 = vmul.f32 %v5532_v39, %v19163_v4 }
 0x4e4   :  { %v4274_v12 = vpop.f32.mrf.mxu2  ;;  %v4924_v57 = vpop.f32.mrf.mxu3  ;;  %6252 = vmatpush.msra.mxu0 %v19156_v25  ;;  %6345 = vmatpush.msra.mxu1 %v14640_v61  ;;  %v18282_v61 = vand.u32 4294901760, %v14911_v2 }
 0x4e5   :  { %v4275_v36 = vadd.f32 %v4274_v12, %v4146_v33  ;;  %5875 = vmatmul.f32.vlgmr.msrb.gmra.mxu1 %v14835_v13  ;;  %v14965_v33 = vand.u32 4294901760, %v5589_v55  ;;  %v5537_v25 = vpop.permute.xlu1 %5536 }
 0x4e6   :  { %6256 = vmatpush.msra.mxu0 %v19158_v44  ;;  %6347 = vmatpush.msra.mxu1 %v14665_v54  ;;  %v5668_v29 = vsub.f32 %v14911_v2, %v18282_v61 }
 0x4e7   :  { %v4404_v20 = vadd.f32 %v4403_v7, %v4275_v36  ;;  %v19161_v7 = vld [vmem:[#allocation97_spill] sm:$0xff]  ;;  %v14973_v44 = vsub.f32 %v5589_v55, %v14965_v33 }
 0x4e8   :  { %v5043_v8 = vpop.f32.mrf.mxu0  ;;  %6260 = vmatpush.msra.mxu0 %v5870_v6  ;;  %6349 = vmatpush.msra.mxu1 %v14690_v17  ;;  %v19159_v6 = vld [vmem:[#allocation61_spill] sm:$0xff]  ;;  %v19160_v17 = vld [vmem:[#allocation47_spill] sm:$0xff]  ;;  %v5669_v37 = vand.u32 4294901760, %v5668_v29 }
 0x4e9   :  { %v4533_v23 = vadd.f32 %v4532_v15, %v4404_v20  ;;  %5310 = vmatmul.f32.vlgmr.msrb.gmra.mxu2 %v14372_v47  ;;  %5411 = vmatmul.f32.gmra.mxu3 %v14411_v46  ;;  %v5588_v15 = vmul.f32 %v5527_v5, %v19159_v6  ;;  %v14937_v47 = vsub.f32 %v5587_v38, %v14924_v51  ;;  %v19165_v20 = vld [vmem:[#allocation77_spill] sm:$0xff]  ;;  %v18278_v29 = vand.u32 4294901760, %v14973_v44 }
 0x4ea   :  { %v14929_v18 = vpop.f32.mrf.mxu1  ;;  %6351 = vmatpush.msra.mxu1 %v14715_v56 }
 0x4eb   :  { %v14932_v45 = vadd.f32 %v4629_v41, %v4533_v23  ;;  %5662 = vmatmul.f32.gmra.mxu0 %v5661_v3  ;;  %v14947_v56 = vand.u32 4294901760, %v5588_v15  ;;  %v18280_v27 = vand.u32 4294901760, %v14937_v47  ;;  %v5692_v55 = vsub.f32 %v14973_v44, %v18278_v29 }
 0x4ec   :  { %v4703_v54 = vpop.f32.mrf.mxu2  ;;  %v4928_v28 = vpop.f32.mrf.mxu3  ;;  %6353 = vmatpush.msra.mxu1 %v19160_v17 }
 0x4ed   :  { %v4925_v48 = vadd.f32 %v4924_v57, %v4703_v54  ;;  %5879 = vmatmul.f32.gmra.mxu1 %v14863_v1 }
 0x4ee   :  { %6355 = vmatpush.msra.mxu1 %v19161_v7  ;;  %v5542_v7 = vpop.permute.xlu2 %5541 }
 0x4ef   :  { %v14944_v41 = vadd.f32 %v5038_v21, %v4925_v48  ;;  %v14956_v21 = vsub.f32 %v5588_v15, %v14947_v56  ;;  %v19166_v15 = vld [vmem:[#allocation28_spill] sm:$0xff] }
 0x4f0   :  { %v5048_v52 = vpop.f32.mrf.mxu0  ;;  %6357 = vmatpush.msra.mxu1 %v14784_v14  ;;  %v19164_v14 = vld [vmem:[#allocation15_spill] sm:$0xff] }
 0x4f1   :  { %5314 = vmatmul.f32.gmra.mxu2 %v14411_v46  ;;  %5415 = vmatmul.f32.gmra.mxu3 %v19162_v24  ;;  %v5676_v46 = vsub.f32 %v14937_v47, %v18280_v27  ;;  %v18279_v57 = vand.u32 4294901760, %v14956_v21 }
 0x4f2   :  { %v14952_v62 = vpop.f32.mrf.mxu1 }
 0x4f3   :  { %5670 = vmatmul.f32.gmra.mxu0 %v5669_v37  ;;  %v5677_v12 = vand.u32 4294901760, %v5676_v46  ;;  %v5684_v3 = vsub.f32 %v14956_v21, %v18279_v57  ;;  %v5552_v57 = vpop.permute.xlu1 %5551 }
 0x4f4   :  { %v4711_v53 = vpop.f32.mrf.mxu2  ;;  %v4932_v10 = vpop.f32.mrf.mxu3 }
 0x4f5   :  { %v4929_v26 = vadd.f32 %v4928_v28, %v4711_v53  ;;  %5883 = vmatmul.f32.gmra.mxu1 %v14892_v58  ;;  %v5685_v48 = vand.u32 4294901760, %v5684_v3 }
 0x4f7   :  { %v14963_v0 = vadd.f32 %v5043_v8, %v4929_v26  ;;  %v5590_v8 = vmul.f32 %v5537_v25, %v19165_v20  ;;  %v5693_v25 = vand.u32 4294901760, %v5692_v55 }
 0x4f8   :  { %v5053_v22 = vpop.f32.mrf.mxu0 }
 0x4f9   :  { %5318 = vmatmul.f32.gmra.mxu2 %v19162_v24  ;;  %5419 = vmatmul.f32.gmra.mxu3 %v19164_v14  ;;  %v14982_v28 = vand.u32 4294901760, %v5590_v8 }
 0x4fa   :  { %v14970_v38 = vpop.f32.mrf.mxu1 }
 0x4fb   :  { %5678 = vmatmul.f32.gmra.mxu0 %v5677_v12  ;;  %v14990_v39 = vsub.f32 %v5590_v8, %v14982_v28  ;;  %v19168_v12 = vld [vmem:[#allocation67_spill] sm:$0xff]  ;;  %v5547_v8 = vpop.permute.xlu0 %5546 }
 0x4fc   :  { %v4719_v36 = vpop.f32.mrf.mxu2  ;;  %v4936_v50 = vpop.f32.mrf.mxu3 }
 0x4fd   :  { %v4933_v23 = vadd.f32 %v4932_v10, %v4719_v36  ;;  %5887 = vmatmul.f32.gmra.mxu1 %v14924_v51  ;;  %v18281_v36 = vand.u32 4294901760, %v14990_v39 }
 0x4ff   :  { %v14980_v5 = vadd.f32 %v5048_v52, %v4933_v23  ;;  %v19167_v52 = vld [vmem:[#allocation80_spill] sm:$0xff] }
 0x500   :  { %v5058_v54 = vpop.f32.mrf.mxu0  ;;  %v5591_v53 = vmul.f32 %v5542_v7, %v19167_v52  ;;  %v19181_v52 = vld [vmem:[#allocation88_spill] sm:$0xff] }
 0x501   :  { %5322 = vmatmul.f32.gmra.mxu2 %v19164_v14  ;;  %5423 = vmatmul.f32.gmra.mxu3 %v19166_v15 }
 0x502   :  { %v14987_v17 = vpop.f32.mrf.mxu1  ;;  %v14999_v14 = vand.u32 4294901760, %v5591_v53 }
 0x503   :  { %5686 = vmatmul.f32.gmra.mxu0 %v5685_v48  ;;  %v19169_v48 = vld [vmem:[#allocation66_spill] sm:$0xff]  ;;  %v5562_v63 = vpop.permute.xlu0 %5561 }
 0x504   :  { %v4727_v24 = vpop.f32.mrf.mxu2  ;;  %v4940_v37 = vpop.f32.mrf.mxu3  ;;  %v5592_v7 = vmul.f32 %v5547_v8, %v19169_v48 }
 0x505   :  { %v4937_v10 = vadd.f32 %v4936_v50, %v4727_v24  ;;  %5891 = vmatmul.f32.gmra.mxu1 %v14947_v56  ;;  %v5557_v48 = vpop.permute.xlu2 %5556 }
 0x506   :  { %v15016_v29 = vand.u32 4294901760, %v5592_v7 }
 0x507   :  { %v14997_v26 = vadd.f32 %v5053_v22, %v4937_v10  ;;  %v15008_v22 = vsub.f32 %v5591_v53, %v14999_v14 }
 0x508   :  { %v5063_v46 = vpop.f32.mrf.mxu0  ;;  %19170 = vst [vmem:[#allocation95_spill] sm:$0xff] %v15016_v29 }
 0x509   :  { %5326 = vmatmul.f32.gmra.mxu2 %v19166_v15  ;;  %5427 = vmatmul.f32.gmra.mxu3 %v19168_v12  ;;  %v5700_v15 = vsub.f32 %v14990_v39, %v18281_v36  ;;  %v18285_v53 = vand.u32 4294901760, %v15008_v22  ;;  %v15024_v36 = vsub.f32 %v5592_v7, %v15016_v29 }
 0x50a   :  { %v15004_v50 = vpop.f32.mrf.mxu1 }
 0x50b   :  { %5694 = vmatmul.f32.gmra.mxu0 %v5693_v25  ;;  %v19171_v25 = vld [vmem:[#allocation21_spill] sm:$0xff]  ;;  %v5701_v8 = vand.u32 4294901760, %v5700_v15  ;;  %19173 = vst [vmem:[#allocation104_spill] sm:$0xff] %v15024_v36  ;;  %v18286_v40 = vand.u32 4294901760, %v15024_v36 }
 0x50c   :  { %v4735_v23 = vpop.f32.mrf.mxu2  ;;  %v4944_v3 = vpop.f32.mrf.mxu3 }
 0x50d   :  { %v4941_v24 = vadd.f32 %v4940_v37, %v4735_v23  ;;  %5895 = vmatmul.f32.gmra.mxu1 %v14965_v33 }
 0x50f   :  { %v15014_v10 = vadd.f32 %v5058_v54, %v4941_v24  ;;  %v19174_v54 = vld [vmem:[#allocation86_spill] sm:$0xff] }
 0x510   :  { %v5068_v55 = vpop.f32.mrf.mxu0  ;;  %v5593_v24 = vmul.f32 %v5552_v57, %v19174_v54 }
 0x511   :  { %5330 = vmatmul.f32.gmra.mxu2 %v19168_v12  ;;  %5431 = vmatmul.f32.gmra.mxu3 %v19171_v25  ;;  %v5708_v12 = vsub.f32 %v15008_v22, %v18285_v53 }
 0x512   :  { %v15021_v37 = vpop.f32.mrf.mxu1  ;;  %v15033_v19 = vand.u32 4294901760, %v5593_v24 }
 0x513   :  { %19172 = vst [vmem:[#allocation103_spill] sm:$0xff] %v15021_v37  ;;  %5702 = vmatmul.f32.gmra.mxu0 %v5701_v8  ;;  %v19176_v8 = vld [vmem:[#allocation23_spill] sm:$0xff]  ;;  %v5709_v7 = vand.u32 4294901760, %v5708_v12  ;;  %v5716_v12 = vsub.f32 %v15024_v36, %v18286_v40  ;;  %v19188_v40 = vld [vmem:[#allocation89_spill] sm:$0xff] }
 0x514   :  { %v4743_v23 = vpop.f32.mrf.mxu2  ;;  %v4948_v27 = vpop.f32.mrf.mxu3  ;;  %19175 = vst [vmem:[#allocation106_spill] sm:$0xff] %v15033_v19  ;;  %v15045_v53 = vsub.f32 %v5593_v24, %v15033_v19  ;;  %v5595_v34 = vmul.f32 %v5562_v63, %v19188_v40 }
 0x515   :  { %v4945_v61 = vadd.f32 %v4944_v3, %v4743_v23  ;;  %5899 = vmatmul.f32.gmra.mxu1 %v14982_v28  ;;  %v19178_v3 = vld [vmem:[#allocation55_spill] sm:$0xff]  ;;  %v19179_v23 = vld [vmem:[#allocation24_spill] sm:$0xff]  ;;  %v5717_v24 = vand.u32 4294901760, %v5716_v12 }
 0x516   :  { %v15042_v54 = vadd.f32 %v19179_v23, %v19178_v3  ;;  %19180 = vst [vmem:[#allocation78_spill] sm:$0xff] %v15045_v53  ;;  %v18288_v6 = vand.u32 4294901760, %v15045_v53 }
 0x517   :  { %v15031_v15 = vadd.f32 %v5063_v46, %v4945_v61 }
 0x518   :  { %v5073_v31 = vpop.f32.mrf.mxu0  ;;  %v5724_v12 = vsub.f32 %v15045_v53, %v18288_v6  ;;  %v19197_v53 = vld [vmem:[#allocation91_spill] sm:$0xff] }
 0x519   :  { %5334 = vmatmul.f32.gmra.mxu2 %v19171_v25  ;;  %5435 = vmatmul.f32.gmra.mxu3 %v19176_v8  ;;  %v5594_v25 = vmul.f32 %v5557_v48, %v19181_v52 }
 0x51a   :  { %v15038_v57 = vpop.f32.mrf.mxu1  ;;  %v5725_v63 = vand.u32 4294901760, %v5724_v12 }
 0x51b   :  { %19177 = vst [vmem:[#allocation107_spill] sm:$0xff] %v15038_v57  ;;  %5710 = vmatmul.f32.gmra.mxu0 %v5709_v7  ;;  %v15054_v23 = vand.u32 4294901760, %v5594_v25  ;;  %v19184_v7 = vld [vmem:[#allocation48_spill] sm:$0xff]  ;;  %v5567_v57 = vpop.permute.xlu1 %5566 }
 0x51c   :  { %v4751_v61 = vpop.f32.mrf.mxu2  ;;  %v4952_v46 = vpop.f32.mrf.mxu3 }
 0x51d   :  { %v4949_v20 = vadd.f32 %v4948_v27, %v4751_v61  ;;  %5903 = vmatmul.f32.gmra.mxu1 %v14999_v14  ;;  %19183 = vst [vmem:[#allocation76_spill] sm:$0xff] %v15054_v23  ;;  %v19186_v27 = vld [vmem:[#allocation16_spill] sm:$0xff]  ;;  %v15067_v35 = vsub.f32 %v5594_v25, %v15054_v23 }
 0x51e   :  { %v19187_v61 = vld [vmem:[#allocation20_spill] sm:$0xff] }
 0x51f   :  { %v15052_v4 = vadd.f32 %v5068_v55, %v4949_v20  ;;  %v15063_v52 = vadd.f32 %v19187_v61, %v19186_v27  ;;  %19189 = vst [vmem:[#allocation70_spill] sm:$0xff] %v15067_v35  ;;  %v15075_v61 = vand.u32 4294901760, %v5595_v34  ;;  %v18295_v25 = vand.u32 4294901760, %v15067_v35 }
 0x520   :  { %v5078_v3 = vpop.f32.mrf.mxu0 }
 0x521   :  { %19182 = vst [vmem:[#allocation81_spill] sm:$0xff] %v15052_v4  ;;  %5338 = vmatmul.f32.gmra.mxu2 %v19176_v8  ;;  %5439 = vmatmul.f32.gmra.mxu3 %v19184_v7  ;;  %v15087_v6 = vsub.f32 %v5595_v34, %v15075_v61  ;;  %v5732_v12 = vsub.f32 %v15067_v35, %v18295_v25  ;;  %v19204_v35 = vld [vmem:[#allocation31_spill] sm:$0xff] }
 0x522   :  { %v15059_v48 = vpop.f32.mrf.mxu1  ;;  %19191 = vst [vmem:[#allocation85_spill] sm:$0xff] %v15075_v61 }
 0x523   :  { %19185 = vst [vmem:[#allocation79_spill] sm:$0xff] %v15059_v48  ;;  %5718 = vmatmul.f32.gmra.mxu0 %v5717_v24  ;;  %v19192_v24 = vld [vmem:[#allocation71_spill] sm:$0xff]  ;;  %v5733_v34 = vand.u32 4294901760, %v5732_v12  ;;  %v5582_v37 = vpop.permute.xlu1 %5581 }
 0x524   :  { %v4759_v20 = vpop.f32.mrf.mxu2  ;;  %v4956_v55 = vpop.f32.mrf.mxu3  ;;  %19196 = vst [vmem:[#allocation69_spill] sm:$0xff] %v15087_v6 }
 0x525   :  { %v4953_v8 = vadd.f32 %v4952_v46, %v4759_v20  ;;  %5907 = vmatmul.f32.gmra.mxu1 %v15016_v29  ;;  %v19194_v46 = vld [vmem:[#allocation60_spill] sm:$0xff]  ;;  %v19195_v20 = vld [vmem:[#allocation46_spill] sm:$0xff]  ;;  %v18302_v29 = vand.u32 4294901760, %v15087_v6 }
 0x526   :  { %v15084_v48 = vadd.f32 %v19195_v20, %v19194_v46 }
 0x527   :  { %v15073_v32 = vadd.f32 %v5073_v31, %v4953_v8  ;;  %v5740_v12 = vsub.f32 %v15087_v6, %v18302_v29  ;;  %v19211_v29 = vld [vmem:[#allocation43_spill] sm:$0xff] }
 0x528   :  { %v5083_v27 = vpop.f32.mrf.mxu0 }
 0x529   :  { %19190 = vst [vmem:[#allocation30_spill] sm:$0xff] %v15073_v32  ;;  %5342 = vmatmul.f32.gmra.mxu2 %v19184_v7  ;;  %5443 = vmatmul.f32.gmra.mxu3 %v19192_v24  ;;  %v5596_v7 = vmul.f32 %v5567_v57, %v19197_v53 }
 0x52a   :  { %v15080_v40 = vpop.f32.mrf.mxu1 }
 0x52b   :  { %19193 = vst [vmem:[#allocation87_spill] sm:$0xff] %v15080_v40  ;;  %5726 = vmatmul.f32.gmra.mxu0 %v5725_v63  ;;  %v15096_v20 = vand.u32 4294901760, %v5596_v7  ;;  %v19199_v63 = vld [vmem:[#allocation53_spill] sm:$0xff] }
 0x52c   :  { %v4767_v31 = vpop.f32.mrf.mxu2  ;;  %v4960_v8 = vpop.f32.mrf.mxu3 }
 0x52d   :  { %v4957_v32 = vadd.f32 %v4956_v55, %v4767_v31  ;;  %5911 = vmatmul.f32.gmra.mxu1 %v15033_v19  ;;  %v19201_v55 = vld [vmem:[#allocation41_spill] sm:$0xff]  ;;  %v19202_v31 = vld [vmem:[#allocation99_spill] sm:$0xff]  ;;  %v5572_v19 = vpop.permute.xlu2 %5571  ;;  %v15108_v25 = vsub.f32 %v5596_v7, %v15096_v20  ;;  %v5741_v7 = vand.u32 4294901760, %v5740_v12 }
 0x52e   :  { %v15105_v53 = vadd.f32 %v19202_v31, %v19201_v55 }
 0x52f   :  { %v15094_v40 = vadd.f32 %v5078_v3, %v4957_v32  ;;  %19203 = vst [vmem:[#allocation56_spill] sm:$0xff] %v15108_v25  ;;  %v18307_v36 = vand.u32 4294901760, %v15108_v25 }
 0x530   :  { %v5088_v46 = vpop.f32.mrf.mxu0 }
 0x531   :  { %19198 = vst [vmem:[#allocation47_spill] sm:$0xff] %v15094_v40  ;;  %5346 = vmatmul.f32.gmra.mxu2 %v19192_v24  ;;  %5447 = vmatmul.f32.gmra.mxu3 %v19199_v63  ;;  %v5597_v24 = vmul.f32 %v5572_v19, %v19204_v35  ;;  %v5748_v12 = vsub.f32 %v15108_v25, %v18307_v36  ;;  %v19219_v25 = vld [vmem:[#allocation52_spill] sm:$0xff] }
 0x532   :  { %v15101_v57 = vpop.f32.mrf.mxu1 }
 0x533   :  { %19200 = vst [vmem:[#allocation97_spill] sm:$0xff] %v15101_v57  ;;  %5734 = vmatmul.f32.gmra.mxu0 %v5733_v34  ;;  %v15117_v31 = vand.u32 4294901760, %v5597_v24  ;;  %v19207_v34 = vld [vmem:[#allocation98_spill] sm:$0xff] }
 0x534   :  { %v4775_v32 = vpop.f32.mrf.mxu2  ;;  %v4964_v3 = vpop.f32.mrf.mxu3 }
 0x535   :  { %v4961_v40 = vadd.f32 %v4960_v8, %v4775_v32  ;;  %5915 = vmatmul.f32.gmra.mxu1 %v15054_v23  ;;  %19206 = vst [vmem:[#allocation28_spill] sm:$0xff] %v15117_v31  ;;  %v19209_v8 = vld [vmem:[#allocation75_spill] sm:$0xff]  ;;  %v5577_v23 = vpop.permute.xlu0 %5576 }
 0x536   :  { %v19210_v32 = vld [vmem:[#allocation27_spill] sm:$0xff]  ;;  %v5598_v6 = vmul.f32 %v5577_v23, %v19211_v29  ;;  %v5749_v23 = vand.u32 4294901760, %v5748_v12 }
 0x537   :  { %v15115_v57 = vadd.f32 %v5083_v27, %v4961_v40  ;;  %v15126_v35 = vadd.f32 %v19210_v32, %v19209_v8 }
 0x538   :  { %v5093_v55 = vpop.f32.mrf.mxu0  ;;  %v15138_v32 = vand.u32 4294901760, %v5598_v6 }
 0x539   :  { %19205 = vst [vmem:[#allocation15_spill] sm:$0xff] %v15115_v57  ;;  %5350 = vmatmul.f32.gmra.mxu2 %v19199_v63  ;;  %5451 = vmatmul.f32.gmra.mxu3 %v19207_v34  ;;  %v15130_v57 = vsub.f32 %v5597_v24, %v15117_v31 }
 0x53a   :  { %v15122_v19 = vpop.f32.mrf.mxu1  ;;  %v15150_v36 = vsub.f32 %v5598_v6, %v15138_v32 }
 0x53b   :  { %19208 = vst [vmem:[#allocation67_spill] sm:$0xff] %v15122_v19  ;;  %5742 = vmatmul.f32.gmra.mxu0 %v5741_v7  ;;  %v19214_v7 = vld [vmem:[#allocation100_spill] sm:$0xff]  ;;  %v18310_v24 = vand.u32 4294901760, %v15130_v57 }
 0x53c   :  { %v4783_v40 = vpop.f32.mrf.mxu2  ;;  %v4968_v27 = vpop.f32.mrf.mxu3  ;;  %19212 = vst [vmem:[#allocation21_spill] sm:$0xff] %v15130_v57 }
 0x53d   :  { %v4965_v63 = vadd.f32 %v4964_v3, %v4783_v40  ;;  %5919 = vmatmul.f32.gmra.mxu1 %v15075_v61  ;;  %v19216_v3 = vld [vmem:[#allocation59_spill] sm:$0xff]  ;;  %v19217_v40 = vld [vmem:[#allocation92_spill] sm:$0xff]  ;;  %19218 = vst [vmem:[#allocation24_spill] sm:$0xff] %v15150_v36  ;;  %v5756_v12 = vsub.f32 %v15130_v57, %v18310_v24  ;;  %v19227_v57 = vand.u32 4294901760, %v15150_v36 }
 0x53e   :  { %v15147_v61 = vadd.f32 %v19217_v40, %v19216_v3 }
 0x53f   :  { %v15136_v19 = vadd.f32 %v5088_v46, %v4965_v63  ;;  %v5757_v6 = vand.u32 4294901760, %v5756_v12 }
 0x540   :  { %v5098_v8 = vpop.f32.mrf.mxu0 }
 0x541   :  { %19213 = vst [vmem:[#allocation23_spill] sm:$0xff] %v15136_v19  ;;  %5354 = vmatmul.f32.gmra.mxu2 %v19207_v34  ;;  %5455 = vmatmul.f32.gmra.mxu3 %v19214_v7  ;;  %v5599_v34 = vmul.f32 %v5582_v37, %v19219_v25  ;;  %v10224_v37 = vld [vmem:[%s17933_s3 + $0x378] sm:$0xff] }
 0x542   :  { %v15143_v29 = vpop.f32.mrf.mxu1 }
 0x543   :  { %19215 = vst [vmem:[#allocation55_spill] sm:$0xff] %v15143_v29  ;;  %5750 = vmatmul.f32.gmra.mxu0 %v5749_v23  ;;  %v15159_v40 = vand.u32 4294901760, %v5599_v34  ;;  %v19220_v23 = vld [vmem:[#allocation105_spill] sm:$0xff] }
 0x544   :  { %v4791_v46 = vpop.f32.mrf.mxu2  ;;  %v4972_v63 = vpop.f32.mrf.mxu3 }
 0x545   :  { %v4969_v19 = vadd.f32 %v4968_v27, %v4791_v46  ;;  %5923 = vmatmul.f32.gmra.mxu1 %v15096_v20  ;;  %v15169_v46 = vand.u32 4294901760, %v10224_v37  ;;  %v15181_v4 = vsub.f32 %v5599_v34, %v15159_v40 }
 0x547   :  { %v15157_v29 = vadd.f32 %v5093_v55, %v4969_v19  ;;  %19222 = vst [vmem:[#allocation16_spill] sm:$0xff] %v15169_v46  ;;  %v19223_v55 = vld [vmem:[#allocation68_spill] sm:$0xff]  ;;  %v19224_v19 = vld [vmem:[#allocation90_spill] sm:$0xff]  ;;  %6570 = vmatpush.msrb.mxu2 %v15169_v46  ;;  %v15177_v12 = vsub.f32 %v10224_v37, %v15169_v46  ;;  %7021 = vmatpush.msrb.mxu1 %v15169_v46 }
 0x548   :  { %v5103_v3 = vpop.f32.mrf.mxu0  ;;  %v15173_v24 = vadd.f32 %v19224_v19, %v19223_v55  ;;  %19226 = vst [vmem:[#allocation71_spill] sm:$0xff] %v15181_v4  ;;  %v5764_v55 = vsub.f32 %v15150_v36, %v19227_v57  ;;  %v10223_v57 = vld [vmem:[%s17933_s3 + $0x370] sm:$0xff]  ;;  %v19230_v36 = vld [vmem:[#allocation84_spill] sm:$0xff] }
 0x549   :  { %5358 = vmatmul.f32.gmra.mxu2 %v19214_v7  ;;  %5459 = vmatmul.f32.gmra.mxu3 %v19220_v23  ;;  %19225 = vst [vmem:[#allocation20_spill] sm:$0xff] %v15177_v12 }
 0x54a   :  { %v15167_v27 = vpop.f32.mrf.mxu1  ;;  %6893 = vmatpush.msrb.mxu0 %v15177_v12 }
 0x54b   :  { %19221 = vst [vmem:[#allocation48_spill] sm:$0xff] %v15167_v27  ;;  %5758 = vmatmul.f32.gmra.mxu0 %v5757_v6  ;;  %v18318_v6 = vand.u32 4294901760, %v15177_v12 }
 0x54c   :  { %v4799_v25 = vpop.f32.mrf.mxu2  ;;  %v4976_v7 = vpop.f32.mrf.mxu3 }
 0x54d   :  { %v4973_v27 = vadd.f32 %v4972_v63, %v4799_v25  ;;  %5927 = vmatmul.f32.gmra.mxu1 %v15117_v31  ;;  %v6733_v46 = vsub.f32 %v15177_v12, %v18318_v6  ;;  %v5765_v25 = vand.u32 4294901760, %v5764_v55 }
 0x54f   :  { %v15189_v19 = vadd.f32 %v5098_v8, %v4973_v27  ;;  %v6734_v8 = vand.u32 4294901760, %v6733_v46  ;;  %v15202_v27 = vand.u32 4294901760, %v10223_v57  ;;  %v19232_v46 = vand.u32 4294901760, %v15181_v4 }
 0x550   :  { %v5108_v37 = vpop.f32.mrf.mxu0 }
 0x551   :  { %19228 = vst [vmem:[#allocation60_spill] sm:$0xff] %v15189_v19  ;;  %5362 = vmatmul.f32.gmra.mxu2 %v19220_v23  ;;  %5463 = vmatmul.f32.gmra.mxu3 %v14781_v16  ;;  %v19231_v19 = vld [vmem:[#allocation94_spill] sm:$0xff]  ;;  %v15210_v55 = vsub.f32 %v10223_v57, %v15202_v27 }
 0x552   :  { %v15200_v34 = vpop.f32.mrf.mxu1  ;;  %v15206_v31 = vadd.f32 %v19231_v19, %v19230_v36  ;;  %6735 = vmatpush.msrb.mxu3 %v6734_v8  ;;  %6572 = vmatpush.msrb.mxu2 %v15202_v27  ;;  %v10222_v57 = vld [vmem:[%s17933_s3 + $0x368] sm:$0xff] }
 0x553   :  { %19229 = vst [vmem:[#allocation46_spill] sm:$0xff] %v15200_v34  ;;  %5766 = vmatmul.f32.gmra.mxu0 %v5765_v25  ;;  %v5772_v34 = vsub.f32 %v15181_v4, %v19232_v46  ;;  %v18322_v12 = vand.u32 4294901760, %v15210_v55  ;;  %7023 = vmatpush.msrb.mxu1 %v15202_v27  ;;  %v15231_v46 = vand.u32 4294901760, %v10222_v57 }
 0x554   :  { %v4807_v23 = vpop.f32.mrf.mxu2  ;;  %v4980_v6 = vpop.f32.mrf.mxu3  ;;  %6896 = vmatpush.msrb.mxu0 %v15210_v55 }
 0x555   :  { %v4977_v63 = vadd.f32 %v4976_v7, %v4807_v23  ;;  %5931 = vmatmul.f32.gmra.mxu1 %v15138_v32  ;;  %v6739_v25 = vsub.f32 %v15210_v55, %v18322_v12  ;;  %v5773_v7 = vand.u32 4294901760, %v5772_v34  ;;  %6574 = vmatpush.msrb.mxu2 %v15231_v46 }
 0x556   :  { %7025 = vmatpush.msrb.mxu1 %v15231_v46 }
 0x557   :  { %v15219_v36 = vadd.f32 %v5103_v3, %v4977_v63  ;;  %v6740_v23 = vand.u32 4294901760, %v6739_v25  ;;  %v19235_v3 = vld [vmem:[#allocation82_spill] sm:$0xff] }
 0x558   :  { %v5113_v19 = vpop.f32.mrf.mxu0  ;;  %v19236_v63 = vld [vmem:[#allocation102_spill] sm:$0xff] }
 0x559   :  { %19233 = vst [vmem:[#allocation53_spill] sm:$0xff] %v15219_v36  ;;  %5366 = vmatmul.f32.gmra.mxu2 %v14781_v16  ;;  %5467 = vmatmul.f32.gmra.mxu3 %v14826_v59  ;;  %v15235_v4 = vadd.f32 %v19236_v63, %v19235_v3  ;;  %v15239_v16 = vsub.f32 %v10222_v57, %v15231_v46 }
 0x55a   :  { %v15229_v8 = vpop.f32.mrf.mxu1  ;;  %6741 = vmatpush.msrb.mxu3 %v6740_v23 }
 0x55b   :  { %19234 = vst [vmem:[#allocation41_spill] sm:$0xff] %v15229_v8  ;;  %5774 = vmatmul.f32.gmra.mxu0 %v5773_v7  ;;  %v18323_v25 = vand.u32 4294901760, %v15239_v16 }
 0x55c   :  { %v4815_v12 = vpop.f32.mrf.mxu2  ;;  %v4984_v36 = vpop.f32.mrf.mxu3  ;;  %6899 = vmatpush.msrb.mxu0 %v15239_v16 }
 0x55d   :  { %v4981_v34 = vadd.f32 %v4980_v6, %v4815_v12  ;;  %5935 = vmatmul.f32.gmra.mxu1 %v15159_v40  ;;  %v6745_v23 = vsub.f32 %v15239_v16, %v18323_v25  ;;  %v19239_v12 = vand.u32 4294901760, %v14855_v9  ;;  %v10221_v6 = vld [vmem:[%s17933_s3 + $0x360] sm:$0xff] }
 0x55f   :  { %v15245_v3 = vadd.f32 %v5108_v37, %v4981_v34  ;;  %v6746_v63 = vand.u32 4294901760, %v6745_v23  ;;  %v15260_v37 = vand.u32 4294901760, %v10221_v6  ;;  %v19241_v34 = vld [vmem:[#allocation34_spill] sm:$0xff] }
 0x560   :  { %v15247_v7 = vpop.f32.mrf.mxu0 }
 0x561   :  { %19237 = vst [vmem:[#allocation99_spill] sm:$0xff] %v15245_v3  ;;  %5370 = vmatmul.f32.gmra.mxu2 %v14826_v59  ;;  %6103 = vmatmul.f32.vlgmr.msra.gmra.mxu3 %v19239_v12  ;;  %v15269_v12 = vsub.f32 %v10221_v6, %v15260_v37 }
 0x562   :  { %19238 = vst [vmem:[#allocation98_spill] sm:$0xff] %v15247_v7  ;;  %v15258_v57 = vpop.f32.mrf.mxu1  ;;  %v19242_v7 = vld [vmem:[#allocation96_spill] sm:$0xff]  ;;  %6747 = vmatpush.msrb.mxu3 %v6746_v63  ;;  %6576 = vmatpush.msrb.mxu2 %v15260_v37 }
 0x563   :  { %19240 = vst [vmem:[#allocation75_spill] sm:$0xff] %v15258_v57  ;;  %v15264_v8 = vadd.f32 %v19242_v7, %v19241_v34  ;;  %6262 = vmatmul.f32.vlgmr.msra.gmra.mxu0 %v14835_v13  ;;  %v18324_v23 = vand.u32 4294901760, %v15269_v12  ;;  %7027 = vmatpush.msrb.mxu1 %v15260_v37 }
 0x564   :  { %v4823_v25 = vpop.f32.mrf.mxu2  ;;  %v5408_v59 = vpop.f32.mrf.mxu3  ;;  %6902 = vmatpush.msrb.mxu0 %v15269_v12 }
 0x565   :  { %v4985_v3 = vadd.f32 %v4984_v36, %v4823_v25  ;;  %6359 = vmatmul.f32.vlgmr.msra.gmra.mxu1 %v14835_v13  ;;  %v6751_v63 = vsub.f32 %v15269_v12, %v18324_v23  ;;  %v19245_v36 = vand.u32 4294901760, %v14880_v49  ;;  %v10220_v13 = vld [vmem:[%s17933_s3 + $0x358] sm:$0xff] }
 0x567   :  { %v15275_v7 = vadd.f32 %v5113_v19, %v4985_v3  ;;  %v6752_v6 = vand.u32 4294901760, %v6751_v63  ;;  %v15290_v19 = vand.u32 4294901760, %v10220_v13  ;;  %v19247_v3 = vld [vmem:[#allocation93_spill] sm:$0xff] }
 0x568   :  { %v15277_v34 = vpop.f32.mrf.mxu0 }
 0x569   :  { %19243 = vst [vmem:[#allocation27_spill] sm:$0xff] %v15275_v7  ;;  %5989 = vmatmul.f32.vlgmr.msra.gmra.mxu2 %v14855_v9  ;;  %6109 = vmatmul.f32.gmra.mxu3 %v19245_v36  ;;  %v5153_v9 = vadd.f32 %v14897_v30, %v14944_v41  ;;  %v15301_v7 = vsub.f32 %v10220_v13, %v15290_v19 }
 0x56a   :  { %19244 = vst [vmem:[#allocation100_spill] sm:$0xff] %v15277_v34  ;;  %v15288_v25 = vpop.f32.mrf.mxu1  ;;  %v19248_v34 = vld [vmem:[#allocation101_spill] sm:$0xff]  ;;  %6753 = vmatpush.msrb.mxu3 %v6752_v6  ;;  %6578 = vmatpush.msrb.mxu2 %v15290_v19 }
 0x56b   :  { %19246 = vst [vmem:[#allocation59_spill] sm:$0xff] %v15288_v25  ;;  %v15294_v57 = vadd.f32 %v19248_v34, %v19247_v3  ;;  %6266 = vmatmul.f32.gmra.mxu0 %v14863_v1  ;;  %v18325_v25 = vand.u32 4294901760, %v15301_v7  ;;  %7029 = vmatpush.msrb.mxu1 %v15290_v19 }
 0x56c   :  { %v5311_v23 = vpop.f32.mrf.mxu2  ;;  %v5412_v36 = vpop.f32.mrf.mxu3  ;;  %6905 = vmatpush.msrb.mxu0 %v15301_v7 }
 0x56d   :  { %v5312_v63 = vadd.f32 %v5311_v23, %v5153_v9  ;;  %6363 = vmatmul.f32.gmra.mxu1 %v14863_v1  ;;  %v6757_v30 = vsub.f32 %v15301_v7, %v18325_v25  ;;  %v19250_v1 = vand.u32 4294901760, %v14911_v2  ;;  %v10219_v23 = vld [vmem:[%s17933_s3 + $0x350] sm:$0xff] }
 0x56e   :  { %v15323_v6 = vand.u32 4294901760, %v10219_v23  ;;  %v19251_v9 = vld [vmem:[#allocation19_spill] sm:$0xff] }
 0x56f   :  { %v5409_v34 = vadd.f32 %v5408_v59, %v5312_v63  ;;  %v6758_v59 = vand.u32 4294901760, %v6757_v30  ;;  %v15327_v63 = vadd.f32 %v14813_v60, %v19251_v9 }
 0x570   :  { %v15307_v3 = vpop.f32.mrf.mxu0  ;;  %6580 = vmatpush.msrb.mxu2 %v15323_v6  ;;  %7031 = vmatpush.msrb.mxu1 %v15323_v6 }
 0x571   :  { %v15313_v41 = vadd.f32 %v5409_v34, %v15042_v54  ;;  %5994 = vmatmul.f32.gmra.mxu2 %v14880_v49  ;;  %6115 = vmatmul.f32.gmra.mxu3 %v19250_v1  ;;  %v5159_v49 = vadd.f32 %v14929_v18, %v14963_v0  ;;  %v15334_v1 = vsub.f32 %v10219_v23, %v15323_v6  ;;  %v10218_v23 = vld [vmem:[%s17933_s3 + $0x348] sm:$0xff] }
 0x572   :  { %v15321_v13 = vpop.f32.mrf.mxu1  ;;  %6759 = vmatpush.msrb.mxu3 %v6758_v59 }
 0x573   :  { %19249 = vst [vmem:[#allocation92_spill] sm:$0xff] %v15313_v41  ;;  %6270 = vmatmul.f32.gmra.mxu0 %v14892_v58  ;;  %v18326_v25 = vand.u32 4294901760, %v15334_v1  ;;  %v19283_v41 = vld [vmem:[#allocation79_spill] sm:$0xff] }
 0x574   :  { %v5315_v54 = vpop.f32.mrf.mxu2  ;;  %v5416_v34 = vpop.f32.mrf.mxu3  ;;  %6908 = vmatpush.msrb.mxu0 %v15334_v1 }
 0x575   :  { %v5316_v30 = vadd.f32 %v5315_v54, %v5159_v49  ;;  %6367 = vmatmul.f32.gmra.mxu1 %v14892_v58  ;;  %v6763_v18 = vsub.f32 %v15334_v1, %v18326_v25  ;;  %v19253_v58 = vand.u32 4294901760, %v14937_v47  ;;  %v15356_v49 = vand.u32 4294901760, %v10218_v23  ;;  %v19254_v54 = vld [vmem:[#allocation54_spill] sm:$0xff] }
 0x577   :  { %v5413_v60 = vadd.f32 %v5412_v36, %v5316_v30  ;;  %v6764_v36 = vand.u32 4294901760, %v6763_v18  ;;  %v15360_v30 = vadd.f32 %v14846_v11, %v19254_v54  ;;  %6582 = vmatpush.msrb.mxu2 %v15356_v49  ;;  %7033 = vmatpush.msrb.mxu1 %v15356_v49 }
 0x578   :  { %v15340_v9 = vpop.f32.mrf.mxu0 }
 0x579   :  { %v15346_v0 = vadd.f32 %v5413_v60, %v15063_v52  ;;  %5999 = vmatmul.f32.gmra.mxu2 %v14911_v2  ;;  %6121 = vmatmul.f32.gmra.mxu3 %v19253_v58  ;;  %v5165_v2 = vadd.f32 %v14952_v62, %v14980_v5  ;;  %v15367_v58 = vsub.f32 %v10218_v23, %v15356_v49  ;;  %v10217_v23 = vld [vmem:[%s17933_s3 + $0x340] sm:$0xff] }
 0x57a   :  { %v15354_v59 = vpop.f32.mrf.mxu1  ;;  %6765 = vmatpush.msrb.mxu3 %v6764_v36 }
 0x57b   :  { %19252 = vst [vmem:[#allocation105_spill] sm:$0xff] %v15346_v0  ;;  %6274 = vmatmul.f32.gmra.mxu0 %v14924_v51  ;;  %v18327_v25 = vand.u32 4294901760, %v15367_v58 }
 0x57c   :  { %v5319_v52 = vpop.f32.mrf.mxu2  ;;  %v5420_v60 = vpop.f32.mrf.mxu3  ;;  %6911 = vmatpush.msrb.mxu0 %v15367_v58 }
 0x57d   :  { %v5320_v18 = vadd.f32 %v5319_v52, %v5165_v2  ;;  %6371 = vmatmul.f32.gmra.mxu1 %v14924_v51  ;;  %v6769_v62 = vsub.f32 %v15367_v58, %v18327_v25  ;;  %v19256_v51 = vand.u32 4294901760, %v14956_v21  ;;  %v15389_v2 = vand.u32 4294901760, %v10217_v23  ;;  %v19257_v52 = vld [vmem:[#allocation11_spill] sm:$0xff] }
 0x57f   :  { %v5417_v11 = vadd.f32 %v5416_v34, %v5320_v18  ;;  %v6770_v34 = vand.u32 4294901760, %v6769_v62  ;;  %v15393_v18 = vadd.f32 %v14874_v42, %v19257_v52  ;;  %6584 = vmatpush.msrb.mxu2 %v15389_v2  ;;  %7035 = vmatpush.msrb.mxu1 %v15389_v2 }
 0x580   :  { %v15373_v54 = vpop.f32.mrf.mxu0 }
 0x581   :  { %v15379_v5 = vadd.f32 %v5417_v11, %v15084_v48  ;;  %6004 = vmatmul.f32.gmra.mxu2 %v14937_v47  ;;  %6127 = vmatmul.f32.gmra.mxu3 %v19256_v51  ;;  %v5171_v47 = vadd.f32 %v14970_v38, %v14997_v26  ;;  %v15400_v51 = vsub.f32 %v10217_v23, %v15389_v2  ;;  %v10216_v23 = vld [vmem:[%s17933_s3 + $0x338] sm:$0xff] }
 0x582   :  { %v15387_v36 = vpop.f32.mrf.mxu1  ;;  %6771 = vmatpush.msrb.mxu3 %v6770_v34 }
 0x583   :  { %19255 = vst [vmem:[#allocation68_spill] sm:$0xff] %v15379_v5  ;;  %6278 = vmatmul.f32.gmra.mxu0 %v14947_v56  ;;  %v18328_v25 = vand.u32 4294901760, %v15400_v51 }
 0x584   :  { %v5323_v48 = vpop.f32.mrf.mxu2  ;;  %v5424_v11 = vpop.f32.mrf.mxu3  ;;  %6914 = vmatpush.msrb.mxu0 %v15400_v51 }
 0x585   :  { %v5324_v62 = vadd.f32 %v5323_v48, %v5171_v47  ;;  %6375 = vmatmul.f32.gmra.mxu1 %v14947_v56  ;;  %v6775_v38 = vsub.f32 %v15400_v51, %v18328_v25  ;;  %v19259_v56 = vand.u32 4294901760, %v14973_v44  ;;  %v15422_v47 = vand.u32 4294901760, %v10216_v23  ;;  %v19260_v48 = vld [vmem:[#allocation63_spill] sm:$0xff] }
 0x587   :  { %v5421_v42 = vadd.f32 %v5420_v60, %v5324_v62  ;;  %v6776_v60 = vand.u32 4294901760, %v6775_v38  ;;  %v15426_v62 = vadd.f32 %v14905_v43, %v19260_v48  ;;  %6586 = vmatpush.msrb.mxu2 %v15422_v47  ;;  %7037 = vmatpush.msrb.mxu1 %v15422_v47 }
 0x588   :  { %v15406_v52 = vpop.f32.mrf.mxu0 }
 0x589   :  { %v15412_v26 = vadd.f32 %v5421_v42, %v15105_v53  ;;  %6009 = vmatmul.f32.gmra.mxu2 %v14956_v21  ;;  %6133 = vmatmul.f32.gmra.mxu3 %v19259_v56  ;;  %v5177_v21 = vadd.f32 %v14987_v17, %v15014_v10  ;;  %v15433_v56 = vsub.f32 %v10216_v23, %v15422_v47  ;;  %v10215_v23 = vld [vmem:[%s17933_s3 + $0x330] sm:$0xff] }
 0x58a   :  { %v15420_v34 = vpop.f32.mrf.mxu1  ;;  %6777 = vmatpush.msrb.mxu3 %v6776_v60 }
 0x58b   :  { %19258 = vst [vmem:[#allocation90_spill] sm:$0xff] %v15412_v26  ;;  %6282 = vmatmul.f32.gmra.mxu0 %v14965_v33  ;;  %v18329_v25 = vand.u32 4294901760, %v15433_v56  ;;  %v19275_v26 = vld [vmem:[#allocation107_spill] sm:$0xff] }
 0x58c   :  { %v5327_v53 = vpop.f32.mrf.mxu2  ;;  %v5428_v42 = vpop.f32.mrf.mxu3  ;;  %6917 = vmatpush.msrb.mxu0 %v15433_v56 }
 0x58d   :  { %v5328_v38 = vadd.f32 %v5327_v53, %v5177_v21  ;;  %6379 = vmatmul.f32.gmra.mxu1 %v14965_v33  ;;  %v6781_v17 = vsub.f32 %v15433_v56, %v18329_v25  ;;  %v19262_v33 = vand.u32 4294901760, %v14990_v39  ;;  %v15455_v21 = vand.u32 4294901760, %v10215_v23  ;;  %v19263_v53 = vld [vmem:[#allocation83_spill] sm:$0xff] }
 0x58f   :  { %v5425_v43 = vadd.f32 %v5424_v11, %v5328_v38  ;;  %v6782_v11 = vand.u32 4294901760, %v6781_v17  ;;  %v15459_v38 = vadd.f32 %v14932_v45, %v19263_v53  ;;  %6588 = vmatpush.msrb.mxu2 %v15455_v21  ;;  %7039 = vmatpush.msrb.mxu1 %v15455_v21 }
 0x590   :  { %v15439_v48 = vpop.f32.mrf.mxu0 }
 0x591   :  { %v15445_v10 = vadd.f32 %v5425_v43, %v15126_v35  ;;  %6014 = vmatmul.f32.gmra.mxu2 %v14973_v44  ;;  %6139 = vmatmul.f32.gmra.mxu3 %v19262_v33  ;;  %v5183_v35 = vadd.f32 %v15004_v50, %v15031_v15  ;;  %v15466_v33 = vsub.f32 %v10215_v23, %v15455_v21  ;;  %v10214_v23 = vld [vmem:[%s17933_s3 + $0x328] sm:$0xff] }
 0x592   :  { %v15453_v60 = vpop.f32.mrf.mxu1  ;;  %6783 = vmatpush.msrb.mxu3 %v6782_v11 }
 0x593   :  { %19261 = vst [vmem:[#allocation84_spill] sm:$0xff] %v15445_v10  ;;  %6286 = vmatmul.f32.gmra.mxu0 %v14982_v28  ;;  %v18330_v25 = vand.u32 4294901760, %v15466_v33 }
 0x594   :  { %v5331_v44 = vpop.f32.mrf.mxu2  ;;  %v5432_v43 = vpop.f32.mrf.mxu3  ;;  %6920 = vmatpush.msrb.mxu0 %v15466_v33 }
 0x595   :  { %v5332_v17 = vadd.f32 %v5331_v44, %v5183_v35  ;;  %6383 = vmatmul.f32.gmra.mxu1 %v14982_v28  ;;  %v6787_v50 = vsub.f32 %v15466_v33, %v18330_v25  ;;  %v19265_v28 = vand.u32 4294901760, %v15008_v22  ;;  %v15488_v35 = vand.u32 4294901760, %v10214_v23  ;;  %v19266_v44 = vld [vmem:[#allocation81_spill] sm:$0xff] }
 0x597   :  { %v5429_v45 = vadd.f32 %v5428_v42, %v5332_v17  ;;  %v6788_v42 = vand.u32 4294901760, %v6787_v50  ;;  %v19267_v17 = vld [vmem:[#allocation103_spill] sm:$0xff]  ;;  %6590 = vmatpush.msrb.mxu2 %v15488_v35  ;;  %7041 = vmatpush.msrb.mxu1 %v15488_v35 }
 0x598   :  { %v15472_v53 = vpop.f32.mrf.mxu0 }
 0x599   :  { %v15478_v15 = vadd.f32 %v5429_v45, %v15147_v61  ;;  %6019 = vmatmul.f32.gmra.mxu2 %v14990_v39  ;;  %6145 = vmatmul.f32.gmra.mxu3 %v19265_v28  ;;  %v5189_v61 = vadd.f32 %v19267_v17, %v19266_v44  ;;  %v15495_v39 = vsub.f32 %v10214_v23, %v15488_v35  ;;  %v19270_v23 = vld [vmem:[#allocation104_spill] sm:$0xff]  ;;  %v10213_v17 = vld [vmem:[%s17933_s3 + $0x320] sm:$0xff] }
 0x59a   :  { %v15486_v11 = vpop.f32.mrf.mxu1  ;;  %6789 = vmatpush.msrb.mxu3 %v6788_v42 }
 0x59b   :  { %19264 = vst [vmem:[#allocation94_spill] sm:$0xff] %v15478_v15  ;;  %6290 = vmatmul.f32.gmra.mxu0 %v14999_v14  ;;  %v18331_v50 = vand.u32 4294901760, %v15495_v39 }
 0x59c   :  { %v5335_v45 = vpop.f32.mrf.mxu2  ;;  %v5436_v25 = vpop.f32.mrf.mxu3  ;;  %6923 = vmatpush.msrb.mxu0 %v15495_v39 }
 0x59d   :  { %v5336_v28 = vadd.f32 %v5335_v45, %v5189_v61  ;;  %6387 = vmatmul.f32.gmra.mxu1 %v14999_v14  ;;  %v6793_v42 = vsub.f32 %v15495_v39, %v18331_v50  ;;  %v19271_v14 = vand.u32 4294901760, %v19270_v23  ;;  %v15517_v45 = vand.u32 4294901760, %v10213_v17  ;;  %v19274_v50 = vld [vmem:[#allocation30_spill] sm:$0xff] }
 0x59f   :  { %v5433_v15 = vadd.f32 %v5432_v43, %v5336_v28  ;;  %v6794_v43 = vand.u32 4294901760, %v6793_v42  ;;  %v19273_v28 = vld [vmem:[#allocation95_spill] sm:$0xff]  ;;  %6592 = vmatpush.msrb.mxu2 %v15517_v45  ;;  %7043 = vmatpush.msrb.mxu1 %v15517_v45 }
 0x5a0   :  { %v15501_v10 = vpop.f32.mrf.mxu0 }
 0x5a1   :  { %19268 = vst [vmem:[#allocation82_spill] sm:$0xff] %v15501_v10  ;;  %v15507_v44 = vadd.f32 %v5433_v15, %v15173_v24  ;;  %6024 = vmatmul.f32.gmra.mxu2 %v15008_v22  ;;  %6151 = vmatmul.f32.gmra.mxu3 %v19271_v14  ;;  %v5195_v24 = vadd.f32 %v19275_v26, %v19274_v50 }
 0x5a2   :  { %v15515_v61 = vpop.f32.mrf.mxu1  ;;  %6795 = vmatpush.msrb.mxu3 %v6794_v43  ;;  %v15524_v22 = vsub.f32 %v10213_v17, %v15517_v45  ;;  %v19278_v17 = vld [vmem:[#allocation78_spill] sm:$0xff] }
 0x5a3   :  { %19269 = vst [vmem:[#allocation102_spill] sm:$0xff] %v15507_v44  ;;  %6294 = vmatmul.f32.gmra.mxu0 %v19273_v28  ;;  %v19279_v43 = vand.u32 4294901760, %v19278_v17 }
 0x5a4   :  { %19272 = vst [vmem:[#allocation34_spill] sm:$0xff] %v15515_v61  ;;  %v5339_v15 = vpop.f32.mrf.mxu2  ;;  %v5440_v44 = vpop.f32.mrf.mxu3  ;;  %v18332_v42 = vand.u32 4294901760, %v15524_v22  ;;  %6926 = vmatpush.msrb.mxu0 %v15524_v22 }
 0x5a5   :  { %v5340_v14 = vadd.f32 %v5339_v15, %v5195_v24  ;;  %6391 = vmatmul.f32.gmra.mxu1 %v19273_v28  ;;  %v10212_v28 = vld [vmem:[%s17933_s3 + $0x318] sm:$0xff] }
 0x5a6   :  { %v6799_v26 = vsub.f32 %v15524_v22, %v18332_v42  ;;  %v15546_v15 = vand.u32 4294901760, %v10212_v28  ;;  %v19282_v42 = vld [vmem:[#allocation47_spill] sm:$0xff] }
 0x5a7   :  { %v5437_v5 = vadd.f32 %v5436_v25, %v5340_v14  ;;  %v19281_v14 = vld [vmem:[#allocation106_spill] sm:$0xff] }
 0x5a8   :  { %v15530_v0 = vpop.f32.mrf.mxu0  ;;  %v6800_v25 = vand.u32 4294901760, %v6799_v26  ;;  %6594 = vmatpush.msrb.mxu2 %v15546_v15  ;;  %7045 = vmatpush.msrb.mxu1 %v15546_v15 }
 0x5a9   :  { %19276 = vst [vmem:[#allocation96_spill] sm:$0xff] %v15530_v0  ;;  %v15536_v50 = vadd.f32 %v5437_v5, %v15206_v31  ;;  %6029 = vmatmul.f32.gmra.mxu2 %v19270_v23  ;;  %6157 = vmatmul.f32.gmra.mxu3 %v19279_v43  ;;  %v5201_v31 = vadd.f32 %v19283_v41, %v19282_v42 }
 0x5aa   :  { %v15544_v24 = vpop.f32.mrf.mxu1  ;;  %6801 = vmatpush.msrb.mxu3 %v6800_v25  ;;  %v15553_v23 = vsub.f32 %v10212_v28, %v15546_v15  ;;  %v19286_v28 = vld [vmem:[#allocation70_spill] sm:$0xff] }
 0x5ab   :  { %19277 = vst [vmem:[#allocation93_spill] sm:$0xff] %v15536_v50  ;;  %6298 = vmatmul.f32.gmra.mxu0 %v19281_v14  ;;  %v19287_v25 = vand.u32 4294901760, %v19286_v28 }
 0x5ac   :  { %19280 = vst [vmem:[#allocation101_spill] sm:$0xff] %v15544_v24  ;;  %v5343_v5 = vpop.f32.mrf.mxu2  ;;  %v5444_v50 = vpop.f32.mrf.mxu3  ;;  %v18333_v26 = vand.u32 4294901760, %v15553_v23  ;;  %6929 = vmatpush.msrb.mxu0 %v15553_v23 }
 0x5ad   :  { %v5344_v43 = vadd.f32 %v5343_v5, %v5201_v31  ;;  %6395 = vmatmul.f32.gmra.mxu1 %v19281_v14  ;;  %v10211_v14 = vld [vmem:[%s17933_s3 + $0x310] sm:$0xff] }
 0x5ae   :  { %v6805_v41 = vsub.f32 %v15553_v23, %v18333_v26  ;;  %v15575_v5 = vand.u32 4294901760, %v10211_v14  ;;  %v19290_v26 = vld [vmem:[#allocation15_spill] sm:$0xff] }
 0x5af   :  { %v5441_v24 = vadd.f32 %v5440_v44, %v5344_v43  ;;  %v19289_v43 = vld [vmem:[#allocation76_spill] sm:$0xff] }
 0x5b0   :  { %v15559_v0 = vpop.f32.mrf.mxu0  ;;  %v6806_v44 = vand.u32 4294901760, %v6805_v41  ;;  %6596 = vmatpush.msrb.mxu2 %v15575_v5  ;;  %7047 = vmatpush.msrb.mxu1 %v15575_v5 }
 0x5b1   :  { %19284 = vst [vmem:[#allocation19_spill] sm:$0xff] %v15559_v0  ;;  %v15565_v42 = vadd.f32 %v5441_v24, %v15235_v4  ;;  %6034 = vmatmul.f32.gmra.mxu2 %v19278_v17  ;;  %6163 = vmatmul.f32.gmra.mxu3 %v19287_v25  ;;  %v19291_v0 = vld [vmem:[#allocation87_spill] sm:$0xff]  ;;  %v15582_v17 = vsub.f32 %v10211_v14, %v15575_v5  ;;  %v19294_v14 = vld [vmem:[#allocation69_spill] sm:$0xff] }
 0x5b2   :  { %v15573_v31 = vpop.f32.mrf.mxu1  ;;  %v5207_v4 = vadd.f32 %v19291_v0, %v19290_v26  ;;  %6807 = vmatpush.msrb.mxu3 %v6806_v44  ;;  %v19295_v44 = vand.u32 4294901760, %v19294_v14 }
 0x5b3   :  { %19285 = vst [vmem:[#allocation54_spill] sm:$0xff] %v15565_v42  ;;  %6302 = vmatmul.f32.gmra.mxu0 %v19289_v43  ;;  %v18334_v41 = vand.u32 4294901760, %v15582_v17 }
 0x5b4   :  { %19288 = vst [vmem:[#allocation11_spill] sm:$0xff] %v15573_v31  ;;  %v5347_v24 = vpop.f32.mrf.mxu2  ;;  %v5448_v42 = vpop.f32.mrf.mxu3  ;;  %6932 = vmatpush.msrb.mxu0 %v15582_v17 }
 0x5b5   :  { %v5348_v25 = vadd.f32 %v5347_v24, %v5207_v4  ;;  %6399 = vmatmul.f32.gmra.mxu1 %v19289_v43  ;;  %v6811_v0 = vsub.f32 %v15582_v17, %v18334_v41  ;;  %v10210_v43 = vld [vmem:[%s17933_s3 + $0x308] sm:$0xff]  ;;  %v19298_v41 = vld [vmem:[#allocation23_spill] sm:$0xff] }
 0x5b6   :  { %v15604_v24 = vand.u32 4294901760, %v10210_v43 }
 0x5b7   :  { %v5445_v31 = vadd.f32 %v5444_v50, %v5348_v25  ;;  %v6812_v50 = vand.u32 4294901760, %v6811_v0  ;;  %v19297_v25 = vld [vmem:[#allocation85_spill] sm:$0xff] }
 0x5b8   :  { %v15588_v61 = vpop.f32.mrf.mxu0  ;;  %6598 = vmatpush.msrb.mxu2 %v15604_v24  ;;  %7049 = vmatpush.msrb.mxu1 %v15604_v24 }
 0x5b9   :  { %19292 = vst [vmem:[#allocation63_spill] sm:$0xff] %v15588_v61  ;;  %v15594_v26 = vadd.f32 %v5445_v31, %v15264_v8  ;;  %6039 = vmatmul.f32.gmra.mxu2 %v19286_v28  ;;  %6169 = vmatmul.f32.gmra.mxu3 %v19295_v44  ;;  %v19299_v61 = vld [vmem:[#allocation97_spill] sm:$0xff]  ;;  %v15611_v28 = vsub.f32 %v10210_v43, %v15604_v24  ;;  %v19302_v43 = vld [vmem:[#allocation56_spill] sm:$0xff] }
 0x5ba   :  { %v15602_v4 = vpop.f32.mrf.mxu1  ;;  %v5213_v8 = vadd.f32 %v19299_v61, %v19298_v41  ;;  %6813 = vmatpush.msrb.mxu3 %v6812_v50  ;;  %v19303_v50 = vand.u32 4294901760, %v19302_v43 }
 0x5bb   :  { %19293 = vst [vmem:[#allocation83_spill] sm:$0xff] %v15594_v26  ;;  %6306 = vmatmul.f32.gmra.mxu0 %v19297_v25  ;;  %v18335_v0 = vand.u32 4294901760, %v15611_v28 }
 0x5bc   :  { %19296 = vst [vmem:[#allocation81_spill] sm:$0xff] %v15602_v4  ;;  %v5351_v31 = vpop.f32.mrf.mxu2  ;;  %v5452_v26 = vpop.f32.mrf.mxu3  ;;  %6935 = vmatpush.msrb.mxu0 %v15611_v28 }
 0x5bd   :  { %v5352_v44 = vadd.f32 %v5351_v31, %v5213_v8  ;;  %6403 = vmatmul.f32.gmra.mxu1 %v19297_v25  ;;  %v6817_v61 = vsub.f32 %v15611_v28, %v18335_v0  ;;  %v10209_v25 = vld [vmem:[%s17933_s3 + $0x300] sm:$0xff] }
 0x5be   :  { %v15633_v31 = vand.u32 4294901760, %v10209_v25 }
 0x5bf   :  { %v5449_v4 = vadd.f32 %v5448_v42, %v5352_v44  ;;  %v6818_v42 = vand.u32 4294901760, %v6817_v61  ;;  %v19305_v44 = vld [vmem:[#allocation67_spill] sm:$0xff] }
 0x5c0   :  { %v15617_v10 = vpop.f32.mrf.mxu0  ;;  %6600 = vmatpush.msrb.mxu2 %v15633_v31  ;;  %7051 = vmatpush.msrb.mxu1 %v15633_v31 }
 0x5c1   :  { %19300 = vst [vmem:[#allocation103_spill] sm:$0xff] %v15617_v10  ;;  %v15623_v41 = vadd.f32 %v5449_v4, %v15294_v57  ;;  %6044 = vmatmul.f32.gmra.mxu2 %v19294_v14  ;;  %6175 = vmatmul.f32.gmra.mxu3 %v19303_v50  ;;  %v5219_v57 = vadd.f32 %v19305_v44, %v15157_v29 }
 0x5c2   :  { %v15631_v8 = vpop.f32.mrf.mxu1  ;;  %6819 = vmatpush.msrb.mxu3 %v6818_v42  ;;  %v15639_v14 = vsub.f32 %v10209_v25, %v15633_v31  ;;  %v19308_v42 = vand.u32 4294901760, %v15210_v55  ;;  %v19313_v55 = vand.u32 4294901760, %v15239_v16  ;;  %v6459_v16 = vpop.permute.xlu2 %6458 }
 0x5c3   :  { %19301 = vst [vmem:[#allocation104_spill] sm:$0xff] %v15623_v41  ;;  %6310 = vmatmul.f32.gmra.mxu0 %v15096_v20  ;;  %v19306_v41 = vld [vmem:[#allocation20_spill] sm:$0xff] }
 0x5c4   :  { %19304 = vst [vmem:[#allocation95_spill] sm:$0xff] %v15631_v8  ;;  %v5355_v4 = vpop.f32.mrf.mxu2  ;;  %v5456_v0 = vpop.f32.mrf.mxu3  ;;  %v19307_v61 = vand.u32 4294901760, %v19306_v41  ;;  %v18336_v8 = vand.u32 4294901760, %v15639_v14  ;;  %6938 = vmatpush.msrb.mxu0 %v15639_v14  ;;  %v19311_v41 = vld [vmem:[#allocation21_spill] sm:$0xff] }
 0x5c5   :  { %v5356_v50 = vadd.f32 %v5355_v4, %v5219_v57  ;;  %6407 = vmatmul.f32.gmra.mxu1 %v15096_v20  ;;  %v19312_v57 = vand.u32 4294901760, %v19311_v41 }
 0x5c6   :  { %7152 = vmatpush.msra.mxu2 %v19307_v61  ;;  %v6823_v44 = vsub.f32 %v15639_v14, %v18336_v8  ;;  %v19315_v61 = vld [vmem:[#allocation60_spill] sm:$0xff] }
 0x5c7   :  { %v5453_v29 = vadd.f32 %v5452_v26, %v5356_v50  ;;  %v19314_v50 = vld [vmem:[#allocation28_spill] sm:$0xff] }
 0x5c8   :  { %7156 = vmatpush.msra.mxu2 %v19308_v42  ;;  %v15650_v25 = vpop.f32.mrf.mxu0  ;;  %v6824_v26 = vand.u32 4294901760, %v6823_v44  ;;  %v19316_v42 = vld [vmem:[#allocation55_spill] sm:$0xff]  ;;  %v19319_v44 = vand.u32 4294901760, %v15301_v7 }
 0x5c9   :  { %19309 = vst [vmem:[#allocation30_spill] sm:$0xff] %v15650_v25  ;;  %v15656_v20 = vadd.f32 %v5453_v29, %v15327_v63  ;;  %6049 = vmatmul.f32.gmra.mxu2 %v19302_v43  ;;  %6181 = vmatmul.f32.gmra.mxu3 %v19312_v57  ;;  %v5225_v25 = vadd.f32 %v19316_v42, %v19315_v61  ;;  %v19317_v63 = vand.u32 4294901760, %v15269_v12  ;;  %v19318_v29 = vld [vmem:[#allocation16_spill] sm:$0xff]  ;;  %v19320_v61 = vand.u32 4294901760, %v15334_v1  ;;  %v19326_v1 = vld [vmem:[#allocation53_spill] sm:$0xff] }
 0x5ca   :  { %v15661_v4 = vpop.f32.mrf.mxu1  ;;  %7160 = vmatpush.msra.mxu2 %v19313_v55  ;;  %6825 = vmatpush.msrb.mxu3 %v6824_v26  ;;  %v19324_v26 = vld [vmem:[#allocation40_spill] sm:$0xff] }
 0x5cb   :  { %19310 = vst [vmem:[#allocation107_spill] sm:$0xff] %v15656_v20  ;;  %6314 = vmatmul.f32.gmra.mxu0 %v19314_v50  ;;  %v6536_v7 = vmul.f32 %v6459_v16, %v19324_v26  ;;  %v19334_v26 = vld [vmem:[#allocation39_spill] sm:$0xff] }
 0x5cc   :  { %v5359_v8 = vpop.f32.mrf.mxu2  ;;  %v5460_v10 = vpop.f32.mrf.mxu3  ;;  %7164 = vmatpush.msra.mxu2 %v19317_v63  ;;  %7279 = vmatpush.msra.mxu3 %v19318_v29 }
 0x5cd   :  { %v5360_v43 = vadd.f32 %v5359_v8, %v5225_v25  ;;  %6411 = vmatmul.f32.gmra.mxu1 %v19314_v50  ;;  %v19322_v8 = vld [vmem:[#allocation24_spill] sm:$0xff]  ;;  %v15703_v29 = vand.u32 4294901760, %v6536_v7 }
 0x5ce   :  { %7168 = vmatpush.msra.mxu2 %v19319_v44  ;;  %7281 = vmatpush.msra.mxu3 %v15202_v27  ;;  %v19323_v25 = vand.u32 4294901760, %v19322_v8  ;;  %v19325_v27 = vand.u32 4294901760, %v15367_v58 }
 0x5cf   :  { %v5457_v57 = vadd.f32 %v5456_v0, %v5360_v43  ;;  %v19327_v0 = vld [vmem:[#allocation48_spill] sm:$0xff] }
 0x5d0   :  { %v15675_v55 = vpop.f32.mrf.mxu0  ;;  %7172 = vmatpush.msra.mxu2 %v19320_v61  ;;  %7283 = vmatpush.msra.mxu3 %v15231_v46  ;;  %v19328_v46 = vand.u32 4294901760, %v15400_v51  ;;  %v19331_v51 = vld [vmem:[#allocation71_spill] sm:$0xff] }
 0x5d1   :  { %v15680_v12 = vadd.f32 %v5457_v57, %v15360_v30  ;;  %6054 = vmatmul.f32.gmra.mxu2 %v19311_v41  ;;  %6187 = vmatmul.f32.gmra.mxu3 %v19323_v25  ;;  %v5231_v30 = vadd.f32 %v19327_v0, %v19326_v1  ;;  %v10256_v41 = vld [vmem:[%s17933_s3 + $0x3f8] sm:$0xff]  ;;  %v19329_v57 = vand.u32 4294901760, %v15433_v56  ;;  %v19332_v25 = vand.u32 4294901760, %v19331_v51 }
 0x5d2   :  { %v15686_v50 = vpop.f32.mrf.mxu1  ;;  %7176 = vmatpush.msra.mxu2 %v19325_v27  ;;  %v15697_v43 = vand.u32 4294901760, %v10256_v41  ;;  %7285 = vmatpush.msra.mxu3 %v15260_v37  ;;  %v6464_v37 = vpop.permute.xlu0 %6463  ;;  %v19333_v56 = vand.u32 4294901760, %v15466_v33 }
 0x5d3   :  { %19321 = vst [vmem:[#allocation78_spill] sm:$0xff] %v15680_v12  ;;  %6318 = vmatmul.f32.gmra.mxu0 %v15138_v32  ;;  %v6537_v27 = vmul.f32 %v6464_v37, %v19334_v26 }
 0x5d4   :  { %v5363_v42 = vpop.f32.mrf.mxu2  ;;  %v5464_v63 = vpop.f32.mrf.mxu3  ;;  %7180 = vmatpush.msra.mxu2 %v19328_v46  ;;  %7522 = vmatpush.msra.mxu0 %v15697_v43  ;;  %v15708_v16 = vsub.f32 %v10256_v41, %v15697_v43 }
 0x5d5   :  { %v5364_v58 = vadd.f32 %v5363_v42, %v5231_v30  ;;  %6415 = vmatmul.f32.gmra.mxu1 %v15138_v32  ;;  %7287 = vmatpush.msra.mxu3 %v15290_v19  ;;  %v6602_v19 = vsub.f32 %v6536_v7, %v15703_v29  ;;  %v10255_v7 = vld [vmem:[%s17933_s3 + $0x3f0] sm:$0xff] }
 0x5d6   :  { %7184 = vmatpush.msra.mxu2 %v19329_v57  ;;  %v15735_v41 = vand.u32 4294901760, %v10255_v7 }
 0x5d7   :  { %v5461_v44 = vadd.f32 %v5460_v10, %v5364_v58  ;;  %7289 = vmatpush.msra.mxu3 %v15323_v6  ;;  %v19335_v6 = vld [vmem:[#allocation99_spill] sm:$0xff]  ;;  %v6603_v46 = vand.u32 4294901760, %v6602_v19  ;;  %v15746_v58 = vand.u32 4294901760, %v6537_v27 }
 0x5d8   :  { %v15712_v61 = vpop.f32.mrf.mxu0  ;;  %7188 = vmatpush.msra.mxu2 %v19333_v56  ;;  %7524 = vmatpush.msra.mxu0 %v15735_v41 }
 0x5d9   :  { %v15716_v32 = vadd.f32 %v5461_v44, %v15393_v18  ;;  %6059 = vmatmul.f32.gmra.mxu2 %v19322_v8  ;;  %6193 = vmatmul.f32.gmra.mxu3 %v19332_v25  ;;  %v19336_v18 = vld [vmem:[#allocation46_spill] sm:$0xff]  ;;  %v18340_v8 = vand.u32 4294901760, %v15708_v16  ;;  %v6469_v44 = vpop.permute.xlu1 %6468  ;;  %v19340_v25 = vld [vmem:[#allocation45_spill] sm:$0xff] }
 0x5da   :  { %v15722_v10 = vpop.f32.mrf.mxu1  ;;  %7291 = vmatpush.msra.mxu3 %v15356_v49  ;;  %v5237_v1 = vadd.f32 %v19336_v18, %v19335_v6  ;;  %v19337_v49 = vand.u32 4294901760, %v15495_v39  ;;  %v19338_v39 = vand.u32 4294901760, %v15524_v22  ;;  %v6538_v56 = vmul.f32 %v6469_v44, %v19340_v25  ;;  %v19350_v25 = vld [vmem:[#allocation98_spill] sm:$0xff] }
 0x5db   :  { %19330 = vst [vmem:[#allocation106_spill] sm:$0xff] %v15716_v32  ;;  %6322 = vmatmul.f32.gmra.mxu0 %v15159_v40  ;;  %v7685_v42 = vsub.f32 %v15708_v16, %v18340_v8  ;;  %v6610_v22 = vsub.f32 %v6537_v27, %v15746_v58  ;;  %v19343_v18 = vand.u32 4294901760, %v15553_v23  ;;  %v19344_v27 = vand.u32 4294901760, %v15582_v17 }
 0x5dc   :  { %v5367_v0 = vpop.f32.mrf.mxu2  ;;  %v5468_v30 = vpop.f32.mrf.mxu3  ;;  %7293 = vmatpush.msra.mxu3 %v15389_v2  ;;  %7192 = vmatpush.msra.mxu2 %v19337_v49 }
 0x5dd   :  { %v5368_v33 = vadd.f32 %v5367_v0, %v5237_v1  ;;  %6419 = vmatmul.f32.gmra.mxu1 %v15159_v40  ;;  %v7686_v2 = vand.u32 4294901760, %v7685_v42  ;;  %v6611_v44 = vand.u32 4294901760, %v6610_v22 }
 0x5de   :  { %7295 = vmatpush.msra.mxu3 %v15422_v47  ;;  %7196 = vmatpush.msra.mxu2 %v19338_v39  ;;  %v6604_v47 = vsub.f32 %v6602_v19, %v6603_v46 }
 0x5df   :  { %v5465_v57 = vadd.f32 %v5464_v63, %v5368_v33  ;;  %7687 = vmatpush.msra.mxu1 %v7686_v2  ;;  %v19341_v63 = vld [vmem:[#allocation27_spill] sm:$0xff]  ;;  %v6474_v33 = vpop.permute.xlu2 %6473 }
 0x5e0   :  { %v15750_v37 = vpop.f32.mrf.mxu0  ;;  %7297 = vmatpush.msra.mxu3 %v15455_v21  ;;  %v19342_v21 = vld [vmem:[#allocation41_spill] sm:$0xff]  ;;  %7200 = vmatpush.msra.mxu2 %v19343_v18  ;;  %v6605_v23 = vand.u32 4294901760, %v6604_v47 }
 0x5e1   :  { %v15754_v40 = vadd.f32 %v5465_v57, %v15426_v62  ;;  %6064 = vmatmul.f32.gmra.mxu2 %v19331_v51  ;;  %6827 = vmatmul.f32.vlgmr.msrb.gmra.mxu3 %v15703_v29  ;;  %v5243_v6 = vadd.f32 %v19342_v21, %v19341_v63  ;;  %v15766_v62 = vsub.f32 %v10255_v7, %v15735_v41  ;;  %v10254_v51 = vld [vmem:[%s17933_s3 + $0x3e8] sm:$0xff]  ;;  %v15779_v7 = vand.u32 4294901760, %v6538_v56 }
 0x5e2   :  { %v15759_v26 = vpop.f32.mrf.mxu1  ;;  %7299 = vmatpush.msra.mxu3 %v15488_v35  ;;  %v15773_v49 = vand.u32 4294901760, %v10254_v51  ;;  %7204 = vmatpush.msra.mxu2 %v19344_v27 }
 0x5e3   :  { %19339 = vst [vmem:[#allocation47_spill] sm:$0xff] %v15754_v40  ;;  %6941 = vmatmul.f32.vlgmr.msrb.gmra.mxu0 %v6602_v19  ;;  %v18339_v19 = vand.u32 4294901760, %v15766_v62  ;;  %v6618_v39 = vsub.f32 %v6538_v56, %v15779_v7  ;;  %v10253_v56 = vld [vmem:[%s17933_s3 + $0x3e0] sm:$0xff] }
 0x5e4   :  { %v5371_v1 = vpop.f32.mrf.mxu2  ;;  %v6104_v0 = vpop.f32.mrf.mxu3  ;;  %7301 = vmatpush.msra.mxu3 %v15517_v45  ;;  %19345 = vst [vmem:[#allocation79_spill] sm:$0xff] %v15779_v7  ;;  %7526 = vmatpush.msra.mxu0 %v15773_v49  ;;  %v15805_v21 = vsub.f32 %v10254_v51, %v15773_v49 }
 0x5e5   :  { %v5372_v35 = vadd.f32 %v5371_v1, %v5243_v6  ;;  %7055 = vmatmul.f32.vlgmr.msrb.gmra.mxu1 %v6603_v46  ;;  %v7691_v45 = vsub.f32 %v15766_v62, %v18339_v19  ;;  %v19346_v46 = vand.u32 4294901760, %v15611_v28  ;;  %v19349_v28 = vand.u32 4294901760, %v15639_v14 }
 0x5e6   :  { %7303 = vmatpush.msra.mxu3 %v15546_v15  ;;  %v15810_v1 = vand.u32 4294901760, %v10253_v56  ;;  %v18337_v14 = vand.u32 4294901760, %v15805_v21  ;;  %v6619_v51 = vand.u32 4294901760, %v6618_v39 }
 0x5e7   :  { %v5469_v42 = vadd.f32 %v5468_v30, %v5372_v35  ;;  %7208 = vmatpush.msra.mxu2 %v19346_v46  ;;  %v7692_v15 = vand.u32 4294901760, %v7691_v45  ;;  %v19348_v30 = vld [vmem:[#allocation5_spill] sm:$0xff]  ;;  %v6479_v35 = vpop.permute.xlu0 %6478 }
 0x5e8   :  { %v15788_v57 = vpop.f32.mrf.mxu0  ;;  %7305 = vmatpush.msra.mxu3 %v15575_v5  ;;  %v6539_v2 = vmul.f32 %v6474_v33, %v19348_v30  ;;  %v19351_v5 = vld [vmem:[#allocation75_spill] sm:$0xff]  ;;  %7528 = vmatpush.msra.mxu0 %v15810_v1  ;;  %v6620_v30 = vsub.f32 %v6618_v39, %v6619_v51 }
 0x5e9   :  { %v15792_v17 = vadd.f32 %v5469_v42, %v15459_v38  ;;  %6606 = vmatmul.f32.vlgmr.msrb.gmra.mxu2 %v6605_v23  ;;  %6831 = vmatmul.f32.gmra.mxu3 %v15746_v58  ;;  %v5877_v63 = vadd.f32 %v19351_v5, %v19350_v25  ;;  %v6612_v38 = vsub.f32 %v6610_v22, %v6611_v44  ;;  %v19355_v25 = vld [vmem:[#allocation59_spill] sm:$0xff] }
 0x5ea   :  { %v15797_v47 = vpop.f32.mrf.mxu1  ;;  %7307 = vmatpush.msra.mxu3 %v15604_v24  ;;  %7212 = vmatpush.msra.mxu2 %v19349_v28  ;;  %v19354_v28 = vld [vmem:[#allocation100_spill] sm:$0xff] }
 0x5eb   :  { %19347 = vst [vmem:[#allocation70_spill] sm:$0xff] %v15792_v17  ;;  %6946 = vmatmul.f32.gmra.mxu0 %v6610_v22  ;;  %7693 = vmatpush.msra.mxu1 %v7692_v15  ;;  %v15816_v22 = vand.u32 4294901760, %v6539_v2  ;;  %v6613_v23 = vand.u32 4294901760, %v6612_v38  ;;  %v5881_v5 = vadd.f32 %v19355_v25, %v19354_v28  ;;  %v19358_v25 = vld [vmem:[#allocation7_spill] sm:$0xff] }
 0x5ec   :  { %v5990_v6 = vpop.f32.mrf.mxu2  ;;  %v6110_v18 = vpop.f32.mrf.mxu3  ;;  %7309 = vmatpush.msra.mxu3 %v15633_v31  ;;  %7845 = vmatpush.msrb.mxu2 %v15708_v16  ;;  %v7697_v31 = vsub.f32 %v15805_v21, %v18337_v14 }
 0x5ed   :  { %v5991_v24 = vadd.f32 %v5990_v6, %v5877_v63  ;;  %7061 = vmatmul.f32.gmra.mxu1 %v6611_v44  ;;  %19352 = vst [vmem:[#allocation76_spill] sm:$0xff] %v15816_v22  ;;  %v6626_v45 = vsub.f32 %v6539_v2, %v15816_v22  ;;  %v10252_v2 = vld [vmem:[%s17933_s3 + $0x3d8] sm:$0xff] }
 0x5ee   :  { %7973 = vmatpush.msrb.mxu3 %v15697_v43  ;;  %7848 = vmatpush.msrb.mxu2 %v15766_v62  ;;  %v7698_v44 = vand.u32 4294901760, %v7697_v31  ;;  %v6621_v31 = vand.u32 4294901760, %v6620_v30 }
 0x5ef   :  { %v6105_v27 = vadd.f32 %v6104_v0, %v5991_v24  ;;  %v19353_v0 = vld [vmem:[#allocation42_spill] sm:$0xff]  ;;  %v15845_v24 = vand.u32 4294901760, %v10252_v2 }
 0x5f0   :  { %7975 = vmatpush.msrb.mxu3 %v15735_v41  ;;  %v15824_v33 = vpop.f32.mrf.mxu0  ;;  %7851 = vmatpush.msrb.mxu2 %v15805_v21  ;;  %v6540_v46 = vmul.f32 %v6479_v35, %v19353_v0 }
 0x5f1   :  { %v6264_v42 = vadd.f32 %v15750_v37, %v6105_v27  ;;  %6614 = vmatmul.f32.gmra.mxu2 %v6613_v23  ;;  %6835 = vmatmul.f32.gmra.mxu3 %v15779_v7  ;;  %v15840_v37 = vsub.f32 %v10253_v56, %v15810_v1  ;;  %v6627_v56 = vand.u32 4294901760, %v6626_v45  ;;  %v6484_v27 = vpop.permute.xlu1 %6483 }
 0x5f2   :  { %v15831_v15 = vpop.f32.mrf.mxu1  ;;  %7977 = vmatpush.msrb.mxu3 %v15773_v49  ;;  %7699 = vmatpush.msra.mxu1 %v7698_v44 }
 0x5f3   :  { %v15837_v63 = vadd.f32 %v15759_v26, %v6264_v42  ;;  %6951 = vmatmul.f32.gmra.mxu0 %v6618_v39  ;;  %v18338_v26 = vand.u32 4294901760, %v15840_v37  ;;  %7854 = vmatpush.msrb.mxu2 %v15840_v37  ;;  %v15850_v39 = vand.u32 4294901760, %v6540_v46  ;;  %v6628_v14 = vsub.f32 %v6626_v45, %v6627_v56 }
 0x5f4   :  { %v5995_v38 = vpop.f32.mrf.mxu2  ;;  %v6116_v6 = vpop.f32.mrf.mxu3  ;;  %7979 = vmatpush.msrb.mxu3 %v15810_v1  ;;  %7530 = vmatpush.msra.mxu0 %v15845_v24 }
 0x5f5   :  { %19356 = vst [vmem:[#allocation15_spill] sm:$0xff] %v15837_v63  ;;  %v5996_v35 = vadd.f32 %v5995_v38, %v5881_v5  ;;  %7067 = vmatmul.f32.gmra.mxu1 %v6619_v51  ;;  %v7703_v42 = vsub.f32 %v15840_v37, %v18338_v26  ;;  %v6634_v28 = vsub.f32 %v6540_v46, %v15850_v39  ;;  %v10251_v46 = vld [vmem:[%s17933_s3 + $0x3d0] sm:$0xff]  ;;  %v19382_v63 = vld [vmem:[#allocation96_spill] sm:$0xff] }
 0x5f6   :  { %19357 = vst [vmem:[#allocation87_spill] sm:$0xff] %v15850_v39  ;;  %7981 = vmatpush.msrb.mxu3 %v15845_v24  ;;  %v6541_v5 = vmul.f32 %v6484_v27, %v19358_v25 }
 0x5f7   :  { %v6111_v23 = vadd.f32 %v6110_v18, %v5996_v35  ;;  %v7704_v0 = vand.u32 4294901760, %v7703_v42  ;;  %v5885_v18 = vadd.f32 %v15321_v13, %v15307_v3  ;;  %v6629_v42 = vand.u32 4294901760, %v6628_v14 }
 0x5f8   :  { %v6275_v44 = vpop.f32.mrf.mxu0  ;;  %v15878_v13 = vand.u32 4294901760, %v6541_v5  ;;  %v5889_v14 = vadd.f32 %v15354_v59, %v15340_v9 }
 0x5f9   :  { %v6268_v51 = vadd.f32 %v15788_v57, %v6111_v23  ;;  %6622 = vmatmul.f32.gmra.mxu2 %v6621_v31  ;;  %6839 = vmatmul.f32.gmra.mxu3 %v15816_v22  ;;  %v15869_v57 = vsub.f32 %v10252_v2, %v15845_v24  ;;  %v15874_v23 = vand.u32 4294901760, %v10251_v46 }
 0x5fa   :  { %v15861_v38 = vpop.f32.mrf.mxu1  ;;  %7705 = vmatpush.msra.mxu1 %v7704_v0  ;;  %19360 = vst [vmem:[#allocation85_spill] sm:$0xff] %v15878_v13  ;;  %v6642_v26 = vsub.f32 %v6541_v5, %v15878_v13 }
 0x5fb   :  { %v15866_v30 = vadd.f32 %v15797_v47, %v6268_v51  ;;  %6956 = vmatmul.f32.gmra.mxu0 %v6626_v45  ;;  %v18341_v3 = vand.u32 4294901760, %v15869_v57  ;;  %7857 = vmatpush.msrb.mxu2 %v15869_v57  ;;  %v6635_v47 = vand.u32 4294901760, %v6634_v28  ;;  %v6489_v45 = vpop.permute.xlu2 %6488 }
 0x5fc   :  { %v6000_v35 = vpop.f32.mrf.mxu2  ;;  %v6122_v27 = vpop.f32.mrf.mxu3  ;;  %7532 = vmatpush.msra.mxu0 %v15874_v23  ;;  %7983 = vmatpush.msrb.mxu3 %v15874_v23 }
 0x5fd   :  { %19359 = vst [vmem:[#allocation69_spill] sm:$0xff] %v15866_v30  ;;  %v6001_v31 = vadd.f32 %v6000_v35, %v5885_v18  ;;  %7073 = vmatmul.f32.gmra.mxu1 %v6627_v56  ;;  %v7709_v51 = vsub.f32 %v15869_v57, %v18341_v3  ;;  %v19361_v18 = vld [vmem:[#allocation44_spill] sm:$0xff]  ;;  %v6636_v8 = vsub.f32 %v6634_v28, %v6635_v47  ;;  %v19377_v30 = vld [vmem:[#allocation82_spill] sm:$0xff] }
 0x5fe   :  { %v6542_v35 = vmul.f32 %v6489_v45, %v19361_v18 }
 0x5ff   :  { %v6117_v2 = vadd.f32 %v6116_v6, %v6001_v31  ;;  %v7710_v25 = vand.u32 4294901760, %v7709_v51  ;;  %v10250_v31 = vld [vmem:[%s17933_s3 + $0x3c8] sm:$0xff]  ;;  %v6637_v51 = vand.u32 4294901760, %v6636_v8  ;;  %v5893_v8 = vadd.f32 %v15387_v36, %v15373_v54 }
 0x600   :  { %v6279_v0 = vpop.f32.mrf.mxu0  ;;  %v15906_v59 = vand.u32 4294901760, %v6542_v35 }
 0x601   :  { %v6272_v56 = vadd.f32 %v15824_v33, %v6117_v2  ;;  %6630 = vmatmul.f32.gmra.mxu2 %v6629_v42  ;;  %6843 = vmatmul.f32.gmra.mxu3 %v15850_v39  ;;  %v15897_v33 = vsub.f32 %v10251_v46, %v15874_v23  ;;  %v15902_v2 = vand.u32 4294901760, %v10250_v31 }
 0x602   :  { %v15889_v19 = vpop.f32.mrf.mxu1  ;;  %7711 = vmatpush.msra.mxu1 %v7710_v25  ;;  %19363 = vst [vmem:[#allocation97_spill] sm:$0xff] %v15906_v59 }
 0x603   :  { %v15894_v6 = vadd.f32 %v15831_v15, %v6272_v56  ;;  %6961 = vmatmul.f32.gmra.mxu0 %v6634_v28  ;;  %v18342_v9 = vand.u32 4294901760, %v15897_v33  ;;  %7860 = vmatpush.msrb.mxu2 %v15897_v33  ;;  %v6643_v15 = vand.u32 4294901760, %v6642_v26  ;;  %v6494_v28 = vpop.permute.xlu0 %6493 }
 0x604   :  { %v6005_v45 = vpop.f32.mrf.mxu2  ;;  %v6128_v5 = vpop.f32.mrf.mxu3  ;;  %7534 = vmatpush.msra.mxu0 %v15902_v2  ;;  %7985 = vmatpush.msrb.mxu3 %v15902_v2 }
 0x605   :  { %19362 = vst [vmem:[#allocation23_spill] sm:$0xff] %v15894_v6  ;;  %v6006_v42 = vadd.f32 %v6005_v45, %v5889_v14  ;;  %7079 = vmatmul.f32.gmra.mxu1 %v6635_v47  ;;  %v7715_v56 = vsub.f32 %v15897_v33, %v18342_v9  ;;  %v6650_v14 = vsub.f32 %v6542_v35, %v15906_v59  ;;  %v19364_v45 = vld [vmem:[#allocation6_spill] sm:$0xff]  ;;  %v10249_v35 = vld [vmem:[%s17933_s3 + $0x3c0] sm:$0xff] }
 0x606   :  { %v6543_v3 = vmul.f32 %v6494_v28, %v19364_v45  ;;  %v6644_v40 = vsub.f32 %v6642_v26, %v6643_v15 }
 0x607   :  { %v6123_v46 = vadd.f32 %v6122_v27, %v6006_v42  ;;  %v7716_v18 = vand.u32 4294901760, %v7715_v56 }
 0x608   :  { %v6283_v25 = vpop.f32.mrf.mxu0  ;;  %v15933_v36 = vand.u32 4294901760, %v6543_v3  ;;  %v6645_v56 = vand.u32 4294901760, %v6644_v40  ;;  %v5897_v40 = vadd.f32 %v15420_v34, %v15406_v52 }
 0x609   :  { %v6276_v47 = vadd.f32 %v6275_v44, %v6123_v46  ;;  %6638 = vmatmul.f32.gmra.mxu2 %v6637_v51  ;;  %6847 = vmatmul.f32.gmra.mxu3 %v15878_v13  ;;  %v15924_v44 = vsub.f32 %v10250_v31, %v15902_v2  ;;  %v15929_v46 = vand.u32 4294901760, %v10249_v35 }
 0x60a   :  { %v15916_v17 = vpop.f32.mrf.mxu1  ;;  %7717 = vmatpush.msra.mxu1 %v7716_v18  ;;  %19366 = vst [vmem:[#allocation67_spill] sm:$0xff] %v15933_v36 }
 0x60b   :  { %v15921_v27 = vadd.f32 %v15861_v38, %v6276_v47  ;;  %6966 = vmatmul.f32.gmra.mxu0 %v6642_v26  ;;  %v18343_v54 = vand.u32 4294901760, %v15924_v44  ;;  %7863 = vmatpush.msrb.mxu2 %v15924_v44  ;;  %v6651_v26 = vand.u32 4294901760, %v6650_v14  ;;  %v6499_v38 = vpop.permute.xlu1 %6498 }
 0x60c   :  { %v6010_v42 = vpop.f32.mrf.mxu2  ;;  %v6134_v28 = vpop.f32.mrf.mxu3  ;;  %7536 = vmatpush.msra.mxu0 %v15929_v46  ;;  %7987 = vmatpush.msrb.mxu3 %v15929_v46 }
 0x60d   :  { %19365 = vst [vmem:[#allocation56_spill] sm:$0xff] %v15921_v27  ;;  %v6011_v51 = vadd.f32 %v6010_v42, %v5893_v8  ;;  %7085 = vmatmul.f32.gmra.mxu1 %v6643_v15  ;;  %v7721_v47 = vsub.f32 %v15924_v44, %v18343_v54  ;;  %v6658_v8 = vsub.f32 %v6543_v3, %v15933_v36  ;;  %v19367_v42 = vld [vmem:[#allocation49_spill] sm:$0xff]  ;;  %v10248_v3 = vld [vmem:[%s17933_s3 + $0x3b8] sm:$0xff] }
 0x60e   :  { %v6544_v9 = vmul.f32 %v6499_v38, %v19367_v42  ;;  %v6652_v12 = vsub.f32 %v6650_v14, %v6651_v26 }
 0x60f   :  { %v6129_v31 = vadd.f32 %v6128_v5, %v6011_v51  ;;  %v7722_v45 = vand.u32 4294901760, %v7721_v47 }
 0x610   :  { %v6287_v18 = vpop.f32.mrf.mxu0  ;;  %v15960_v34 = vand.u32 4294901760, %v6544_v9  ;;  %v6653_v47 = vand.u32 4294901760, %v6652_v12  ;;  %v5901_v12 = vadd.f32 %v15453_v60, %v15439_v48 }
 0x611   :  { %v6280_v15 = vadd.f32 %v6279_v0, %v6129_v31  ;;  %6646 = vmatmul.f32.gmra.mxu2 %v6645_v56  ;;  %6851 = vmatmul.f32.gmra.mxu3 %v15906_v59  ;;  %v15951_v0 = vsub.f32 %v10249_v35, %v15929_v46  ;;  %v15956_v31 = vand.u32 4294901760, %v10248_v3 }
 0x612   :  { %v15943_v32 = vpop.f32.mrf.mxu1  ;;  %7723 = vmatpush.msra.mxu1 %v7722_v45  ;;  %19369 = vst [vmem:[#allocation21_spill] sm:$0xff] %v15960_v34  ;;  %v6666_v54 = vsub.f32 %v6544_v9, %v15960_v34 }
 0x613   :  { %v15948_v5 = vadd.f32 %v15889_v19, %v6280_v15  ;;  %6971 = vmatmul.f32.gmra.mxu0 %v6650_v14  ;;  %v18344_v52 = vand.u32 4294901760, %v15951_v0  ;;  %7866 = vmatpush.msrb.mxu2 %v15951_v0  ;;  %v6659_v19 = vand.u32 4294901760, %v6658_v8  ;;  %v6504_v14 = vpop.permute.xlu2 %6503 }
 0x614   :  { %v6015_v51 = vpop.f32.mrf.mxu2  ;;  %v6140_v38 = vpop.f32.mrf.mxu3  ;;  %7538 = vmatpush.msra.mxu0 %v15956_v31  ;;  %7989 = vmatpush.msrb.mxu3 %v15956_v31 }
 0x615   :  { %19368 = vst [vmem:[#allocation20_spill] sm:$0xff] %v15948_v5  ;;  %v6016_v56 = vadd.f32 %v6015_v51, %v5897_v40  ;;  %7091 = vmatmul.f32.gmra.mxu1 %v6651_v26  ;;  %v7727_v15 = vsub.f32 %v15951_v0, %v18344_v52  ;;  %v19370_v40 = vld [vmem:[#allocation9_spill] sm:$0xff]  ;;  %v6660_v5 = vsub.f32 %v6658_v8, %v6659_v19 }
 0x616   :  { %v6545_v51 = vmul.f32 %v6504_v14, %v19370_v40 }
 0x617   :  { %v6135_v35 = vadd.f32 %v6134_v28, %v6016_v56  ;;  %v7728_v42 = vand.u32 4294901760, %v7727_v15  ;;  %v10247_v56 = vld [vmem:[%s17933_s3 + $0x3b0] sm:$0xff]  ;;  %v6661_v15 = vand.u32 4294901760, %v6660_v5  ;;  %v5905_v5 = vadd.f32 %v15486_v11, %v15472_v53 }
 0x618   :  { %v6291_v45 = vpop.f32.mrf.mxu0  ;;  %v15987_v60 = vand.u32 4294901760, %v6545_v51 }
 0x619   :  { %v6284_v26 = vadd.f32 %v6283_v25, %v6135_v35  ;;  %6654 = vmatmul.f32.gmra.mxu2 %v6653_v47  ;;  %6855 = vmatmul.f32.gmra.mxu3 %v15933_v36  ;;  %v15978_v25 = vsub.f32 %v10248_v3, %v15956_v31  ;;  %v15983_v35 = vand.u32 4294901760, %v10247_v56 }
 0x61a   :  { %v15970_v20 = vpop.f32.mrf.mxu1  ;;  %7729 = vmatpush.msra.mxu1 %v7728_v42  ;;  %19372 = vst [vmem:[#allocation60_spill] sm:$0xff] %v15987_v60 }
 0x61b   :  { %v15975_v28 = vadd.f32 %v15916_v17, %v6284_v26  ;;  %6976 = vmatmul.f32.gmra.mxu0 %v6658_v8  ;;  %v18345_v48 = vand.u32 4294901760, %v15978_v25  ;;  %7869 = vmatpush.msrb.mxu2 %v15978_v25  ;;  %v6667_v17 = vand.u32 4294901760, %v6666_v54  ;;  %v6509_v8 = vpop.permute.xlu0 %6508 }
 0x61c   :  { %v6020_v14 = vpop.f32.mrf.mxu2  ;;  %v6146_v9 = vpop.f32.mrf.mxu3  ;;  %7540 = vmatpush.msra.mxu0 %v15983_v35  ;;  %7991 = vmatpush.msrb.mxu3 %v15983_v35 }
 0x61d   :  { %19371 = vst [vmem:[#allocation28_spill] sm:$0xff] %v15975_v28  ;;  %v6021_v47 = vadd.f32 %v6020_v14, %v5901_v12  ;;  %7097 = vmatmul.f32.gmra.mxu1 %v6659_v19  ;;  %v7733_v26 = vsub.f32 %v15978_v25, %v18345_v48  ;;  %v6674_v12 = vsub.f32 %v6545_v51, %v15987_v60  ;;  %v19373_v14 = vld [vmem:[#allocation8_spill] sm:$0xff]  ;;  %v10246_v51 = vld [vmem:[%s17933_s3 + $0x3a8] sm:$0xff] }
 0x61e   :  { %v6546_v52 = vmul.f32 %v6509_v8, %v19373_v14  ;;  %v6668_v27 = vsub.f32 %v6666_v54, %v6667_v17 }
 0x61f   :  { %v6141_v3 = vadd.f32 %v6140_v38, %v6021_v47  ;;  %v7734_v40 = vand.u32 4294901760, %v7733_v26 }
 0x620   :  { %v6295_v42 = vpop.f32.mrf.mxu0  ;;  %v16014_v11 = vand.u32 4294901760, %v6546_v52  ;;  %v6669_v26 = vand.u32 4294901760, %v6668_v27 }
 0x621   :  { %v6288_v19 = vadd.f32 %v6287_v18, %v6141_v3  ;;  %6662 = vmatmul.f32.gmra.mxu2 %v6661_v15  ;;  %6859 = vmatmul.f32.gmra.mxu3 %v15960_v34  ;;  %v16005_v18 = vsub.f32 %v10247_v56, %v15983_v35  ;;  %v16010_v3 = vand.u32 4294901760, %v10246_v51 }
 0x622   :  { %v15997_v28 = vpop.f32.mrf.mxu1  ;;  %7735 = vmatpush.msra.mxu1 %v7734_v40  ;;  %19375 = vst [vmem:[#allocation16_spill] sm:$0xff] %v16014_v11 }
 0x623   :  { %v16002_v38 = vadd.f32 %v15943_v32, %v6288_v19  ;;  %6981 = vmatmul.f32.gmra.mxu0 %v6666_v54  ;;  %v18346_v53 = vand.u32 4294901760, %v16005_v18  ;;  %7872 = vmatpush.msrb.mxu2 %v16005_v18  ;;  %v6675_v32 = vand.u32 4294901760, %v6674_v12  ;;  %v6514_v54 = vpop.permute.xlu1 %6513 }
 0x624   :  { %v6025_v47 = vpop.f32.mrf.mxu2  ;;  %v6152_v8 = vpop.f32.mrf.mxu3  ;;  %7542 = vmatpush.msra.mxu0 %v16010_v3  ;;  %7993 = vmatpush.msrb.mxu3 %v16010_v3 }
 0x625   :  { %19374 = vst [vmem:[#allocation55_spill] sm:$0xff] %v16002_v38  ;;  %v6026_v15 = vadd.f32 %v6025_v47, %v5905_v5  ;;  %7103 = vmatmul.f32.gmra.mxu1 %v6667_v17  ;;  %v7739_v19 = vsub.f32 %v16005_v18, %v18346_v53  ;;  %v6682_v5 = vsub.f32 %v6546_v52, %v16014_v11  ;;  %v19376_v47 = vld [vmem:[#allocation50_spill] sm:$0xff]  ;;  %v10245_v52 = vld [vmem:[%s17933_s3 + $0x3a0] sm:$0xff] }
 0x626   :  { %v6547_v48 = vmul.f32 %v6514_v54, %v19376_v47  ;;  %v6676_v6 = vsub.f32 %v6674_v12, %v6675_v32 }
 0x627   :  { %v6147_v56 = vadd.f32 %v6146_v9, %v6026_v15  ;;  %v7740_v14 = vand.u32 4294901760, %v7739_v19  ;;  %v19378_v9 = vld [vmem:[#allocation34_spill] sm:$0xff] }
 0x628   :  { %v6299_v40 = vpop.f32.mrf.mxu0  ;;  %v5909_v27 = vadd.f32 %v19378_v9, %v19377_v30 }
 0x629   :  { %v6292_v17 = vadd.f32 %v6291_v45, %v6147_v56  ;;  %6670 = vmatmul.f32.gmra.mxu2 %v6669_v26  ;;  %6863 = vmatmul.f32.gmra.mxu3 %v15987_v60  ;;  %v16032_v45 = vsub.f32 %v10246_v51, %v16010_v3  ;;  %v16037_v26 = vand.u32 4294901760, %v10245_v52  ;;  %v6519_v51 = vpop.permute.xlu2 %6518 }
 0x62a   :  { %v16024_v38 = vpop.f32.mrf.mxu1  ;;  %7741 = vmatpush.msra.mxu1 %v7740_v14  ;;  %v6677_v14 = vand.u32 4294901760, %v6676_v6 }
 0x62b   :  { %v16029_v15 = vadd.f32 %v15970_v20, %v6292_v17  ;;  %6986 = vmatmul.f32.gmra.mxu0 %v6674_v12  ;;  %v18351_v30 = vand.u32 4294901760, %v16032_v45  ;;  %7875 = vmatpush.msrb.mxu2 %v16032_v45  ;;  %v16041_v20 = vand.u32 4294901760, %v6547_v48  ;;  %v6683_v12 = vand.u32 4294901760, %v6682_v5 }
 0x62c   :  { %v6030_v56 = vpop.f32.mrf.mxu2  ;;  %v6158_v54 = vpop.f32.mrf.mxu3  ;;  %7544 = vmatpush.msra.mxu0 %v16037_v26  ;;  %7995 = vmatpush.msrb.mxu3 %v16037_v26 }
 0x62d   :  { %19379 = vst [vmem:[#allocation24_spill] sm:$0xff] %v16029_v15  ;;  %v6031_v19 = vadd.f32 %v6030_v56, %v5909_v27  ;;  %7109 = vmatmul.f32.gmra.mxu1 %v6675_v32  ;;  %v7745_v47 = vsub.f32 %v16032_v45, %v18351_v30  ;;  %v19381_v56 = vld [vmem:[#allocation51_spill] sm:$0xff]  ;;  %v6690_v15 = vsub.f32 %v6547_v48, %v16041_v20  ;;  %v19386_v30 = vld [vmem:[#allocation13_spill] sm:$0xff] }
 0x62e   :  { %19380 = vst [vmem:[#allocation40_spill] sm:$0xff] %v16041_v20  ;;  %v6548_v53 = vmul.f32 %v6519_v51, %v19381_v56  ;;  %v6684_v34 = vsub.f32 %v6682_v5, %v6683_v12  ;;  %v10244_v51 = vld [vmem:[%s17933_s3 + $0x398] sm:$0xff] }
 0x62f   :  { %v6153_v17 = vadd.f32 %v6152_v8, %v6031_v19  ;;  %v7746_v27 = vand.u32 4294901760, %v7745_v47  ;;  %v19383_v8 = vld [vmem:[#allocation101_spill] sm:$0xff] }
 0x630   :  { %v6303_v9 = vpop.f32.mrf.mxu0  ;;  %v5913_v6 = vadd.f32 %v19383_v8, %v19382_v63 }
 0x631   :  { %v6296_v32 = vadd.f32 %v6295_v42, %v6153_v17  ;;  %6678 = vmatmul.f32.gmra.mxu2 %v6677_v14  ;;  %6867 = vmatmul.f32.gmra.mxu3 %v16014_v11  ;;  %v16059_v42 = vsub.f32 %v10245_v52, %v16037_v26  ;;  %v16064_v14 = vand.u32 4294901760, %v10244_v51  ;;  %v6524_v52 = vpop.permute.xlu0 %6523 }
 0x632   :  { %v16051_v60 = vpop.f32.mrf.mxu1  ;;  %7747 = vmatpush.msra.mxu1 %v7746_v27  ;;  %v6685_v27 = vand.u32 4294901760, %v6684_v34  ;;  %v19388_v34 = vld [vmem:[#allocation11_spill] sm:$0xff] }
 0x633   :  { %v16056_v19 = vadd.f32 %v15997_v28, %v6296_v32  ;;  %6991 = vmatmul.f32.gmra.mxu0 %v6682_v5  ;;  %v18358_v63 = vand.u32 4294901760, %v16059_v42  ;;  %7878 = vmatpush.msrb.mxu2 %v16059_v42  ;;  %v16068_v28 = vand.u32 4294901760, %v6548_v53  ;;  %v6691_v5 = vand.u32 4294901760, %v6690_v15 }
 0x634   :  { %v6035_v17 = vpop.f32.mrf.mxu2  ;;  %v6164_v48 = vpop.f32.mrf.mxu3  ;;  %7546 = vmatpush.msra.mxu0 %v16064_v14  ;;  %7997 = vmatpush.msrb.mxu3 %v16064_v14 }
 0x635   :  { %19384 = vst [vmem:[#allocation53_spill] sm:$0xff] %v16056_v19  ;;  %v6036_v47 = vadd.f32 %v6035_v17, %v5913_v6  ;;  %7115 = vmatmul.f32.gmra.mxu1 %v6683_v12  ;;  %v7751_v56 = vsub.f32 %v16059_v42, %v18358_v63  ;;  %v6698_v17 = vsub.f32 %v6548_v53, %v16068_v28  ;;  %v10243_v53 = vld [vmem:[%s17933_s3 + $0x390] sm:$0xff] }
 0x636   :  { %19385 = vst [vmem:[#allocation48_spill] sm:$0xff] %v16068_v28  ;;  %v6549_v19 = vmul.f32 %v6524_v52, %v19386_v30  ;;  %v6692_v36 = vsub.f32 %v6690_v15, %v6691_v5  ;;  %v16093_v52 = vand.u32 4294901760, %v10243_v53 }
 0x637   :  { %v6159_v32 = vadd.f32 %v6158_v54, %v6036_v47  ;;  %v7752_v6 = vand.u32 4294901760, %v7751_v56  ;;  %v19387_v54 = vld [vmem:[#allocation19_spill] sm:$0xff] }
 0x638   :  { %v16075_v8 = vpop.f32.mrf.mxu0  ;;  %v5917_v47 = vadd.f32 %v19388_v34, %v19387_v54  ;;  %19390 = vst [vmem:[#allocation39_spill] sm:$0xff] %v16093_v52  ;;  %7548 = vmatpush.msra.mxu0 %v16093_v52  ;;  %7999 = vmatpush.msrb.mxu3 %v16093_v52 }
 0x639   :  { %v6300_v12 = vadd.f32 %v6299_v40, %v6159_v32  ;;  %6686 = vmatmul.f32.gmra.mxu2 %v6685_v27  ;;  %6871 = vmatmul.f32.gmra.mxu3 %v16041_v20  ;;  %v16088_v40 = vsub.f32 %v10244_v51, %v16064_v14 }
 0x63a   :  { %v16080_v11 = vpop.f32.mrf.mxu1  ;;  %7753 = vmatpush.msra.mxu1 %v7752_v6  ;;  %v6693_v6 = vand.u32 4294901760, %v6692_v36  ;;  %v19394_v36 = vld [vmem:[#allocation81_spill] sm:$0xff] }
 0x63b   :  { %v16085_v59 = vadd.f32 %v16024_v38, %v6300_v12  ;;  %6996 = vmatmul.f32.gmra.mxu0 %v6690_v15  ;;  %v18365_v56 = vand.u32 4294901760, %v16088_v40  ;;  %7881 = vmatpush.msrb.mxu2 %v16088_v40  ;;  %v16097_v38 = vand.u32 4294901760, %v6549_v19  ;;  %v6529_v15 = vpop.permute.xlu1 %6528  ;;  %v6699_v12 = vand.u32 4294901760, %v6698_v17 }
 0x63c   :  { %v6040_v32 = vpop.f32.mrf.mxu2  ;;  %v6170_v30 = vpop.f32.mrf.mxu3 }
 0x63d   :  { %19389 = vst [vmem:[#allocation71_spill] sm:$0xff] %v16085_v59  ;;  %v6041_v27 = vadd.f32 %v6040_v32, %v5917_v47  ;;  %7121 = vmatmul.f32.gmra.mxu1 %v6691_v5  ;;  %v7757_v54 = vsub.f32 %v16088_v40, %v18365_v56  ;;  %v19392_v5 = vld [vmem:[#allocation25_spill] sm:$0xff]  ;;  %v6706_v59 = vsub.f32 %v6549_v19, %v16097_v38  ;;  %v6534_v56 = vpop.permute.xlu2 %6533 }
 0x63e   :  { %19391 = vst [vmem:[#allocation99_spill] sm:$0xff] %v16097_v38  ;;  %v6550_v47 = vmul.f32 %v6529_v15, %v19392_v5  ;;  %v6700_v13 = vsub.f32 %v6698_v17, %v6699_v12  ;;  %v16117_v15 = vsub.f32 %v10243_v53, %v16093_v52  ;;  %v10241_v19 = vld [vmem:[%s17933_s3 + $0x380] sm:$0xff] }
 0x63f   :  { %v6165_v51 = vadd.f32 %v6164_v48, %v6041_v27  ;;  %v7758_v63 = vand.u32 4294901760, %v7757_v54  ;;  %v19393_v48 = vld [vmem:[#allocation63_spill] sm:$0xff]  ;;  %v16132_v53 = vand.u32 4294901760, %v10241_v19 }
 0x640   :  { %v16104_v34 = vpop.f32.mrf.mxu0  ;;  %v5921_v27 = vadd.f32 %v19394_v36, %v19393_v48  ;;  %v16127_v5 = vand.u32 4294901760, %v6550_v47  ;;  %7884 = vmatpush.msrb.mxu2 %v16117_v15  ;;  %v6701_v36 = vand.u32 4294901760, %v6700_v13 }
 0x641   :  { %v6304_v32 = vadd.f32 %v6303_v9, %v6165_v51  ;;  %6694 = vmatmul.f32.gmra.mxu2 %v6693_v6  ;;  %6875 = vmatmul.f32.gmra.mxu3 %v16068_v28  ;;  %v10242_v9 = vld [vmem:[%s17933_s3 + $0x388] sm:$0xff] }
 0x642   :  { %v16109_v20 = vpop.f32.mrf.mxu1  ;;  %7759 = vmatpush.msra.mxu1 %v7758_v63  ;;  %v16125_v54 = vand.u32 4294901760, %v10242_v9  ;;  %v18366_v63 = vand.u32 4294901760, %v16117_v15  ;;  %v19397_v28 = vld [vmem:[#allocation38_spill] sm:$0xff] }
 0x643   :  { %v16114_v39 = vadd.f32 %v16051_v60, %v6304_v32  ;;  %7001 = vmatmul.f32.gmra.mxu0 %v6698_v17  ;;  %v6707_v17 = vand.u32 4294901760, %v6706_v59  ;;  %v6551_v22 = vmul.f32 %v6534_v56, %v19397_v28 }
 0x644   :  { %v6045_v51 = vpop.f32.mrf.mxu2  ;;  %v6176_v6 = vpop.f32.mrf.mxu3  ;;  %19396 = vst [vmem:[#allocation45_spill] sm:$0xff] %v16125_v54  ;;  %7550 = vmatpush.msra.mxu0 %v16125_v54  ;;  %v16135_v32 = vsub.f32 %v10242_v9, %v16125_v54  ;;  %8001 = vmatpush.msrb.mxu3 %v16125_v54  ;;  %v6714_v9 = vsub.f32 %v6550_v47, %v16127_v5  ;;  %v19398_v54 = vand.u32 4294901760, %v15708_v16  ;;  %v19400_v47 = vld [vmem:[#allocation95_spill] sm:$0xff]  ;;  %v19402_v16 = vld [vmem:[#allocation74_spill] sm:$0xff] }
 0x645   :  { %19395 = vst [vmem:[#allocation46_spill] sm:$0xff] %v16114_v39  ;;  %v6046_v60 = vadd.f32 %v6045_v51, %v5921_v27  ;;  %7127 = vmatmul.f32.gmra.mxu1 %v6699_v12  ;;  %v7763_v12 = vsub.f32 %v16117_v15, %v18366_v63  ;;  %v6708_v63 = vsub.f32 %v6706_v59, %v6707_v17 }
 0x646   :  { %7552 = vmatpush.msra.mxu0 %v16132_v53  ;;  %v18376_v51 = vand.u32 4294901760, %v16135_v32  ;;  %7887 = vmatpush.msrb.mxu2 %v16135_v32 }
 0x647   :  { %v6171_v48 = vadd.f32 %v6170_v30, %v6046_v60  ;;  %v7764_v13 = vand.u32 4294901760, %v7763_v12  ;;  %v7411_v30 = vpop.permute.xlu0 %7410  ;;  %8003 = vmatpush.msrb.mxu3 %v16132_v53  ;;  %v16164_v12 = vsub.f32 %v10241_v19, %v16132_v53  ;;  %v6709_v19 = vand.u32 4294901760, %v6708_v63 }
 0x648   :  { %v16141_v27 = vpop.f32.mrf.mxu0  ;;  %v7769_v7 = vsub.f32 %v16135_v32, %v18376_v51  ;;  %8104 = vmatpush.msrb.mxu0 %v19398_v54  ;;  %v19401_v51 = vand.u32 4294901760, %v15766_v62  ;;  %v7488_v54 = vmul.f32 %v7411_v30, %v19402_v16  ;;  %v19405_v63 = vand.u32 4294901760, %v15869_v57  ;;  %v19408_v57 = vld [vmem:[#allocation29_spill] sm:$0xff] }
 0x649   :  { %v6308_v39 = vadd.f32 %v16075_v8, %v6171_v48  ;;  %6702 = vmatmul.f32.gmra.mxu2 %v6701_v36  ;;  %6879 = vmatmul.f32.gmra.mxu3 %v16097_v38  ;;  %v19399_v8 = vld [vmem:[#allocation103_spill] sm:$0xff] }
 0x64a   :  { %v16149_v60 = vpop.f32.mrf.mxu1  ;;  %v5925_v48 = vadd.f32 %v19400_v47, %v19399_v8  ;;  %7765 = vmatpush.msra.mxu1 %v7764_v13  ;;  %v7770_v38 = vand.u32 4294901760, %v7769_v7  ;;  %8108 = vmatpush.msrb.mxu0 %v19401_v51  ;;  %v7774_v8 = vand.u32 4294901760, %v16164_v12  ;;  %v6715_v7 = vand.u32 4294901760, %v6714_v9  ;;  %v19406_v47 = vld [vmem:[#allocation30_spill] sm:$0xff] }
 0x64b   :  { %v16161_v36 = vadd.f32 %v16080_v11, %v6308_v39  ;;  %7006 = vmatmul.f32.gmra.mxu0 %v6706_v59  ;;  %7890 = vmatpush.msrb.mxu2 %v16164_v12  ;;  %v16171_v39 = vand.u32 4294901760, %v6551_v22  ;;  %v19403_v59 = vand.u32 4294901760, %v15805_v21  ;;  %v16182_v13 = vand.u32 4294901760, %v7488_v54 }
 0x64c   :  { %v6050_v28 = vpop.f32.mrf.mxu2  ;;  %v6182_v56 = vpop.f32.mrf.mxu3  ;;  %7771 = vmatpush.msra.mxu1 %v7770_v38  ;;  %v7775_v62 = vsub.f32 %v16164_v12, %v7774_v8 }
 0x64d   :  { %v6051_v52 = vadd.f32 %v6050_v28, %v5925_v48  ;;  %7133 = vmatmul.f32.gmra.mxu1 %v6707_v17  ;;  %8112 = vmatpush.msrb.mxu0 %v19403_v59  ;;  %v19404_v17 = vand.u32 4294901760, %v15840_v37  ;;  %v5929_v37 = vadd.f32 %v15661_v4, %v19406_v47  ;;  %v19407_v59 = vand.u32 4294901760, %v15897_v33 }
 0x64e   :  { %v7776_v21 = vand.u32 4294901760, %v7775_v62  ;;  %v19409_v4 = vand.u32 4294901760, %v15924_v44  ;;  %v19415_v47 = vand.u32 4294901760, %v16059_v42  ;;  %v5937_v42 = vadd.f32 %v15722_v10, %v15712_v61 }
 0x64f   :  { %v6177_v11 = vadd.f32 %v6176_v6, %v6051_v52  ;;  %8116 = vmatpush.msrb.mxu0 %v19404_v17  ;;  %v7416_v52 = vpop.permute.xlu1 %7415  ;;  %v6722_v6 = vsub.f32 %v6551_v22, %v16171_v39  ;;  %v16200_v22 = vsub.f32 %v7488_v54, %v16182_v13  ;;  %v19419_v10 = vand.u32 4294901760, %v16135_v32 }
 0x650   :  { %v16178_v51 = vpop.f32.mrf.mxu0  ;;  %7777 = vmatpush.msra.mxu1 %v7776_v21 }
 0x651   :  { %v6312_v30 = vadd.f32 %v16104_v34, %v6177_v11  ;;  %6710 = vmatmul.f32.gmra.mxu2 %v6709_v19  ;;  %6883 = vmatmul.f32.gmra.mxu3 %v16127_v5  ;;  %v6716_v34 = vsub.f32 %v6714_v9, %v6715_v7  ;;  %v7489_v11 = vmul.f32 %v7416_v52, %v19408_v57  ;;  %v6723_v62 = vand.u32 4294901760, %v6722_v6 }
 0x652   :  { %v16186_v38 = vpop.f32.mrf.mxu1  ;;  %8120 = vmatpush.msrb.mxu0 %v19405_v63  ;;  %8231 = vmatpush.msrb.mxu1 %v15697_v43  ;;  %v19410_v43 = vand.u32 4294901760, %v15951_v0  ;;  %v18386_v33 = vand.u32 4294901760, %v16200_v22  ;;  %v19412_v52 = vand.u32 4294901760, %v16005_v18  ;;  %v19413_v63 = vld [vmem:[#allocation65_spill] sm:$0xff] }
 0x653   :  { %v16194_v48 = vadd.f32 %v16109_v20, %v6312_v30  ;;  %7011 = vmatmul.f32.gmra.mxu0 %v6714_v9  ;;  %v6717_v9 = vand.u32 4294901760, %v6716_v34  ;;  %v16210_v54 = vand.u32 4294901760, %v7489_v11  ;;  %v6724_v30 = vsub.f32 %v6722_v6, %v6723_v62 }
 0x654   :  { %v6055_v28 = vpop.f32.mrf.mxu2  ;;  %v6188_v16 = vpop.f32.mrf.mxu3  ;;  %8124 = vmatpush.msrb.mxu0 %v19407_v59  ;;  %8233 = vmatpush.msrb.mxu1 %v15735_v41 }
 0x655   :  { %v6056_v19 = vadd.f32 %v6055_v28, %v5929_v37  ;;  %7139 = vmatmul.f32.gmra.mxu1 %v6715_v7  ;;  %v7421_v41 = vpop.permute.xlu2 %7420 }
 0x656   :  { %8128 = vmatpush.msrb.mxu0 %v19409_v4  ;;  %8235 = vmatpush.msrb.mxu1 %v15773_v49  ;;  %v5933_v49 = vadd.f32 %v15686_v50, %v15675_v55  ;;  %v16230_v55 = vsub.f32 %v7489_v11, %v16210_v54  ;;  %v19417_v11 = vand.u32 4294901760, %v16117_v15 }
 0x657   :  { %v6183_v20 = vadd.f32 %v6182_v56, %v6056_v19  ;;  %v19411_v56 = vand.u32 4294901760, %v15978_v25  ;;  %v7556_v25 = vsub.f32 %v16200_v22, %v18386_v33 }
 0x658   :  { %v6323_v17 = vpop.f32.mrf.mxu0  ;;  %8132 = vmatpush.msrb.mxu0 %v19410_v43  ;;  %8237 = vmatpush.msrb.mxu1 %v15810_v1  ;;  %v7490_v1 = vmul.f32 %v7421_v41, %v19413_v63 }
 0x659   :  { %v6316_v7 = vadd.f32 %v16141_v27, %v6183_v20  ;;  %6718 = vmatmul.f32.gmra.mxu2 %v6717_v9  ;;  %6887 = vmatmul.f32.gmra.mxu3 %v16171_v39  ;;  %v7557_v34 = vand.u32 4294901760, %v7556_v25 }
 0x65a   :  { %v6420_v44 = vpop.f32.mrf.mxu1  ;;  %8136 = vmatpush.msrb.mxu0 %v19411_v56  ;;  %8239 = vmatpush.msrb.mxu1 %v15845_v24  ;;  %v16238_v37 = vand.u32 4294901760, %v7490_v1 }
 0x65b   :  { %v16220_v0 = vadd.f32 %v16149_v60, %v6316_v7  ;;  %7016 = vmatmul.f32.gmra.mxu0 %v6722_v6  ;;  %v19414_v60 = vand.u32 4294901760, %v16032_v45  ;;  %v6725_v6 = vand.u32 4294901760, %v6724_v30  ;;  %v7426_v45 = vpop.permute.xlu0 %7425  ;;  %v19423_v30 = vld [vmem:[#allocation79_spill] sm:$0xff] }
 0x65c   :  { %v6060_v21 = vpop.f32.mrf.mxu2  ;;  %v6194_v27 = vpop.f32.mrf.mxu3  ;;  %8140 = vmatpush.msrb.mxu0 %v19412_v52  ;;  %8241 = vmatpush.msrb.mxu1 %v15874_v23  ;;  %v18385_v23 = vand.u32 4294901760, %v16230_v55  ;;  %v16257_v19 = vsub.f32 %v7490_v1, %v16238_v37 }
 0x65d   :  { %v6061_v50 = vadd.f32 %v6060_v21, %v5933_v49  ;;  %7145 = vmatmul.f32.gmra.mxu1 %v6723_v62  ;;  %v7431_v62 = vpop.permute.xlu1 %7430  ;;  %v19422_v49 = vld [vmem:[#allocation45_spill] sm:$0xff]  ;;  %v7436_v52 = vpop.permute.xlu2 %7435 }
 0x65e   :  { %8144 = vmatpush.msrb.mxu0 %v19414_v60  ;;  %8243 = vmatpush.msrb.mxu1 %v15902_v2  ;;  %v19416_v2 = vand.u32 4294901760, %v16088_v40  ;;  %v7564_v61 = vsub.f32 %v16230_v55, %v18385_v23 }
 0x65f   :  { %v6189_v24 = vadd.f32 %v6188_v16, %v6061_v50  ;;  %v19424_v50 = vld [vmem:[#allocation26_spill] sm:$0xff] }
 0x660   :  { %v6942_v18 = vpop.f32.mrf.mxu0  ;;  %8148 = vmatpush.msrb.mxu0 %v19415_v47  ;;  %8245 = vmatpush.msrb.mxu1 %v15929_v46  ;;  %v19418_v46 = vld [vmem:[#allocation58_spill] sm:$0xff]  ;;  %v7565_v9 = vand.u32 4294901760, %v7564_v61  ;;  %v7493_v60 = vmul.f32 %v7436_v52, %v19424_v50 }
 0x661   :  { %v6320_v28 = vadd.f32 %v16178_v51, %v6189_v24  ;;  %6726 = vmatmul.f32.gmra.mxu2 %v6725_v6  ;;  %7311 = vmatmul.f32.vlgmr.msra.gmra.mxu3 %v15703_v29  ;;  %v7491_v40 = vmul.f32 %v7426_v45, %v19418_v46  ;;  %v19426_v46 = vld [vmem:[#allocation17_spill] sm:$0xff] }
 0x662   :  { %v16243_v59 = vpop.f32.mrf.mxu1  ;;  %8152 = vmatpush.msrb.mxu0 %v19416_v2  ;;  %8247 = vmatpush.msrb.mxu1 %v15956_v31 }
 0x663   :  { %v16251_v16 = vadd.f32 %v16186_v38, %v6320_v28  ;;  %7558 = vmatmul.f32.vlgmr.msra.gmra.mxu0 %v7557_v34  ;;  %v16270_v38 = vand.u32 4294901760, %v7491_v40  ;;  %v16311_v34 = vand.u32 4294901760, %v7493_v60  ;;  %v7441_v2 = vpop.permute.xlu0 %7440 }
 0x664   :  { %v6065_v51 = vpop.f32.mrf.mxu2  ;;  %v6828_v57 = vpop.f32.mrf.mxu3  ;;  %8156 = vmatpush.msrb.mxu0 %v19417_v11  ;;  %8249 = vmatpush.msrb.mxu1 %v15983_v35  ;;  %v18384_v35 = vand.u32 4294901760, %v16257_v19 }
 0x665   :  { %v6066_v4 = vadd.f32 %v6065_v51, %v5937_v42  ;;  %7779 = vmatmul.f32.vlgmr.msra.gmra.mxu1 %v16182_v13  ;;  %v16319_v11 = vsub.f32 %v7493_v60, %v16311_v34  ;;  %v7451_v60 = vpop.permute.xlu2 %7450 }
 0x666   :  { %8160 = vmatpush.msrb.mxu0 %v19419_v10  ;;  %8251 = vmatpush.msrb.mxu1 %v16010_v3  ;;  %v7572_v41 = vsub.f32 %v16257_v19, %v18384_v35 }
 0x667   :  { %v6195_v31 = vadd.f32 %v6194_v27, %v6066_v4 }
 0x668   :  { %v6947_v15 = vpop.f32.mrf.mxu0  ;;  %8164 = vmatpush.msrb.mxu0 %v7774_v8  ;;  %8253 = vmatpush.msrb.mxu1 %v16037_v26  ;;  %v16282_v8 = vsub.f32 %v7491_v40, %v16270_v38  ;;  %v19421_v26 = vld [vmem:[#allocation39_spill] sm:$0xff]  ;;  %v7573_v21 = vand.u32 4294901760, %v7572_v41  ;;  %v7494_v40 = vmul.f32 %v7441_v2, %v19426_v46  ;;  %v19428_v41 = vld [vmem:[#allocation33_spill] sm:$0xff] }
 0x669   :  { %v6324_v20 = vadd.f32 %v6323_v17, %v6195_v31  ;;  %7214 = vmatmul.f32.vlgmr.msra.gmra.mxu2 %v15703_v29  ;;  %7315 = vmatmul.f32.gmra.mxu3 %v15746_v58  ;;  %v19420_v29 = vld [vmem:[#allocation14_spill] sm:$0xff] }
 0x66a   :  { %v16275_v32 = vpop.f32.mrf.mxu1  ;;  %8255 = vmatpush.msrb.mxu1 %v16064_v14  ;;  %v7492_v17 = vmul.f32 %v7431_v62, %v19420_v29  ;;  %v18382_v27 = vand.u32 4294901760, %v16282_v8  ;;  %v18380_v62 = vand.u32 4294901760, %v16319_v11 }
 0x66b   :  { %v16278_v43 = vadd.f32 %v6420_v44, %v6324_v20  ;;  %7566 = vmatmul.f32.gmra.mxu0 %v7565_v9  ;;  %v19427_v20 = vld [vmem:[#allocation87_spill] sm:$0xff] }
 0x66c   :  { %v6607_v3 = vpop.f32.mrf.mxu2  ;;  %v6832_v12 = vpop.f32.mrf.mxu3  ;;  %8257 = vmatpush.msrb.mxu1 %v19421_v26  ;;  %v16293_v14 = vand.u32 4294901760, %v7492_v17 }
 0x66d   :  { %v6829_v7 = vadd.f32 %v6828_v57, %v6607_v3  ;;  %7783 = vmatmul.f32.gmra.mxu1 %v16210_v54  ;;  %v7446_v3 = vpop.permute.xlu1 %7445 }
 0x66e   :  { %8259 = vmatpush.msrb.mxu1 %v19422_v49  ;;  %v16303_v24 = vsub.f32 %v7492_v17, %v16293_v14  ;;  %v7495_v26 = vmul.f32 %v7446_v3, %v19428_v41  ;;  %v7596_v49 = vsub.f32 %v16319_v11, %v18380_v62  ;;  %v7456_v3 = vpop.permute.xlu0 %7455 }
 0x66f   :  { %v16290_v44 = vadd.f32 %v6942_v18, %v6829_v7 }
 0x670   :  { %v6952_v56 = vpop.f32.mrf.mxu0  ;;  %8261 = vmatpush.msrb.mxu1 %v16132_v53  ;;  %v19425_v53 = vld [vmem:[#allocation76_spill] sm:$0xff]  ;;  %v18381_v45 = vand.u32 4294901760, %v16303_v24  ;;  %v16345_v52 = vand.u32 4294901760, %v7495_v26 }
 0x671   :  { %7218 = vmatmul.f32.gmra.mxu2 %v15746_v58  ;;  %7319 = vmatmul.f32.gmra.mxu3 %v19423_v30  ;;  %v7580_v58 = vsub.f32 %v16282_v8, %v18382_v27 }
 0x672   :  { %v16298_v63 = vpop.f32.mrf.mxu1  ;;  %v7588_v61 = vsub.f32 %v16303_v24, %v18381_v45 }
 0x673   :  { %7574 = vmatmul.f32.gmra.mxu0 %v7573_v21  ;;  %v7581_v28 = vand.u32 4294901760, %v7580_v58 }
 0x674   :  { %v6615_v1 = vpop.f32.mrf.mxu2  ;;  %v6836_v25 = vpop.f32.mrf.mxu3  ;;  %v7589_v9 = vand.u32 4294901760, %v7588_v61  ;;  %v19432_v61 = vld [vmem:[#allocation97_spill] sm:$0xff] }
 0x675   :  { %v6833_v6 = vadd.f32 %v6832_v12, %v6615_v1  ;;  %7787 = vmatmul.f32.gmra.mxu1 %v16238_v37  ;;  %v19429_v1 = vld [vmem:[#allocation85_spill] sm:$0xff] }
 0x677   :  { %v16309_v18 = vadd.f32 %v6947_v15, %v6833_v6  ;;  %v16328_v15 = vand.u32 4294901760, %v7494_v40 }
 0x678   :  { %v6957_v47 = vpop.f32.mrf.mxu0 }
 0x679   :  { %7222 = vmatmul.f32.gmra.mxu2 %v19423_v30  ;;  %7323 = vmatmul.f32.gmra.mxu3 %v19425_v53  ;;  %v16336_v7 = vsub.f32 %v7494_v40, %v16328_v15 }
 0x67a   :  { %v16316_v42 = vpop.f32.mrf.mxu1 }
 0x67b   :  { %7582 = vmatmul.f32.gmra.mxu0 %v7581_v28  ;;  %v18379_v50 = vand.u32 4294901760, %v16336_v7  ;;  %v19430_v28 = vld [vmem:[#allocation18_spill] sm:$0xff] }
 0x67c   :  { %v6623_v51 = vpop.f32.mrf.mxu2  ;;  %v6840_v57 = vpop.f32.mrf.mxu3  ;;  %v7496_v2 = vmul.f32 %v7451_v60, %v19430_v28  ;;  %v19437_v28 = vld [vmem:[#allocation67_spill] sm:$0xff] }
 0x67d   :  { %v6837_v4 = vadd.f32 %v6836_v25, %v6623_v51  ;;  %7791 = vmatmul.f32.gmra.mxu1 %v16270_v38  ;;  %v7597_v25 = vand.u32 4294901760, %v7596_v49 }
 0x67f   :  { %v16326_v10 = vadd.f32 %v6952_v56, %v6837_v4  ;;  %v16362_v4 = vand.u32 4294901760, %v7496_v2 }
 0x680   :  { %v6962_v31 = vpop.f32.mrf.mxu0 }
 0x681   :  { %7226 = vmatmul.f32.gmra.mxu2 %v19425_v53  ;;  %7327 = vmatmul.f32.gmra.mxu3 %v19427_v20  ;;  %19431 = vst [vmem:[#allocation27_spill] sm:$0xff] %v16362_v4 }
 0x682   :  { %v16333_v12 = vpop.f32.mrf.mxu1 }
 0x683   :  { %7590 = vmatmul.f32.gmra.mxu0 %v7589_v9 }
 0x684   :  { %v6631_v29 = vpop.f32.mrf.mxu2  ;;  %v6844_v17 = vpop.f32.mrf.mxu3 }
 0x685   :  { %v6841_v56 = vadd.f32 %v6840_v57, %v6631_v29  ;;  %7795 = vmatmul.f32.gmra.mxu1 %v16293_v14  ;;  %v7604_v57 = vsub.f32 %v16336_v7, %v18379_v50 }
 0x687   :  { %v16343_v30 = vadd.f32 %v6957_v47, %v6841_v56  ;;  %v16354_v47 = vsub.f32 %v7495_v26, %v16345_v52  ;;  %v16370_v26 = vsub.f32 %v7496_v2, %v16362_v4 }
 0x688   :  { %v6967_v21 = vpop.f32.mrf.mxu0 }
 0x689   :  { %7230 = vmatmul.f32.gmra.mxu2 %v19427_v20  ;;  %7331 = vmatmul.f32.gmra.mxu3 %v19429_v1  ;;  %v7605_v20 = vand.u32 4294901760, %v7604_v57  ;;  %v18378_v9 = vand.u32 4294901760, %v16354_v47  ;;  %19434 = vst [vmem:[#allocation5_spill] sm:$0xff] %v16370_v26  ;;  %v7461_v57 = vpop.permute.xlu1 %7460 }
 0x68a   :  { %v16350_v6 = vpop.f32.mrf.mxu1 }
 0x68b   :  { %7598 = vmatmul.f32.gmra.mxu0 %v7597_v25 }
 0x68c   :  { %v6639_v58 = vpop.f32.mrf.mxu2  ;;  %v6848_v53 = vpop.f32.mrf.mxu3 }
 0x68d   :  { %v6845_v51 = vadd.f32 %v6844_v17, %v6639_v58  ;;  %7799 = vmatmul.f32.gmra.mxu1 %v16311_v34 }
 0x68f   :  { %v16360_v46 = vadd.f32 %v6962_v31, %v6845_v51  ;;  %v19435_v31 = vld [vmem:[#allocation32_spill] sm:$0xff]  ;;  %v18383_v51 = vand.u32 4294901760, %v16370_v26 }
 0x690   :  { %v6972_v40 = vpop.f32.mrf.mxu0  ;;  %v7497_v56 = vmul.f32 %v7456_v3, %v19435_v31  ;;  %v19440_v3 = vld [vmem:[#allocation15_spill] sm:$0xff] }
 0x691   :  { %7234 = vmatmul.f32.gmra.mxu2 %v19429_v1  ;;  %7335 = vmatmul.f32.gmra.mxu3 %v19432_v61  ;;  %v7612_v1 = vsub.f32 %v16354_v47, %v18378_v9  ;;  %v19442_v9 = vld [vmem:[#allocation37_spill] sm:$0xff] }
 0x692   :  { %v16367_v29 = vpop.f32.mrf.mxu1  ;;  %v16379_v58 = vand.u32 4294901760, %v7497_v56 }
 0x693   :  { %19433 = vst [vmem:[#allocation41_spill] sm:$0xff] %v16367_v29  ;;  %7606 = vmatmul.f32.gmra.mxu0 %v7605_v20  ;;  %v7613_v2 = vand.u32 4294901760, %v7612_v1  ;;  %v19439_v20 = vld [vmem:[#allocation92_spill] sm:$0xff]  ;;  %v7620_v1 = vsub.f32 %v16370_v26, %v18383_v51  ;;  %v19449_v51 = vld [vmem:[#allocation22_spill] sm:$0xff] }
 0x694   :  { %v6647_v17 = vpop.f32.mrf.mxu2  ;;  %v6852_v41 = vpop.f32.mrf.mxu3  ;;  %19436 = vst [vmem:[#allocation98_spill] sm:$0xff] %v16379_v58 }
 0x695   :  { %v6849_v49 = vadd.f32 %v6848_v53, %v6647_v17  ;;  %7803 = vmatmul.f32.gmra.mxu1 %v16328_v15  ;;  %v16388_v17 = vadd.f32 %v19440_v3, %v19439_v20 }
 0x697   :  { %v16377_v25 = vadd.f32 %v6967_v21, %v6849_v49  ;;  %v16391_v49 = vsub.f32 %v7497_v56, %v16379_v58  ;;  %v7621_v56 = vand.u32 4294901760, %v7620_v1 }
 0x698   :  { %v6977_v60 = vpop.f32.mrf.mxu0 }
 0x699   :  { %7238 = vmatmul.f32.gmra.mxu2 %v19432_v61  ;;  %7339 = vmatmul.f32.gmra.mxu3 %v19437_v28  ;;  %19441 = vst [vmem:[#allocation42_spill] sm:$0xff] %v16391_v49  ;;  %v7498_v61 = vmul.f32 %v7461_v57, %v19442_v9  ;;  %v18387_v3 = vand.u32 4294901760, %v16391_v49  ;;  %v7466_v9 = vpop.permute.xlu2 %7465  ;;  %v19447_v57 = vld [vmem:[#allocation105_spill] sm:$0xff] }
 0x69a   :  { %v16384_v53 = vpop.f32.mrf.mxu1  ;;  %v7499_v35 = vmul.f32 %v7466_v9, %v19449_v51  ;;  %v7471_v9 = vpop.permute.xlu0 %7470 }
 0x69b   :  { %19438 = vst [vmem:[#allocation75_spill] sm:$0xff] %v16384_v53  ;;  %7614 = vmatmul.f32.gmra.mxu0 %v7613_v2  ;;  %v16400_v20 = vand.u32 4294901760, %v7498_v61  ;;  %v19445_v2 = vld [vmem:[#allocation21_spill] sm:$0xff]  ;;  %v7628_v1 = vsub.f32 %v16391_v49, %v18387_v3  ;;  %v19458_v49 = vld [vmem:[#allocation36_spill] sm:$0xff] }
 0x69c   :  { %v6655_v21 = vpop.f32.mrf.mxu2  ;;  %v6856_v31 = vpop.f32.mrf.mxu3 }
 0x69d   :  { %v6853_v50 = vadd.f32 %v6852_v41, %v6655_v21  ;;  %7807 = vmatmul.f32.gmra.mxu1 %v16345_v52  ;;  %19444 = vst [vmem:[#allocation59_spill] sm:$0xff] %v16400_v20  ;;  %v19448_v21 = vld [vmem:[#allocation69_spill] sm:$0xff]  ;;  %v16413_v23 = vsub.f32 %v7498_v61, %v16400_v20  ;;  %v7629_v51 = vand.u32 4294901760, %v7628_v1 }
 0x69e   :  { %v16409_v27 = vadd.f32 %v19448_v21, %v19447_v57  ;;  %v16421_v57 = vand.u32 4294901760, %v7499_v35  ;;  %v19455_v21 = vld [vmem:[#allocation68_spill] sm:$0xff] }
 0x69f   :  { %v16398_v62 = vadd.f32 %v6972_v40, %v6853_v50  ;;  %19450 = vst [vmem:[#allocation44_spill] sm:$0xff] %v16413_v23  ;;  %v18394_v61 = vand.u32 4294901760, %v16413_v23 }
 0x6a0   :  { %v6982_v45 = vpop.f32.mrf.mxu0  ;;  %19452 = vst [vmem:[#allocation49_spill] sm:$0xff] %v16421_v57  ;;  %v16433_v3 = vsub.f32 %v7499_v35, %v16421_v57 }
 0x6a1   :  { %19443 = vst [vmem:[#allocation100_spill] sm:$0xff] %v16398_v62  ;;  %7242 = vmatmul.f32.gmra.mxu2 %v19437_v28  ;;  %7343 = vmatmul.f32.gmra.mxu3 %v19445_v2  ;;  %v7636_v1 = vsub.f32 %v16413_v23, %v18394_v61  ;;  %v19465_v23 = vld [vmem:[#allocation35_spill] sm:$0xff] }
 0x6a2   :  { %v16405_v41 = vpop.f32.mrf.mxu1  ;;  %19457 = vst [vmem:[#allocation8_spill] sm:$0xff] %v16433_v3 }
 0x6a3   :  { %19446 = vst [vmem:[#allocation7_spill] sm:$0xff] %v16405_v41  ;;  %7622 = vmatmul.f32.gmra.mxu0 %v7621_v56  ;;  %v19453_v56 = vld [vmem:[#allocation60_spill] sm:$0xff]  ;;  %v7637_v35 = vand.u32 4294901760, %v7636_v1 }
 0x6a4   :  { %v6663_v50 = vpop.f32.mrf.mxu2  ;;  %v6860_v40 = vpop.f32.mrf.mxu3 }
 0x6a5   :  { %v6857_v28 = vadd.f32 %v6856_v31, %v6663_v50  ;;  %7811 = vmatmul.f32.gmra.mxu1 %v16362_v4  ;;  %v19456_v50 = vld [vmem:[#allocation23_spill] sm:$0xff] }
 0x6a6   :  { %v16430_v53 = vadd.f32 %v19456_v50, %v19455_v21  ;;  %v18401_v50 = vand.u32 4294901760, %v16433_v3 }
 0x6a7   :  { %v16419_v33 = vadd.f32 %v6977_v60, %v6857_v28 }
 0x6a8   :  { %v6987_v41 = vpop.f32.mrf.mxu0  ;;  %v7644_v1 = vsub.f32 %v16433_v3, %v18401_v50  ;;  %v19472_v50 = vld [vmem:[#allocation73_spill] sm:$0xff] }
 0x6a9   :  { %19451 = vst [vmem:[#allocation6_spill] sm:$0xff] %v16419_v33  ;;  %7246 = vmatmul.f32.gmra.mxu2 %v19445_v2  ;;  %7347 = vmatmul.f32.gmra.mxu3 %v19453_v56  ;;  %v7500_v2 = vmul.f32 %v7471_v9, %v19458_v49  ;;  %v7476_v49 = vpop.permute.xlu1 %7475  ;;  %v19462_v9 = vld [vmem:[#allocation90_spill] sm:$0xff] }
 0x6aa   :  { %v16426_v31 = vpop.f32.mrf.mxu1 }
 0x6ab   :  { %19454 = vst [vmem:[#allocation9_spill] sm:$0xff] %v16426_v31  ;;  %7630 = vmatmul.f32.gmra.mxu0 %v7629_v51  ;;  %v16442_v21 = vand.u32 4294901760, %v7500_v2  ;;  %v19460_v51 = vld [vmem:[#allocation16_spill] sm:$0xff] }
 0x6ac   :  { %v6671_v60 = vpop.f32.mrf.mxu2  ;;  %v6864_v28 = vpop.f32.mrf.mxu3 }
 0x6ad   :  { %v6861_v33 = vadd.f32 %v6860_v40, %v6671_v60  ;;  %7815 = vmatmul.f32.gmra.mxu1 %v16379_v58  ;;  %v19463_v60 = vld [vmem:[#allocation56_spill] sm:$0xff]  ;;  %v16454_v61 = vsub.f32 %v7500_v2, %v16442_v21  ;;  %v7645_v2 = vand.u32 4294901760, %v7644_v1 }
 0x6ae   :  { %v16451_v58 = vadd.f32 %v19463_v60, %v19462_v9 }
 0x6af   :  { %v16440_v31 = vadd.f32 %v6982_v45, %v6861_v33  ;;  %19464 = vst [vmem:[#allocation34_spill] sm:$0xff] %v16454_v61  ;;  %v18406_v60 = vand.u32 4294901760, %v16454_v61 }
 0x6b0   :  { %v6992_v4 = vpop.f32.mrf.mxu0 }
 0x6b1   :  { %19459 = vst [vmem:[#allocation50_spill] sm:$0xff] %v16440_v31  ;;  %7250 = vmatmul.f32.gmra.mxu2 %v19453_v56  ;;  %7351 = vmatmul.f32.gmra.mxu3 %v19460_v51  ;;  %v7501_v56 = vmul.f32 %v7476_v49, %v19465_v23  ;;  %v7481_v23 = vpop.permute.xlu2 %7480  ;;  %v19470_v49 = vld [vmem:[#allocation84_spill] sm:$0xff]  ;;  %v7652_v1 = vsub.f32 %v16454_v61, %v18406_v60 }
 0x6b2   :  { %v16447_v40 = vpop.f32.mrf.mxu1  ;;  %v7502_v3 = vmul.f32 %v7481_v23, %v19472_v50  ;;  %v7486_v23 = vpop.permute.xlu0 %7485  ;;  %v19480_v61 = vld [vmem:[#allocation72_spill] sm:$0xff] }
 0x6b3   :  { %19461 = vst [vmem:[#allocation82_spill] sm:$0xff] %v16447_v40  ;;  %7638 = vmatmul.f32.gmra.mxu0 %v7637_v35  ;;  %v16463_v9 = vand.u32 4294901760, %v7501_v56  ;;  %v19468_v35 = vld [vmem:[#allocation40_spill] sm:$0xff]  ;;  %v7653_v50 = vand.u32 4294901760, %v7652_v1 }
 0x6b4   :  { %v6679_v33 = vpop.f32.mrf.mxu2  ;;  %v6868_v45 = vpop.f32.mrf.mxu3 }
 0x6b5   :  { %v6865_v31 = vadd.f32 %v6864_v28, %v6679_v33  ;;  %7819 = vmatmul.f32.gmra.mxu1 %v16400_v20  ;;  %19467 = vst [vmem:[#allocation96_spill] sm:$0xff] %v16463_v9  ;;  %v19471_v33 = vld [vmem:[#allocation20_spill] sm:$0xff] }
 0x6b6   :  { %v16472_v20 = vadd.f32 %v19471_v33, %v19470_v49  ;;  %v16484_v49 = vand.u32 4294901760, %v7502_v3  ;;  %v19477_v33 = vld [vmem:[#allocation94_spill] sm:$0xff] }
 0x6b7   :  { %v16461_v40 = vadd.f32 %v6987_v41, %v6865_v31 }
 0x6b8   :  { %v6997_v26 = vpop.f32.mrf.mxu0  ;;  %v16496_v60 = vsub.f32 %v7502_v3, %v16484_v49 }
 0x6b9   :  { %19466 = vst [vmem:[#allocation51_spill] sm:$0xff] %v16461_v40  ;;  %7254 = vmatmul.f32.gmra.mxu2 %v19460_v51  ;;  %7355 = vmatmul.f32.gmra.mxu3 %v19468_v35  ;;  %v16476_v40 = vsub.f32 %v7501_v56, %v16463_v9 }
 0x6ba   :  { %v16468_v28 = vpop.f32.mrf.mxu1  ;;  %19479 = vst [vmem:[#allocation25_spill] sm:$0xff] %v16496_v60 }
 0x6bb   :  { %19469 = vst [vmem:[#allocation101_spill] sm:$0xff] %v16468_v28  ;;  %7646 = vmatmul.f32.gmra.mxu0 %v7645_v2  ;;  %v19475_v2 = vld [vmem:[#allocation48_spill] sm:$0xff]  ;;  %v18409_v56 = vand.u32 4294901760, %v16476_v40 }
 0x6bc   :  { %v6687_v41 = vpop.f32.mrf.mxu2  ;;  %v6872_v31 = vpop.f32.mrf.mxu3  ;;  %19473 = vst [vmem:[#allocation13_spill] sm:$0xff] %v16476_v40 }
 0x6bd   :  { %v6869_v51 = vadd.f32 %v6868_v45, %v6687_v41  ;;  %7823 = vmatmul.f32.gmra.mxu1 %v16421_v57  ;;  %v19478_v41 = vld [vmem:[#allocation28_spill] sm:$0xff]  ;;  %v7660_v1 = vsub.f32 %v16476_v40, %v18409_v56  ;;  %v19488_v40 = vand.u32 4294901760, %v16496_v60 }
 0x6be   :  { %v16493_v57 = vadd.f32 %v19478_v41, %v19477_v33 }
 0x6bf   :  { %v16482_v28 = vadd.f32 %v6992_v4, %v6869_v51  ;;  %v7661_v3 = vand.u32 4294901760, %v7660_v1 }
 0x6c0   :  { %v7002_v29 = vpop.f32.mrf.mxu0 }
 0x6c1   :  { %19474 = vst [vmem:[#allocation19_spill] sm:$0xff] %v16482_v28  ;;  %7258 = vmatmul.f32.gmra.mxu2 %v19468_v35  ;;  %7359 = vmatmul.f32.gmra.mxu3 %v19475_v2  ;;  %v7503_v35 = vmul.f32 %v7486_v23, %v19480_v61  ;;  %v10288_v61 = vld [vmem:[%s17933_s3 + $0x478] sm:$0xff] }
 0x6c2   :  { %v16489_v45 = vpop.f32.mrf.mxu1  ;;  %v16515_v23 = vand.u32 4294901760, %v10288_v61 }
 0x6c3   :  { %19476 = vst [vmem:[#allocation11_spill] sm:$0xff] %v16489_v45  ;;  %7654 = vmatmul.f32.gmra.mxu0 %v7653_v50  ;;  %v16505_v33 = vand.u32 4294901760, %v7503_v35  ;;  %v19481_v50 = vld [vmem:[#allocation99_spill] sm:$0xff] }
 0x6c4   :  { %v6695_v4 = vpop.f32.mrf.mxu2  ;;  %v6876_v51 = vpop.f32.mrf.mxu3  ;;  %19483 = vst [vmem:[#allocation81_spill] sm:$0xff] %v16515_v23  ;;  %8474 = vmatpush.msra.mxu2 %v16515_v23  ;;  %v16523_v1 = vsub.f32 %v10288_v61, %v16515_v23  ;;  %8925 = vmatpush.msra.mxu1 %v16515_v23 }
 0x6c5   :  { %v6873_v28 = vadd.f32 %v6872_v31, %v6695_v4  ;;  %7827 = vmatmul.f32.gmra.mxu1 %v16442_v21  ;;  %v16527_v41 = vsub.f32 %v7503_v35, %v16505_v33 }
 0x6c6   :  { %19486 = vst [vmem:[#allocation38_spill] sm:$0xff] %v16523_v1  ;;  %8797 = vmatpush.msra.mxu0 %v16523_v1 }
 0x6c7   :  { %v16503_v45 = vadd.f32 %v6997_v26, %v6873_v28  ;;  %v19484_v26 = vld [vmem:[#allocation102_spill] sm:$0xff]  ;;  %v19485_v28 = vld [vmem:[#allocation55_spill] sm:$0xff]  ;;  %19487 = vst [vmem:[#allocation103_spill] sm:$0xff] %v16527_v41 }
 0x6c8   :  { %v7007_v62 = vpop.f32.mrf.mxu0  ;;  %v16519_v4 = vadd.f32 %v19485_v28, %v19484_v26  ;;  %v7668_v26 = vsub.f32 %v16496_v60, %v19488_v40  ;;  %v10287_v40 = vld [vmem:[%s17933_s3 + $0x470] sm:$0xff]  ;;  %v19491_v60 = vld [vmem:[#allocation93_spill] sm:$0xff] }
 0x6c9   :  { %7262 = vmatmul.f32.gmra.mxu2 %v19475_v2  ;;  %7363 = vmatmul.f32.gmra.mxu3 %v19481_v50 }
 0x6ca   :  { %v16513_v31 = vpop.f32.mrf.mxu1 }
 0x6cb   :  { %19482 = vst [vmem:[#allocation63_spill] sm:$0xff] %v16513_v31  ;;  %7662 = vmatmul.f32.gmra.mxu0 %v7661_v3  ;;  %v18417_v3 = vand.u32 4294901760, %v16523_v1 }
 0x6cc   :  { %v6703_v56 = vpop.f32.mrf.mxu2  ;;  %v6880_v2 = vpop.f32.mrf.mxu3 }
 0x6cd   :  { %v6877_v31 = vadd.f32 %v6876_v51, %v6703_v56  ;;  %7831 = vmatmul.f32.gmra.mxu1 %v16463_v9  ;;  %v8637_v23 = vsub.f32 %v16523_v1, %v18417_v3  ;;  %v7669_v56 = vand.u32 4294901760, %v7668_v26 }
 0x6cf   :  { %v16535_v28 = vadd.f32 %v7002_v29, %v6877_v31  ;;  %v8638_v29 = vand.u32 4294901760, %v8637_v23  ;;  %v16548_v31 = vand.u32 4294901760, %v10287_v40  ;;  %v19493_v23 = vand.u32 4294901760, %v16527_v41 }
 0x6d0   :  { %v7012_v61 = vpop.f32.mrf.mxu0 }
 0x6d1   :  { %19489 = vst [vmem:[#allocation95_spill] sm:$0xff] %v16535_v28  ;;  %7266 = vmatmul.f32.gmra.mxu2 %v19481_v50  ;;  %7367 = vmatmul.f32.gmra.mxu3 %v16127_v5  ;;  %v19492_v28 = vld [vmem:[#allocation24_spill] sm:$0xff]  ;;  %v16556_v26 = vsub.f32 %v10287_v40, %v16548_v31  ;;  %v10286_v40 = vld [vmem:[%s17933_s3 + $0x468] sm:$0xff] }
 0x6d2   :  { %v16546_v35 = vpop.f32.mrf.mxu1  ;;  %v16552_v9 = vadd.f32 %v19492_v28, %v19491_v60  ;;  %8639 = vmatpush.msra.mxu3 %v8638_v29  ;;  %8476 = vmatpush.msra.mxu2 %v16548_v31 }
 0x6d3   :  { %19490 = vst [vmem:[#allocation74_spill] sm:$0xff] %v16546_v35  ;;  %7670 = vmatmul.f32.gmra.mxu0 %v7669_v56  ;;  %v7676_v35 = vsub.f32 %v16527_v41, %v19493_v23  ;;  %v18421_v1 = vand.u32 4294901760, %v16556_v26  ;;  %8927 = vmatpush.msra.mxu1 %v16548_v31  ;;  %v16577_v23 = vand.u32 4294901760, %v10286_v40 }
 0x6d4   :  { %v6711_v50 = vpop.f32.mrf.mxu2  ;;  %v6884_v3 = vpop.f32.mrf.mxu3  ;;  %8800 = vmatpush.msra.mxu0 %v16556_v26 }
 0x6d5   :  { %v6881_v51 = vadd.f32 %v6880_v2, %v6711_v50  ;;  %7835 = vmatmul.f32.gmra.mxu1 %v16484_v49  ;;  %v8643_v56 = vsub.f32 %v16556_v26, %v18421_v1  ;;  %v7677_v2 = vand.u32 4294901760, %v7676_v35  ;;  %8478 = vmatpush.msra.mxu2 %v16577_v23 }
 0x6d6   :  { %8929 = vmatpush.msra.mxu1 %v16577_v23 }
 0x6d7   :  { %v16565_v60 = vadd.f32 %v7007_v62, %v6881_v51  ;;  %v8644_v50 = vand.u32 4294901760, %v8643_v56  ;;  %v19496_v62 = vld [vmem:[#allocation54_spill] sm:$0xff]  ;;  %v19497_v51 = vld [vmem:[#allocation53_spill] sm:$0xff] }
 0x6d8   :  { %v7017_v28 = vpop.f32.mrf.mxu0  ;;  %v16581_v41 = vadd.f32 %v19497_v51, %v19496_v62 }
 0x6d9   :  { %19494 = vst [vmem:[#allocation30_spill] sm:$0xff] %v16565_v60  ;;  %7270 = vmatmul.f32.gmra.mxu2 %v16127_v5  ;;  %7371 = vmatmul.f32.gmra.mxu3 %v16171_v39  ;;  %v16585_v5 = vsub.f32 %v10286_v40, %v16577_v23 }
 0x6da   :  { %v16575_v29 = vpop.f32.mrf.mxu1  ;;  %8645 = vmatpush.msra.mxu3 %v8644_v50 }
 0x6db   :  { %19495 = vst [vmem:[#allocation29_spill] sm:$0xff] %v16575_v29  ;;  %7678 = vmatmul.f32.gmra.mxu0 %v7677_v2  ;;  %v18422_v56 = vand.u32 4294901760, %v16585_v5 }
 0x6dc   :  { %v6719_v1 = vpop.f32.mrf.mxu2  ;;  %v6888_v60 = vpop.f32.mrf.mxu3  ;;  %8803 = vmatpush.msra.mxu0 %v16585_v5 }
 0x6dd   :  { %v6885_v35 = vadd.f32 %v6884_v3, %v6719_v1  ;;  %7839 = vmatmul.f32.gmra.mxu1 %v16505_v33  ;;  %v8649_v50 = vsub.f32 %v16585_v5, %v18422_v56  ;;  %v19500_v1 = vand.u32 4294901760, %v16200_v22  ;;  %v10285_v3 = vld [vmem:[%s17933_s3 + $0x460] sm:$0xff] }
 0x6df   :  { %v16591_v62 = vadd.f32 %v7012_v61, %v6885_v35  ;;  %v8650_v51 = vand.u32 4294901760, %v8649_v50  ;;  %v16606_v61 = vand.u32 4294901760, %v10285_v3  ;;  %v19502_v35 = vld [vmem:[#allocation83_spill] sm:$0xff] }
 0x6e0   :  { %v16593_v2 = vpop.f32.mrf.mxu0 }
 0x6e1   :  { %19498 = vst [vmem:[#allocation65_spill] sm:$0xff] %v16591_v62  ;;  %7274 = vmatmul.f32.gmra.mxu2 %v16171_v39  ;;  %8007 = vmatmul.f32.vlgmr.msrb.gmra.mxu3 %v19500_v1  ;;  %v16615_v1 = vsub.f32 %v10285_v3, %v16606_v61 }
 0x6e2   :  { %19499 = vst [vmem:[#allocation58_spill] sm:$0xff] %v16593_v2  ;;  %v16604_v40 = vpop.f32.mrf.mxu1  ;;  %v19503_v2 = vld [vmem:[#allocation71_spill] sm:$0xff]  ;;  %8651 = vmatpush.msra.mxu3 %v8650_v51  ;;  %8480 = vmatpush.msra.mxu2 %v16606_v61 }
 0x6e3   :  { %19501 = vst [vmem:[#allocation14_spill] sm:$0xff] %v16604_v40  ;;  %v16610_v29 = vadd.f32 %v19503_v2, %v19502_v35  ;;  %8166 = vmatmul.f32.vlgmr.msrb.gmra.mxu0 %v16182_v13  ;;  %v18423_v50 = vand.u32 4294901760, %v16615_v1  ;;  %8931 = vmatpush.msra.mxu1 %v16606_v61 }
 0x6e4   :  { %v6727_v56 = vpop.f32.mrf.mxu2  ;;  %v7312_v39 = vpop.f32.mrf.mxu3  ;;  %8806 = vmatpush.msra.mxu0 %v16615_v1 }
 0x6e5   :  { %v6889_v62 = vadd.f32 %v6888_v60, %v6727_v56  ;;  %8263 = vmatmul.f32.vlgmr.msrb.gmra.mxu1 %v16182_v13  ;;  %v8655_v51 = vsub.f32 %v16615_v1, %v18423_v50  ;;  %v19506_v60 = vand.u32 4294901760, %v16230_v55  ;;  %v10284_v13 = vld [vmem:[%s17933_s3 + $0x458] sm:$0xff] }
 0x6e7   :  { %v16621_v2 = vadd.f32 %v7017_v28, %v6889_v62  ;;  %v8656_v3 = vand.u32 4294901760, %v8655_v51  ;;  %v16636_v28 = vand.u32 4294901760, %v10284_v13  ;;  %v19508_v62 = vld [vmem:[#allocation104_spill] sm:$0xff] }
 0x6e8   :  { %v16623_v35 = vpop.f32.mrf.mxu0 }
 0x6e9   :  { %19504 = vst [vmem:[#allocation39_spill] sm:$0xff] %v16621_v2  ;;  %7893 = vmatmul.f32.vlgmr.msrb.gmra.mxu2 %v16200_v22  ;;  %8013 = vmatmul.f32.gmra.mxu3 %v19506_v60  ;;  %v7057_v22 = vadd.f32 %v16243_v59, %v16290_v44  ;;  %v16647_v2 = vsub.f32 %v10284_v13, %v16636_v28 }
 0x6ea   :  { %19505 = vst [vmem:[#allocation45_spill] sm:$0xff] %v16623_v35  ;;  %v16634_v56 = vpop.f32.mrf.mxu1  ;;  %v19509_v35 = vld [vmem:[#allocation46_spill] sm:$0xff]  ;;  %8657 = vmatpush.msra.mxu3 %v8656_v3  ;;  %8482 = vmatpush.msra.mxu2 %v16636_v28 }
 0x6eb   :  { %19507 = vst [vmem:[#allocation79_spill] sm:$0xff] %v16634_v56  ;;  %v16640_v40 = vadd.f32 %v19509_v35, %v19508_v62  ;;  %8170 = vmatmul.f32.gmra.mxu0 %v16210_v54  ;;  %v18424_v56 = vand.u32 4294901760, %v16647_v2  ;;  %8933 = vmatpush.msra.mxu1 %v16636_v28 }
 0x6ec   :  { %v7215_v50 = vpop.f32.mrf.mxu2  ;;  %v7316_v60 = vpop.f32.mrf.mxu3  ;;  %8809 = vmatpush.msra.mxu0 %v16647_v2 }
 0x6ed   :  { %v7216_v51 = vadd.f32 %v7215_v50, %v7057_v22  ;;  %8267 = vmatmul.f32.gmra.mxu1 %v16210_v54  ;;  %v8661_v59 = vsub.f32 %v16647_v2, %v18424_v56  ;;  %v19511_v54 = vand.u32 4294901760, %v16257_v19  ;;  %v10283_v50 = vld [vmem:[%s17933_s3 + $0x450] sm:$0xff] }
 0x6ee   :  { %v16669_v3 = vand.u32 4294901760, %v10283_v50  ;;  %v19512_v22 = vld [vmem:[#allocation107_spill] sm:$0xff] }
 0x6ef   :  { %v7313_v35 = vadd.f32 %v7312_v39, %v7216_v51  ;;  %v8662_v39 = vand.u32 4294901760, %v8661_v59  ;;  %v16673_v51 = vadd.f32 %v16161_v36, %v19512_v22 }
 0x6f0   :  { %v16653_v62 = vpop.f32.mrf.mxu0  ;;  %8484 = vmatpush.msra.mxu2 %v16669_v3  ;;  %8935 = vmatpush.msra.mxu1 %v16669_v3 }
 0x6f1   :  { %v16659_v44 = vadd.f32 %v7313_v35, %v16388_v17  ;;  %7898 = vmatmul.f32.gmra.mxu2 %v16230_v55  ;;  %8019 = vmatmul.f32.gmra.mxu3 %v19511_v54  ;;  %v7063_v55 = vadd.f32 %v16275_v32, %v16309_v18  ;;  %v16680_v54 = vsub.f32 %v10283_v50, %v16669_v3  ;;  %v10282_v50 = vld [vmem:[%s17933_s3 + $0x448] sm:$0xff] }
 0x6f2   :  { %v16667_v13 = vpop.f32.mrf.mxu1  ;;  %8663 = vmatpush.msra.mxu3 %v8662_v39 }
 0x6f3   :  { %19510 = vst [vmem:[#allocation26_spill] sm:$0xff] %v16659_v44  ;;  %8174 = vmatmul.f32.gmra.mxu0 %v16238_v37  ;;  %v18425_v56 = vand.u32 4294901760, %v16680_v54  ;;  %v19544_v44 = vld [vmem:[#allocation7_spill] sm:$0xff] }
 0x6f4   :  { %v7219_v17 = vpop.f32.mrf.mxu2  ;;  %v7320_v35 = vpop.f32.mrf.mxu3  ;;  %8812 = vmatpush.msra.mxu0 %v16680_v54 }
 0x6f5   :  { %v7220_v59 = vadd.f32 %v7219_v17, %v7063_v55  ;;  %8271 = vmatmul.f32.gmra.mxu1 %v16238_v37  ;;  %v8667_v32 = vsub.f32 %v16680_v54, %v18425_v56  ;;  %v19514_v37 = vand.u32 4294901760, %v16282_v8  ;;  %v16702_v55 = vand.u32 4294901760, %v10282_v50  ;;  %v19515_v17 = vld [vmem:[#allocation78_spill] sm:$0xff] }
 0x6f7   :  { %v7317_v36 = vadd.f32 %v7316_v60, %v7220_v59  ;;  %v8668_v60 = vand.u32 4294901760, %v8667_v32  ;;  %v16706_v59 = vadd.f32 %v16194_v48, %v19515_v17  ;;  %8486 = vmatpush.msra.mxu2 %v16702_v55  ;;  %8937 = vmatpush.msra.mxu1 %v16702_v55 }
 0x6f8   :  { %v16686_v22 = vpop.f32.mrf.mxu0 }
 0x6f9   :  { %v16692_v18 = vadd.f32 %v7317_v36, %v16409_v27  ;;  %7903 = vmatmul.f32.gmra.mxu2 %v16257_v19  ;;  %8025 = vmatmul.f32.gmra.mxu3 %v19514_v37  ;;  %v7069_v19 = vadd.f32 %v16298_v63, %v16326_v10  ;;  %v16713_v37 = vsub.f32 %v10282_v50, %v16702_v55  ;;  %v10281_v50 = vld [vmem:[%s17933_s3 + $0x440] sm:$0xff] }
 0x6fa   :  { %v16700_v39 = vpop.f32.mrf.mxu1  ;;  %8669 = vmatpush.msra.mxu3 %v8668_v60 }
 0x6fb   :  { %19513 = vst [vmem:[#allocation76_spill] sm:$0xff] %v16692_v18  ;;  %8178 = vmatmul.f32.gmra.mxu0 %v16270_v38  ;;  %v18426_v56 = vand.u32 4294901760, %v16713_v37 }
 0x6fc   :  { %v7223_v27 = vpop.f32.mrf.mxu2  ;;  %v7324_v36 = vpop.f32.mrf.mxu3  ;;  %8815 = vmatpush.msra.mxu0 %v16713_v37 }
 0x6fd   :  { %v7224_v32 = vadd.f32 %v7223_v27, %v7069_v19  ;;  %8275 = vmatmul.f32.gmra.mxu1 %v16270_v38  ;;  %v8673_v63 = vsub.f32 %v16713_v37, %v18426_v56  ;;  %v19517_v38 = vand.u32 4294901760, %v16303_v24  ;;  %v16735_v19 = vand.u32 4294901760, %v10281_v50  ;;  %v19518_v27 = vld [vmem:[#allocation106_spill] sm:$0xff] }
 0x6ff   :  { %v7321_v48 = vadd.f32 %v7320_v35, %v7224_v32  ;;  %v8674_v35 = vand.u32 4294901760, %v8673_v63  ;;  %v16739_v32 = vadd.f32 %v16220_v0, %v19518_v27  ;;  %8488 = vmatpush.msra.mxu2 %v16735_v19  ;;  %8939 = vmatpush.msra.mxu1 %v16735_v19 }
 0x700   :  { %v16719_v17 = vpop.f32.mrf.mxu0 }
 0x701   :  { %v16725_v10 = vadd.f32 %v7321_v48, %v16430_v53  ;;  %7908 = vmatmul.f32.gmra.mxu2 %v16282_v8  ;;  %8031 = vmatmul.f32.gmra.mxu3 %v19517_v38  ;;  %v7075_v8 = vadd.f32 %v16316_v42, %v16343_v30  ;;  %v16746_v38 = vsub.f32 %v10281_v50, %v16735_v19  ;;  %v10280_v50 = vld [vmem:[%s17933_s3 + $0x438] sm:$0xff] }
 0x702   :  { %v16733_v60 = vpop.f32.mrf.mxu1  ;;  %8675 = vmatpush.msra.mxu3 %v8674_v35 }
 0x703   :  { %19516 = vst [vmem:[#allocation17_spill] sm:$0xff] %v16725_v10  ;;  %8182 = vmatmul.f32.gmra.mxu0 %v16293_v14  ;;  %v18427_v56 = vand.u32 4294901760, %v16746_v38 }
 0x704   :  { %v7227_v53 = vpop.f32.mrf.mxu2  ;;  %v7328_v48 = vpop.f32.mrf.mxu3  ;;  %8818 = vmatpush.msra.mxu0 %v16746_v38 }
 0x705   :  { %v7228_v63 = vadd.f32 %v7227_v53, %v7075_v8  ;;  %8279 = vmatmul.f32.gmra.mxu1 %v16293_v14  ;;  %v8679_v42 = vsub.f32 %v16746_v38, %v18427_v56  ;;  %v19520_v14 = vand.u32 4294901760, %v16319_v11  ;;  %v16768_v8 = vand.u32 4294901760, %v10280_v50  ;;  %v19521_v53 = vld [vmem:[#allocation47_spill] sm:$0xff] }
 0x707   :  { %v7325_v0 = vadd.f32 %v7324_v36, %v7228_v63  ;;  %v8680_v36 = vand.u32 4294901760, %v8679_v42  ;;  %v16772_v63 = vadd.f32 %v16251_v16, %v19521_v53  ;;  %8490 = vmatpush.msra.mxu2 %v16768_v8  ;;  %8941 = vmatpush.msra.mxu1 %v16768_v8 }
 0x708   :  { %v16752_v27 = vpop.f32.mrf.mxu0 }
 0x709   :  { %v16758_v30 = vadd.f32 %v7325_v0, %v16451_v58  ;;  %7913 = vmatmul.f32.gmra.mxu2 %v16303_v24  ;;  %8037 = vmatmul.f32.gmra.mxu3 %v19520_v14  ;;  %v7081_v24 = vadd.f32 %v16333_v12, %v16360_v46  ;;  %v16779_v14 = vsub.f32 %v10280_v50, %v16768_v8  ;;  %v10279_v50 = vld [vmem:[%s17933_s3 + $0x430] sm:$0xff] }
 0x70a   :  { %v16766_v35 = vpop.f32.mrf.mxu1  ;;  %8681 = vmatpush.msra.mxu3 %v8680_v36 }
 0x70b   :  { %19519 = vst [vmem:[#allocation87_spill] sm:$0xff] %v16758_v30  ;;  %8186 = vmatmul.f32.gmra.mxu0 %v16311_v34  ;;  %v18428_v56 = vand.u32 4294901760, %v16779_v14  ;;  %v19536_v30 = vld [vmem:[#allocation75_spill] sm:$0xff] }
 0x70c   :  { %v7231_v58 = vpop.f32.mrf.mxu2  ;;  %v7332_v0 = vpop.f32.mrf.mxu3  ;;  %8821 = vmatpush.msra.mxu0 %v16779_v14 }
 0x70d   :  { %v7232_v42 = vadd.f32 %v7231_v58, %v7081_v24  ;;  %8283 = vmatmul.f32.gmra.mxu1 %v16311_v34  ;;  %v8685_v12 = vsub.f32 %v16779_v14, %v18428_v56  ;;  %v19523_v34 = vand.u32 4294901760, %v16336_v7  ;;  %v16801_v24 = vand.u32 4294901760, %v10279_v50  ;;  %v19524_v58 = vld [vmem:[#allocation70_spill] sm:$0xff] }
 0x70f   :  { %v7329_v16 = vadd.f32 %v7328_v48, %v7232_v42  ;;  %v8686_v48 = vand.u32 4294901760, %v8685_v12  ;;  %v16805_v42 = vadd.f32 %v16278_v43, %v19524_v58  ;;  %8492 = vmatpush.msra.mxu2 %v16801_v24  ;;  %8943 = vmatpush.msra.mxu1 %v16801_v24 }
 0x710   :  { %v16785_v53 = vpop.f32.mrf.mxu0 }
 0x711   :  { %v16791_v46 = vadd.f32 %v7329_v16, %v16472_v20  ;;  %7918 = vmatmul.f32.gmra.mxu2 %v16319_v11  ;;  %8043 = vmatmul.f32.gmra.mxu3 %v19523_v34  ;;  %v7087_v11 = vadd.f32 %v16350_v6, %v16377_v25  ;;  %v16812_v34 = vsub.f32 %v10279_v50, %v16801_v24  ;;  %v10278_v50 = vld [vmem:[%s17933_s3 + $0x428] sm:$0xff] }
 0x712   :  { %v16799_v36 = vpop.f32.mrf.mxu1  ;;  %8687 = vmatpush.msra.mxu3 %v8686_v48 }
 0x713   :  { %19522 = vst [vmem:[#allocation33_spill] sm:$0xff] %v16791_v46  ;;  %8190 = vmatmul.f32.gmra.mxu0 %v16328_v15  ;;  %v18429_v56 = vand.u32 4294901760, %v16812_v34 }
 0x714   :  { %v7235_v20 = vpop.f32.mrf.mxu2  ;;  %v7336_v16 = vpop.f32.mrf.mxu3  ;;  %8824 = vmatpush.msra.mxu0 %v16812_v34 }
 0x715   :  { %v7236_v12 = vadd.f32 %v7235_v20, %v7087_v11  ;;  %8287 = vmatmul.f32.gmra.mxu1 %v16328_v15  ;;  %v8691_v6 = vsub.f32 %v16812_v34, %v18429_v56  ;;  %v19526_v15 = vand.u32 4294901760, %v16354_v47  ;;  %v16834_v11 = vand.u32 4294901760, %v10278_v50  ;;  %v19527_v20 = vld [vmem:[#allocation100_spill] sm:$0xff] }
 0x717   :  { %v7333_v43 = vadd.f32 %v7332_v0, %v7236_v12  ;;  %v8692_v0 = vand.u32 4294901760, %v8691_v6  ;;  %v19528_v12 = vld [vmem:[#allocation41_spill] sm:$0xff]  ;;  %8494 = vmatpush.msra.mxu2 %v16834_v11  ;;  %8945 = vmatpush.msra.mxu1 %v16834_v11 }
 0x718   :  { %v16818_v58 = vpop.f32.mrf.mxu0 }
 0x719   :  { %v16824_v25 = vadd.f32 %v7333_v43, %v16493_v57  ;;  %7923 = vmatmul.f32.gmra.mxu2 %v16336_v7  ;;  %8049 = vmatmul.f32.gmra.mxu3 %v19526_v15  ;;  %v7093_v57 = vadd.f32 %v19528_v12, %v19527_v20  ;;  %v16841_v7 = vsub.f32 %v10278_v50, %v16834_v11  ;;  %v19531_v50 = vld [vmem:[#allocation5_spill] sm:$0xff] }
 0x71a   :  { %v16832_v48 = vpop.f32.mrf.mxu1  ;;  %8693 = vmatpush.msra.mxu3 %v8692_v0  ;;  %v10277_v12 = vld [vmem:[%s17933_s3 + $0x420] sm:$0xff] }
 0x71b   :  { %19525 = vst [vmem:[#allocation85_spill] sm:$0xff] %v16824_v25  ;;  %8194 = vmatmul.f32.gmra.mxu0 %v16345_v52  ;;  %v18430_v6 = vand.u32 4294901760, %v16841_v7 }
 0x71c   :  { %v7239_v43 = vpop.f32.mrf.mxu2  ;;  %v7340_v56 = vpop.f32.mrf.mxu3  ;;  %8827 = vmatpush.msra.mxu0 %v16841_v7 }
 0x71d   :  { %v7240_v15 = vadd.f32 %v7239_v43, %v7093_v57  ;;  %8291 = vmatmul.f32.gmra.mxu1 %v16345_v52  ;;  %v8697_v0 = vsub.f32 %v16841_v7, %v18430_v6  ;;  %v19532_v52 = vand.u32 4294901760, %v19531_v50  ;;  %v16863_v43 = vand.u32 4294901760, %v10277_v12  ;;  %v19535_v6 = vld [vmem:[#allocation6_spill] sm:$0xff] }
 0x71f   :  { %v7337_v25 = vadd.f32 %v7336_v16, %v7240_v15  ;;  %v8698_v16 = vand.u32 4294901760, %v8697_v0  ;;  %v19534_v15 = vld [vmem:[#allocation27_spill] sm:$0xff]  ;;  %8496 = vmatpush.msra.mxu2 %v16863_v43  ;;  %8947 = vmatpush.msra.mxu1 %v16863_v43 }
 0x720   :  { %v16847_v46 = vpop.f32.mrf.mxu0 }
 0x721   :  { %19529 = vst [vmem:[#allocation18_spill] sm:$0xff] %v16847_v46  ;;  %v16853_v20 = vadd.f32 %v7337_v25, %v16519_v4  ;;  %7928 = vmatmul.f32.gmra.mxu2 %v16354_v47  ;;  %8055 = vmatmul.f32.gmra.mxu3 %v19532_v52  ;;  %v7099_v4 = vadd.f32 %v19536_v30, %v19535_v6 }
 0x722   :  { %v16861_v57 = vpop.f32.mrf.mxu1  ;;  %8699 = vmatpush.msra.mxu3 %v8698_v16  ;;  %v16870_v47 = vsub.f32 %v10277_v12, %v16863_v43  ;;  %v19539_v12 = vld [vmem:[#allocation42_spill] sm:$0xff] }
 0x723   :  { %19530 = vst [vmem:[#allocation97_spill] sm:$0xff] %v16853_v20  ;;  %8198 = vmatmul.f32.gmra.mxu0 %v19534_v15  ;;  %v19540_v16 = vand.u32 4294901760, %v19539_v12 }
 0x724   :  { %19533 = vst [vmem:[#allocation32_spill] sm:$0xff] %v16861_v57  ;;  %v7243_v25 = vpop.f32.mrf.mxu2  ;;  %v7344_v20 = vpop.f32.mrf.mxu3  ;;  %v18431_v0 = vand.u32 4294901760, %v16870_v47  ;;  %8830 = vmatpush.msra.mxu0 %v16870_v47 }
 0x725   :  { %v7244_v52 = vadd.f32 %v7243_v25, %v7099_v4  ;;  %8295 = vmatmul.f32.gmra.mxu1 %v19534_v15  ;;  %v10276_v15 = vld [vmem:[%s17933_s3 + $0x418] sm:$0xff] }
 0x726   :  { %v8703_v30 = vsub.f32 %v16870_v47, %v18431_v0  ;;  %v16892_v25 = vand.u32 4294901760, %v10276_v15  ;;  %v19543_v0 = vld [vmem:[#allocation50_spill] sm:$0xff] }
 0x727   :  { %v7341_v10 = vadd.f32 %v7340_v56, %v7244_v52  ;;  %v19542_v52 = vld [vmem:[#allocation98_spill] sm:$0xff] }
 0x728   :  { %v16876_v18 = vpop.f32.mrf.mxu0  ;;  %v8704_v56 = vand.u32 4294901760, %v8703_v30  ;;  %8498 = vmatpush.msra.mxu2 %v16892_v25  ;;  %8949 = vmatpush.msra.mxu1 %v16892_v25 }
 0x729   :  { %19537 = vst [vmem:[#allocation67_spill] sm:$0xff] %v16876_v18  ;;  %v16882_v6 = vadd.f32 %v7341_v10, %v16552_v9  ;;  %7933 = vmatmul.f32.gmra.mxu2 %v19531_v50  ;;  %8061 = vmatmul.f32.gmra.mxu3 %v19540_v16  ;;  %v7105_v9 = vadd.f32 %v19544_v44, %v19543_v0 }
 0x72a   :  { %v16890_v4 = vpop.f32.mrf.mxu1  ;;  %8705 = vmatpush.msra.mxu3 %v8704_v56  ;;  %v16899_v50 = vsub.f32 %v10276_v15, %v16892_v25  ;;  %v19547_v15 = vld [vmem:[#allocation44_spill] sm:$0xff] }
 0x72b   :  { %19538 = vst [vmem:[#allocation92_spill] sm:$0xff] %v16882_v6  ;;  %8202 = vmatmul.f32.gmra.mxu0 %v19542_v52  ;;  %v19548_v56 = vand.u32 4294901760, %v19547_v15 }
 0x72c   :  { %19541 = vst [vmem:[#allocation15_spill] sm:$0xff] %v16890_v4  ;;  %v7247_v10 = vpop.f32.mrf.mxu2  ;;  %v7348_v6 = vpop.f32.mrf.mxu3  ;;  %v18432_v30 = vand.u32 4294901760, %v16899_v50  ;;  %8833 = vmatpush.msra.mxu0 %v16899_v50 }
 0x72d   :  { %v7248_v16 = vadd.f32 %v7247_v10, %v7105_v9  ;;  %8299 = vmatmul.f32.gmra.mxu1 %v19542_v52  ;;  %v10275_v52 = vld [vmem:[%s17933_s3 + $0x410] sm:$0xff] }
 0x72e   :  { %v8709_v44 = vsub.f32 %v16899_v50, %v18432_v30  ;;  %v16921_v10 = vand.u32 4294901760, %v10275_v52  ;;  %v19551_v30 = vld [vmem:[#allocation51_spill] sm:$0xff] }
 0x72f   :  { %v7345_v4 = vadd.f32 %v7344_v20, %v7248_v16  ;;  %v19550_v16 = vld [vmem:[#allocation59_spill] sm:$0xff] }
 0x730   :  { %v16905_v18 = vpop.f32.mrf.mxu0  ;;  %v8710_v20 = vand.u32 4294901760, %v8709_v44  ;;  %8500 = vmatpush.msra.mxu2 %v16921_v10  ;;  %8951 = vmatpush.msra.mxu1 %v16921_v10 }
 0x731   :  { %19545 = vst [vmem:[#allocation37_spill] sm:$0xff] %v16905_v18  ;;  %v16911_v0 = vadd.f32 %v7345_v4, %v16581_v41  ;;  %7938 = vmatmul.f32.gmra.mxu2 %v19539_v12  ;;  %8067 = vmatmul.f32.gmra.mxu3 %v19548_v56  ;;  %v19552_v18 = vld [vmem:[#allocation9_spill] sm:$0xff]  ;;  %v16928_v12 = vsub.f32 %v10275_v52, %v16921_v10  ;;  %v19555_v52 = vld [vmem:[#allocation8_spill] sm:$0xff] }
 0x732   :  { %v16919_v9 = vpop.f32.mrf.mxu1  ;;  %v7111_v41 = vadd.f32 %v19552_v18, %v19551_v30  ;;  %8711 = vmatpush.msra.mxu3 %v8710_v20  ;;  %v19556_v20 = vand.u32 4294901760, %v19555_v52 }
 0x733   :  { %19546 = vst [vmem:[#allocation21_spill] sm:$0xff] %v16911_v0  ;;  %8206 = vmatmul.f32.gmra.mxu0 %v19550_v16  ;;  %v18433_v44 = vand.u32 4294901760, %v16928_v12 }
 0x734   :  { %19549 = vst [vmem:[#allocation105_spill] sm:$0xff] %v16919_v9  ;;  %v7251_v4 = vpop.f32.mrf.mxu2  ;;  %v7352_v0 = vpop.f32.mrf.mxu3  ;;  %8836 = vmatpush.msra.mxu0 %v16928_v12 }
 0x735   :  { %v7252_v56 = vadd.f32 %v7251_v4, %v7111_v41  ;;  %8303 = vmatmul.f32.gmra.mxu1 %v19550_v16  ;;  %v8715_v18 = vsub.f32 %v16928_v12, %v18433_v44  ;;  %v10274_v16 = vld [vmem:[%s17933_s3 + $0x408] sm:$0xff]  ;;  %v19559_v44 = vld [vmem:[#allocation19_spill] sm:$0xff] }
 0x736   :  { %v16950_v4 = vand.u32 4294901760, %v10274_v16 }
 0x737   :  { %v7349_v9 = vadd.f32 %v7348_v6, %v7252_v56  ;;  %v8716_v6 = vand.u32 4294901760, %v8715_v18  ;;  %v19558_v56 = vld [vmem:[#allocation49_spill] sm:$0xff] }
 0x738   :  { %v16934_v57 = vpop.f32.mrf.mxu0  ;;  %8502 = vmatpush.msra.mxu2 %v16950_v4  ;;  %8953 = vmatpush.msra.mxu1 %v16950_v4 }
 0x739   :  { %19553 = vst [vmem:[#allocation69_spill] sm:$0xff] %v16934_v57  ;;  %v16940_v30 = vadd.f32 %v7349_v9, %v16610_v29  ;;  %7943 = vmatmul.f32.gmra.mxu2 %v19547_v15  ;;  %8073 = vmatmul.f32.gmra.mxu3 %v19556_v20  ;;  %v19560_v57 = vld [vmem:[#allocation82_spill] sm:$0xff]  ;;  %v16957_v15 = vsub.f32 %v10274_v16, %v16950_v4 }
 0x73a   :  { %v16948_v41 = vpop.f32.mrf.mxu1  ;;  %v7117_v29 = vadd.f32 %v19560_v57, %v19559_v44  ;;  %8717 = vmatpush.msra.mxu3 %v8716_v6  ;;  %v19563_v16 = vld [vmem:[#allocation34_spill] sm:$0xff] }
 0x73b   :  { %19554 = vst [vmem:[#allocation22_spill] sm:$0xff] %v16940_v30  ;;  %8210 = vmatmul.f32.gmra.mxu0 %v19558_v56  ;;  %v18434_v18 = vand.u32 4294901760, %v16957_v15  ;;  %v19564_v6 = vand.u32 4294901760, %v19563_v16 }
 0x73c   :  { %19557 = vst [vmem:[#allocation60_spill] sm:$0xff] %v16948_v41  ;;  %v7255_v9 = vpop.f32.mrf.mxu2  ;;  %v7356_v30 = vpop.f32.mrf.mxu3  ;;  %8839 = vmatpush.msra.mxu0 %v16957_v15 }
 0x73d   :  { %v7256_v20 = vadd.f32 %v7255_v9, %v7117_v29  ;;  %8307 = vmatmul.f32.gmra.mxu1 %v19558_v56  ;;  %v8721_v57 = vsub.f32 %v16957_v15, %v18434_v18  ;;  %v10273_v56 = vld [vmem:[%s17933_s3 + $0x400] sm:$0xff] }
 0x73e   :  { %v16979_v9 = vand.u32 4294901760, %v10273_v56 }
 0x73f   :  { %v7353_v41 = vadd.f32 %v7352_v0, %v7256_v20  ;;  %v8722_v0 = vand.u32 4294901760, %v8721_v57  ;;  %v19566_v20 = vld [vmem:[#allocation101_spill] sm:$0xff] }
 0x740   :  { %v16963_v46 = vpop.f32.mrf.mxu0  ;;  %8504 = vmatpush.msra.mxu2 %v16979_v9  ;;  %8955 = vmatpush.msra.mxu1 %v16979_v9 }
 0x741   :  { %19561 = vst [vmem:[#allocation68_spill] sm:$0xff] %v16963_v46  ;;  %v16969_v44 = vadd.f32 %v7353_v41, %v16640_v40  ;;  %7948 = vmatmul.f32.gmra.mxu2 %v19555_v52  ;;  %8079 = vmatmul.f32.gmra.mxu3 %v19564_v6  ;;  %v7123_v40 = vadd.f32 %v19566_v20, %v16503_v45 }
 0x742   :  { %v16977_v29 = vpop.f32.mrf.mxu1  ;;  %8723 = vmatpush.msra.mxu3 %v8722_v0  ;;  %v16985_v52 = vsub.f32 %v10273_v56, %v16979_v9  ;;  %v19569_v0 = vand.u32 4294901760, %v16556_v26  ;;  %v19573_v26 = vand.u32 4294901760, %v16585_v5 }
 0x743   :  { %19562 = vst [vmem:[#allocation23_spill] sm:$0xff] %v16969_v44  ;;  %8214 = vmatmul.f32.gmra.mxu0 %v16442_v21  ;;  %v19567_v44 = vld [vmem:[#allocation38_spill] sm:$0xff] }
 0x744   :  { %19565 = vst [vmem:[#allocation36_spill] sm:$0xff] %v16977_v29  ;;  %v7259_v41 = vpop.f32.mrf.mxu2  ;;  %v7360_v18 = vpop.f32.mrf.mxu3  ;;  %v19568_v57 = vand.u32 4294901760, %v19567_v44  ;;  %v18435_v29 = vand.u32 4294901760, %v16985_v52  ;;  %8842 = vmatpush.msra.mxu0 %v16985_v52  ;;  %v19571_v44 = vld [vmem:[#allocation13_spill] sm:$0xff] }
 0x745   :  { %v7260_v6 = vadd.f32 %v7259_v41, %v7123_v40  ;;  %8311 = vmatmul.f32.gmra.mxu1 %v16442_v21  ;;  %v19572_v40 = vand.u32 4294901760, %v19571_v44 }
 0x746   :  { %9056 = vmatpush.msrb.mxu2 %v19568_v57  ;;  %v8727_v20 = vsub.f32 %v16985_v52, %v18435_v29  ;;  %v19575_v57 = vld [vmem:[#allocation95_spill] sm:$0xff] }
 0x747   :  { %v7357_v45 = vadd.f32 %v7356_v30, %v7260_v6  ;;  %v19574_v6 = vld [vmem:[#allocation96_spill] sm:$0xff] }
 0x748   :  { %9060 = vmatpush.msrb.mxu2 %v19569_v0  ;;  %v16996_v56 = vpop.f32.mrf.mxu0  ;;  %v8728_v30 = vand.u32 4294901760, %v8727_v20  ;;  %v19576_v0 = vld [vmem:[#allocation11_spill] sm:$0xff]  ;;  %v19579_v20 = vand.u32 4294901760, %v16647_v2  ;;  %v19584_v2 = vld [vmem:[#allocation57_spill] sm:$0xff] }
 0x749   :  { %19570 = vst [vmem:[#allocation16_spill] sm:$0xff] %v16996_v56  ;;  %v17002_v21 = vadd.f32 %v7357_v45, %v16673_v51  ;;  %7953 = vmatmul.f32.gmra.mxu2 %v19563_v16  ;;  %8085 = vmatmul.f32.gmra.mxu3 %v19572_v40  ;;  %v7129_v56 = vadd.f32 %v19576_v0, %v19575_v57  ;;  %v19577_v51 = vand.u32 4294901760, %v16615_v1  ;;  %v19578_v45 = vld [vmem:[#allocation81_spill] sm:$0xff]  ;;  %v8363_v40 = vpop.permute.xlu1 %8362  ;;  %v19580_v57 = vand.u32 4294901760, %v16680_v54  ;;  %v19585_v54 = vld [vmem:[#allocation30_spill] sm:$0xff] }
 0x74a   :  { %v17007_v41 = vpop.f32.mrf.mxu1  ;;  %9064 = vmatpush.msrb.mxu2 %v19573_v26  ;;  %8729 = vmatpush.msra.mxu3 %v8728_v30 }
 0x74b   :  { %8218 = vmatmul.f32.gmra.mxu0 %v19574_v6 }
 0x74c   :  { %v7263_v29 = vpop.f32.mrf.mxu2  ;;  %v7364_v46 = vpop.f32.mrf.mxu3  ;;  %9068 = vmatpush.msrb.mxu2 %v19577_v51  ;;  %9183 = vmatpush.msrb.mxu3 %v19578_v45 }
 0x74d   :  { %v7264_v16 = vadd.f32 %v7263_v29, %v7129_v56  ;;  %8315 = vmatmul.f32.gmra.mxu1 %v19574_v6  ;;  %v19581_v29 = vld [vmem:[#allocation25_spill] sm:$0xff]  ;;  %v19586_v6 = vld [vmem:[#allocation63_spill] sm:$0xff] }
 0x74e   :  { %9072 = vmatpush.msrb.mxu2 %v19579_v20  ;;  %9185 = vmatpush.msrb.mxu3 %v16548_v31  ;;  %v19582_v56 = vand.u32 4294901760, %v19581_v29  ;;  %v19583_v31 = vand.u32 4294901760, %v16713_v37  ;;  %v19588_v20 = vand.u32 4294901760, %v16779_v14  ;;  %v19590_v14 = vld [vmem:[#allocation103_spill] sm:$0xff] }
 0x74f   :  { %v7361_v5 = vadd.f32 %v7360_v18, %v7264_v16  ;;  %v8440_v18 = vmul.f32 %v8363_v40, %v19584_v2 }
 0x750   :  { %v17021_v26 = vpop.f32.mrf.mxu0  ;;  %9076 = vmatpush.msrb.mxu2 %v19580_v57  ;;  %9187 = vmatpush.msrb.mxu3 %v16577_v23  ;;  %v19587_v23 = vand.u32 4294901760, %v16746_v38 }
 0x751   :  { %v17026_v1 = vadd.f32 %v7361_v5, %v16706_v59  ;;  %7958 = vmatmul.f32.gmra.mxu2 %v19571_v44  ;;  %8091 = vmatmul.f32.gmra.mxu3 %v19582_v56  ;;  %v7135_v59 = vadd.f32 %v19586_v6, %v19585_v54  ;;  %v9315_v44 = vld [vmem:[%s17937_s7] sm:$0xf]  ;;  %v8368_v5 = vpop.permute.xlu2 %8367  ;;  %v17053_v40 = vand.u32 4294901760, %v8440_v18  ;;  %v19591_v56 = vand.u32 4294901760, %v19590_v14 }
 0x752   :  { %v17031_v30 = vpop.f32.mrf.mxu1  ;;  %9080 = vmatpush.msrb.mxu2 %v19583_v31  ;;  %v9370_v16 = vsel %vm123_vm0, %v9315_v44, 0  ;;  %9189 = vmatpush.msrb.mxu3 %v16606_v61  ;;  %v19593_v54 = vand.u32 4294901760, %v16841_v7 }
 0x753   :  { %8222 = vmatmul.f32.gmra.mxu0 %v16484_v49  ;;  %v17048_v45 = vand.u32 4294901760, %v9370_v16 }
 0x754   :  { %v7267_v0 = vpop.f32.mrf.mxu2  ;;  %v7368_v51 = vpop.f32.mrf.mxu3  ;;  %9084 = vmatpush.msrb.mxu2 %v19587_v23  ;;  %9191 = vmatpush.msrb.mxu3 %v16636_v28 }
 0x755   :  { %v7268_v37 = vadd.f32 %v7267_v0, %v7135_v59  ;;  %8319 = vmatmul.f32.gmra.mxu1 %v16484_v49  ;;  %9388 = vmatpush.msrb.mxu0 %v17048_v45  ;;  %v17057_v61 = vsub.f32 %v9370_v16, %v17048_v45  ;;  %v19589_v49 = vand.u32 4294901760, %v16812_v34  ;;  %v19595_v34 = vld [vmem:[#allocation74_spill] sm:$0xff]  ;;  %v19596_v0 = vand.u32 4294901760, %v16870_v47 }
 0x756   :  { %9088 = vmatpush.msrb.mxu2 %v19588_v20  ;;  %9193 = vmatpush.msrb.mxu3 %v16669_v3  ;;  %v8506_v3 = vsub.f32 %v8440_v18, %v17053_v40  ;;  %v19597_v16 = vand.u32 4294901760, %v16899_v50  ;;  %v19598_v47 = vand.u32 4294901760, %v16928_v12  ;;  %v19602_v12 = vld [vmem:[#allocation29_spill] sm:$0xff] }
 0x757   :  { %v7365_v57 = vadd.f32 %v7364_v46, %v7268_v37  ;;  %v19592_v46 = vld [vmem:[#allocation62_spill] sm:$0xff] }
 0x758   :  { %v17059_v38 = vpop.f32.mrf.mxu0  ;;  %9092 = vmatpush.msrb.mxu2 %v19589_v49  ;;  %v8441_v31 = vmul.f32 %v8368_v5, %v19592_v46  ;;  %9195 = vmatpush.msrb.mxu3 %v16702_v55  ;;  %v8507_v23 = vand.u32 4294901760, %v8506_v3  ;;  %v8373_v5 = vpop.permute.xlu0 %8372 }
 0x759   :  { %v17065_v28 = vadd.f32 %v7365_v57, %v16739_v32  ;;  %7963 = vmatmul.f32.gmra.mxu2 %v19581_v29  ;;  %8097 = vmatmul.f32.gmra.mxu3 %v19591_v56  ;;  %v19594_v32 = vld [vmem:[#allocation65_spill] sm:$0xff]  ;;  %v9535_v29 = vand.u32 4294901760, %v17057_v61  ;;  %v19600_v57 = vld [vmem:[#allocation12_spill] sm:$0xff] }
 0x75a   :  { %v17071_v2 = vpop.f32.mrf.mxu1  ;;  %9096 = vmatpush.msrb.mxu2 %v19593_v54  ;;  %v7141_v6 = vadd.f32 %v19595_v34, %v19594_v32  ;;  %9197 = vmatpush.msrb.mxu3 %v16735_v19  ;;  %v17086_v18 = vand.u32 4294901760, %v8441_v31  ;;  %v8442_v49 = vmul.f32 %v8373_v5, %v19600_v57  ;;  %v19604_v54 = vand.u32 4294901760, %v16985_v52  ;;  %v8378_v34 = vpop.permute.xlu1 %8377 }
 0x75b   :  { %8226 = vmatmul.f32.gmra.mxu0 %v16505_v33  ;;  %v9536_v7 = vsub.f32 %v17057_v61, %v9535_v29 }
 0x75c   :  { %v7271_v59 = vpop.f32.mrf.mxu2  ;;  %v7372_v44 = vpop.f32.mrf.mxu3  ;;  %9100 = vmatpush.msrb.mxu2 %v19596_v0  ;;  %9199 = vmatpush.msrb.mxu3 %v16768_v8  ;;  %v8514_v8 = vsub.f32 %v8441_v31, %v17086_v18  ;;  %v19608_v0 = vld [vmem:[#allocation14_spill] sm:$0xff] }
 0x75d   :  { %v7272_v55 = vadd.f32 %v7271_v59, %v7141_v6  ;;  %8323 = vmatmul.f32.gmra.mxu1 %v16505_v33  ;;  %v9537_v20 = vand.u32 4294901760, %v9536_v7 }
 0x75e   :  { %9104 = vmatpush.msrb.mxu2 %v19597_v16  ;;  %9201 = vmatpush.msrb.mxu3 %v16801_v24  ;;  %v19601_v24 = vld [vmem:[#allocation39_spill] sm:$0xff] }
 0x75f   :  { %v7369_v37 = vadd.f32 %v7368_v51, %v7272_v55  ;;  %9538 = vmatpush.msrb.mxu1 %v9537_v20  ;;  %v8508_v51 = vsub.f32 %v8506_v3, %v8507_v23  ;;  %v7147_v56 = vadd.f32 %v19602_v12, %v19601_v24  ;;  %v19611_v24 = vld [vmem:[#allocation79_spill] sm:$0xff] }
 0x760   :  { %v8167_v19 = vpop.f32.mrf.mxu0  ;;  %9108 = vmatpush.msrb.mxu2 %v19598_v47  ;;  %9203 = vmatpush.msrb.mxu3 %v16834_v11 }
 0x761   :  { %v17095_v33 = vadd.f32 %v7369_v37, %v16772_v63  ;;  %7968 = vmatmul.f32.gmra.mxu2 %v19590_v14  ;;  %8731 = vmatmul.f32.vlgmr.msra.gmra.mxu3 %v17053_v40  ;;  %v19603_v63 = vand.u32 4294901760, %v16957_v15  ;;  %v8509_v11 = vand.u32 4294901760, %v8508_v51  ;;  %v8515_v15 = vand.u32 4294901760, %v8514_v8 }
 0x762   :  { %v8264_v50 = vpop.f32.mrf.mxu1  ;;  %9205 = vmatpush.msrb.mxu3 %v16863_v43 }
 0x763   :  { %19599 = vst [vmem:[#allocation90_spill] sm:$0xff] %v17095_v33  ;;  %8845 = vmatmul.f32.vlgmr.msra.gmra.mxu0 %v8506_v3  ;;  %9112 = vmatpush.msrb.mxu2 %v19603_v63  ;;  %v17111_v3 = vand.u32 4294901760, %v8442_v49 }
 0x764   :  { %v7275_v46 = vpop.f32.mrf.mxu2  ;;  %v8008_v14 = vpop.f32.mrf.mxu3  ;;  %9835 = vmatpush.msra.mxu0 %v9535_v29  ;;  %9207 = vmatpush.msrb.mxu3 %v16892_v25  ;;  %v19606_v29 = vld [vmem:[#allocation61_spill] sm:$0xff] }
 0x765   :  { %v7276_v31 = vadd.f32 %v7275_v46, %v7147_v56  ;;  %8959 = vmatmul.f32.vlgmr.msra.gmra.mxu1 %v8507_v23  ;;  %9116 = vmatpush.msrb.mxu2 %v19604_v54  ;;  %v8522_v25 = vsub.f32 %v8442_v49, %v17111_v3  ;;  %v8443_v59 = vmul.f32 %v8378_v34, %v19606_v29  ;;  %v19610_v49 = vld [vmem:[#allocation45_spill] sm:$0xff] }
 0x766   :  { %9917 = vmatpush.msra.mxu1 %v17048_v45  ;;  %9209 = vmatpush.msrb.mxu3 %v16921_v10  ;;  %v8516_v10 = vsub.f32 %v8514_v8, %v8515_v15  ;;  %v7785_v12 = vadd.f32 %v19611_v24, %v19610_v49 }
 0x767   :  { %v7373_v32 = vadd.f32 %v7372_v44, %v7276_v31  ;;  %v19607_v44 = vld [vmem:[#allocation58_spill] sm:$0xff]  ;;  %v17126_v23 = vand.u32 4294901760, %v8443_v59  ;;  %v8523_v20 = vand.u32 4294901760, %v8522_v25 }
 0x768   :  { %v8171_v6 = vpop.f32.mrf.mxu0  ;;  %9211 = vmatpush.msrb.mxu3 %v16950_v4  ;;  %v7781_v55 = vadd.f32 %v19608_v0, %v19607_v44  ;;  %v8383_v4 = vpop.permute.xlu2 %8382  ;;  %v8517_v37 = vand.u32 4294901760, %v8516_v10  ;;  %v7789_v44 = vadd.f32 %v16667_v13, %v16653_v62  ;;  %v19613_v62 = vld [vmem:[#allocation80_spill] sm:$0xff] }
 0x769   :  { %v17115_v43 = vadd.f32 %v7373_v32, %v16805_v42  ;;  %8510 = vmatmul.f32.vlgmr.msra.gmra.mxu2 %v8509_v11  ;;  %8735 = vmatmul.f32.gmra.mxu3 %v17086_v18  ;;  %v8524_v56 = vsub.f32 %v8522_v25, %v8523_v20  ;;  %v8388_v32 = vpop.permute.xlu0 %8387 }
 0x76a   :  { %v8268_v52 = vpop.f32.mrf.mxu1  ;;  %9621 = vmatpush.msra.mxu2 %v17057_v61  ;;  %9213 = vmatpush.msrb.mxu3 %v16979_v9  ;;  %v8530_v9 = vsub.f32 %v8443_v59, %v17126_v23  ;;  %v19612_v59 = vld [vmem:[#allocation77_spill] sm:$0xff] }
 0x76b   :  { %19605 = vst [vmem:[#allocation56_spill] sm:$0xff] %v17115_v43  ;;  %8850 = vmatmul.f32.gmra.mxu0 %v8514_v8  ;;  %v19609_v8 = vld [vmem:[#allocation64_spill] sm:$0xff]  ;;  %v8525_v54 = vand.u32 4294901760, %v8524_v56 }
 0x76c   :  { %v7894_v7 = vpop.f32.mrf.mxu2  ;;  %v8014_v42 = vpop.f32.mrf.mxu3  ;;  %9719 = vmatpush.msra.mxu3 %v17048_v45  ;;  %v8444_v51 = vmul.f32 %v8383_v4, %v19609_v8  ;;  %v8531_v11 = vand.u32 4294901760, %v8530_v9 }
 0x76d   :  { %v7895_v16 = vadd.f32 %v7894_v7, %v7781_v55  ;;  %8965 = vmatmul.f32.gmra.mxu1 %v8515_v15 }
 0x76e   :  { %v8532_v55 = vsub.f32 %v8530_v9, %v8531_v11 }
 0x76f   :  { %v8009_v61 = vadd.f32 %v8008_v14, %v7895_v16  ;;  %v8393_v16 = vpop.permute.xlu1 %8392 }
 0x770   :  { %v8175_v5 = vpop.f32.mrf.mxu0  ;;  %v8446_v13 = vmul.f32 %v8393_v16, %v19613_v62 }
 0x771   :  { %v8168_v47 = vadd.f32 %v8167_v19, %v8009_v61  ;;  %8518 = vmatmul.f32.gmra.mxu2 %v8517_v37  ;;  %8739 = vmatmul.f32.gmra.mxu3 %v17111_v3  ;;  %v17135_v19 = vand.u32 4294901760, %v8444_v51  ;;  %v8533_v61 = vand.u32 4294901760, %v8532_v55  ;;  %v8403_v16 = vpop.permute.xlu0 %8402 }
 0x772   :  { %v8272_v57 = vpop.f32.mrf.mxu1 }
 0x773   :  { %v17133_v45 = vadd.f32 %v8264_v50, %v8168_v47  ;;  %8855 = vmatmul.f32.gmra.mxu0 %v8522_v25  ;;  %v8538_v50 = vsub.f32 %v8444_v51, %v17135_v19  ;;  %v8445_v25 = vmul.f32 %v8388_v32, %v19612_v59  ;;  %v7793_v51 = vadd.f32 %v16700_v39, %v16686_v22  ;;  %v19614_v22 = vld [vmem:[#allocation66_spill] sm:$0xff] }
 0x774   :  { %v7899_v63 = vpop.f32.mrf.mxu2  ;;  %v8020_v46 = vpop.f32.mrf.mxu3 }
 0x775   :  { %v7900_v14 = vadd.f32 %v7899_v63, %v7785_v12  ;;  %8971 = vmatmul.f32.gmra.mxu1 %v8523_v20  ;;  %v8539_v37 = vand.u32 4294901760, %v8538_v50  ;;  %v17153_v63 = vand.u32 4294901760, %v8446_v13 }
 0x777   :  { %v8015_v31 = vadd.f32 %v8014_v42, %v7900_v14  ;;  %v8540_v49 = vsub.f32 %v8538_v50, %v8539_v37  ;;  %v8554_v32 = vsub.f32 %v8446_v13, %v17153_v63 }
 0x778   :  { %v8179_v15 = vpop.f32.mrf.mxu0 }
 0x779   :  { %v8172_v34 = vadd.f32 %v8171_v6, %v8015_v31  ;;  %8526 = vmatmul.f32.gmra.mxu2 %v8525_v54  ;;  %8743 = vmatmul.f32.gmra.mxu3 %v17126_v23  ;;  %v17144_v6 = vand.u32 4294901760, %v8445_v25  ;;  %v8541_v14 = vand.u32 4294901760, %v8540_v49 }
 0x77a   :  { %v8276_v29 = vpop.f32.mrf.mxu1 }
 0x77b   :  { %v17142_v0 = vadd.f32 %v8268_v52, %v8172_v34  ;;  %8860 = vmatmul.f32.gmra.mxu0 %v8530_v9  ;;  %v8546_v8 = vsub.f32 %v8445_v25, %v17144_v6  ;;  %v7797_v34 = vadd.f32 %v16733_v60, %v16719_v17 }
 0x77c   :  { %v7904_v10 = vpop.f32.mrf.mxu2  ;;  %v8026_v7 = vpop.f32.mrf.mxu3 }
 0x77d   :  { %v7905_v42 = vadd.f32 %v7904_v10, %v7789_v44  ;;  %8977 = vmatmul.f32.gmra.mxu1 %v8531_v11  ;;  %v8547_v31 = vand.u32 4294901760, %v8546_v8 }
 0x77f   :  { %v8021_v4 = vadd.f32 %v8020_v46, %v7905_v42  ;;  %v8548_v59 = vsub.f32 %v8546_v8, %v8547_v31  ;;  %v8555_v42 = vand.u32 4294901760, %v8554_v32 }
 0x780   :  { %v8183_v20 = vpop.f32.mrf.mxu0 }
 0x781   :  { %v8176_v47 = vadd.f32 %v8175_v5, %v8021_v4  ;;  %8534 = vmatmul.f32.gmra.mxu2 %v8533_v61  ;;  %8747 = vmatmul.f32.gmra.mxu3 %v17135_v19  ;;  %v8398_v5 = vpop.permute.xlu2 %8397  ;;  %v8556_v13 = vsub.f32 %v8554_v32, %v8555_v42 }
 0x782   :  { %v8280_v52 = vpop.f32.mrf.mxu1  ;;  %v8447_v39 = vmul.f32 %v8398_v5, %v19614_v22 }
 0x783   :  { %v17151_v9 = vadd.f32 %v8272_v57, %v8176_v47  ;;  %8865 = vmatmul.f32.gmra.mxu0 %v8538_v50  ;;  %v7801_v47 = vadd.f32 %v16766_v35, %v16752_v27  ;;  %v19616_v27 = vld [vmem:[#allocation88_spill] sm:$0xff] }
 0x784   :  { %v7909_v24 = vpop.f32.mrf.mxu2  ;;  %v8032_v12 = vpop.f32.mrf.mxu3 }
 0x785   :  { %v7910_v56 = vadd.f32 %v7909_v24, %v7793_v51  ;;  %8983 = vmatmul.f32.gmra.mxu1 %v8539_v37  ;;  %v8408_v24 = vpop.permute.xlu1 %8407 }
 0x786   :  { %v8449_v35 = vmul.f32 %v8408_v24, %v19616_v27  ;;  %v8418_v24 = vpop.permute.xlu0 %8417  ;;  %v19620_v27 = vld [vmem:[#allocation32_spill] sm:$0xff] }
 0x787   :  { %v8027_v46 = vadd.f32 %v8026_v7, %v7910_v56  ;;  %v8549_v7 = vand.u32 4294901760, %v8548_v59  ;;  %v8557_v56 = vand.u32 4294901760, %v8556_v13 }
 0x788   :  { %v8187_v54 = vpop.f32.mrf.mxu0 }
 0x789   :  { %v8180_v11 = vadd.f32 %v8179_v15, %v8027_v46  ;;  %8542 = vmatmul.f32.gmra.mxu2 %v8541_v14  ;;  %8751 = vmatmul.f32.gmra.mxu3 %v17144_v6  ;;  %v17162_v15 = vand.u32 4294901760, %v8447_v39 }
 0x78a   :  { %v8284_v57 = vpop.f32.mrf.mxu1 }
 0x78b   :  { %v17160_v50 = vadd.f32 %v8276_v29, %v8180_v11  ;;  %8870 = vmatmul.f32.gmra.mxu0 %v8546_v8  ;;  %v8562_v17 = vsub.f32 %v8447_v39, %v17162_v15  ;;  %v19615_v29 = vld [vmem:[#allocation86_spill] sm:$0xff]  ;;  %v7805_v11 = vadd.f32 %v16799_v36, %v16785_v53  ;;  %v19617_v53 = vld [vmem:[#allocation89_spill] sm:$0xff] }
 0x78c   :  { %v7914_v25 = vpop.f32.mrf.mxu2  ;;  %v8038_v44 = vpop.f32.mrf.mxu3  ;;  %v8448_v37 = vmul.f32 %v8403_v16, %v19615_v29 }
 0x78d   :  { %v7915_v55 = vadd.f32 %v7914_v25, %v7797_v34  ;;  %8989 = vmatmul.f32.gmra.mxu1 %v8547_v31  ;;  %v8563_v5 = vand.u32 4294901760, %v8562_v17  ;;  %v17180_v25 = vand.u32 4294901760, %v8449_v35 }
 0x78f   :  { %v8033_v10 = vadd.f32 %v8032_v12, %v7915_v55  ;;  %v8564_v39 = vsub.f32 %v8562_v17, %v8563_v5  ;;  %v8578_v16 = vsub.f32 %v8449_v35, %v17180_v25 }
 0x790   :  { %v8191_v4 = vpop.f32.mrf.mxu0 }
 0x791   :  { %v8184_v61 = vadd.f32 %v8183_v20, %v8033_v10  ;;  %8550 = vmatmul.f32.gmra.mxu2 %v8549_v7  ;;  %8755 = vmatmul.f32.gmra.mxu3 %v17153_v63  ;;  %v17171_v20 = vand.u32 4294901760, %v8448_v37  ;;  %v8565_v55 = vand.u32 4294901760, %v8564_v39 }
 0x792   :  { %v8288_v60 = vpop.f32.mrf.mxu1 }
 0x793   :  { %v17169_v62 = vadd.f32 %v8280_v52, %v8184_v61  ;;  %8875 = vmatmul.f32.gmra.mxu0 %v8554_v32  ;;  %v8570_v31 = vsub.f32 %v8448_v37, %v17171_v20  ;;  %v7809_v61 = vadd.f32 %v16832_v48, %v16818_v58 }
 0x794   :  { %v7919_v8 = vpop.f32.mrf.mxu2  ;;  %v8044_v51 = vpop.f32.mrf.mxu3 }
 0x795   :  { %v7920_v49 = vadd.f32 %v7919_v8, %v7801_v47  ;;  %8995 = vmatmul.f32.gmra.mxu1 %v8555_v42  ;;  %v8571_v10 = vand.u32 4294901760, %v8570_v31 }
 0x797   :  { %v8039_v12 = vadd.f32 %v8038_v44, %v7920_v49  ;;  %v8572_v29 = vsub.f32 %v8570_v31, %v8571_v10  ;;  %v8579_v49 = vand.u32 4294901760, %v8578_v16 }
 0x798   :  { %v8195_v46 = vpop.f32.mrf.mxu0 }
 0x799   :  { %v8188_v14 = vadd.f32 %v8187_v54, %v8039_v12  ;;  %8558 = vmatmul.f32.gmra.mxu2 %v8557_v56  ;;  %8759 = vmatmul.f32.gmra.mxu3 %v17162_v15  ;;  %v8413_v54 = vpop.permute.xlu2 %8412 }
 0x79a   :  { %v8292_v52 = vpop.f32.mrf.mxu1  ;;  %v8450_v36 = vmul.f32 %v8413_v54, %v19617_v53  ;;  %v19621_v53 = vld [vmem:[#allocation31_spill] sm:$0xff] }
 0x79b   :  { %v17178_v22 = vadd.f32 %v8284_v57, %v8188_v14  ;;  %8880 = vmatmul.f32.gmra.mxu0 %v8562_v17  ;;  %v19619_v14 = vld [vmem:[#allocation18_spill] sm:$0xff] }
 0x79c   :  { %v7924_v32 = vpop.f32.mrf.mxu2  ;;  %v8050_v34 = vpop.f32.mrf.mxu3  ;;  %v7813_v35 = vadd.f32 %v19620_v27, %v19619_v14 }
 0x79d   :  { %v7925_v59 = vadd.f32 %v7924_v32, %v7805_v11  ;;  %9001 = vmatmul.f32.gmra.mxu1 %v8563_v5  ;;  %v8580_v11 = vsub.f32 %v8578_v16, %v8579_v49 }
 0x79f   :  { %v8045_v44 = vadd.f32 %v8044_v51, %v7925_v59  ;;  %v8573_v51 = vand.u32 4294901760, %v8572_v29  ;;  %v8423_v59 = vpop.permute.xlu1 %8422  ;;  %v19623_v29 = vld [vmem:[#allocation15_spill] sm:$0xff] }
 0x7a0   :  { %v8199_v7 = vpop.f32.mrf.mxu0 }
 0x7a1   :  { %v8192_v42 = vadd.f32 %v8191_v4, %v8045_v44  ;;  %8566 = vmatmul.f32.gmra.mxu2 %v8565_v55  ;;  %8763 = vmatmul.f32.gmra.mxu3 %v17171_v20  ;;  %v17189_v4 = vand.u32 4294901760, %v8450_v36  ;;  %v8581_v44 = vand.u32 4294901760, %v8580_v11 }
 0x7a2   :  { %v8296_v57 = vpop.f32.mrf.mxu1 }
 0x7a3   :  { %v17187_v17 = vadd.f32 %v8288_v60, %v8192_v42  ;;  %8885 = vmatmul.f32.gmra.mxu0 %v8570_v31  ;;  %v8586_v58 = vsub.f32 %v8450_v36, %v17189_v4  ;;  %v19618_v60 = vld [vmem:[#allocation91_spill] sm:$0xff] }
 0x7a4   :  { %v7929_v37 = vpop.f32.mrf.mxu2  ;;  %v8056_v47 = vpop.f32.mrf.mxu3  ;;  %v8451_v5 = vmul.f32 %v8418_v24, %v19618_v60 }
 0x7a5   :  { %v7930_v13 = vadd.f32 %v7929_v37, %v7809_v61  ;;  %9007 = vmatmul.f32.gmra.mxu1 %v8571_v10  ;;  %v8587_v55 = vand.u32 4294901760, %v8586_v58  ;;  %v19622_v61 = vld [vmem:[#allocation67_spill] sm:$0xff] }
 0x7a6   :  { %v7817_v37 = vadd.f32 %v19623_v29, %v19622_v61 }
 0x7a7   :  { %v8051_v8 = vadd.f32 %v8050_v34, %v7930_v13 }
 0x7a8   :  { %v8203_v12 = vpop.f32.mrf.mxu0 }
 0x7a9   :  { %v8196_v56 = vadd.f32 %v8195_v46, %v8051_v8  ;;  %8574 = vmatmul.f32.gmra.mxu2 %v8573_v51  ;;  %8767 = vmatmul.f32.gmra.mxu3 %v17180_v25  ;;  %v17198_v46 = vand.u32 4294901760, %v8451_v5  ;;  %v8588_v8 = vsub.f32 %v8586_v58, %v8587_v55 }
 0x7aa   :  { %v8300_v48 = vpop.f32.mrf.mxu1 }
 0x7ab   :  { %v17196_v31 = vadd.f32 %v8292_v52, %v8196_v56  ;;  %8890 = vmatmul.f32.gmra.mxu0 %v8578_v16  ;;  %v8452_v52 = vmul.f32 %v8423_v59, %v19621_v53  ;;  %v8594_v16 = vsub.f32 %v8451_v5, %v17198_v46  ;;  %v8589_v60 = vand.u32 4294901760, %v8588_v8  ;;  %v19624_v5 = vld [vmem:[#allocation43_spill] sm:$0xff] }
 0x7ac   :  { %v7934_v39 = vpop.f32.mrf.mxu2  ;;  %v8062_v32 = vpop.f32.mrf.mxu3 }
 0x7ad   :  { %v7935_v34 = vadd.f32 %v7934_v39, %v7813_v35  ;;  %9013 = vmatmul.f32.gmra.mxu1 %v8579_v49  ;;  %v17207_v24 = vand.u32 4294901760, %v8452_v52  ;;  %v8595_v14 = vand.u32 4294901760, %v8594_v16  ;;  %v19625_v39 = vld [vmem:[#allocation37_spill] sm:$0xff] }
 0x7af   :  { %v8057_v54 = vadd.f32 %v8056_v47, %v7935_v34  ;;  %v19626_v34 = vld [vmem:[#allocation105_spill] sm:$0xff] }
 0x7b0   :  { %v8207_v10 = vpop.f32.mrf.mxu0  ;;  %v7821_v59 = vadd.f32 %v19626_v34, %v19625_v39  ;;  %v8438_v34 = vpop.permute.xlu1 %8437 }
 0x7b1   :  { %v8200_v42 = vadd.f32 %v8199_v7, %v8057_v54  ;;  %8582 = vmatmul.f32.gmra.mxu2 %v8581_v44  ;;  %8771 = vmatmul.f32.gmra.mxu3 %v17189_v4  ;;  %v8428_v7 = vpop.permute.xlu2 %8427  ;;  %v8596_v44 = vsub.f32 %v8594_v16, %v8595_v14 }
 0x7b2   :  { %v8304_v36 = vpop.f32.mrf.mxu1 }
 0x7b3   :  { %v17205_v13 = vadd.f32 %v8296_v57, %v8200_v42  ;;  %8895 = vmatmul.f32.gmra.mxu0 %v8586_v58  ;;  %v8453_v57 = vmul.f32 %v8428_v7, %v19624_v5  ;;  %v8602_v58 = vsub.f32 %v8452_v52, %v17207_v24  ;;  %v8597_v61 = vand.u32 4294901760, %v8596_v44  ;;  %v19628_v7 = vld [vmem:[#allocation69_spill] sm:$0xff] }
 0x7b4   :  { %v7939_v47 = vpop.f32.mrf.mxu2  ;;  %v8068_v51 = vpop.f32.mrf.mxu3 }
 0x7b5   :  { %v7940_v49 = vadd.f32 %v7939_v47, %v7817_v37  ;;  %9019 = vmatmul.f32.gmra.mxu1 %v8587_v55  ;;  %v8603_v29 = vand.u32 4294901760, %v8602_v58  ;;  %v8433_v37 = vpop.permute.xlu0 %8432 }
 0x7b7   :  { %v8063_v56 = vadd.f32 %v8062_v32, %v7940_v49  ;;  %v19627_v49 = vld [vmem:[#allocation52_spill] sm:$0xff] }
 0x7b8   :  { %v8211_v27 = vpop.f32.mrf.mxu0 }
 0x7b9   :  { %v8204_v35 = vadd.f32 %v8203_v12, %v8063_v56  ;;  %8590 = vmatmul.f32.gmra.mxu2 %v8589_v60  ;;  %8775 = vmatmul.f32.gmra.mxu3 %v17198_v46  ;;  %v17216_v12 = vand.u32 4294901760, %v8453_v57  ;;  %v19629_v56 = vld [vmem:[#allocation60_spill] sm:$0xff] }
 0x7ba   :  { %v8308_v11 = vpop.f32.mrf.mxu1  ;;  %v7825_v60 = vadd.f32 %v19629_v56, %v19628_v7 }
 0x7bb   :  { %v17214_v54 = vadd.f32 %v8300_v48, %v8204_v35  ;;  %8900 = vmatmul.f32.gmra.mxu0 %v8594_v16  ;;  %v8610_v48 = vsub.f32 %v8453_v57, %v17216_v12  ;;  %v8454_v16 = vmul.f32 %v8433_v37, %v19627_v49  ;;  %v19631_v37 = vld [vmem:[#allocation68_spill] sm:$0xff] }
 0x7bc   :  { %v7944_v32 = vpop.f32.mrf.mxu2  ;;  %v8074_v55 = vpop.f32.mrf.mxu3 }
 0x7bd   :  { %v7945_v42 = vadd.f32 %v7944_v32, %v7821_v59  ;;  %9025 = vmatmul.f32.gmra.mxu1 %v8595_v14  ;;  %v8611_v57 = vand.u32 4294901760, %v8610_v48 }
 0x7bf   :  { %v8069_v53 = vadd.f32 %v8068_v51, %v7945_v42  ;;  %v8604_v51 = vsub.f32 %v8602_v58, %v8603_v29  ;;  %v8612_v7 = vsub.f32 %v8610_v48, %v8611_v57 }
 0x7c0   :  { %v8215_v8 = vpop.f32.mrf.mxu0 }
 0x7c1   :  { %v8208_v47 = vadd.f32 %v8207_v10, %v8069_v53  ;;  %8598 = vmatmul.f32.gmra.mxu2 %v8597_v61  ;;  %8779 = vmatmul.f32.gmra.mxu3 %v17207_v24  ;;  %v17225_v10 = vand.u32 4294901760, %v8454_v16  ;;  %v8605_v44 = vand.u32 4294901760, %v8604_v51  ;;  %v19630_v53 = vld [vmem:[#allocation10_spill] sm:$0xff] }
 0x7c2   :  { %v8312_v52 = vpop.f32.mrf.mxu1 }
 0x7c3   :  { %v17223_v14 = vadd.f32 %v8304_v36, %v8208_v47  ;;  %8905 = vmatmul.f32.gmra.mxu0 %v8602_v58  ;;  %v8455_v36 = vmul.f32 %v8438_v34, %v19630_v53  ;;  %v8618_v58 = vsub.f32 %v8454_v16, %v17225_v10  ;;  %v19632_v47 = vld [vmem:[#allocation36_spill] sm:$0xff] }
 0x7c4   :  { %v7949_v35 = vpop.f32.mrf.mxu2  ;;  %v8080_v5 = vpop.f32.mrf.mxu3  ;;  %v7829_v49 = vadd.f32 %v19632_v47, %v19631_v37 }
 0x7c5   :  { %v7950_v39 = vadd.f32 %v7949_v35, %v7825_v60  ;;  %9031 = vmatmul.f32.gmra.mxu1 %v8603_v29  ;;  %v8613_v35 = vand.u32 4294901760, %v8612_v7 }
 0x7c7   :  { %v8075_v59 = vadd.f32 %v8074_v55, %v7950_v39  ;;  %v8619_v39 = vand.u32 4294901760, %v8618_v58 }
 0x7c8   :  { %v8219_v32 = vpop.f32.mrf.mxu0 }
 0x7c9   :  { %v8212_v42 = vadd.f32 %v8211_v27, %v8075_v59  ;;  %8606 = vmatmul.f32.gmra.mxu2 %v8605_v44  ;;  %8783 = vmatmul.f32.gmra.mxu3 %v17216_v12  ;;  %v17234_v27 = vand.u32 4294901760, %v8455_v36  ;;  %v19633_v44 = vld [vmem:[#allocation16_spill] sm:$0xff] }
 0x7ca   :  { %v8316_v61 = vpop.f32.mrf.mxu1 }
 0x7cb   :  { %v17232_v29 = vadd.f32 %v8308_v11, %v8212_v42  ;;  %8910 = vmatmul.f32.gmra.mxu0 %v8610_v48  ;;  %v8626_v16 = vsub.f32 %v8455_v36, %v17234_v27  ;;  %v54_v48 = vld [vmem:[%s17936_s6] sm:$0xff] }
 0x7cc   :  { %v7954_v55 = vpop.f32.mrf.mxu2  ;;  %v8086_v56 = vpop.f32.mrf.mxu3 }
 0x7cd   :  { %v7955_v60 = vadd.f32 %v7954_v55, %v7829_v49  ;;  %9037 = vmatmul.f32.gmra.mxu1 %v8611_v57  ;;  %v7833_v57 = vadd.f32 %v17007_v41, %v19633_v44  ;;  %v8627_v49 = vand.u32 4294901760, %v8626_v16 }
 0x7cf   :  { %v8081_v51 = vadd.f32 %v8080_v5, %v7955_v60  ;;  %v8620_v5 = vsub.f32 %v8618_v58, %v8619_v39 }
 0x7d0   :  { %v8223_v34 = vpop.f32.mrf.mxu0 }
 0x7d1   :  { %v8216_v59 = vadd.f32 %v8215_v8, %v8081_v51  ;;  %8614 = vmatmul.f32.gmra.mxu2 %v8613_v35  ;;  %8787 = vmatmul.f32.gmra.mxu3 %v17225_v10  ;;  %v9322_v8 = vsel %vm9320_vm4, %v54_v48, 0  ;;  %v8621_v60 = vand.u32 4294901760, %v8620_v5  ;;  %v8628_v35 = vsub.f32 %v8626_v16, %v8627_v49 }
 0x7d2   :  { %v8320_v11 = vpop.f32.mrf.mxu1  ;;  %v17246_v47 = vand.u32 4294901760, %v9322_v8 }
 0x7d3   :  { %v17243_v42 = vadd.f32 %v8312_v52, %v8216_v59  ;;  %8915 = vmatmul.f32.gmra.mxu0 %v8618_v58  ;;  %v55_v59 = vld [vmem:[%s17936_s6 + $0x8] sm:$0xff] }
 0x7d4   :  { %v7959_v53 = vpop.f32.mrf.mxu2  ;;  %v8092_v37 = vpop.f32.mrf.mxu3  ;;  %v17249_v7 = vsub.f32 %v9322_v8, %v17246_v47 }
 0x7d5   :  { %v7960_v36 = vadd.f32 %v7959_v53, %v7833_v57  ;;  %9043 = vmatmul.f32.gmra.mxu1 %v8619_v39  ;;  %v7837_v39 = vadd.f32 %v17031_v30, %v17021_v26  ;;  %v8629_v26 = vand.u32 4294901760, %v8628_v35 }
 0x7d6   :  { %v18439_v41 = vand.u32 4294901760, %v17249_v7 }
 0x7d7   :  { %v8087_v55 = vadd.f32 %v8086_v56, %v7960_v36 }
 0x7d8   :  { %v8227_v51 = vpop.f32.mrf.mxu0  ;;  %v9392_v56 = vsub.f32 %v17249_v7, %v18439_v41 }
 0x7d9   :  { %v8220_v52 = vadd.f32 %v8219_v32, %v8087_v55  ;;  %8622 = vmatmul.f32.gmra.mxu2 %v8621_v60  ;;  %8791 = vmatmul.f32.gmra.mxu3 %v17234_v27  ;;  %v9325_v32 = vsel %vm9320_vm4, %v55_v59, 0 }
 0x7da   :  { %v8324_v58 = vpop.f32.mrf.mxu1  ;;  %v17264_v5 = vand.u32 4294901760, %v9325_v32  ;;  %v9393_v30 = vand.u32 4294901760, %v9392_v56 }
 0x7db   :  { %v17258_v48 = vadd.f32 %v8316_v61, %v8220_v52  ;;  %8920 = vmatmul.f32.gmra.mxu0 %v8626_v16  ;;  %v56_v52 = vld [vmem:[%s17936_s6 + $0x10] sm:$0xff] }
 0x7dc   :  { %v7964_v44 = vpop.f32.mrf.mxu2  ;;  %v8098_v57 = vpop.f32.mrf.mxu3  ;;  %v17267_v53 = vsub.f32 %v9325_v32, %v17264_v5 }
 0x7dd   :  { %v7965_v8 = vadd.f32 %v7964_v44, %v7837_v39  ;;  %9049 = vmatmul.f32.gmra.mxu1 %v8627_v49  ;;  %v7841_v49 = vadd.f32 %v17071_v2, %v17059_v38 }
 0x7de   :  { %v18437_v16 = vand.u32 4294901760, %v17267_v53 }
 0x7df   :  { %v8093_v36 = vadd.f32 %v8092_v37, %v7965_v8 }
 0x7e0   :  { %v8846_v61 = vpop.f32.mrf.mxu0  ;;  %v9400_v37 = vsub.f32 %v17267_v53, %v18437_v16 }
 0x7e1   :  { %v8224_v55 = vadd.f32 %v8223_v34, %v8093_v36  ;;  %8630 = vmatmul.f32.gmra.mxu2 %v8629_v26  ;;  %9215 = vmatmul.f32.vlgmr.msrb.gmra.mxu3 %v17053_v40  ;;  %v9328_v34 = vsel %vm9320_vm4, %v56_v52, 0 }
 0x7e2   :  { %v17271_v60 = vpop.f32.mrf.mxu1  ;;  %v17284_v56 = vand.u32 4294901760, %v9328_v34  ;;  %v9401_v2 = vand.u32 4294901760, %v9400_v37 }
 0x7e3   :  { %v17278_v59 = vadd.f32 %v8320_v11, %v8224_v55  ;;  %9394 = vmatmul.f32.vlgmr.msrb.gmra.mxu0 %v9393_v30  ;;  %v57_v30 = vld [vmem:[%s17936_s6 + $0x18] sm:$0xff] }
 0x7e4   :  { %v7969_v35 = vpop.f32.mrf.mxu2  ;;  %v8732_v39 = vpop.f32.mrf.mxu3  ;;  %v17288_v44 = vsub.f32 %v9328_v34, %v17284_v56  ;;  %v9331_v52 = vsel %vm9320_vm4, %v57_v30, 0 }
 0x7e5   :  { %19634 = vst [vmem:[#allocation35_spill] sm:$0xff] %v17278_v59  ;;  %v7970_v32 = vadd.f32 %v7969_v35, %v7841_v49  ;;  %9540 = vmatmul.f32.vlgmr.msrb.gmra.mxu1 %v17246_v47 }
 0x7e6   :  { %v18436_v8 = vand.u32 4294901760, %v17288_v44 }
 0x7e7   :  { %v8099_v38 = vadd.f32 %v8098_v57, %v7970_v32 }
 0x7e8   :  { %v8851_v11 = vpop.f32.mrf.mxu0  ;;  %v9408_v57 = vsub.f32 %v17288_v44, %v18436_v8 }
 0x7e9   :  { %v8228_v36 = vadd.f32 %v8227_v51, %v8099_v38  ;;  %9118 = vmatmul.f32.vlgmr.msrb.gmra.mxu2 %v17053_v40  ;;  %9219 = vmatmul.f32.gmra.mxu3 %v17086_v18  ;;  %v17304_v40 = vand.u32 4294901760, %v9331_v52 }
 0x7ea   :  { %v17293_v26 = vpop.f32.mrf.mxu1 }
 0x7eb   :  { %v17298_v55 = vadd.f32 %v8324_v58, %v8228_v36  ;;  %9402 = vmatmul.f32.gmra.mxu0 %v9401_v2  ;;  %v17308_v34 = vsub.f32 %v9331_v52, %v17304_v40  ;;  %v9409_v58 = vand.u32 4294901760, %v9408_v57 }
 0x7ec   :  { %v8511_v51 = vpop.f32.mrf.mxu2  ;;  %v8736_v49 = vpop.f32.mrf.mxu3 }
 0x7ed   :  { %19635 = vst [vmem:[#allocation40_spill] sm:$0xff] %v17298_v55  ;;  %v8733_v37 = vadd.f32 %v8732_v39, %v8511_v51  ;;  %9544 = vmatmul.f32.gmra.mxu1 %v17264_v5  ;;  %v18438_v38 = vand.u32 4294901760, %v17308_v34  ;;  %v58_v39 = vld [vmem:[%s17936_s6 + $0x20] sm:$0xff] }
 0x7ee   :  { %v9334_v36 = vsel %vm9320_vm4, %v58_v39, 0 }
 0x7ef   :  { %v17310_v35 = vadd.f32 %v8846_v61, %v8733_v37  ;;  %v9416_v61 = vsub.f32 %v17308_v34, %v18438_v38  ;;  %v17324_v52 = vand.u32 4294901760, %v9334_v36 }
 0x7f0   :  { %v8856_v32 = vpop.f32.mrf.mxu0 }
 0x7f1   :  { %9122 = vmatmul.f32.gmra.mxu2 %v17086_v18  ;;  %9223 = vmatmul.f32.gmra.mxu3 %v17111_v3  ;;  %19636 = vst [vmem:[#allocation84_spill] sm:$0xff] %v17324_v52  ;;  %v17328_v51 = vsub.f32 %v9334_v36, %v17324_v52  ;;  %v9417_v8 = vand.u32 4294901760, %v9416_v61 }
 0x7f2   :  { %v17315_v2 = vpop.f32.mrf.mxu1 }
 0x7f3   :  { %9410 = vmatmul.f32.gmra.mxu0 %v9409_v58  ;;  %v18440_v16 = vand.u32 4294901760, %v17328_v51 }
 0x7f4   :  { %v8519_v30 = vpop.f32.mrf.mxu2  ;;  %v8740_v57 = vpop.f32.mrf.mxu3 }
 0x7f5   :  { %v8737_v18 = vadd.f32 %v8736_v49, %v8519_v30  ;;  %9548 = vmatmul.f32.gmra.mxu1 %v17284_v56  ;;  %v59_v49 = vld [vmem:[%s17936_s6 + $0x28] sm:$0xff] }
 0x7f6   :  { %v9337_v61 = vsel %vm9320_vm4, %v59_v49, 0 }
 0x7f7   :  { %v17330_v37 = vadd.f32 %v8851_v11, %v8737_v18  ;;  %v9424_v11 = vsub.f32 %v17328_v51, %v18440_v16  ;;  %v17344_v18 = vand.u32 4294901760, %v9337_v61 }
 0x7f8   :  { %v8861_v58 = vpop.f32.mrf.mxu0 }
 0x7f9   :  { %9126 = vmatmul.f32.gmra.mxu2 %v17111_v3  ;;  %9227 = vmatmul.f32.gmra.mxu3 %v17126_v23  ;;  %19637 = vst [vmem:[#allocation20_spill] sm:$0xff] %v17344_v18  ;;  %v17348_v38 = vsub.f32 %v9337_v61, %v17344_v18  ;;  %v9425_v55 = vand.u32 4294901760, %v9424_v11 }
 0x7fa   :  { %v17335_v39 = vpop.f32.mrf.mxu1 }
 0x7fb   :  { %9418 = vmatmul.f32.gmra.mxu0 %v9417_v8  ;;  %19638 = vst [vmem:[#allocation73_spill] sm:$0xff] %v17348_v38  ;;  %v18441_v43 = vand.u32 4294901760, %v17348_v38 }
 0x7fc   :  { %v8527_v36 = vpop.f32.mrf.mxu2  ;;  %v8744_v30 = vpop.f32.mrf.mxu3 }
 0x7fd   :  { %v8741_v3 = vadd.f32 %v8740_v57, %v8527_v36  ;;  %9552 = vmatmul.f32.gmra.mxu1 %v17304_v40  ;;  %v60_v57 = vld [vmem:[%s17936_s6 + $0x30] sm:$0xff] }
 0x7fe   :  { %v9340_v11 = vsel %vm9320_vm4, %v60_v57, 0 }
 0x7ff   :  { %v17350_v41 = vadd.f32 %v8856_v32, %v8741_v3  ;;  %v9432_v32 = vsub.f32 %v17348_v38, %v18441_v43  ;;  %v17364_v3 = vand.u32 4294901760, %v9340_v11 }
 0x800   :  { %v8866_v8 = vpop.f32.mrf.mxu0 }
 0x801   :  { %9130 = vmatmul.f32.gmra.mxu2 %v17126_v23  ;;  %9231 = vmatmul.f32.gmra.mxu3 %v17135_v19  ;;  %19640 = vst [vmem:[#allocation94_spill] sm:$0xff] %v17364_v3  ;;  %v17368_v16 = vsub.f32 %v9340_v11, %v17364_v3  ;;  %v9433_v59 = vand.u32 4294901760, %v9432_v32 }
 0x802   :  { %v17355_v49 = vpop.f32.mrf.mxu1 }
 0x803   :  { %19639 = vst [vmem:[#allocation48_spill] sm:$0xff] %v17355_v49  ;;  %9426 = vmatmul.f32.gmra.mxu0 %v9425_v55  ;;  %v18446_v33 = vand.u32 4294901760, %v17368_v16 }
 0x804   :  { %v8535_v61 = vpop.f32.mrf.mxu2  ;;  %v8748_v36 = vpop.f32.mrf.mxu3  ;;  %19641 = vst [vmem:[#allocation28_spill] sm:$0xff] %v17368_v16 }
 0x805   :  { %v8745_v23 = vadd.f32 %v8744_v30, %v8535_v61  ;;  %9556 = vmatmul.f32.gmra.mxu1 %v17324_v52  ;;  %v61_v30 = vld [vmem:[%s17936_s6 + $0x38] sm:$0xff] }
 0x806   :  { %v9343_v32 = vsel %vm9320_vm4, %v61_v30, 0 }
 0x807   :  { %v17370_v49 = vadd.f32 %v8861_v58, %v8745_v23  ;;  %v9440_v58 = vsub.f32 %v17368_v16, %v18446_v33  ;;  %v17384_v23 = vand.u32 4294901760, %v9343_v32 }
 0x808   :  { %v8871_v55 = vpop.f32.mrf.mxu0 }
 0x809   :  { %9134 = vmatmul.f32.gmra.mxu2 %v17135_v19  ;;  %9235 = vmatmul.f32.gmra.mxu3 %v17144_v6  ;;  %19643 = vst [vmem:[#allocation99_spill] sm:$0xff] %v17384_v23  ;;  %v17388_v43 = vsub.f32 %v9343_v32, %v17384_v23  ;;  %v9441_v38 = vand.u32 4294901760, %v9440_v58 }
 0x80a   :  { %v17375_v57 = vpop.f32.mrf.mxu1 }
 0x80b   :  { %19642 = vst [vmem:[#allocation72_spill] sm:$0xff] %v17375_v57  ;;  %9434 = vmatmul.f32.gmra.mxu0 %v9433_v59  ;;  %v18451_v52 = vand.u32 4294901760, %v17388_v43 }
 0x80c   :  { %v8543_v11 = vpop.f32.mrf.mxu2  ;;  %v8752_v61 = vpop.f32.mrf.mxu3  ;;  %19644 = vst [vmem:[#allocation102_spill] sm:$0xff] %v17388_v43 }
 0x80d   :  { %v8749_v19 = vadd.f32 %v8748_v36, %v8543_v11  ;;  %9560 = vmatmul.f32.gmra.mxu1 %v17344_v18  ;;  %v62_v36 = vld [vmem:[%s17936_s6 + $0x40] sm:$0xff] }
 0x80e   :  { %v9346_v58 = vsel %vm9320_vm4, %v62_v36, 0 }
 0x80f   :  { %v17390_v57 = vadd.f32 %v8866_v8, %v8749_v19  ;;  %v9448_v8 = vsub.f32 %v17388_v43, %v18451_v52  ;;  %v17404_v19 = vand.u32 4294901760, %v9346_v58 }
 0x810   :  { %v8876_v59 = vpop.f32.mrf.mxu0 }
 0x811   :  { %9138 = vmatmul.f32.gmra.mxu2 %v17144_v6  ;;  %9239 = vmatmul.f32.gmra.mxu3 %v17153_v63  ;;  %19646 = vst [vmem:[#allocation93_spill] sm:$0xff] %v17404_v19  ;;  %v17408_v33 = vsub.f32 %v9346_v58, %v17404_v19  ;;  %v9449_v16 = vand.u32 4294901760, %v9448_v8 }
 0x812   :  { %v17395_v30 = vpop.f32.mrf.mxu1 }
 0x813   :  { %19645 = vst [vmem:[#allocation55_spill] sm:$0xff] %v17395_v30  ;;  %9442 = vmatmul.f32.gmra.mxu0 %v9441_v38  ;;  %v18456_v18 = vand.u32 4294901760, %v17408_v33 }
 0x814   :  { %v8551_v32 = vpop.f32.mrf.mxu2  ;;  %v8756_v11 = vpop.f32.mrf.mxu3  ;;  %19647 = vst [vmem:[#allocation24_spill] sm:$0xff] %v17408_v33 }
 0x815   :  { %v8753_v6 = vadd.f32 %v8752_v61, %v8551_v32  ;;  %9564 = vmatmul.f32.gmra.mxu1 %v17364_v3  ;;  %v63_v61 = vld [vmem:[%s17936_s6 + $0x48] sm:$0xff] }
 0x816   :  { %v19649_v32 = vld [vmem:[#allocation26_spill] sm:$0xff]  ;;  %v9349_v8 = vsel %vm9320_vm4, %v63_v61, 0 }
 0x817   :  { %v17410_v30 = vadd.f32 %v8871_v55, %v8753_v6  ;;  %v17422_v58 = vadd.f32 %v17133_v45, %v19649_v32  ;;  %v9456_v55 = vsub.f32 %v17408_v33, %v18456_v18  ;;  %v17428_v52 = vand.u32 4294901760, %v9349_v8 }
 0x818   :  { %v8881_v38 = vpop.f32.mrf.mxu0 }
 0x819   :  { %9142 = vmatmul.f32.gmra.mxu2 %v17153_v63  ;;  %9243 = vmatmul.f32.gmra.mxu3 %v17162_v15  ;;  %19650 = vst [vmem:[#allocation53_spill] sm:$0xff] %v17428_v52  ;;  %v17432_v43 = vsub.f32 %v9349_v8, %v17428_v52  ;;  %v9457_v45 = vand.u32 4294901760, %v9456_v55 }
 0x81a   :  { %v17415_v36 = vpop.f32.mrf.mxu1 }
 0x81b   :  { %19648 = vst [vmem:[#allocation54_spill] sm:$0xff] %v17415_v36  ;;  %9450 = vmatmul.f32.gmra.mxu0 %v9449_v16  ;;  %v18461_v32 = vand.u32 4294901760, %v17432_v43 }
 0x81c   :  { %v8559_v63 = vpop.f32.mrf.mxu2  ;;  %v8760_v6 = vpop.f32.mrf.mxu3  ;;  %19651 = vst [vmem:[#allocation83_spill] sm:$0xff] %v17432_v43 }
 0x81d   :  { %v8757_v36 = vadd.f32 %v8756_v11, %v8559_v63  ;;  %9568 = vmatmul.f32.gmra.mxu1 %v17384_v23  ;;  %v64_v11 = vld [vmem:[%s17936_s6 + $0x50] sm:$0xff]  ;;  %v19653_v63 = vld [vmem:[#allocation76_spill] sm:$0xff] }
 0x81e   :  { %v17446_v8 = vadd.f32 %v17142_v0, %v19653_v63 }
 0x81f   :  { %v17434_v3 = vadd.f32 %v8876_v59, %v8757_v36  ;;  %v9464_v59 = vsub.f32 %v17432_v43, %v18461_v32  ;;  %v9352_v36 = vsel %vm9320_vm4, %v64_v11, 0 }
 0x820   :  { %v8886_v16 = vpop.f32.mrf.mxu0  ;;  %v17452_v18 = vand.u32 4294901760, %v9352_v36 }
 0x821   :  { %9146 = vmatmul.f32.gmra.mxu2 %v17162_v15  ;;  %9247 = vmatmul.f32.gmra.mxu3 %v17171_v20  ;;  %v9465_v0 = vand.u32 4294901760, %v9464_v59 }
 0x822   :  { %v17439_v61 = vpop.f32.mrf.mxu1  ;;  %19654 = vst [vmem:[#allocation104_spill] sm:$0xff] %v17452_v18  ;;  %v17456_v33 = vsub.f32 %v9352_v36, %v17452_v18 }
 0x823   :  { %19652 = vst [vmem:[#allocation71_spill] sm:$0xff] %v17439_v61  ;;  %9458 = vmatmul.f32.gmra.mxu0 %v9457_v45 }
 0x824   :  { %v8567_v15 = vpop.f32.mrf.mxu2  ;;  %v8764_v55 = vpop.f32.mrf.mxu3  ;;  %19655 = vst [vmem:[#allocation46_spill] sm:$0xff] %v17456_v33  ;;  %v18466_v63 = vand.u32 4294901760, %v17456_v33 }
 0x825   :  { %v8761_v61 = vadd.f32 %v8760_v6, %v8567_v15  ;;  %9572 = vmatmul.f32.gmra.mxu1 %v17404_v19  ;;  %v65_v6 = vld [vmem:[%s17936_s6 + $0x58] sm:$0xff]  ;;  %v19657_v15 = vld [vmem:[#allocation17_spill] sm:$0xff] }
 0x826   :  { %v17470_v36 = vadd.f32 %v17151_v9, %v19657_v15 }
 0x827   :  { %v17458_v23 = vadd.f32 %v8881_v38, %v8761_v61  ;;  %v9472_v38 = vsub.f32 %v17456_v33, %v18466_v63  ;;  %v9355_v61 = vsel %vm9320_vm4, %v65_v6, 0 }
 0x828   :  { %v8891_v45 = vpop.f32.mrf.mxu0  ;;  %v17476_v32 = vand.u32 4294901760, %v9355_v61 }
 0x829   :  { %9150 = vmatmul.f32.gmra.mxu2 %v17171_v20  ;;  %9251 = vmatmul.f32.gmra.mxu3 %v17180_v25  ;;  %v9473_v9 = vand.u32 4294901760, %v9472_v38 }
 0x82a   :  { %v17463_v11 = vpop.f32.mrf.mxu1  ;;  %19658 = vst [vmem:[#allocation78_spill] sm:$0xff] %v17476_v32  ;;  %v17480_v43 = vsub.f32 %v9355_v61, %v17476_v32 }
 0x82b   :  { %19656 = vst [vmem:[#allocation107_spill] sm:$0xff] %v17463_v11  ;;  %9466 = vmatmul.f32.gmra.mxu0 %v9465_v0 }
 0x82c   :  { %v8575_v20 = vpop.f32.mrf.mxu2  ;;  %v8768_v59 = vpop.f32.mrf.mxu3  ;;  %19659 = vst [vmem:[#allocation106_spill] sm:$0xff] %v17480_v43  ;;  %v18471_v15 = vand.u32 4294901760, %v17480_v43 }
 0x82d   :  { %v8765_v11 = vadd.f32 %v8764_v55, %v8575_v20  ;;  %9576 = vmatmul.f32.gmra.mxu1 %v17428_v52  ;;  %v66_v55 = vld [vmem:[%s17936_s6 + $0x60] sm:$0xff]  ;;  %v19661_v20 = vld [vmem:[#allocation87_spill] sm:$0xff] }
 0x82e   :  { %v17494_v61 = vadd.f32 %v17160_v50, %v19661_v20 }
 0x82f   :  { %v17482_v19 = vadd.f32 %v8886_v16, %v8765_v11  ;;  %v9480_v16 = vsub.f32 %v17480_v43, %v18471_v15  ;;  %v9358_v11 = vsel %vm9320_vm4, %v66_v55, 0 }
 0x830   :  { %v8896_v0 = vpop.f32.mrf.mxu0  ;;  %v17500_v63 = vand.u32 4294901760, %v9358_v11 }
 0x831   :  { %9154 = vmatmul.f32.gmra.mxu2 %v17180_v25  ;;  %9255 = vmatmul.f32.gmra.mxu3 %v17189_v4  ;;  %v9481_v50 = vand.u32 4294901760, %v9480_v16 }
 0x832   :  { %v17487_v6 = vpop.f32.mrf.mxu1  ;;  %19662 = vst [vmem:[#allocation70_spill] sm:$0xff] %v17500_v63  ;;  %v17504_v33 = vsub.f32 %v9358_v11, %v17500_v63 }
 0x833   :  { %19660 = vst [vmem:[#allocation47_spill] sm:$0xff] %v17487_v6  ;;  %9474 = vmatmul.f32.gmra.mxu0 %v9473_v9 }
 0x834   :  { %v8583_v25 = vpop.f32.mrf.mxu2  ;;  %v8772_v38 = vpop.f32.mrf.mxu3  ;;  %19663 = vst [vmem:[#allocation100_spill] sm:$0xff] %v17504_v33  ;;  %v18476_v20 = vand.u32 4294901760, %v17504_v33 }
 0x835   :  { %v8769_v6 = vadd.f32 %v8768_v59, %v8583_v25  ;;  %9580 = vmatmul.f32.gmra.mxu1 %v17452_v18  ;;  %v67_v59 = vld [vmem:[%s17936_s6 + $0x68] sm:$0xff]  ;;  %v19665_v25 = vld [vmem:[#allocation33_spill] sm:$0xff] }
 0x836   :  { %v17518_v11 = vadd.f32 %v17169_v62, %v19665_v25 }
 0x837   :  { %v17506_v52 = vadd.f32 %v8891_v45, %v8769_v6  ;;  %v9488_v45 = vsub.f32 %v17504_v33, %v18476_v20  ;;  %v9361_v6 = vsel %vm9320_vm4, %v67_v59, 0  ;;  %v68_v59 = vld [vmem:[%s17936_s6 + $0x70] sm:$0xff] }
 0x838   :  { %v8901_v9 = vpop.f32.mrf.mxu0  ;;  %v17524_v15 = vand.u32 4294901760, %v9361_v6 }
 0x839   :  { %9158 = vmatmul.f32.gmra.mxu2 %v17189_v4  ;;  %9259 = vmatmul.f32.gmra.mxu3 %v17198_v46  ;;  %v9489_v62 = vand.u32 4294901760, %v9488_v45 }
 0x83a   :  { %v17511_v55 = vpop.f32.mrf.mxu1  ;;  %v17528_v43 = vsub.f32 %v9361_v6, %v17524_v15  ;;  %v19668_v6 = vld [vmem:[#allocation85_spill] sm:$0xff] }
 0x83b   :  { %19664 = vst [vmem:[#allocation41_spill] sm:$0xff] %v17511_v55  ;;  %9482 = vmatmul.f32.gmra.mxu0 %v9481_v50 }
 0x83c   :  { %v8591_v4 = vpop.f32.mrf.mxu2  ;;  %v8776_v16 = vpop.f32.mrf.mxu3  ;;  %19666 = vst [vmem:[#allocation5_spill] sm:$0xff] %v17528_v43  ;;  %v18481_v25 = vand.u32 4294901760, %v17528_v43 }
 0x83d   :  { %v8773_v55 = vadd.f32 %v8772_v38, %v8591_v4  ;;  %9584 = vmatmul.f32.gmra.mxu1 %v17476_v32  ;;  %v9364_v4 = vsel %vm9320_vm4, %v68_v59, 0 }
 0x83f   :  { %v17530_v18 = vadd.f32 %v8896_v0, %v8773_v55  ;;  %v17543_v0 = vadd.f32 %v17178_v22, %v19668_v6  ;;  %v9496_v55 = vsub.f32 %v17528_v43, %v18481_v25  ;;  %v69_v6 = vld [vmem:[%s17936_s6 + $0x78] sm:$0xff] }
 0x840   :  { %v8906_v50 = vpop.f32.mrf.mxu0 }
 0x841   :  { %9162 = vmatmul.f32.gmra.mxu2 %v17198_v46  ;;  %9263 = vmatmul.f32.gmra.mxu3 %v17207_v24  ;;  %v17548_v46 = vand.u32 4294901760, %v9364_v4  ;;  %v9497_v32 = vand.u32 4294901760, %v9496_v55 }
 0x842   :  { %v17538_v38 = vpop.f32.mrf.mxu1 }
 0x843   :  { %19667 = vst [vmem:[#allocation27_spill] sm:$0xff] %v17538_v38  ;;  %9490 = vmatmul.f32.gmra.mxu0 %v9489_v62  ;;  %v17552_v38 = vsub.f32 %v9364_v4, %v17548_v46  ;;  %v19671_v4 = vld [vmem:[#allocation97_spill] sm:$0xff] }
 0x844   :  { %v8599_v45 = vpop.f32.mrf.mxu2  ;;  %v8780_v20 = vpop.f32.mrf.mxu3 }
 0x845   :  { %v8777_v33 = vadd.f32 %v8776_v16, %v8599_v45  ;;  %9588 = vmatmul.f32.gmra.mxu1 %v17500_v63  ;;  %19669 = vst [vmem:[#allocation6_spill] sm:$0xff] %v17552_v38  ;;  %v18486_v22 = vand.u32 4294901760, %v17552_v38  ;;  %v9367_v45 = vsel %vm9320_vm4, %v69_v6, 0 }
 0x847   :  { %v17554_v59 = vadd.f32 %v8901_v9, %v8777_v33  ;;  %v17567_v33 = vadd.f32 %v17187_v17, %v19671_v4  ;;  %v9504_v9 = vsub.f32 %v17552_v38, %v18486_v22  ;;  %v19673_v22 = vld [vmem:[#allocation92_spill] sm:$0xff] }
 0x848   :  { %v8911_v62 = vpop.f32.mrf.mxu0 }
 0x849   :  { %9166 = vmatmul.f32.gmra.mxu2 %v17207_v24  ;;  %9267 = vmatmul.f32.gmra.mxu3 %v17216_v12  ;;  %v17572_v24 = vand.u32 4294901760, %v9367_v45  ;;  %v9505_v63 = vand.u32 4294901760, %v9504_v9 }
 0x84a   :  { %v17562_v16 = vpop.f32.mrf.mxu1 }
 0x84b   :  { %19670 = vst [vmem:[#allocation75_spill] sm:$0xff] %v17562_v16  ;;  %9498 = vmatmul.f32.gmra.mxu0 %v9497_v32  ;;  %v17576_v16 = vsub.f32 %v9367_v45, %v17572_v24 }
 0x84c   :  { %v8607_v55 = vpop.f32.mrf.mxu2  ;;  %v8784_v25 = vpop.f32.mrf.mxu3 }
 0x84d   :  { %v8781_v43 = vadd.f32 %v8780_v20, %v8607_v55  ;;  %9592 = vmatmul.f32.gmra.mxu1 %v17524_v15  ;;  %v18489_v17 = vand.u32 4294901760, %v17576_v16  ;;  %v17587_v20 = vadd.f32 %v17196_v31, %v19673_v22 }
 0x84f   :  { %v17578_v6 = vadd.f32 %v8906_v50, %v8781_v43  ;;  %v9512_v43 = vsub.f32 %v17576_v16, %v18489_v17 }
 0x850   :  { %v8916_v32 = vpop.f32.mrf.mxu0 }
 0x851   :  { %9170 = vmatmul.f32.gmra.mxu2 %v17216_v12  ;;  %9271 = vmatmul.f32.gmra.mxu3 %v17225_v10  ;;  %v9513_v12 = vand.u32 4294901760, %v9512_v43 }
 0x852   :  { %v17583_v4 = vpop.f32.mrf.mxu1 }
 0x853   :  { %19672 = vst [vmem:[#allocation42_spill] sm:$0xff] %v17583_v4  ;;  %9506 = vmatmul.f32.gmra.mxu0 %v9505_v63  ;;  %v19674_v63 = vld [vmem:[#allocation21_spill] sm:$0xff] }
 0x854   :  { %v8615_v50 = vpop.f32.mrf.mxu2  ;;  %v8788_v45 = vpop.f32.mrf.mxu3  ;;  %v17601_v22 = vadd.f32 %v17205_v13, %v19674_v63 }
 0x855   :  { %v8785_v9 = vadd.f32 %v8784_v25, %v8615_v50  ;;  %9596 = vmatmul.f32.gmra.mxu1 %v17548_v46 }
 0x857   :  { %v17593_v55 = vadd.f32 %v8911_v62, %v8785_v9  ;;  %v19676_v9 = vld [vmem:[#allocation22_spill] sm:$0xff] }
 0x858   :  { %v8921_v38 = vpop.f32.mrf.mxu0  ;;  %v17615_v13 = vadd.f32 %v17214_v54, %v19676_v9  ;;  %v19678_v54 = vld [vmem:[#allocation23_spill] sm:$0xff] }
 0x859   :  { %9174 = vmatmul.f32.gmra.mxu2 %v17225_v10  ;;  %9275 = vmatmul.f32.gmra.mxu3 %v17234_v27  ;;  %v19675_v10 = vand.u32 4294901760, %v17249_v7 }
 0x85a   :  { %v17597_v31 = vpop.f32.mrf.mxu1 }
 0x85b   :  { %9514 = vmatmul.f32.gmra.mxu0 %v9513_v12 }
 0x85c   :  { %v8623_v17 = vpop.f32.mrf.mxu2  ;;  %v8792_v4 = vpop.f32.mrf.mxu3 }
 0x85d   :  { %v8789_v25 = vadd.f32 %v8788_v45, %v8623_v17  ;;  %9600 = vmatmul.f32.gmra.mxu1 %v17572_v24 }
 0x85f   :  { %v17604_v62 = vadd.f32 %v8916_v32, %v8789_v25 }
 0x860   :  { %v17606_v43 = vpop.f32.mrf.mxu0 }
 0x861   :  { %9178 = vmatmul.f32.gmra.mxu2 %v17234_v27  ;;  %9723 = vmatmul.f32.vlgmr.msra.gmra.mxu3 %v19675_v10  ;;  %v19677_v27 = vand.u32 4294901760, %v17267_v53  ;;  %v17630_v10 = vadd.f32 %v17223_v14, %v19678_v54  ;;  %v19679_v14 = vand.u32 4294901760, %v17288_v44 }
 0x862   :  { %v17611_v50 = vpop.f32.mrf.mxu1 }
 0x863   :  { %9837 = vmatmul.f32.vlgmr.msra.gmra.mxu0 %v17246_v47 }
 0x864   :  { %v8631_v17 = vpop.f32.mrf.mxu2  ;;  %v9216_v45 = vpop.f32.mrf.mxu3 }
 0x865   :  { %v8793_v12 = vadd.f32 %v8792_v4, %v8631_v17  ;;  %9919 = vmatmul.f32.vlgmr.msra.gmra.mxu1 %v17246_v47  ;;  %v8961_v4 = vadd.f32 %v17271_v60, %v17310_v35  ;;  %v17648_v60 = vadd.f32 %v17232_v29, %v17002_v21  ;;  %v19680_v21 = vand.u32 4294901760, %v17308_v34 }
 0x867   :  { %v17619_v32 = vadd.f32 %v8921_v38, %v8793_v12 }
 0x868   :  { %v17621_v63 = vpop.f32.mrf.mxu0 }
 0x869   :  { %9624 = vmatmul.f32.vlgmr.msra.gmra.mxu2 %v17249_v7  ;;  %9729 = vmatmul.f32.gmra.mxu3 %v19677_v27 }
 0x86a   :  { %v17626_v25 = vpop.f32.mrf.mxu1 }
 0x86b   :  { %9841 = vmatmul.f32.gmra.mxu0 %v17264_v5 }
 0x86c   :  { %v9119_v47 = vpop.f32.mrf.mxu2  ;;  %v9220_v38 = vpop.f32.mrf.mxu3 }
 0x86d   :  { %v9120_v9 = vadd.f32 %v9119_v47, %v8961_v4  ;;  %9923 = vmatmul.f32.gmra.mxu1 %v17264_v5  ;;  %v8967_v5 = vadd.f32 %v17293_v26, %v17330_v37  ;;  %v17666_v26 = vadd.f32 %v17243_v42, %v17026_v1  ;;  %v19681_v1 = vand.u32 4294901760, %v17328_v51 }
 0x86f   :  { %v9217_v7 = vadd.f32 %v9216_v45, %v9120_v9 }
 0x870   :  { %v17636_v17 = vpop.f32.mrf.mxu0 }
 0x871   :  { %v17639_v12 = vadd.f32 %v9217_v7, %v17422_v58  ;;  %9629 = vmatmul.f32.gmra.mxu2 %v17267_v53  ;;  %9735 = vmatmul.f32.gmra.mxu3 %v19679_v14 }
 0x872   :  { %v17644_v27 = vpop.f32.mrf.mxu1 }
 0x873   :  { %9845 = vmatmul.f32.gmra.mxu0 %v17284_v56 }
 0x874   :  { %v9123_v35 = vpop.f32.mrf.mxu2  ;;  %v9224_v45 = vpop.f32.mrf.mxu3 }
 0x875   :  { %v9124_v58 = vadd.f32 %v9123_v35, %v8967_v5  ;;  %9927 = vmatmul.f32.gmra.mxu1 %v17284_v56  ;;  %v8973_v56 = vadd.f32 %v17315_v2, %v17350_v41  ;;  %v17684_v41 = vadd.f32 %v17258_v48, %v17065_v28  ;;  %v19682_v2 = vld [vmem:[#allocation84_spill] sm:$0xff]  ;;  %v19683_v28 = vld [vmem:[#allocation73_spill] sm:$0xff] }
 0x876   :  { %v19684_v48 = vand.u32 4294901760, %v19683_v28 }
 0x877   :  { %v9221_v53 = vadd.f32 %v9220_v38, %v9124_v58 }
 0x878   :  { %v17654_v54 = vpop.f32.mrf.mxu0 }
 0x879   :  { %v17657_v4 = vadd.f32 %v9221_v53, %v17446_v8  ;;  %9634 = vmatmul.f32.gmra.mxu2 %v17288_v44  ;;  %9741 = vmatmul.f32.gmra.mxu3 %v19680_v21  ;;  %v19687_v53 = vld [vmem:[#allocation48_spill] sm:$0xff] }
 0x87a   :  { %v17662_v29 = vpop.f32.mrf.mxu1  ;;  %v8985_v21 = vadd.f32 %v19687_v53, %v17390_v57  ;;  %v19691_v57 = vld [vmem:[#allocation56_spill] sm:$0xff] }
 0x87b   :  { %9849 = vmatmul.f32.gmra.mxu0 %v17304_v40 }
 0x87c   :  { %v9127_v37 = vpop.f32.mrf.mxu2  ;;  %v9228_v47 = vpop.f32.mrf.mxu3 }
 0x87d   :  { %v9128_v8 = vadd.f32 %v9127_v37, %v8973_v56  ;;  %9931 = vmatmul.f32.gmra.mxu1 %v17304_v40  ;;  %v8979_v40 = vadd.f32 %v17335_v39, %v17370_v49  ;;  %v19685_v39 = vld [vmem:[#allocation90_spill] sm:$0xff]  ;;  %v19686_v49 = vld [vmem:[#allocation35_spill] sm:$0xff]  ;;  %v19688_v56 = vld [vmem:[#allocation20_spill] sm:$0xff] }
 0x87e   :  { %v17702_v58 = vadd.f32 %v19686_v49, %v19685_v39 }
 0x87f   :  { %v9225_v44 = vadd.f32 %v9224_v45, %v9128_v8 }
 0x880   :  { %v17672_v38 = vpop.f32.mrf.mxu0 }
 0x881   :  { %v17675_v9 = vadd.f32 %v9225_v44, %v17470_v36  ;;  %9639 = vmatmul.f32.gmra.mxu2 %v17308_v34  ;;  %9747 = vmatmul.f32.gmra.mxu3 %v19681_v1  ;;  %v19689_v1 = vld [vmem:[#allocation28_spill] sm:$0xff] }
 0x882   :  { %v17680_v42 = vpop.f32.mrf.mxu1 }
 0x883   :  { %9853 = vmatmul.f32.gmra.mxu0 %v19682_v2 }
 0x884   :  { %v9131_v7 = vpop.f32.mrf.mxu2  ;;  %v9232_v14 = vpop.f32.mrf.mxu3 }
 0x885   :  { %v9132_v36 = vadd.f32 %v9131_v7, %v8979_v40  ;;  %9935 = vmatmul.f32.gmra.mxu1 %v19682_v2  ;;  %v19690_v40 = vand.u32 4294901760, %v19689_v1  ;;  %v19692_v7 = vld [vmem:[#allocation40_spill] sm:$0xff] }
 0x887   :  { %v9229_v34 = vadd.f32 %v9228_v47, %v9132_v36  ;;  %v17720_v36 = vadd.f32 %v19692_v7, %v19691_v57 }
 0x888   :  { %v17690_v5 = vpop.f32.mrf.mxu0 }
 0x889   :  { %v17693_v35 = vadd.f32 %v9229_v34, %v17494_v61  ;;  %9644 = vmatmul.f32.gmra.mxu2 %v17328_v51  ;;  %9753 = vmatmul.f32.gmra.mxu3 %v19684_v48  ;;  %v19693_v34 = vld [vmem:[#allocation72_spill] sm:$0xff] }
 0x88a   :  { %v17698_v45 = vpop.f32.mrf.mxu1  ;;  %v8991_v48 = vadd.f32 %v19693_v34, %v17410_v30  ;;  %v19697_v30 = vld [vmem:[#allocation55_spill] sm:$0xff] }
 0x88b   :  { %9857 = vmatmul.f32.gmra.mxu0 %v19688_v56 }
 0x88c   :  { %v9135_v37 = vpop.f32.mrf.mxu2  ;;  %v9236_v47 = vpop.f32.mrf.mxu3 }
 0x88d   :  { %v9136_v61 = vadd.f32 %v9135_v37, %v8985_v21  ;;  %9939 = vmatmul.f32.gmra.mxu1 %v19688_v56  ;;  %v19695_v56 = vld [vmem:[#allocation102_spill] sm:$0xff] }
 0x88e   :  { %v19696_v37 = vand.u32 4294901760, %v19695_v56 }
 0x88f   :  { %v9233_v51 = vadd.f32 %v9232_v14, %v9136_v61  ;;  %v19694_v14 = vld [vmem:[#allocation94_spill] sm:$0xff] }
 0x890   :  { %v17708_v8 = vpop.f32.mrf.mxu0 }
 0x891   :  { %v17711_v44 = vadd.f32 %v9233_v51, %v17518_v11  ;;  %9649 = vmatmul.f32.gmra.mxu2 %v19683_v28  ;;  %9759 = vmatmul.f32.gmra.mxu3 %v19690_v40  ;;  %v8997_v51 = vadd.f32 %v19697_v30, %v17434_v3  ;;  %v19698_v40 = vld [vmem:[#allocation99_spill] sm:$0xff]  ;;  %v19699_v3 = vld [vmem:[#allocation24_spill] sm:$0xff] }
 0x892   :  { %v17716_v2 = vpop.f32.mrf.mxu1 }
 0x893   :  { %9861 = vmatmul.f32.gmra.mxu0 %v19694_v14 }
 0x894   :  { %v9139_v39 = vpop.f32.mrf.mxu2  ;;  %v9240_v49 = vpop.f32.mrf.mxu3 }
 0x895   :  { %v9140_v11 = vadd.f32 %v9139_v39, %v8991_v48  ;;  %9943 = vmatmul.f32.gmra.mxu1 %v19694_v14  ;;  %v19700_v14 = vand.u32 4294901760, %v19699_v3 }
 0x897   :  { %v9237_v28 = vadd.f32 %v9236_v47, %v9140_v11 }
 0x898   :  { %v17726_v53 = vpop.f32.mrf.mxu0 }
 0x899   :  { %v17729_v21 = vadd.f32 %v9237_v28, %v17543_v0  ;;  %9654 = vmatmul.f32.gmra.mxu2 %v19689_v1  ;;  %9765 = vmatmul.f32.gmra.mxu3 %v19696_v37  ;;  %v17743_v0 = vld [vmem:[%s17938_s8] ss:$0 sm:$0xff]  ;;  %v19701_v28 = vld [vmem:[#allocation54_spill] sm:$0xff] }
 0x89a   :  { %v17734_v61 = vpop.f32.mrf.mxu1  ;;  %v9003_v37 = vadd.f32 %v19701_v28, %v17458_v23 }
 0x89b   :  { %9865 = vmatmul.f32.gmra.mxu0 %v19698_v40 }
 0x89c   :  { %v9143_v57 = vpop.f32.mrf.mxu2  ;;  %v9244_v7 = vpop.f32.mrf.mxu3 }
 0x89d   :  { %v9144_v47 = vadd.f32 %v9143_v57, %v8997_v51  ;;  %9947 = vmatmul.f32.gmra.mxu1 %v19698_v40  ;;  %v19702_v51 = vld [vmem:[#allocation93_spill] sm:$0xff] }
 0x89f   :  { %v9241_v1 = vadd.f32 %v9240_v49, %v9144_v47 }
 0x8a0   :  { %v9459_v34 = vpop.f32.mrf.mxu0 }
 0x8a1   :  { %v17746_v48 = vadd.f32 %v9241_v1, %v17567_v33  ;;  %9659 = vmatmul.f32.gmra.mxu2 %v19695_v56  ;;  %9771 = vmatmul.f32.gmra.mxu3 %v19700_v14  ;;  %v9460_v39 = vadd.f32 %v17743_v0, %v9459_v34  ;;  %v19703_v1 = vld [vmem:[#allocation83_spill] sm:$0xff] }
 0x8a2   :  { %v9573_v11 = vpop.f32.mrf.mxu1  ;;  %v19704_v34 = vand.u32 4294901760, %v19703_v1 }
 0x8a3   :  { %v17754_v30 = vadd.f32 %v9573_v11, %v9460_v39  ;;  %9869 = vmatmul.f32.gmra.mxu0 %v19702_v51  ;;  %v19705_v39 = vld [vmem:[#allocation71_spill] sm:$0xff] }
 0x8a4   :  { %v9147_v49 = vpop.f32.mrf.mxu2  ;;  %v9248_v40 = vpop.f32.mrf.mxu3  ;;  %v9009_v11 = vadd.f32 %v19705_v39, %v17482_v19 }
 0x8a5   :  { %v9148_v57 = vadd.f32 %v9147_v49, %v9003_v37  ;;  %9951 = vmatmul.f32.gmra.mxu1 %v19702_v51  ;;  %v19706_v37 = vld [vmem:[#allocation53_spill] sm:$0xff] }
 0x8a7   :  { %v9245_v33 = vadd.f32 %v9244_v7, %v9148_v57 }
 0x8a8   :  { %v9467_v56 = vpop.f32.mrf.mxu0 }
 0x8a9   :  { %v17759_v47 = vadd.f32 %v9245_v33, %v17587_v20  ;;  %9664 = vmatmul.f32.gmra.mxu2 %v19699_v3  ;;  %9777 = vmatmul.f32.gmra.mxu3 %v19704_v34  ;;  %v9468_v23 = vadd.f32 %v17743_v0, %v9467_v56  ;;  %v19707_v33 = vld [vmem:[#allocation46_spill] sm:$0xff] }
 0x8aa   :  { %v9577_v14 = vpop.f32.mrf.mxu1  ;;  %v19708_v56 = vand.u32 4294901760, %v19707_v33 }
 0x8ab   :  { %v17767_v28 = vadd.f32 %v9577_v14, %v9468_v23  ;;  %9873 = vmatmul.f32.gmra.mxu0 %v19706_v37  ;;  %v19709_v23 = vld [vmem:[#allocation107_spill] sm:$0xff] }
 0x8ac   :  { %v9151_v7 = vpop.f32.mrf.mxu2  ;;  %v9252_v51 = vpop.f32.mrf.mxu3  ;;  %v9015_v14 = vadd.f32 %v19709_v23, %v17506_v52 }
 0x8ad   :  { %v9152_v49 = vadd.f32 %v9151_v7, %v9009_v11  ;;  %9955 = vmatmul.f32.gmra.mxu1 %v19706_v37  ;;  %v19710_v11 = vld [vmem:[#allocation104_spill] sm:$0xff] }
 0x8af   :  { %v9249_v20 = vadd.f32 %v9248_v40, %v9152_v49 }
 0x8b0   :  { %v9475_v3 = vpop.f32.mrf.mxu0 }
 0x8b1   :  { %v17772_v57 = vadd.f32 %v9249_v20, %v17601_v22  ;;  %9669 = vmatmul.f32.gmra.mxu2 %v19703_v1  ;;  %9783 = vmatmul.f32.gmra.mxu3 %v19708_v56  ;;  %v9476_v19 = vadd.f32 %v17743_v0, %v9475_v3  ;;  %v19711_v20 = vld [vmem:[#allocation106_spill] sm:$0xff] }
 0x8b2   :  { %v9581_v34 = vpop.f32.mrf.mxu1  ;;  %v19712_v3 = vand.u32 4294901760, %v19711_v20 }
 0x8b3   :  { %v17780_v39 = vadd.f32 %v9581_v34, %v9476_v19  ;;  %9877 = vmatmul.f32.gmra.mxu0 %v19710_v11  ;;  %v19713_v19 = vld [vmem:[#allocation47_spill] sm:$0xff] }
 0x8b4   :  { %v9155_v40 = vpop.f32.mrf.mxu2  ;;  %v9256_v37 = vpop.f32.mrf.mxu3  ;;  %v9021_v34 = vadd.f32 %v19713_v19, %v17530_v18 }
 0x8b5   :  { %v9156_v7 = vadd.f32 %v9155_v40, %v9015_v14  ;;  %9959 = vmatmul.f32.gmra.mxu1 %v19710_v11  ;;  %v19714_v14 = vld [vmem:[#allocation78_spill] sm:$0xff] }
 0x8b7   :  { %v9253_v22 = vadd.f32 %v9252_v51, %v9156_v7 }
 0x8b8   :  { %v9483_v1 = vpop.f32.mrf.mxu0 }
 0x8b9   :  { %v17785_v49 = vadd.f32 %v9253_v22, %v17615_v13  ;;  %9674 = vmatmul.f32.gmra.mxu2 %v19707_v33  ;;  %9789 = vmatmul.f32.gmra.mxu3 %v19712_v3  ;;  %v9484_v52 = vadd.f32 %v17743_v0, %v9483_v1  ;;  %v19715_v22 = vld [vmem:[#allocation100_spill] sm:$0xff] }
 0x8ba   :  { %v9585_v56 = vpop.f32.mrf.mxu1  ;;  %v19716_v1 = vand.u32 4294901760, %v19715_v22 }
 0x8bb   :  { %v17793_v23 = vadd.f32 %v9585_v56, %v9484_v52  ;;  %9881 = vmatmul.f32.gmra.mxu0 %v19714_v14  ;;  %v19717_v52 = vld [vmem:[#allocation41_spill] sm:$0xff] }
 0x8bc   :  { %v9159_v51 = vpop.f32.mrf.mxu2  ;;  %v9260_v11 = vpop.f32.mrf.mxu3  ;;  %v9027_v56 = vadd.f32 %v19717_v52, %v17554_v59 }
 0x8bd   :  { %v9160_v40 = vadd.f32 %v9159_v51, %v9021_v34  ;;  %9963 = vmatmul.f32.gmra.mxu1 %v19714_v14  ;;  %v19718_v34 = vld [vmem:[#allocation70_spill] sm:$0xff] }
 0x8bf   :  { %v9257_v13 = vadd.f32 %v9256_v37, %v9160_v40 }
 0x8c0   :  { %v9491_v33 = vpop.f32.mrf.mxu0 }
 0x8c1   :  { %v17798_v7 = vadd.f32 %v9257_v13, %v17630_v10  ;;  %9679 = vmatmul.f32.gmra.mxu2 %v19711_v20  ;;  %9795 = vmatmul.f32.gmra.mxu3 %v19716_v1  ;;  %v9492_v18 = vadd.f32 %v17743_v0, %v9491_v33  ;;  %v19719_v13 = vld [vmem:[#allocation5_spill] sm:$0xff] }
 0x8c2   :  { %v9589_v3 = vpop.f32.mrf.mxu1  ;;  %v19720_v33 = vand.u32 4294901760, %v19719_v13 }
 0x8c3   :  { %v17806_v19 = vadd.f32 %v9589_v3, %v9492_v18  ;;  %9885 = vmatmul.f32.gmra.mxu0 %v19718_v34  ;;  %v19721_v18 = vld [vmem:[#allocation27_spill] sm:$0xff] }
 0x8c4   :  { %v9163_v37 = vpop.f32.mrf.mxu2  ;;  %v9264_v14 = vpop.f32.mrf.mxu3  ;;  %v9033_v3 = vadd.f32 %v19721_v18, %v17578_v6 }
 0x8c5   :  { %v9164_v51 = vadd.f32 %v9163_v37, %v9027_v56  ;;  %9967 = vmatmul.f32.gmra.mxu1 %v19718_v34 }
 0x8c7   :  { %v9261_v10 = vadd.f32 %v9260_v11, %v9164_v51  ;;  %v19722_v51 = vld [vmem:[#allocation6_spill] sm:$0xff] }
 0x8c8   :  { %v9499_v20 = vpop.f32.mrf.mxu0 }
 0x8c9   :  { %v17811_v40 = vadd.f32 %v9261_v10, %v17648_v60  ;;  %9684 = vmatmul.f32.gmra.mxu2 %v19715_v22  ;;  %9801 = vmatmul.f32.gmra.mxu3 %v19720_v33  ;;  %v9500_v59 = vadd.f32 %v17743_v0, %v9499_v20  ;;  %v19723_v10 = vand.u32 4294901760, %v19722_v51  ;;  %v19724_v33 = vld [vmem:[#allocation75_spill] sm:$0xff] }
 0x8ca   :  { %v9593_v1 = vpop.f32.mrf.mxu1 }
 0x8cb   :  { %v17819_v52 = vadd.f32 %v9593_v1, %v9500_v59  ;;  %9889 = vmatmul.f32.gmra.mxu0 %v17524_v15  ;;  %v9039_v59 = vadd.f32 %v19724_v33, %v17593_v55 }
 0x8cc   :  { %v9167_v11 = vpop.f32.mrf.mxu2  ;;  %v9268_v56 = vpop.f32.mrf.mxu3 }
 0x8cd   :  { %v9168_v34 = vadd.f32 %v9167_v11, %v9033_v3  ;;  %9971 = vmatmul.f32.gmra.mxu1 %v17524_v15  ;;  %v19725_v11 = vand.u32 4294901760, %v17576_v16 }
 0x8cf   :  { %v9265_v60 = vadd.f32 %v9264_v14, %v9168_v34 }
 0x8d0   :  { %v9507_v22 = vpop.f32.mrf.mxu0 }
 0x8d1   :  { %v17824_v37 = vadd.f32 %v9265_v60, %v17666_v26  ;;  %9689 = vmatmul.f32.gmra.mxu2 %v19719_v13  ;;  %9807 = vmatmul.f32.gmra.mxu3 %v19723_v10  ;;  %v9508_v6 = vadd.f32 %v17743_v0, %v9507_v22  ;;  %v19726_v60 = vld [vmem:[#allocation42_spill] sm:$0xff] }
 0x8d2   :  { %v9597_v20 = vpop.f32.mrf.mxu1  ;;  %v9045_v22 = vadd.f32 %v19726_v60, %v17604_v62  ;;  %v9051_v62 = vadd.f32 %v17597_v31, %v17619_v32  ;;  %v9404_v31 = vadd.f32 %v17743_v0, %v17621_v63  ;;  %v17866_v60 = vld [vmem:[%s17934_s4] ss:$0 sm:$0xff]  ;;  %v9412_v63 = vadd.f32 %v17743_v0, %v17636_v17  ;;  %s10336_s4 = smov [#allocation2]  }
 0x8d3   :  { %v17832_v1 = vadd.f32 %v9597_v20, %v9508_v6  ;;  %9893 = vmatmul.f32.gmra.mxu0 %v17548_v46  ;;  %s10035_s30 = sshll.u32 %s10336_s4, 4  ;;  %s10036_s30 = int_to_ptr.vmem [resolvable:$true] %s10035_s30 }
 0x8d4   :  { %v9171_v15 = vpop.f32.mrf.mxu2  ;;  %v9272_v14 = vpop.f32.mrf.mxu3 }
 0x8d5   :  { %v9172_v18 = vadd.f32 %v9171_v15, %v9039_v59  ;;  %9975 = vmatmul.f32.gmra.mxu1 %v17548_v46 }
 0x8d7   :  { %v9269_v26 = vadd.f32 %v9268_v56, %v9172_v18 }
 0x8d8   :  { %v9515_v13 = vpop.f32.mrf.mxu0 }
 0x8d9   :  { %v17837_v3 = vadd.f32 %v9269_v26, %v17684_v41  ;;  %9694 = vmatmul.f32.gmra.mxu2 %v19722_v51  ;;  %9813 = vmatmul.f32.gmra.mxu3 %v19725_v11  ;;  %v9516_v55 = vadd.f32 %v17743_v0, %v9515_v13  ;;  %v9396_v26 = vadd.f32 %v17743_v0, %v17606_v43 }
 0x8da   :  { %v9601_v34 = vpop.f32.mrf.mxu1 }
 0x8db   :  { %v17845_v10 = vadd.f32 %v9601_v34, %v9516_v55  ;;  %9897 = vmatmul.f32.gmra.mxu0 %v17572_v24 }
 0x8dc   :  { %v9175_v46 = vpop.f32.mrf.mxu2  ;;  %v9276_v56 = vpop.f32.mrf.mxu3 }
 0x8dd   :  { %v9176_v6 = vadd.f32 %v9175_v46, %v9045_v22  ;;  %9979 = vmatmul.f32.gmra.mxu1 %v17572_v24 }
 0x8df   :  { %v9273_v41 = vadd.f32 %v9272_v14, %v9176_v6 }
 0x8e0   :  { %v9838_v51 = vpop.f32.mrf.mxu0 }
 0x8e1   :  { %v17850_v20 = vadd.f32 %v9273_v41, %v17702_v58  ;;  %9699 = vmatmul.f32.gmra.mxu2 %v17576_v16  ;;  %v9542_v58 = vadd.f32 %v17611_v50, %v9396_v26  ;;  %v9299_v50 = vadd.f32 %v17866_v60, %v17639_v12 }
 0x8e2   :  { %v9920_v33 = vpop.f32.mrf.mxu1 }
 0x8e4   :  { %v9179_v59 = vpop.f32.mrf.mxu2  ;;  %v9724_v15 = vpop.f32.mrf.mxu3 }
 0x8e5   :  { %v9180_v18 = vadd.f32 %v9179_v59, %v9051_v62 }
 0x8e7   :  { %v9277_v13 = vadd.f32 %v9276_v56, %v9180_v18 }
 0x8e8   :  { %v9842_v11 = vpop.f32.mrf.mxu0 }
 0x8e9   :  { %v17858_v24 = vadd.f32 %v9277_v13, %v17720_v36  ;;  %v9546_v36 = vadd.f32 %v17626_v25, %v9404_v31  ;;  %v9300_v25 = vadd.f32 %v17866_v60, %v17657_v4 }
 0x8ea   :  { %v9924_v14 = vpop.f32.mrf.mxu1 }
 0x8ec   :  { %v9625_v55 = vpop.f32.mrf.mxu2  ;;  %v9730_v16 = vpop.f32.mrf.mxu3 }
 0x8ed   :  { %v9626_v34 = vadd.f32 %v9625_v55, %v9542_v58  ;;  %v9550_v58 = vadd.f32 %v17644_v27, %v9412_v63  ;;  %v9301_v27 = vadd.f32 %v17866_v60, %v17675_v9 }
 0x8ef   :  { %v9725_v32 = vadd.f32 %v9724_v15, %v9626_v34 }
 0x8f0   :  { %v9846_v43 = vpop.f32.mrf.mxu0 }
 0x8f1   :  { %v9839_v22 = vadd.f32 %v9838_v51, %v9725_v32  ;;  %v9420_v32 = vadd.f32 %v17743_v0, %v17654_v54 }
 0x8f2   :  { %v9928_v46 = vpop.f32.mrf.mxu1 }
 0x8f3   :  { %v9921_v56 = vadd.f32 %v9920_v33, %v9839_v22 }
 0x8f4   :  { %v9630_v6 = vpop.f32.mrf.mxu2  ;;  %v9736_v41 = vpop.f32.mrf.mxu3 }
 0x8f5   :  { %v9983_v62 = vadd.f32 %v9921_v56, %v9299_v50  ;;  %v9631_v59 = vadd.f32 %v9630_v6, %v9546_v36  ;;  %v9554_v50 = vadd.f32 %v17662_v29, %v9420_v32  ;;  %v9302_v29 = vadd.f32 %v17866_v60, %v17693_v35 }
 0x8f7   :  { %v9999_v15 = vmax.f32 %v9983_v62, 0.0  ;;  %v9731_v18 = vadd.f32 %v9730_v16, %v9631_v59  ;;  %v9428_v59 = vadd.f32 %v17743_v0, %v17672_v38 }
 0x8f8   :  { %v9850_v26 = vpop.f32.mrf.mxu0 }
 0x8f9   :  { %10015 = vst [vmem:[#allocation2] sm:$0xff] %v9999_v15  ;;  %v9843_v13 = vadd.f32 %v9842_v11, %v9731_v18  ;;  %v9558_v18 = vadd.f32 %v17680_v42, %v9428_v59  ;;  %v9303_v42 = vadd.f32 %v17866_v60, %v17711_v44  ;;  %v9452_v59 = vadd.f32 %v17743_v0, %v17726_v53 }
 0x8fa   :  { %v9932_v51 = vpop.f32.mrf.mxu1 }
 0x8fb   :  { %v9925_v12 = vadd.f32 %v9924_v14, %v9843_v13 }
 0x8fc   :  { %v9635_v33 = vpop.f32.mrf.mxu2  ;;  %v9742_v55 = vpop.f32.mrf.mxu3 }
 0x8fd   :  { %v9984_v34 = vadd.f32 %v9925_v12, %v9300_v25  ;;  %v9636_v31 = vadd.f32 %v9635_v33, %v9550_v58  ;;  %v9436_v12 = vadd.f32 %v17743_v0, %v17690_v5 }
 0x8ff   :  { %v10000_v17 = vmax.f32 %v9984_v34, 0.0  ;;  %v9737_v22 = vadd.f32 %v9736_v41, %v9636_v31  ;;  %v9562_v31 = vadd.f32 %v17698_v45, %v9436_v12  ;;  %v9304_v45 = vadd.f32 %v17866_v60, %v17729_v21 }
 0x900   :  { %v9854_v16 = vpop.f32.mrf.mxu0 }
 0x901   :  { %10016 = vst [vmem:[#allocation2 + $0x8] sm:$0xff] %v10000_v17  ;;  %v9847_v36 = vadd.f32 %v9846_v43, %v9737_v22 }
 0x902   :  { %v9936_v11 = vpop.f32.mrf.mxu1 }
 0x903   :  { %v9929_v4 = vadd.f32 %v9928_v46, %v9847_v36  ;;  %v9444_v36 = vadd.f32 %v17743_v0, %v17708_v8 }
 0x904   :  { %v9640_v14 = vpop.f32.mrf.mxu2  ;;  %v9748_v56 = vpop.f32.mrf.mxu3 }
 0x905   :  { %v9985_v6 = vadd.f32 %v9929_v4, %v9301_v27  ;;  %v9641_v62 = vadd.f32 %v9640_v14, %v9554_v50  ;;  %v9566_v14 = vadd.f32 %v17716_v2, %v9444_v36  ;;  %v9305_v2 = vadd.f32 %v17866_v60, %v17746_v48 }
 0x907   :  { %v10001_v54 = vmax.f32 %v9985_v6, 0.0  ;;  %v9743_v63 = vadd.f32 %v9742_v55, %v9641_v62 }
 0x908   :  { %v9858_v41 = vpop.f32.mrf.mxu0 }
 0x909   :  { %10017 = vst [vmem:[#allocation2 + $0x10] sm:$0xff] %v10001_v54  ;;  %v9851_v15 = vadd.f32 %v9850_v26, %v9743_v63 }
 0x90a   :  { %v9940_v43 = vpop.f32.mrf.mxu1 }
 0x90b   :  { %v9933_v9 = vadd.f32 %v9932_v51, %v9851_v15 }
 0x90c   :  { %v9645_v46 = vpop.f32.mrf.mxu2  ;;  %v9754_v13 = vpop.f32.mrf.mxu3 }
 0x90d   :  { %v9986_v58 = vadd.f32 %v9933_v9, %v9302_v29  ;;  %v9646_v25 = vadd.f32 %v9645_v46, %v9558_v18  ;;  %v9570_v18 = vadd.f32 %v17734_v61, %v9452_v59 }
 0x90f   :  { %v10002_v38 = vmax.f32 %v9986_v58, 0.0  ;;  %v9749_v33 = vadd.f32 %v9748_v56, %v9646_v25  ;;  %v9306_v25 = vadd.f32 %v17866_v60, %v17759_v47 }
 0x910   :  { %v9862_v55 = vpop.f32.mrf.mxu0 }
 0x911   :  { %10018 = vst [vmem:[#allocation2 + $0x18] sm:$0xff] %v10002_v38  ;;  %v9855_v34 = vadd.f32 %v9854_v16, %v9749_v33 }
 0x912   :  { %v9944_v26 = vpop.f32.mrf.mxu1 }
 0x913   :  { %v9937_v35 = vadd.f32 %v9936_v11, %v9855_v34 }
 0x914   :  { %v9650_v51 = vpop.f32.mrf.mxu2  ;;  %v9760_v32 = vpop.f32.mrf.mxu3 }
 0x915   :  { %v9987_v17 = vadd.f32 %v9937_v35, %v9303_v42  ;;  %v9651_v22 = vadd.f32 %v9650_v51, %v9562_v31  ;;  %v9307_v42 = vadd.f32 %v17866_v60, %v17772_v57 }
 0x917   :  { %v10003_v5 = vmax.f32 %v9987_v17, 0.0  ;;  %v9755_v50 = vadd.f32 %v9754_v13, %v9651_v22 }
 0x918   :  { %v9866_v27 = vpop.f32.mrf.mxu0 }
 0x919   :  { %10019 = vst [vmem:[#allocation2 + $0x20] sm:$0xff] %v10003_v5  ;;  %v9859_v4 = vadd.f32 %v9858_v41, %v9755_v50 }
 0x91a   :  { %v9948_v16 = vpop.f32.mrf.mxu1 }
 0x91b   :  { %v9941_v44 = vadd.f32 %v9940_v43, %v9859_v4 }
 0x91c   :  { %v9655_v11 = vpop.f32.mrf.mxu2  ;;  %v9766_v56 = vpop.f32.mrf.mxu3 }
 0x91d   :  { %v9988_v6 = vadd.f32 %v9941_v44, %v9304_v45  ;;  %v9656_v62 = vadd.f32 %v9655_v11, %v9566_v14 }
 0x91f   :  { %v10004_v8 = vmax.f32 %v9988_v6, 0.0  ;;  %v9761_v54 = vadd.f32 %v9760_v32, %v9656_v62  ;;  %v9309_v62 = vadd.f32 %v17866_v60, %v17798_v7 }
 0x920   :  { %v9870_v63 = vpop.f32.mrf.mxu0 }
 0x921   :  { %10020 = vst [vmem:[#allocation2 + $0x28] sm:$0xff] %v10004_v8  ;;  %v9863_v15 = vadd.f32 %v9862_v55, %v9761_v54 }
 0x922   :  { %v9952_v41 = vpop.f32.mrf.mxu1 }
 0x923   :  { %v9945_v21 = vadd.f32 %v9944_v26, %v9863_v15 }
 0x924   :  { %v9660_v43 = vpop.f32.mrf.mxu2  ;;  %v9772_v29 = vpop.f32.mrf.mxu3 }
 0x925   :  { %v9989_v9 = vadd.f32 %v9945_v21, %v9305_v2  ;;  %v9661_v46 = vadd.f32 %v9660_v43, %v9570_v18  ;;  %v9310_v21 = vadd.f32 %v17866_v60, %v17811_v40 }
 0x927   :  { %v10005_v13 = vmax.f32 %v9989_v9, 0.0  ;;  %v9767_v58 = vadd.f32 %v9766_v56, %v9661_v46 }
 0x928   :  { %v9874_v0 = vpop.f32.mrf.mxu0 }
 0x929   :  { %10021 = vst [vmem:[#allocation2 + $0x30] sm:$0xff] %v10005_v13  ;;  %v9867_v53 = vadd.f32 %v9866_v27, %v9767_v58 }
 0x92a   :  { %v9956_v38 = vpop.f32.mrf.mxu1 }
 0x92b   :  { %v9949_v12 = vadd.f32 %v9948_v16, %v9867_v53 }
 0x92c   :  { %v9665_v33 = vpop.f32.mrf.mxu2  ;;  %v9778_v61 = vpop.f32.mrf.mxu3 }
 0x92d   :  { %v9990_v55 = vadd.f32 %v9949_v12, %v9306_v25  ;;  %v9666_v48 = vadd.f32 %v9665_v33, %v17754_v30  ;;  %v9308_v30 = vadd.f32 %v17866_v60, %v17785_v49 }
 0x92f   :  { %v10006_v34 = vmax.f32 %v9990_v55, 0.0  ;;  %v9773_v26 = vadd.f32 %v9772_v29, %v9666_v48 }
 0x930   :  { %v9878_v51 = vpop.f32.mrf.mxu0 }
 0x931   :  { %10022 = vst [vmem:[#allocation2 + $0x38] sm:$0xff] %v10006_v34  ;;  %v9871_v31 = vadd.f32 %v9870_v63, %v9773_v26  ;;  %v9312_v34 = vadd.f32 %v17866_v60, %v17837_v3 }
 0x932   :  { %v9960_v36 = vpop.f32.mrf.mxu1 }
 0x933   :  { %v9953_v35 = vadd.f32 %v9952_v41, %v9871_v31 }
 0x934   :  { %v9670_v32 = vpop.f32.mrf.mxu2  ;;  %v9784_v17 = vpop.f32.mrf.mxu3 }
 0x935   :  { %v9991_v22 = vadd.f32 %v9953_v35, %v9307_v42  ;;  %v9671_v47 = vadd.f32 %v9670_v32, %v17767_v28 }
 0x937   :  { %v10007_v5 = vmax.f32 %v9991_v22, 0.0  ;;  %v9779_v50 = vadd.f32 %v9778_v61, %v9671_v47 }
 0x938   :  { %v9882_v44 = vpop.f32.mrf.mxu0 }
 0x939   :  { %10023 = vst [vmem:[#allocation2 + $0x40] sm:$0xff] %v10007_v5  ;;  %v9875_v27 = vadd.f32 %v9874_v0, %v9779_v50  ;;  %v9311_v0 = vadd.f32 %v17866_v60, %v17824_v37 }
 0x93a   :  { %v9964_v6 = vpop.f32.mrf.mxu1 }
 0x93b   :  { %v9957_v4 = vadd.f32 %v9956_v38, %v9875_v27 }
 0x93c   :  { %v9675_v16 = vpop.f32.mrf.mxu2  ;;  %v9790_v14 = vpop.f32.mrf.mxu3 }
 0x93d   :  { %v9992_v45 = vadd.f32 %v9957_v4, %v9308_v30  ;;  %v9676_v57 = vadd.f32 %v9675_v16, %v17780_v39 }
 0x93f   :  { %v10008_v11 = vmax.f32 %v9992_v45, 0.0  ;;  %v9785_v56 = vadd.f32 %v9784_v17, %v9676_v57 }
 0x940   :  { %v9886_v18 = vpop.f32.mrf.mxu0 }
 0x941   :  { %10024 = vst [vmem:[#allocation2 + $0x48] sm:$0xff] %v10008_v11  ;;  %v9879_v28 = vadd.f32 %v9878_v51, %v9785_v56 }
 0x942   :  { %v9968_v2 = vpop.f32.mrf.mxu1 }
 0x943   :  { %v9961_v59 = vadd.f32 %v9960_v36, %v9879_v28 }
 0x944   :  { %v9680_v8 = vpop.f32.mrf.mxu2  ;;  %v9796_v63 = vpop.f32.mrf.mxu3 }
 0x945   :  { %v9993_v54 = vadd.f32 %v9961_v59, %v9309_v62  ;;  %v9681_v49 = vadd.f32 %v9680_v8, %v17793_v23 }
 0x947   :  { %v10009_v15 = vmax.f32 %v9993_v54, 0.0  ;;  %v9791_v41 = vadd.f32 %v9790_v14, %v9681_v49  ;;  %v9314_v14 = vadd.f32 %v17866_v60, %v17858_v24 }
 0x948   :  { %v9890_v53 = vpop.f32.mrf.mxu0 }
 0x949   :  { %10025 = vst [vmem:[#allocation2 + $0x50] sm:$0xff] %v10009_v15  ;;  %v9883_v39 = vadd.f32 %v9882_v44, %v9791_v41 }
 0x94a   :  { %v9972_v38 = vpop.f32.mrf.mxu1 }
 0x94b   :  { %v9965_v43 = vadd.f32 %v9964_v6, %v9883_v39 }
 0x94c   :  { %v9685_v29 = vpop.f32.mrf.mxu2  ;;  %v9802_v58 = vpop.f32.mrf.mxu3 }
 0x94d   :  { %v9994_v9 = vadd.f32 %v9965_v43, %v9310_v21  ;;  %v9686_v7 = vadd.f32 %v9685_v29, %v17806_v19 }
 0x94f   :  { %v10010_v46 = vmax.f32 %v9994_v9, 0.0  ;;  %v9797_v13 = vadd.f32 %v9796_v63, %v9686_v7 }
 0x950   :  { %v9894_v42 = vpop.f32.mrf.mxu0 }
 0x951   :  { %10026 = vst [vmem:[#allocation2 + $0x58] sm:$0xff] %v10010_v46  ;;  %v9887_v23 = vadd.f32 %v9886_v18, %v9797_v13 }
 0x952   :  { %v9976_v51 = vpop.f32.mrf.mxu1 }
 0x953   :  { %v9969_v25 = vadd.f32 %v9968_v2, %v9887_v23 }
 0x954   :  { %v9690_v12 = vpop.f32.mrf.mxu2  ;;  %v9808_v19 = vpop.f32.mrf.mxu3 }
 0x955   :  { %v9995_v33 = vadd.f32 %v9969_v25, %v9311_v0  ;;  %v9691_v40 = vadd.f32 %v9690_v12, %v17819_v52  ;;  %v9313_v52 = vadd.f32 %v17866_v60, %v17850_v20 }
 0x957   :  { %v10011_v61 = vmax.f32 %v9995_v33, 0.0  ;;  %v9803_v55 = vadd.f32 %v9802_v58, %v9691_v40 }
 0x958   :  { %v9898_v27 = vpop.f32.mrf.mxu0 }
 0x959   :  { %10027 = vst [vmem:[#allocation2 + $0x60] sm:$0xff] %v10011_v61  ;;  %v9891_v48 = vadd.f32 %v9890_v53, %v9803_v55 }
 0x95a   :  { %v9980_v16 = vpop.f32.mrf.mxu1 }
 0x95b   :  { %v9973_v26 = vadd.f32 %v9972_v38, %v9891_v48 }
 0x95c   :  { %v9695_v31 = vpop.f32.mrf.mxu2  ;;  %v9814_v5 = vpop.f32.mrf.mxu3 }
 0x95d   :  { %v9996_v35 = vadd.f32 %v9973_v26, %v9312_v34  ;;  %v9696_v37 = vadd.f32 %v9695_v31, %v17832_v1 }
 0x95f   :  { %v10012_v32 = vmax.f32 %v9996_v35, 0.0  ;;  %v9809_v17 = vadd.f32 %v9808_v19, %v9696_v37 }
 0x961   :  { %10028 = vst [vmem:[#allocation2 + $0x68] sm:$0xff] %v10012_v32  ;;  %v9895_v22 = vadd.f32 %v9894_v42, %v9809_v17 }
 0x963   :  { %v9977_v47 = vadd.f32 %v9976_v51, %v9895_v22 }
 0x964   :  { %v9700_v36 = vpop.f32.mrf.mxu2 }
 0x965   :  { %v9997_v50 = vadd.f32 %v9977_v47, %v9313_v52  ;;  %v9701_v3 = vadd.f32 %v9700_v36, %v17845_v10 }
 0x967   :  { %v10013_v30 = vmax.f32 %v9997_v50, 0.0  ;;  %v9815_v4 = vadd.f32 %v9814_v5, %v9701_v3 }
 0x969   :  { %10029 = vst [vmem:[#allocation2 + $0x70] sm:$0xff] %v10013_v30  ;;  %v9899_v1 = vadd.f32 %v9898_v27, %v9815_v4 }
 0x96b   :  { %v9981_v45 = vadd.f32 %v9980_v16, %v9899_v1 }
 0x96d   :  { %v9998_v20 = vadd.f32 %v9981_v45, %v9314_v14 }
 0x96f   :  { %v10014_v10 = vmax.f32 %v9998_v20, 0.0 }
 0x971   :  { %10030 = vst [vmem:[#allocation2 + $0x78] sm:$0xff] %v10014_v10 }
 0x972   :  { %10043 = dma.vmem_to_hbm [thread:$0]  %s10036_s30, 2048, %s10038_s12, [#allocation3], %s10337_s13, %s10337_s13, %s10338_s14  }
 0x973   :  { %10333 = dma.done.wait [#allocation3], 2048  }
 0x974   :  { %10334 = vsyncadd [#allocation3], 4294965248 }
 0x975   :  { %10048 = vsyncpa [#allocation3], 1 }

</bundles_post_ra>
